<compile_context>
chip_gen: v7x
topology: tpu7x:2x2x1
jax: 0.10.0
libtpu: 0.0.40
codegen_flags: <defaults>
</compile_context>

<pallas_src>
import functools

import jax
import jax.numpy as jnp
from jax.experimental import pallas as pl
from jax.experimental.pallas import tpu as pltpu


def _round_up(x, m):
    return ((x + m - 1) // m) * m


# ----------------------------------------------------------------------------
# Single fused kernel: conv1 + conv2 + flatten + 4 FC layers, all in VMEM,
# with FC weights DMA'd in manually so their transfer overlaps conv compute.
# ----------------------------------------------------------------------------
def _fused_critic_kernel(p1_ref, w1_ref, b1_ref, w2_ref, b2_ref,
                         bf1_ref, bf2_ref, bf3_ref, bo_ref,
                         wf1_hbm, wf2_hbm, wf3_hbm, wo_hbm,
                         out_ref,
                         h1_s, h2_s, flat_s,
                         wf1_s, wf2_s, wf3_s, wo_s, dma_sem,
                         *, batch, oh1, ow1, oh2, ow2, c1, c2, k2):
    # ---- kick off FC-weight DMA (HBM -> VMEM); overlaps the conv compute ----
    w_copies = (
        pltpu.make_async_copy(wf1_hbm, wf1_s, dma_sem.at[0]),
        pltpu.make_async_copy(wf2_hbm, wf2_s, dma_sem.at[1]),
        pltpu.make_async_copy(wf3_hbm, wf3_s, dma_sem.at[2]),
        pltpu.make_async_copy(wo_hbm,  wo_s,  dma_sem.at[3]),
    )
    for cp in w_copies:
        cp.start()

    n1 = oh1 * ow1 * batch                       # rows of the conv1 output grid

    # ---- conv1: one im2col matmul (bf16 x bf16 -> f32) + bias + ReLU --------
    h1 = jnp.dot(p1_ref[...], w1_ref[...], preferred_element_type=jnp.float32)
    h1 = jnp.maximum(h1 + b1_ref[...], 0.0)
    h1_s[0:n1, :] = h1
    pad_rows = h1_s.shape[0] - n1
    h1_s[n1:n1 + pad_rows, :] = jnp.zeros((pad_rows, c1), jnp.float32)

    # ---- conv2: k2*k2 taps as row-shifted slices of h1, accumulated in VMEM -
    # rows are ordered (h, w, b); tap (di, dj) reads rows shifted by
    # (di*ow1 + dj)*batch.  Out-of-window contributions only land in rows the
    # flatten below discards, and the shifted reads stay inside the zeroed pad.
    for di in range(k2):
        for dj in range(k2):
            t = di * k2 + dj
            s = (di * ow1 + dj) * batch
            contrib = jnp.dot(h1_s[s:s + n1, :], w2_ref[t * c1:(t + 1) * c1, :],
                              preferred_element_type=jnp.float32)
            if t == 0:
                h2_s[...] = contrib
            else:
                h2_s[...] = h2_s[...] + contrib
    h2_s[...] = jnp.maximum(h2_s[...] + b2_ref[...], 0.0)

    # ---- flatten: gather the valid oh2 x ow2 window into (batch, fc_in) -----
    # (Kept as per-position stores — a contiguous-copy flatten needs a
    # lane-changing reshape that is not reliably supported; on v5e/v6e this
    # loop is hidden behind the in-flight fc1-weight DMA anyway.)
    for oi in range(oh2):
        for oj in range(ow2):
            p = oi * ow2 + oj
            r = (oi * ow1 + oj) * batch
            flat_s[:, p * c2:(p + 1) * c2] = h2_s[r:r + batch, :]

    # ---- fully-connected stack (bf16 weights, f32 accumulation) -------------
    w_copies[0].wait()
    z = jnp.dot(flat_s[...].astype(jnp.bfloat16), wf1_s[...],
                preferred_element_type=jnp.float32)
    z = jnp.maximum(z + bf1_ref[...], 0.0)

    w_copies[1].wait()
    z = jnp.dot(z.astype(jnp.bfloat16), wf2_s[...],
                preferred_element_type=jnp.float32)
    z = jnp.maximum(z + bf2_ref[...], 0.0)

    w_copies[2].wait()
    z = jnp.dot(z.astype(jnp.bfloat16), wf3_s[...],
                preferred_element_type=jnp.float32)
    z = jnp.maximum(z + bf3_ref[...], 0.0)

    w_copies[3].wait()
    q = jnp.dot(z.astype(jnp.bfloat16), wo_s[...],
                preferred_element_type=jnp.float32) + bo_ref[...]
    out_ref[...] = q.astype(out_ref.dtype)


# ----------------------------------------------------------------------------
# Wrapper-side glue: im2col for conv1 only (tiny, runs once on the raw input).
# ----------------------------------------------------------------------------
def _im2col_conv1(x_nchw, kh, kw):
    """(B,C,H,W) -> patches (OH*OW*B, kh*kw*C); rows (oh,ow,b), cols (i,j,c)."""
    B, C, H, W = x_nchw.shape
    oh, ow = H - kh + 1, W - kw + 1
    x = jnp.transpose(x_nchw, (0, 2, 3, 1))                    # (B,H,W,C)
    cols = [x[:, i:i + oh, j:j + ow, :] for i in range(kh) for j in range(kw)]
    p = jnp.stack(cols, axis=3)                                # (B,OH,OW,kh*kw,C)
    p = jnp.transpose(p, (1, 2, 0, 3, 4))                      # (OH,OW,B,kh*kw,C)
    return p.reshape(oh * ow * B, kh * kw * C), (oh, ow)


def critic_forward(params, state, *, action_size):
    """state: (B, C, H, W) float32  ->  Q: (B, action_size) float32."""
    B, C, H, W = state.shape
    k2 = 3
    patches, (oh1, ow1) = _im2col_conv1(state.astype(jnp.float32), 5, 5)
    k1 = patches.shape[1]
    k1_pad = params["conv1"]["w"].shape[0]
    patches = jnp.pad(patches, ((0, 0), (0, k1_pad - k1))).astype(jnp.bfloat16)

    oh2, ow2 = oh1 - (k2 - 1), ow1 - (k2 - 1)
    c1 = params["conv1"]["w"].shape[1]
    c2 = params["conv2"]["w"].shape[1]
    fc_in = oh2 * ow2 * c2
    n_fc_pad = params["fc1"]["w"].shape[1]
    n_out_pad = params["f_out"]["w"].shape[1]

    n1 = oh1 * ow1 * B
    shift_max = (k2 - 1) * (ow1 + 1) * B          # max conv2 row shift, any k2
    n1_pad = _round_up(n1 + shift_max, 8)

    kernel = functools.partial(
        _fused_critic_kernel, batch=B, oh1=oh1, ow1=ow1, oh2=oh2, ow2=ow2,
        c1=c1, c2=c2, k2=k2)

    operands = (patches,
                params["conv1"]["w"], params["conv1"]["b"],
                params["conv2"]["w"], params["conv2"]["b"],
                params["fc1"]["b"], params["fc2"]["b"],
                params["fc3"]["b"], params["f_out"]["b"],
                params["fc1"]["w"], params["fc2"]["w"],
                params["fc3"]["w"], params["f_out"]["w"])

    flops = 2 * (n1 * k1_pad * c1 + k2 * k2 * n1 * c1 * c2
                 + B * fc_in * n_fc_pad + 2 * B * n_fc_pad * n_fc_pad
                 + B * n_fc_pad * n_out_pad)
    bytes_accessed = (sum(int(a.size) * a.dtype.itemsize for a in operands)
                      + int(B * n_out_pad * 4))

    vmem_spec = pl.BlockSpec(memory_space=pltpu.MemorySpace.VMEM)
    hbm_spec = pl.BlockSpec(memory_space=pl.ANY)

    q_pad = pl.pallas_call(
        kernel,
        out_shape=jax.ShapeDtypeStruct((B, n_out_pad), jnp.float32),
        in_specs=[vmem_spec] * 9 + [hbm_spec] * 4,
        out_specs=vmem_spec,
        scratch_shapes=[
            pltpu.VMEM((n1_pad, c1), jnp.float32),       # conv1 activations (+pad)
            pltpu.VMEM((n1, c2), jnp.float32),           # conv2 accumulator/activations
            pltpu.VMEM((B, fc_in), jnp.float32),         # flattened features
            pltpu.VMEM((fc_in, n_fc_pad), jnp.bfloat16),     # fc1 weight landing buf
            pltpu.VMEM((n_fc_pad, n_fc_pad), jnp.bfloat16),  # fc2 weight landing buf
            pltpu.VMEM((n_fc_pad, n_fc_pad), jnp.bfloat16),  # fc3 weight landing buf
            pltpu.VMEM((n_fc_pad, n_out_pad), jnp.bfloat16), # f_out weight landing buf
            pltpu.SemaphoreType.DMA((4,)),
        ],
        cost_estimate=pl.CostEstimate(flops=int(flops), transcendentals=0,
                                      bytes_accessed=int(bytes_accessed)),
    )(*operands)
    return q_pad[:, :action_size]


# ----------------------------------------------------------------------------
# Deterministic synthetic parameters (true sizes, zero-padded to lane-dense;
# FC + conv1 weights in bf16, biases and conv2 weight in f32).
# ----------------------------------------------------------------------------
def init_params(input_size, action_size, key):
    C, H, W = input_size
    oh1, ow1 = H - 5 + 1, W - 5 + 1
    oh2, ow2 = oh1 - 3 + 1, ow1 - 3 + 1
    c_conv = 16
    fc_in = c_conv * oh2 * ow2
    n_fc = 255

    k1 = 5 * 5 * C
    k1_pad = _round_up(k1, 128)
    n_fc_pad = _round_up(n_fc, 128)                 # 255 -> 256
    n_out_pad = _round_up(action_size, 128)         # 8   -> 128

    layer_defs = [
        # name,   fan_in,          fan_out,     padded_in,        padded_out, w_dtype
        ("conv1", k1,              c_conv,      k1_pad,           c_conv,    jnp.bfloat16),
        ("conv2", 3 * 3 * c_conv,  c_conv,      3 * 3 * c_conv,   c_conv,    jnp.float32),
        ("fc1",   fc_in,           n_fc,        fc_in,            n_fc_pad,  jnp.bfloat16),
        ("fc2",   n_fc,            n_fc,        n_fc_pad,         n_fc_pad,  jnp.bfloat16),
        ("fc3",   n_fc,            n_fc,        n_fc_pad,         n_fc_pad,  jnp.bfloat16),
        ("f_out", n_fc,            action_size, n_fc_pad,         n_out_pad, jnp.bfloat16),
    ]
    params = {}
    keys = jax.random.split(key, 2 * len(layer_defs))
    for idx, (name, fan_in, fan_out, fi_pad, fo_pad, w_dtype) in enumerate(layer_defs):
        scale = 1.0 / jnp.sqrt(jnp.float32(fan_in))
        w = scale * jax.random.normal(keys[2 * idx], (fan_in, fan_out),
                                      dtype=jnp.float32)
        b = scale * jax.random.normal(keys[2 * idx + 1], (1, fan_out),
                                      dtype=jnp.float32)
        w = jnp.pad(w, ((0, fi_pad - fan_in), (0, fo_pad - fan_out))).astype(w_dtype)
        b = jnp.pad(b, ((0, 0), (0, fo_pad - fan_out)))
        params[name] = {"w": w, "b": b}
    return params


if __name__ == "__main__":
    input_size = (4, 16, 16)     # (C, H, W) as in the PyTorch module
    action_size = 8
    batch = 2

    key = jax.random.PRNGKey(0)
    k_param, k_data = jax.random.split(key)
    params = init_params(input_size, action_size, k_param)
    state = jax.random.normal(k_data, (batch,) + input_size, dtype=jnp.float32)

    fwd = jax.jit(functools.partial(critic_forward, action_size=action_size))
    q = fwd(params, state)
    q = jax.block_until_ready(q)

    assert q.shape == (batch, action_size), q.shape
    assert bool(jnp.all(jnp.isfinite(q)))
    print("KERNEL_OK")
</pallas_src>

<mosaic_0001>
module attributes {stable_mosaic.version = 11 : i64} {
  func.func @_fused_critic_kernel(%arg0: memref<288x128xbf16, #tpu.memory_space<vmem>>, %arg1: memref<128x16xbf16, #tpu.memory_space<vmem>>, %arg2: memref<1x16xf32, #tpu.memory_space<vmem>>, %arg3: memref<144x16xf32, #tpu.memory_space<vmem>>, %arg4: memref<1x16xf32, #tpu.memory_space<vmem>>, %arg5: memref<1x256xf32, #tpu.memory_space<vmem>>, %arg6: memref<1x256xf32, #tpu.memory_space<vmem>>, %arg7: memref<1x256xf32, #tpu.memory_space<vmem>>, %arg8: memref<1x128xf32, #tpu.memory_space<vmem>>, %arg9: memref<1600x256xbf16, #tpu.memory_space<any>>, %arg10: memref<256x256xbf16, #tpu.memory_space<any>>, %arg11: memref<256x256xbf16, #tpu.memory_space<any>>, %arg12: memref<256x128xbf16, #tpu.memory_space<any>>, %arg13: memref<2x128xf32, #tpu.memory_space<vmem>>, %arg14: memref<344x16xf32, #tpu.memory_space<vmem>>, %arg15: memref<288x16xf32, #tpu.memory_space<vmem>>, %arg16: memref<2x1600xf32, #tpu.memory_space<vmem>>, %arg17: memref<1600x256xbf16, #tpu.memory_space<vmem>>, %arg18: memref<256x256xbf16, #tpu.memory_space<vmem>>, %arg19: memref<256x256xbf16, #tpu.memory_space<vmem>>, %arg20: memref<256x128xbf16, #tpu.memory_space<vmem>>, %arg21: memref<4x!tpu.dma_semaphore, #tpu.memory_space<semaphore_mem>>) attributes {dimension_semantics = [], scalar_prefetch = 0 : i64, scratch_operands = 8 : i64, tpu.core_type = #tpu.core_type<tc>} {
    %c0_i32 = arith.constant 0 : i32
    %0 = tpu.memref_slice %arg21[%c0_i32] : memref<4x!tpu.dma_semaphore, #tpu.memory_space<semaphore_mem>> -> memref<1x!tpu.dma_semaphore, #tpu.memory_space<semaphore_mem>>
    %1 = tpu.memref_squeeze %0 : memref<1x!tpu.dma_semaphore, #tpu.memory_space<semaphore_mem>> -> memref<!tpu.dma_semaphore, #tpu.memory_space<semaphore_mem>>
    tpu.enqueue_dma source(%arg9 : memref<1600x256xbf16, #tpu.memory_space<any>>) target(%arg17 : memref<1600x256xbf16, #tpu.memory_space<vmem>>) target_semaphore(%1 : memref<!tpu.dma_semaphore, #tpu.memory_space<semaphore_mem>>)
    %c1_i32 = arith.constant 1 : i32
    %2 = tpu.memref_slice %arg21[%c1_i32] : memref<4x!tpu.dma_semaphore, #tpu.memory_space<semaphore_mem>> -> memref<1x!tpu.dma_semaphore, #tpu.memory_space<semaphore_mem>>
    %3 = tpu.memref_squeeze %2 : memref<1x!tpu.dma_semaphore, #tpu.memory_space<semaphore_mem>> -> memref<!tpu.dma_semaphore, #tpu.memory_space<semaphore_mem>>
    tpu.enqueue_dma source(%arg10 : memref<256x256xbf16, #tpu.memory_space<any>>) target(%arg18 : memref<256x256xbf16, #tpu.memory_space<vmem>>) target_semaphore(%3 : memref<!tpu.dma_semaphore, #tpu.memory_space<semaphore_mem>>)
    %c2_i32 = arith.constant 2 : i32
    %4 = tpu.memref_slice %arg21[%c2_i32] : memref<4x!tpu.dma_semaphore, #tpu.memory_space<semaphore_mem>> -> memref<1x!tpu.dma_semaphore, #tpu.memory_space<semaphore_mem>>
    %5 = tpu.memref_squeeze %4 : memref<1x!tpu.dma_semaphore, #tpu.memory_space<semaphore_mem>> -> memref<!tpu.dma_semaphore, #tpu.memory_space<semaphore_mem>>
    tpu.enqueue_dma source(%arg11 : memref<256x256xbf16, #tpu.memory_space<any>>) target(%arg19 : memref<256x256xbf16, #tpu.memory_space<vmem>>) target_semaphore(%5 : memref<!tpu.dma_semaphore, #tpu.memory_space<semaphore_mem>>)
    %c3_i32 = arith.constant 3 : i32
    %6 = tpu.memref_slice %arg21[%c3_i32] : memref<4x!tpu.dma_semaphore, #tpu.memory_space<semaphore_mem>> -> memref<1x!tpu.dma_semaphore, #tpu.memory_space<semaphore_mem>>
    %7 = tpu.memref_squeeze %6 : memref<1x!tpu.dma_semaphore, #tpu.memory_space<semaphore_mem>> -> memref<!tpu.dma_semaphore, #tpu.memory_space<semaphore_mem>>
    tpu.enqueue_dma source(%arg12 : memref<256x128xbf16, #tpu.memory_space<any>>) target(%arg20 : memref<256x128xbf16, #tpu.memory_space<vmem>>) target_semaphore(%7 : memref<!tpu.dma_semaphore, #tpu.memory_space<semaphore_mem>>)
    %c0 = arith.constant 0 : index
    %c0_0 = arith.constant 0 : index
    %8 = vector.load %arg0[%c0, %c0_0] : memref<288x128xbf16, #tpu.memory_space<vmem>>, vector<288x128xbf16>
    %c0_1 = arith.constant 0 : index
    %c0_2 = arith.constant 0 : index
    %9 = vector.load %arg1[%c0_1, %c0_2] : memref<128x16xbf16, #tpu.memory_space<vmem>>, vector<128x16xbf16>
    %cst = arith.constant dense<0.000000e+00> : vector<288x16xf32>
    %10 = tpu.matmul %8, %9, %cst {dimension_numbers = #tpu.dot_dimension_numbers<[1], [0], [0], [1], [0, 0, 1, 1], [], []>} : vector<288x128xbf16>, vector<128x16xbf16>, vector<288x16xf32> -> vector<288x16xf32>
    %c0_3 = arith.constant 0 : index
    %c0_4 = arith.constant 0 : index
    %11 = vector.load %arg2[%c0_3, %c0_4] : memref<1x16xf32, #tpu.memory_space<vmem>>, vector<1x16xf32>
    %12 = vector.broadcast %11 : vector<1x16xf32> to vector<288x16xf32>
    %13 = arith.addf %10, %12 : vector<288x16xf32>
    %cst_5 = arith.constant 0.000000e+00 : f32
    %14 = vector.broadcast %cst_5 : f32 to vector<288x16xf32>
    %15 = arith.maximumf %13, %14 : vector<288x16xf32>
    %c0_6 = arith.constant 0 : index
    %c0_7 = arith.constant 0 : index
    %16 = vector.load %arg14[%c0_6, %c0_7] : memref<344x16xf32, #tpu.memory_space<vmem>>, vector<288x16xf32>
    tpu.vector_store %arg14[%c0_6, %c0_7], %15 {strides = array<i32>} : memref<344x16xf32, #tpu.memory_space<vmem>>, vector<288x16xf32>,
    %cst_8 = arith.constant 0.000000e+00 : f32
    %17 = vector.broadcast %cst_8 : f32 to vector<56x16xf32>
    %c288 = arith.constant 288 : index
    %c0_9 = arith.constant 0 : index
    %18 = vector.load %arg14[%c288, %c0_9] : memref<344x16xf32, #tpu.memory_space<vmem>>, vector<56x16xf32>
    tpu.vector_store %arg14[%c288, %c0_9], %17 {strides = array<i32>} : memref<344x16xf32, #tpu.memory_space<vmem>>, vector<56x16xf32>,
    %c0_10 = arith.constant 0 : index
    %c0_11 = arith.constant 0 : index
    %19 = vector.load %arg14[%c0_10, %c0_11] : memref<344x16xf32, #tpu.memory_space<vmem>>, vector<288x16xf32>
    %c0_12 = arith.constant 0 : index
    %c0_13 = arith.constant 0 : index
    %20 = vector.load %arg3[%c0_12, %c0_13] : memref<144x16xf32, #tpu.memory_space<vmem>>, vector<16x16xf32>
    %cst_14 = arith.constant dense<0.000000e+00> : vector<288x16xf32>
    %21 = tpu.matmul %19, %20, %cst_14 {dimension_numbers = #tpu.dot_dimension_numbers<[1], [0], [0], [1], [0, 0, 1, 1], [], []>} : vector<288x16xf32>, vector<16x16xf32>, vector<288x16xf32> -> vector<288x16xf32>
    %c0_15 = arith.constant 0 : index
    %c0_16 = arith.constant 0 : index
    %22 = vector.load %arg15[%c0_15, %c0_16] : memref<288x16xf32, #tpu.memory_space<vmem>>, vector<288x16xf32>
    tpu.vector_store %arg15[%c0_15, %c0_16], %21 {strides = array<i32>} : memref<288x16xf32, #tpu.memory_space<vmem>>, vector<288x16xf32>,
    %c2 = arith.constant 2 : index
    %c0_17 = arith.constant 0 : index
    %23 = vector.load %arg14[%c2, %c0_17] : memref<344x16xf32, #tpu.memory_space<vmem>>, vector<288x16xf32>
    %c16 = arith.constant 16 : index
    %c0_18 = arith.constant 0 : index
    %24 = vector.load %arg3[%c16, %c0_18] : memref<144x16xf32, #tpu.memory_space<vmem>>, vector<16x16xf32>
    %cst_19 = arith.constant dense<0.000000e+00> : vector<288x16xf32>
    %25 = tpu.matmul %23, %24, %cst_19 {dimension_numbers = #tpu.dot_dimension_numbers<[1], [0], [0], [1], [0, 0, 1, 1], [], []>} : vector<288x16xf32>, vector<16x16xf32>, vector<288x16xf32> -> vector<288x16xf32>
    %c0_20 = arith.constant 0 : index
    %c0_21 = arith.constant 0 : index
    %26 = vector.load %arg15[%c0_20, %c0_21] : memref<288x16xf32, #tpu.memory_space<vmem>>, vector<288x16xf32>
    %27 = arith.addf %26, %25 : vector<288x16xf32>
    %c0_22 = arith.constant 0 : index
    %c0_23 = arith.constant 0 : index
    %28 = vector.load %arg15[%c0_22, %c0_23] : memref<288x16xf32, #tpu.memory_space<vmem>>, vector<288x16xf32>
    tpu.vector_store %arg15[%c0_22, %c0_23], %27 {strides = array<i32>} : memref<288x16xf32, #tpu.memory_space<vmem>>, vector<288x16xf32>,
    %c4 = arith.constant 4 : index
    %c0_24 = arith.constant 0 : index
    %29 = vector.load %arg14[%c4, %c0_24] : memref<344x16xf32, #tpu.memory_space<vmem>>, vector<288x16xf32>
    %c32 = arith.constant 32 : index
    %c0_25 = arith.constant 0 : index
    %30 = vector.load %arg3[%c32, %c0_25] : memref<144x16xf32, #tpu.memory_space<vmem>>, vector<16x16xf32>
    %cst_26 = arith.constant dense<0.000000e+00> : vector<288x16xf32>
    %31 = tpu.matmul %29, %30, %cst_26 {dimension_numbers = #tpu.dot_dimension_numbers<[1], [0], [0], [1], [0, 0, 1, 1], [], []>} : vector<288x16xf32>, vector<16x16xf32>, vector<288x16xf32> -> vector<288x16xf32>
    %c0_27 = arith.constant 0 : index
    %c0_28 = arith.constant 0 : index
    %32 = vector.load %arg15[%c0_27, %c0_28] : memref<288x16xf32, #tpu.memory_space<vmem>>, vector<288x16xf32>
    %33 = arith.addf %32, %31 : vector<288x16xf32>
    %c0_29 = arith.constant 0 : index
    %c0_30 = arith.constant 0 : index
    %34 = vector.load %arg15[%c0_29, %c0_30] : memref<288x16xf32, #tpu.memory_space<vmem>>, vector<288x16xf32>
    tpu.vector_store %arg15[%c0_29, %c0_30], %33 {strides = array<i32>} : memref<288x16xf32, #tpu.memory_space<vmem>>, vector<288x16xf32>,
    %c24 = arith.constant 24 : index
    %c0_31 = arith.constant 0 : index
    %35 = vector.load %arg14[%c24, %c0_31] : memref<344x16xf32, #tpu.memory_space<vmem>>, vector<288x16xf32>
    %c48 = arith.constant 48 : index
    %c0_32 = arith.constant 0 : index
    %36 = vector.load %arg3[%c48, %c0_32] : memref<144x16xf32, #tpu.memory_space<vmem>>, vector<16x16xf32>
    %cst_33 = arith.constant dense<0.000000e+00> : vector<288x16xf32>
    %37 = tpu.matmul %35, %36, %cst_33 {dimension_numbers = #tpu.dot_dimension_numbers<[1], [0], [0], [1], [0, 0, 1, 1], [], []>} : vector<288x16xf32>, vector<16x16xf32>, vector<288x16xf32> -> vector<288x16xf32>
    %c0_34 = arith.constant 0 : index
    %c0_35 = arith.constant 0 : index
    %38 = vector.load %arg15[%c0_34, %c0_35] : memref<288x16xf32, #tpu.memory_space<vmem>>, vector<288x16xf32>
    %39 = arith.addf %38, %37 : vector<288x16xf32>
    %c0_36 = arith.constant 0 : index
    %c0_37 = arith.constant 0 : index
    %40 = vector.load %arg15[%c0_36, %c0_37] : memref<288x16xf32, #tpu.memory_space<vmem>>, vector<288x16xf32>
    tpu.vector_store %arg15[%c0_36, %c0_37], %39 {strides = array<i32>} : memref<288x16xf32, #tpu.memory_space<vmem>>, vector<288x16xf32>,
    %c26 = arith.constant 26 : index
    %c0_38 = arith.constant 0 : index
    %41 = vector.load %arg14[%c26, %c0_38] : memref<344x16xf32, #tpu.memory_space<vmem>>, vector<288x16xf32>
    %c64 = arith.constant 64 : index
    %c0_39 = arith.constant 0 : index
    %42 = vector.load %arg3[%c64, %c0_39] : memref<144x16xf32, #tpu.memory_space<vmem>>, vector<16x16xf32>
    %cst_40 = arith.constant dense<0.000000e+00> : vector<288x16xf32>
    %43 = tpu.matmul %41, %42, %cst_40 {dimension_numbers = #tpu.dot_dimension_numbers<[1], [0], [0], [1], [0, 0, 1, 1], [], []>} : vector<288x16xf32>, vector<16x16xf32>, vector<288x16xf32> -> vector<288x16xf32>
    %c0_41 = arith.constant 0 : index
    %c0_42 = arith.constant 0 : index
    %44 = vector.load %arg15[%c0_41, %c0_42] : memref<288x16xf32, #tpu.memory_space<vmem>>, vector<288x16xf32>
    %45 = arith.addf %44, %43 : vector<288x16xf32>
    %c0_43 = arith.constant 0 : index
    %c0_44 = arith.constant 0 : index
    %46 = vector.load %arg15[%c0_43, %c0_44] : memref<288x16xf32, #tpu.memory_space<vmem>>, vector<288x16xf32>
    tpu.vector_store %arg15[%c0_43, %c0_44], %45 {strides = array<i32>} : memref<288x16xf32, #tpu.memory_space<vmem>>, vector<288x16xf32>,
    %c28 = arith.constant 28 : index
    %c0_45 = arith.constant 0 : index
    %47 = vector.load %arg14[%c28, %c0_45] : memref<344x16xf32, #tpu.memory_space<vmem>>, vector<288x16xf32>
    %c80 = arith.constant 80 : index
    %c0_46 = arith.constant 0 : index
    %48 = vector.load %arg3[%c80, %c0_46] : memref<144x16xf32, #tpu.memory_space<vmem>>, vector<16x16xf32>
    %cst_47 = arith.constant dense<0.000000e+00> : vector<288x16xf32>
    %49 = tpu.matmul %47, %48, %cst_47 {dimension_numbers = #tpu.dot_dimension_numbers<[1], [0], [0], [1], [0, 0, 1, 1], [], []>} : vector<288x16xf32>, vector<16x16xf32>, vector<288x16xf32> -> vector<288x16xf32>
    %c0_48 = arith.constant 0 : index
    %c0_49 = arith.constant 0 : index
    %50 = vector.load %arg15[%c0_48, %c0_49] : memref<288x16xf32, #tpu.memory_space<vmem>>, vector<288x16xf32>
    %51 = arith.addf %50, %49 : vector<288x16xf32>
    %c0_50 = arith.constant 0 : index
    %c0_51 = arith.constant 0 : index
    %52 = vector.load %arg15[%c0_50, %c0_51] : memref<288x16xf32, #tpu.memory_space<vmem>>, vector<288x16xf32>
    tpu.vector_store %arg15[%c0_50, %c0_51], %51 {strides = array<i32>} : memref<288x16xf32, #tpu.memory_space<vmem>>, vector<288x16xf32>,
    %c48_52 = arith.constant 48 : index
    %c0_53 = arith.constant 0 : index
    %53 = vector.load %arg14[%c48_52, %c0_53] : memref<344x16xf32, #tpu.memory_space<vmem>>, vector<288x16xf32>
    %c96 = arith.constant 96 : index
    %c0_54 = arith.constant 0 : index
    %54 = vector.load %arg3[%c96, %c0_54] : memref<144x16xf32, #tpu.memory_space<vmem>>, vector<16x16xf32>
    %cst_55 = arith.constant dense<0.000000e+00> : vector<288x16xf32>
    %55 = tpu.matmul %53, %54, %cst_55 {dimension_numbers = #tpu.dot_dimension_numbers<[1], [0], [0], [1], [0, 0, 1, 1], [], []>} : vector<288x16xf32>, vector<16x16xf32>, vector<288x16xf32> -> vector<288x16xf32>
    %c0_56 = arith.constant 0 : index
    %c0_57 = arith.constant 0 : index
    %56 = vector.load %arg15[%c0_56, %c0_57] : memref<288x16xf32, #tpu.memory_space<vmem>>, vector<288x16xf32>
    %57 = arith.addf %56, %55 : vector<288x16xf32>
    %c0_58 = arith.constant 0 : index
    %c0_59 = arith.constant 0 : index
    %58 = vector.load %arg15[%c0_58, %c0_59] : memref<288x16xf32, #tpu.memory_space<vmem>>, vector<288x16xf32>
    tpu.vector_store %arg15[%c0_58, %c0_59], %57 {strides = array<i32>} : memref<288x16xf32, #tpu.memory_space<vmem>>, vector<288x16xf32>,
    %c50 = arith.constant 50 : index
    %c0_60 = arith.constant 0 : index
    %59 = vector.load %arg14[%c50, %c0_60] : memref<344x16xf32, #tpu.memory_space<vmem>>, vector<288x16xf32>
    %c112 = arith.constant 112 : index
    %c0_61 = arith.constant 0 : index
    %60 = vector.load %arg3[%c112, %c0_61] : memref<144x16xf32, #tpu.memory_space<vmem>>, vector<16x16xf32>
    %cst_62 = arith.constant dense<0.000000e+00> : vector<288x16xf32>
    %61 = tpu.matmul %59, %60, %cst_62 {dimension_numbers = #tpu.dot_dimension_numbers<[1], [0], [0], [1], [0, 0, 1, 1], [], []>} : vector<288x16xf32>, vector<16x16xf32>, vector<288x16xf32> -> vector<288x16xf32>
    %c0_63 = arith.constant 0 : index
    %c0_64 = arith.constant 0 : index
    %62 = vector.load %arg15[%c0_63, %c0_64] : memref<288x16xf32, #tpu.memory_space<vmem>>, vector<288x16xf32>
    %63 = arith.addf %62, %61 : vector<288x16xf32>
    %c0_65 = arith.constant 0 : index
    %c0_66 = arith.constant 0 : index
    %64 = vector.load %arg15[%c0_65, %c0_66] : memref<288x16xf32, #tpu.memory_space<vmem>>, vector<288x16xf32>
    tpu.vector_store %arg15[%c0_65, %c0_66], %63 {strides = array<i32>} : memref<288x16xf32, #tpu.memory_space<vmem>>, vector<288x16xf32>,
    %c52 = arith.constant 52 : index
    %c0_67 = arith.constant 0 : index
    %65 = vector.load %arg14[%c52, %c0_67] : memref<344x16xf32, #tpu.memory_space<vmem>>, vector<288x16xf32>
    %c128 = arith.constant 128 : index
    %c0_68 = arith.constant 0 : index
    %66 = vector.load %arg3[%c128, %c0_68] : memref<144x16xf32, #tpu.memory_space<vmem>>, vector<16x16xf32>
    %cst_69 = arith.constant dense<0.000000e+00> : vector<288x16xf32>
    %67 = tpu.matmul %65, %66, %cst_69 {dimension_numbers = #tpu.dot_dimension_numbers<[1], [0], [0], [1], [0, 0, 1, 1], [], []>} : vector<288x16xf32>, vector<16x16xf32>, vector<288x16xf32> -> vector<288x16xf32>
    %c0_70 = arith.constant 0 : index
    %c0_71 = arith.constant 0 : index
    %68 = vector.load %arg15[%c0_70, %c0_71] : memref<288x16xf32, #tpu.memory_space<vmem>>, vector<288x16xf32>
    %69 = arith.addf %68, %67 : vector<288x16xf32>
    %c0_72 = arith.constant 0 : index
    %c0_73 = arith.constant 0 : index
    %70 = vector.load %arg15[%c0_72, %c0_73] : memref<288x16xf32, #tpu.memory_space<vmem>>, vector<288x16xf32>
    tpu.vector_store %arg15[%c0_72, %c0_73], %69 {strides = array<i32>} : memref<288x16xf32, #tpu.memory_space<vmem>>, vector<288x16xf32>,
    %c0_74 = arith.constant 0 : index
    %c0_75 = arith.constant 0 : index
    %71 = vector.load %arg15[%c0_74, %c0_75] : memref<288x16xf32, #tpu.memory_space<vmem>>, vector<288x16xf32>
    %c0_76 = arith.constant 0 : index
    %c0_77 = arith.constant 0 : index
    %72 = vector.load %arg4[%c0_76, %c0_77] : memref<1x16xf32, #tpu.memory_space<vmem>>, vector<1x16xf32>
    %73 = vector.broadcast %72 : vector<1x16xf32> to vector<288x16xf32>
    %74 = arith.addf %71, %73 : vector<288x16xf32>
    %cst_78 = arith.constant 0.000000e+00 : f32
    %75 = vector.broadcast %cst_78 : f32 to vector<288x16xf32>
    %76 = arith.maximumf %74, %75 : vector<288x16xf32>
    %c0_79 = arith.constant 0 : index
    %c0_80 = arith.constant 0 : index
    %77 = vector.load %arg15[%c0_79, %c0_80] : memref<288x16xf32, #tpu.memory_space<vmem>>, vector<288x16xf32>
    tpu.vector_store %arg15[%c0_79, %c0_80], %76 {strides = array<i32>} : memref<288x16xf32, #tpu.memory_space<vmem>>, vector<288x16xf32>,
    %c0_81 = arith.constant 0 : index
    %c0_82 = arith.constant 0 : index
    %78 = vector.load %arg15[%c0_81, %c0_82] : memref<288x16xf32, #tpu.memory_space<vmem>>, vector<2x16xf32>
    %c0_83 = arith.constant 0 : index
    %c0_84 = arith.constant 0 : index
    %79 = vector.load %arg16[%c0_83, %c0_84] : memref<2x1600xf32, #tpu.memory_space<vmem>>, vector<2x16xf32>
    tpu.vector_store %arg16[%c0_83, %c0_84], %78 {strides = array<i32>} : memref<2x1600xf32, #tpu.memory_space<vmem>>, vector<2x16xf32>,
    %c2_85 = arith.constant 2 : index
    %c0_86 = arith.constant 0 : index
    %80 = vector.load %arg15[%c2_85, %c0_86] : memref<288x16xf32, #tpu.memory_space<vmem>>, vector<2x16xf32>
    %c0_87 = arith.constant 0 : index
    %c16_88 = arith.constant 16 : index
    %81 = vector.load %arg16[%c0_87, %c16_88] : memref<2x1600xf32, #tpu.memory_space<vmem>>, vector<2x16xf32>
    tpu.vector_store %arg16[%c0_87, %c16_88], %80 {strides = array<i32>} : memref<2x1600xf32, #tpu.memory_space<vmem>>, vector<2x16xf32>,
    %c4_89 = arith.constant 4 : index
    %c0_90 = arith.constant 0 : index
    %82 = vector.load %arg15[%c4_89, %c0_90] : memref<288x16xf32, #tpu.memory_space<vmem>>, vector<2x16xf32>
    %c0_91 = arith.constant 0 : index
    %c32_92 = arith.constant 32 : index
    %83 = vector.load %arg16[%c0_91, %c32_92] : memref<2x1600xf32, #tpu.memory_space<vmem>>, vector<2x16xf32>
    tpu.vector_store %arg16[%c0_91, %c32_92], %82 {strides = array<i32>} : memref<2x1600xf32, #tpu.memory_space<vmem>>, vector<2x16xf32>,
    %c6 = arith.constant 6 : index
    %c0_93 = arith.constant 0 : index
    %84 = vector.load %arg15[%c6, %c0_93] : memref<288x16xf32, #tpu.memory_space<vmem>>, vector<2x16xf32>
    %c0_94 = arith.constant 0 : index
    %c48_95 = arith.constant 48 : index
    %85 = vector.load %arg16[%c0_94, %c48_95] : memref<2x1600xf32, #tpu.memory_space<vmem>>, vector<2x16xf32>
    tpu.vector_store %arg16[%c0_94, %c48_95], %84 {strides = array<i32>} : memref<2x1600xf32, #tpu.memory_space<vmem>>, vector<2x16xf32>,
    %c8 = arith.constant 8 : index
    %c0_96 = arith.constant 0 : index
    %86 = vector.load %arg15[%c8, %c0_96] : memref<288x16xf32, #tpu.memory_space<vmem>>, vector<2x16xf32>
    %c0_97 = arith.constant 0 : index
    %c64_98 = arith.constant 64 : index
    %87 = vector.load %arg16[%c0_97, %c64_98] : memref<2x1600xf32, #tpu.memory_space<vmem>>, vector<2x16xf32>
    tpu.vector_store %arg16[%c0_97, %c64_98], %86 {strides = array<i32>} : memref<2x1600xf32, #tpu.memory_space<vmem>>, vector<2x16xf32>,
    %c10 = arith.constant 10 : index
    %c0_99 = arith.constant 0 : index
    %88 = vector.load %arg15[%c10, %c0_99] : memref<288x16xf32, #tpu.memory_space<vmem>>, vector<2x16xf32>
    %c0_100 = arith.constant 0 : index
    %c80_101 = arith.constant 80 : index
    %89 = vector.load %arg16[%c0_100, %c80_101] : memref<2x1600xf32, #tpu.memory_space<vmem>>, vector<2x16xf32>
    tpu.vector_store %arg16[%c0_100, %c80_101], %88 {strides = array<i32>} : memref<2x1600xf32, #tpu.memory_space<vmem>>, vector<2x16xf32>,
    %c12 = arith.constant 12 : index
    %c0_102 = arith.constant 0 : index
    %90 = vector.load %arg15[%c12, %c0_102] : memref<288x16xf32, #tpu.memory_space<vmem>>, vector<2x16xf32>
    %c0_103 = arith.constant 0 : index
    %c96_104 = arith.constant 96 : index
    %91 = vector.load %arg16[%c0_103, %c96_104] : memref<2x1600xf32, #tpu.memory_space<vmem>>, vector<2x16xf32>
    tpu.vector_store %arg16[%c0_103, %c96_104], %90 {strides = array<i32>} : memref<2x1600xf32, #tpu.memory_space<vmem>>, vector<2x16xf32>,
    %c14 = arith.constant 14 : index
    %c0_105 = arith.constant 0 : index
    %92 = vector.load %arg15[%c14, %c0_105] : memref<288x16xf32, #tpu.memory_space<vmem>>, vector<2x16xf32>
    %c0_106 = arith.constant 0 : index
    %c112_107 = arith.constant 112 : index
    %93 = vector.load %arg16[%c0_106, %c112_107] : memref<2x1600xf32, #tpu.memory_space<vmem>>, vector<2x16xf32>
    tpu.vector_store %arg16[%c0_106, %c112_107], %92 {strides = array<i32>} : memref<2x1600xf32, #tpu.memory_space<vmem>>, vector<2x16xf32>,
    %c16_108 = arith.constant 16 : index
    %c0_109 = arith.constant 0 : index
    %94 = vector.load %arg15[%c16_108, %c0_109] : memref<288x16xf32, #tpu.memory_space<vmem>>, vector<2x16xf32>
    %c0_110 = arith.constant 0 : index
    %c128_111 = arith.constant 128 : index
    %95 = vector.load %arg16[%c0_110, %c128_111] : memref<2x1600xf32, #tpu.memory_space<vmem>>, vector<2x16xf32>
    tpu.vector_store %arg16[%c0_110, %c128_111], %94 {strides = array<i32>} : memref<2x1600xf32, #tpu.memory_space<vmem>>, vector<2x16xf32>,
    %c18 = arith.constant 18 : index
    %c0_112 = arith.constant 0 : index
    %96 = vector.load %arg15[%c18, %c0_112] : memref<288x16xf32, #tpu.memory_space<vmem>>, vector<2x16xf32>
    %c0_113 = arith.constant 0 : index
    %c144 = arith.constant 144 : index
    %97 = vector.load %arg16[%c0_113, %c144] : memref<2x1600xf32, #tpu.memory_space<vmem>>, vector<2x16xf32>
    tpu.vector_store %arg16[%c0_113, %c144], %96 {strides = array<i32>} : memref<2x1600xf32, #tpu.memory_space<vmem>>, vector<2x16xf32>,
    %c24_114 = arith.constant 24 : index
    %c0_115 = arith.constant 0 : index
    %98 = vector.load %arg15[%c24_114, %c0_115] : memref<288x16xf32, #tpu.memory_space<vmem>>, vector<2x16xf32>
    %c0_116 = arith.constant 0 : index
    %c160 = arith.constant 160 : index
    %99 = vector.load %arg16[%c0_116, %c160] : memref<2x1600xf32, #tpu.memory_space<vmem>>, vector<2x16xf32>
    tpu.vector_store %arg16[%c0_116, %c160], %98 {strides = array<i32>} : memref<2x1600xf32, #tpu.memory_space<vmem>>, vector<2x16xf32>,
    %c26_117 = arith.constant 26 : index
    %c0_118 = arith.constant 0 : index
    %100 = vector.load %arg15[%c26_117, %c0_118] : memref<288x16xf32, #tpu.memory_space<vmem>>, vector<2x16xf32>
    %c0_119 = arith.constant 0 : index
    %c176 = arith.constant 176 : index
    %101 = vector.load %arg16[%c0_119, %c176] : memref<2x1600xf32, #tpu.memory_space<vmem>>, vector<2x16xf32>
    tpu.vector_store %arg16[%c0_119, %c176], %100 {strides = array<i32>} : memref<2x1600xf32, #tpu.memory_space<vmem>>, vector<2x16xf32>,
    %c28_120 = arith.constant 28 : index
    %c0_121 = arith.constant 0 : index
    %102 = vector.load %arg15[%c28_120, %c0_121] : memref<288x16xf32, #tpu.memory_space<vmem>>, vector<2x16xf32>
    %c0_122 = arith.constant 0 : index
    %c192 = arith.constant 192 : index
    %103 = vector.load %arg16[%c0_122, %c192] : memref<2x1600xf32, #tpu.memory_space<vmem>>, vector<2x16xf32>
    tpu.vector_store %arg16[%c0_122, %c192], %102 {strides = array<i32>} : memref<2x1600xf32, #tpu.memory_space<vmem>>, vector<2x16xf32>,
    %c30 = arith.constant 30 : index
    %c0_123 = arith.constant 0 : index
    %104 = vector.load %arg15[%c30, %c0_123] : memref<288x16xf32, #tpu.memory_space<vmem>>, vector<2x16xf32>
    %c0_124 = arith.constant 0 : index
    %c208 = arith.constant 208 : index
    %105 = vector.load %arg16[%c0_124, %c208] : memref<2x1600xf32, #tpu.memory_space<vmem>>, vector<2x16xf32>
    tpu.vector_store %arg16[%c0_124, %c208], %104 {strides = array<i32>} : memref<2x1600xf32, #tpu.memory_space<vmem>>, vector<2x16xf32>,
    %c32_125 = arith.constant 32 : index
    %c0_126 = arith.constant 0 : index
    %106 = vector.load %arg15[%c32_125, %c0_126] : memref<288x16xf32, #tpu.memory_space<vmem>>, vector<2x16xf32>
    %c0_127 = arith.constant 0 : index
    %c224 = arith.constant 224 : index
    %107 = vector.load %arg16[%c0_127, %c224] : memref<2x1600xf32, #tpu.memory_space<vmem>>, vector<2x16xf32>
    tpu.vector_store %arg16[%c0_127, %c224], %106 {strides = array<i32>} : memref<2x1600xf32, #tpu.memory_space<vmem>>, vector<2x16xf32>,
    %c34 = arith.constant 34 : index
    %c0_128 = arith.constant 0 : index
    %108 = vector.load %arg15[%c34, %c0_128] : memref<288x16xf32, #tpu.memory_space<vmem>>, vector<2x16xf32>
    %c0_129 = arith.constant 0 : index
    %c240 = arith.constant 240 : index
    %109 = vector.load %arg16[%c0_129, %c240] : memref<2x1600xf32, #tpu.memory_space<vmem>>, vector<2x16xf32>
    tpu.vector_store %arg16[%c0_129, %c240], %108 {strides = array<i32>} : memref<2x1600xf32, #tpu.memory_space<vmem>>, vector<2x16xf32>,
    %c36 = arith.constant 36 : index
    %c0_130 = arith.constant 0 : index
    %110 = vector.load %arg15[%c36, %c0_130] : memref<288x16xf32, #tpu.memory_space<vmem>>, vector<2x16xf32>
    %c0_131 = arith.constant 0 : index
    %c256 = arith.constant 256 : index
    %111 = vector.load %arg16[%c0_131, %c256] : memref<2x1600xf32, #tpu.memory_space<vmem>>, vector<2x16xf32>
    tpu.vector_store %arg16[%c0_131, %c256], %110 {strides = array<i32>} : memref<2x1600xf32, #tpu.memory_space<vmem>>, vector<2x16xf32>,
    %c38 = arith.constant 38 : index
    %c0_132 = arith.constant 0 : index
    %112 = vector.load %arg15[%c38, %c0_132] : memref<288x16xf32, #tpu.memory_space<vmem>>, vector<2x16xf32>
    %c0_133 = arith.constant 0 : index
    %c272 = arith.constant 272 : index
    %113 = vector.load %arg16[%c0_133, %c272] : memref<2x1600xf32, #tpu.memory_space<vmem>>, vector<2x16xf32>
    tpu.vector_store %arg16[%c0_133, %c272], %112 {strides = array<i32>} : memref<2x1600xf32, #tpu.memory_space<vmem>>, vector<2x16xf32>,
    %c40 = arith.constant 40 : index
    %c0_134 = arith.constant 0 : index
    %114 = vector.load %arg15[%c40, %c0_134] : memref<288x16xf32, #tpu.memory_space<vmem>>, vector<2x16xf32>
    %c0_135 = arith.constant 0 : index
    %c288_136 = arith.constant 288 : index
    %115 = vector.load %arg16[%c0_135, %c288_136] : memref<2x1600xf32, #tpu.memory_space<vmem>>, vector<2x16xf32>
    tpu.vector_store %arg16[%c0_135, %c288_136], %114 {strides = array<i32>} : memref<2x1600xf32, #tpu.memory_space<vmem>>, vector<2x16xf32>,
    %c42 = arith.constant 42 : index
    %c0_137 = arith.constant 0 : index
    %116 = vector.load %arg15[%c42, %c0_137] : memref<288x16xf32, #tpu.memory_space<vmem>>, vector<2x16xf32>
    %c0_138 = arith.constant 0 : index
    %c304 = arith.constant 304 : index
    %117 = vector.load %arg16[%c0_138, %c304] : memref<2x1600xf32, #tpu.memory_space<vmem>>, vector<2x16xf32>
    tpu.vector_store %arg16[%c0_138, %c304], %116 {strides = array<i32>} : memref<2x1600xf32, #tpu.memory_space<vmem>>, vector<2x16xf32>,
    %c48_139 = arith.constant 48 : index
    %c0_140 = arith.constant 0 : index
    %118 = vector.load %arg15[%c48_139, %c0_140] : memref<288x16xf32, #tpu.memory_space<vmem>>, vector<2x16xf32>
    %c0_141 = arith.constant 0 : index
    %c320 = arith.constant 320 : index
    %119 = vector.load %arg16[%c0_141, %c320] : memref<2x1600xf32, #tpu.memory_space<vmem>>, vector<2x16xf32>
    tpu.vector_store %arg16[%c0_141, %c320], %118 {strides = array<i32>} : memref<2x1600xf32, #tpu.memory_space<vmem>>, vector<2x16xf32>,
    %c50_142 = arith.constant 50 : index
    %c0_143 = arith.constant 0 : index
    %120 = vector.load %arg15[%c50_142, %c0_143] : memref<288x16xf32, #tpu.memory_space<vmem>>, vector<2x16xf32>
    %c0_144 = arith.constant 0 : index
    %c336 = arith.constant 336 : index
    %121 = vector.load %arg16[%c0_144, %c336] : memref<2x1600xf32, #tpu.memory_space<vmem>>, vector<2x16xf32>
    tpu.vector_store %arg16[%c0_144, %c336], %120 {strides = array<i32>} : memref<2x1600xf32, #tpu.memory_space<vmem>>, vector<2x16xf32>,
    %c52_145 = arith.constant 52 : index
    %c0_146 = arith.constant 0 : index
    %122 = vector.load %arg15[%c52_145, %c0_146] : memref<288x16xf32, #tpu.memory_space<vmem>>, vector<2x16xf32>
    %c0_147 = arith.constant 0 : index
    %c352 = arith.constant 352 : index
    %123 = vector.load %arg16[%c0_147, %c352] : memref<2x1600xf32, #tpu.memory_space<vmem>>, vector<2x16xf32>
    tpu.vector_store %arg16[%c0_147, %c352], %122 {strides = array<i32>} : memref<2x1600xf32, #tpu.memory_space<vmem>>, vector<2x16xf32>,
    %c54 = arith.constant 54 : index
    %c0_148 = arith.constant 0 : index
    %124 = vector.load %arg15[%c54, %c0_148] : memref<288x16xf32, #tpu.memory_space<vmem>>, vector<2x16xf32>
    %c0_149 = arith.constant 0 : index
    %c368 = arith.constant 368 : index
    %125 = vector.load %arg16[%c0_149, %c368] : memref<2x1600xf32, #tpu.memory_space<vmem>>, vector<2x16xf32>
    tpu.vector_store %arg16[%c0_149, %c368], %124 {strides = array<i32>} : memref<2x1600xf32, #tpu.memory_space<vmem>>, vector<2x16xf32>,
    %c56 = arith.constant 56 : index
    %c0_150 = arith.constant 0 : index
    %126 = vector.load %arg15[%c56, %c0_150] : memref<288x16xf32, #tpu.memory_space<vmem>>, vector<2x16xf32>
    %c0_151 = arith.constant 0 : index
    %c384 = arith.constant 384 : index
    %127 = vector.load %arg16[%c0_151, %c384] : memref<2x1600xf32, #tpu.memory_space<vmem>>, vector<2x16xf32>
    tpu.vector_store %arg16[%c0_151, %c384], %126 {strides = array<i32>} : memref<2x1600xf32, #tpu.memory_space<vmem>>, vector<2x16xf32>,
    %c58 = arith.constant 58 : index
    %c0_152 = arith.constant 0 : index
    %128 = vector.load %arg15[%c58, %c0_152] : memref<288x16xf32, #tpu.memory_space<vmem>>, vector<2x16xf32>
    %c0_153 = arith.constant 0 : index
    %c400 = arith.constant 400 : index
    %129 = vector.load %arg16[%c0_153, %c400] : memref<2x1600xf32, #tpu.memory_space<vmem>>, vector<2x16xf32>
    tpu.vector_store %arg16[%c0_153, %c400], %128 {strides = array<i32>} : memref<2x1600xf32, #tpu.memory_space<vmem>>, vector<2x16xf32>,
    %c60 = arith.constant 60 : index
    %c0_154 = arith.constant 0 : index
    %130 = vector.load %arg15[%c60, %c0_154] : memref<288x16xf32, #tpu.memory_space<vmem>>, vector<2x16xf32>
    %c0_155 = arith.constant 0 : index
    %c416 = arith.constant 416 : index
    %131 = vector.load %arg16[%c0_155, %c416] : memref<2x1600xf32, #tpu.memory_space<vmem>>, vector<2x16xf32>
    tpu.vector_store %arg16[%c0_155, %c416], %130 {strides = array<i32>} : memref<2x1600xf32, #tpu.memory_space<vmem>>, vector<2x16xf32>,
    %c62 = arith.constant 62 : index
    %c0_156 = arith.constant 0 : index
    %132 = vector.load %arg15[%c62, %c0_156] : memref<288x16xf32, #tpu.memory_space<vmem>>, vector<2x16xf32>
    %c0_157 = arith.constant 0 : index
    %c432 = arith.constant 432 : index
    %133 = vector.load %arg16[%c0_157, %c432] : memref<2x1600xf32, #tpu.memory_space<vmem>>, vector<2x16xf32>
    tpu.vector_store %arg16[%c0_157, %c432], %132 {strides = array<i32>} : memref<2x1600xf32, #tpu.memory_space<vmem>>, vector<2x16xf32>,
    %c64_158 = arith.constant 64 : index
    %c0_159 = arith.constant 0 : index
    %134 = vector.load %arg15[%c64_158, %c0_159] : memref<288x16xf32, #tpu.memory_space<vmem>>, vector<2x16xf32>
    %c0_160 = arith.constant 0 : index
    %c448 = arith.constant 448 : index
    %135 = vector.load %arg16[%c0_160, %c448] : memref<2x1600xf32, #tpu.memory_space<vmem>>, vector<2x16xf32>
    tpu.vector_store %arg16[%c0_160, %c448], %134 {strides = array<i32>} : memref<2x1600xf32, #tpu.memory_space<vmem>>, vector<2x16xf32>,
    %c66 = arith.constant 66 : index
    %c0_161 = arith.constant 0 : index
    %136 = vector.load %arg15[%c66, %c0_161] : memref<288x16xf32, #tpu.memory_space<vmem>>, vector<2x16xf32>
    %c0_162 = arith.constant 0 : index
    %c464 = arith.constant 464 : index
    %137 = vector.load %arg16[%c0_162, %c464] : memref<2x1600xf32, #tpu.memory_space<vmem>>, vector<2x16xf32>
    tpu.vector_store %arg16[%c0_162, %c464], %136 {strides = array<i32>} : memref<2x1600xf32, #tpu.memory_space<vmem>>, vector<2x16xf32>,
    %c72 = arith.constant 72 : index
    %c0_163 = arith.constant 0 : index
    %138 = vector.load %arg15[%c72, %c0_163] : memref<288x16xf32, #tpu.memory_space<vmem>>, vector<2x16xf32>
    %c0_164 = arith.constant 0 : index
    %c480 = arith.constant 480 : index
    %139 = vector.load %arg16[%c0_164, %c480] : memref<2x1600xf32, #tpu.memory_space<vmem>>, vector<2x16xf32>
    tpu.vector_store %arg16[%c0_164, %c480], %138 {strides = array<i32>} : memref<2x1600xf32, #tpu.memory_space<vmem>>, vector<2x16xf32>,
    %c74 = arith.constant 74 : index
    %c0_165 = arith.constant 0 : index
    %140 = vector.load %arg15[%c74, %c0_165] : memref<288x16xf32, #tpu.memory_space<vmem>>, vector<2x16xf32>
    %c0_166 = arith.constant 0 : index
    %c496 = arith.constant 496 : index
    %141 = vector.load %arg16[%c0_166, %c496] : memref<2x1600xf32, #tpu.memory_space<vmem>>, vector<2x16xf32>
    tpu.vector_store %arg16[%c0_166, %c496], %140 {strides = array<i32>} : memref<2x1600xf32, #tpu.memory_space<vmem>>, vector<2x16xf32>,
    %c76 = arith.constant 76 : index
    %c0_167 = arith.constant 0 : index
    %142 = vector.load %arg15[%c76, %c0_167] : memref<288x16xf32, #tpu.memory_space<vmem>>, vector<2x16xf32>
    %c0_168 = arith.constant 0 : index
    %c512 = arith.constant 512 : index
    %143 = vector.load %arg16[%c0_168, %c512] : memref<2x1600xf32, #tpu.memory_space<vmem>>, vector<2x16xf32>
    tpu.vector_store %arg16[%c0_168, %c512], %142 {strides = array<i32>} : memref<2x1600xf32, #tpu.memory_space<vmem>>, vector<2x16xf32>,
    %c78 = arith.constant 78 : index
    %c0_169 = arith.constant 0 : index
    %144 = vector.load %arg15[%c78, %c0_169] : memref<288x16xf32, #tpu.memory_space<vmem>>, vector<2x16xf32>
    %c0_170 = arith.constant 0 : index
    %c528 = arith.constant 528 : index
    %145 = vector.load %arg16[%c0_170, %c528] : memref<2x1600xf32, #tpu.memory_space<vmem>>, vector<2x16xf32>
    tpu.vector_store %arg16[%c0_170, %c528], %144 {strides = array<i32>} : memref<2x1600xf32, #tpu.memory_space<vmem>>, vector<2x16xf32>,
    %c80_171 = arith.constant 80 : index
    %c0_172 = arith.constant 0 : index
    %146 = vector.load %arg15[%c80_171, %c0_172] : memref<288x16xf32, #tpu.memory_space<vmem>>, vector<2x16xf32>
    %c0_173 = arith.constant 0 : index
    %c544 = arith.constant 544 : index
    %147 = vector.load %arg16[%c0_173, %c544] : memref<2x1600xf32, #tpu.memory_space<vmem>>, vector<2x16xf32>
    tpu.vector_store %arg16[%c0_173, %c544], %146 {strides = array<i32>} : memref<2x1600xf32, #tpu.memory_space<vmem>>, vector<2x16xf32>,
    %c82 = arith.constant 82 : index
    %c0_174 = arith.constant 0 : index
    %148 = vector.load %arg15[%c82, %c0_174] : memref<288x16xf32, #tpu.memory_space<vmem>>, vector<2x16xf32>
    %c0_175 = arith.constant 0 : index
    %c560 = arith.constant 560 : index
    %149 = vector.load %arg16[%c0_175, %c560] : memref<2x1600xf32, #tpu.memory_space<vmem>>, vector<2x16xf32>
    tpu.vector_store %arg16[%c0_175, %c560], %148 {strides = array<i32>} : memref<2x1600xf32, #tpu.memory_space<vmem>>, vector<2x16xf32>,
    %c84 = arith.constant 84 : index
    %c0_176 = arith.constant 0 : index
    %150 = vector.load %arg15[%c84, %c0_176] : memref<288x16xf32, #tpu.memory_space<vmem>>, vector<2x16xf32>
    %c0_177 = arith.constant 0 : index
    %c576 = arith.constant 576 : index
    %151 = vector.load %arg16[%c0_177, %c576] : memref<2x1600xf32, #tpu.memory_space<vmem>>, vector<2x16xf32>
    tpu.vector_store %arg16[%c0_177, %c576], %150 {strides = array<i32>} : memref<2x1600xf32, #tpu.memory_space<vmem>>, vector<2x16xf32>,
    %c86 = arith.constant 86 : index
    %c0_178 = arith.constant 0 : index
    %152 = vector.load %arg15[%c86, %c0_178] : memref<288x16xf32, #tpu.memory_space<vmem>>, vector<2x16xf32>
    %c0_179 = arith.constant 0 : index
    %c592 = arith.constant 592 : index
    %153 = vector.load %arg16[%c0_179, %c592] : memref<2x1600xf32, #tpu.memory_space<vmem>>, vector<2x16xf32>
    tpu.vector_store %arg16[%c0_179, %c592], %152 {strides = array<i32>} : memref<2x1600xf32, #tpu.memory_space<vmem>>, vector<2x16xf32>,
    %c88 = arith.constant 88 : index
    %c0_180 = arith.constant 0 : index
    %154 = vector.load %arg15[%c88, %c0_180] : memref<288x16xf32, #tpu.memory_space<vmem>>, vector<2x16xf32>
    %c0_181 = arith.constant 0 : index
    %c608 = arith.constant 608 : index
    %155 = vector.load %arg16[%c0_181, %c608] : memref<2x1600xf32, #tpu.memory_space<vmem>>, vector<2x16xf32>
    tpu.vector_store %arg16[%c0_181, %c608], %154 {strides = array<i32>} : memref<2x1600xf32, #tpu.memory_space<vmem>>, vector<2x16xf32>,
    %c90 = arith.constant 90 : index
    %c0_182 = arith.constant 0 : index
    %156 = vector.load %arg15[%c90, %c0_182] : memref<288x16xf32, #tpu.memory_space<vmem>>, vector<2x16xf32>
    %c0_183 = arith.constant 0 : index
    %c624 = arith.constant 624 : index
    %157 = vector.load %arg16[%c0_183, %c624] : memref<2x1600xf32, #tpu.memory_space<vmem>>, vector<2x16xf32>
    tpu.vector_store %arg16[%c0_183, %c624], %156 {strides = array<i32>} : memref<2x1600xf32, #tpu.memory_space<vmem>>, vector<2x16xf32>,
    %c96_184 = arith.constant 96 : index
    %c0_185 = arith.constant 0 : index
    %158 = vector.load %arg15[%c96_184, %c0_185] : memref<288x16xf32, #tpu.memory_space<vmem>>, vector<2x16xf32>
    %c0_186 = arith.constant 0 : index
    %c640 = arith.constant 640 : index
    %159 = vector.load %arg16[%c0_186, %c640] : memref<2x1600xf32, #tpu.memory_space<vmem>>, vector<2x16xf32>
    tpu.vector_store %arg16[%c0_186, %c640], %158 {strides = array<i32>} : memref<2x1600xf32, #tpu.memory_space<vmem>>, vector<2x16xf32>,
    %c98 = arith.constant 98 : index
    %c0_187 = arith.constant 0 : index
    %160 = vector.load %arg15[%c98, %c0_187] : memref<288x16xf32, #tpu.memory_space<vmem>>, vector<2x16xf32>
    %c0_188 = arith.constant 0 : index
    %c656 = arith.constant 656 : index
    %161 = vector.load %arg16[%c0_188, %c656] : memref<2x1600xf32, #tpu.memory_space<vmem>>, vector<2x16xf32>
    tpu.vector_store %arg16[%c0_188, %c656], %160 {strides = array<i32>} : memref<2x1600xf32, #tpu.memory_space<vmem>>, vector<2x16xf32>,
    %c100 = arith.constant 100 : index
    %c0_189 = arith.constant 0 : index
    %162 = vector.load %arg15[%c100, %c0_189] : memref<288x16xf32, #tpu.memory_space<vmem>>, vector<2x16xf32>
    %c0_190 = arith.constant 0 : index
    %c672 = arith.constant 672 : index
    %163 = vector.load %arg16[%c0_190, %c672] : memref<2x1600xf32, #tpu.memory_space<vmem>>, vector<2x16xf32>
    tpu.vector_store %arg16[%c0_190, %c672], %162 {strides = array<i32>} : memref<2x1600xf32, #tpu.memory_space<vmem>>, vector<2x16xf32>,
    %c102 = arith.constant 102 : index
    %c0_191 = arith.constant 0 : index
    %164 = vector.load %arg15[%c102, %c0_191] : memref<288x16xf32, #tpu.memory_space<vmem>>, vector<2x16xf32>
    %c0_192 = arith.constant 0 : index
    %c688 = arith.constant 688 : index
    %165 = vector.load %arg16[%c0_192, %c688] : memref<2x1600xf32, #tpu.memory_space<vmem>>, vector<2x16xf32>
    tpu.vector_store %arg16[%c0_192, %c688], %164 {strides = array<i32>} : memref<2x1600xf32, #tpu.memory_space<vmem>>, vector<2x16xf32>,
    %c104 = arith.constant 104 : index
    %c0_193 = arith.constant 0 : index
    %166 = vector.load %arg15[%c104, %c0_193] : memref<288x16xf32, #tpu.memory_space<vmem>>, vector<2x16xf32>
    %c0_194 = arith.constant 0 : index
    %c704 = arith.constant 704 : index
    %167 = vector.load %arg16[%c0_194, %c704] : memref<2x1600xf32, #tpu.memory_space<vmem>>, vector<2x16xf32>
    tpu.vector_store %arg16[%c0_194, %c704], %166 {strides = array<i32>} : memref<2x1600xf32, #tpu.memory_space<vmem>>, vector<2x16xf32>,
    %c106 = arith.constant 106 : index
    %c0_195 = arith.constant 0 : index
    %168 = vector.load %arg15[%c106, %c0_195] : memref<288x16xf32, #tpu.memory_space<vmem>>, vector<2x16xf32>
    %c0_196 = arith.constant 0 : index
    %c720 = arith.constant 720 : index
    %169 = vector.load %arg16[%c0_196, %c720] : memref<2x1600xf32, #tpu.memory_space<vmem>>, vector<2x16xf32>
    tpu.vector_store %arg16[%c0_196, %c720], %168 {strides = array<i32>} : memref<2x1600xf32, #tpu.memory_space<vmem>>, vector<2x16xf32>,
    %c108 = arith.constant 108 : index
    %c0_197 = arith.constant 0 : index
    %170 = vector.load %arg15[%c108, %c0_197] : memref<288x16xf32, #tpu.memory_space<vmem>>, vector<2x16xf32>
    %c0_198 = arith.constant 0 : index
    %c736 = arith.constant 736 : index
    %171 = vector.load %arg16[%c0_198, %c736] : memref<2x1600xf32, #tpu.memory_space<vmem>>, vector<2x16xf32>
    tpu.vector_store %arg16[%c0_198, %c736], %170 {strides = array<i32>} : memref<2x1600xf32, #tpu.memory_space<vmem>>, vector<2x16xf32>,
    %c110 = arith.constant 110 : index
    %c0_199 = arith.constant 0 : index
    %172 = vector.load %arg15[%c110, %c0_199] : memref<288x16xf32, #tpu.memory_space<vmem>>, vector<2x16xf32>
    %c0_200 = arith.constant 0 : index
    %c752 = arith.constant 752 : index
    %173 = vector.load %arg16[%c0_200, %c752] : memref<2x1600xf32, #tpu.memory_space<vmem>>, vector<2x16xf32>
    tpu.vector_store %arg16[%c0_200, %c752], %172 {strides = array<i32>} : memref<2x1600xf32, #tpu.memory_space<vmem>>, vector<2x16xf32>,
    %c112_201 = arith.constant 112 : index
    %c0_202 = arith.constant 0 : index
    %174 = vector.load %arg15[%c112_201, %c0_202] : memref<288x16xf32, #tpu.memory_space<vmem>>, vector<2x16xf32>
    %c0_203 = arith.constant 0 : index
    %c768 = arith.constant 768 : index
    %175 = vector.load %arg16[%c0_203, %c768] : memref<2x1600xf32, #tpu.memory_space<vmem>>, vector<2x16xf32>
    tpu.vector_store %arg16[%c0_203, %c768], %174 {strides = array<i32>} : memref<2x1600xf32, #tpu.memory_space<vmem>>, vector<2x16xf32>,
    %c114 = arith.constant 114 : index
    %c0_204 = arith.constant 0 : index
    %176 = vector.load %arg15[%c114, %c0_204] : memref<288x16xf32, #tpu.memory_space<vmem>>, vector<2x16xf32>
    %c0_205 = arith.constant 0 : index
    %c784 = arith.constant 784 : index
    %177 = vector.load %arg16[%c0_205, %c784] : memref<2x1600xf32, #tpu.memory_space<vmem>>, vector<2x16xf32>
    tpu.vector_store %arg16[%c0_205, %c784], %176 {strides = array<i32>} : memref<2x1600xf32, #tpu.memory_space<vmem>>, vector<2x16xf32>,
    %c120 = arith.constant 120 : index
    %c0_206 = arith.constant 0 : index
    %178 = vector.load %arg15[%c120, %c0_206] : memref<288x16xf32, #tpu.memory_space<vmem>>, vector<2x16xf32>
    %c0_207 = arith.constant 0 : index
    %c800 = arith.constant 800 : index
    %179 = vector.load %arg16[%c0_207, %c800] : memref<2x1600xf32, #tpu.memory_space<vmem>>, vector<2x16xf32>
    tpu.vector_store %arg16[%c0_207, %c800], %178 {strides = array<i32>} : memref<2x1600xf32, #tpu.memory_space<vmem>>, vector<2x16xf32>,
    %c122 = arith.constant 122 : index
    %c0_208 = arith.constant 0 : index
    %180 = vector.load %arg15[%c122, %c0_208] : memref<288x16xf32, #tpu.memory_space<vmem>>, vector<2x16xf32>
    %c0_209 = arith.constant 0 : index
    %c816 = arith.constant 816 : index
    %181 = vector.load %arg16[%c0_209, %c816] : memref<2x1600xf32, #tpu.memory_space<vmem>>, vector<2x16xf32>
    tpu.vector_store %arg16[%c0_209, %c816], %180 {strides = array<i32>} : memref<2x1600xf32, #tpu.memory_space<vmem>>, vector<2x16xf32>,
    %c124 = arith.constant 124 : index
    %c0_210 = arith.constant 0 : index
    %182 = vector.load %arg15[%c124, %c0_210] : memref<288x16xf32, #tpu.memory_space<vmem>>, vector<2x16xf32>
    %c0_211 = arith.constant 0 : index
    %c832 = arith.constant 832 : index
    %183 = vector.load %arg16[%c0_211, %c832] : memref<2x1600xf32, #tpu.memory_space<vmem>>, vector<2x16xf32>
    tpu.vector_store %arg16[%c0_211, %c832], %182 {strides = array<i32>} : memref<2x1600xf32, #tpu.memory_space<vmem>>, vector<2x16xf32>,
    %c126 = arith.constant 126 : index
    %c0_212 = arith.constant 0 : index
    %184 = vector.load %arg15[%c126, %c0_212] : memref<288x16xf32, #tpu.memory_space<vmem>>, vector<2x16xf32>
    %c0_213 = arith.constant 0 : index
    %c848 = arith.constant 848 : index
    %185 = vector.load %arg16[%c0_213, %c848] : memref<2x1600xf32, #tpu.memory_space<vmem>>, vector<2x16xf32>
    tpu.vector_store %arg16[%c0_213, %c848], %184 {strides = array<i32>} : memref<2x1600xf32, #tpu.memory_space<vmem>>, vector<2x16xf32>,
    %c128_214 = arith.constant 128 : index
    %c0_215 = arith.constant 0 : index
    %186 = vector.load %arg15[%c128_214, %c0_215] : memref<288x16xf32, #tpu.memory_space<vmem>>, vector<2x16xf32>
    %c0_216 = arith.constant 0 : index
    %c864 = arith.constant 864 : index
    %187 = vector.load %arg16[%c0_216, %c864] : memref<2x1600xf32, #tpu.memory_space<vmem>>, vector<2x16xf32>
    tpu.vector_store %arg16[%c0_216, %c864], %186 {strides = array<i32>} : memref<2x1600xf32, #tpu.memory_space<vmem>>, vector<2x16xf32>,
    %c130 = arith.constant 130 : index
    %c0_217 = arith.constant 0 : index
    %188 = vector.load %arg15[%c130, %c0_217] : memref<288x16xf32, #tpu.memory_space<vmem>>, vector<2x16xf32>
    %c0_218 = arith.constant 0 : index
    %c880 = arith.constant 880 : index
    %189 = vector.load %arg16[%c0_218, %c880] : memref<2x1600xf32, #tpu.memory_space<vmem>>, vector<2x16xf32>
    tpu.vector_store %arg16[%c0_218, %c880], %188 {strides = array<i32>} : memref<2x1600xf32, #tpu.memory_space<vmem>>, vector<2x16xf32>,
    %c132 = arith.constant 132 : index
    %c0_219 = arith.constant 0 : index
    %190 = vector.load %arg15[%c132, %c0_219] : memref<288x16xf32, #tpu.memory_space<vmem>>, vector<2x16xf32>
    %c0_220 = arith.constant 0 : index
    %c896 = arith.constant 896 : index
    %191 = vector.load %arg16[%c0_220, %c896] : memref<2x1600xf32, #tpu.memory_space<vmem>>, vector<2x16xf32>
    tpu.vector_store %arg16[%c0_220, %c896], %190 {strides = array<i32>} : memref<2x1600xf32, #tpu.memory_space<vmem>>, vector<2x16xf32>,
    %c134 = arith.constant 134 : index
    %c0_221 = arith.constant 0 : index
    %192 = vector.load %arg15[%c134, %c0_221] : memref<288x16xf32, #tpu.memory_space<vmem>>, vector<2x16xf32>
    %c0_222 = arith.constant 0 : index
    %c912 = arith.constant 912 : index
    %193 = vector.load %arg16[%c0_222, %c912] : memref<2x1600xf32, #tpu.memory_space<vmem>>, vector<2x16xf32>
    tpu.vector_store %arg16[%c0_222, %c912], %192 {strides = array<i32>} : memref<2x1600xf32, #tpu.memory_space<vmem>>, vector<2x16xf32>,
    %c136 = arith.constant 136 : index
    %c0_223 = arith.constant 0 : index
    %194 = vector.load %arg15[%c136, %c0_223] : memref<288x16xf32, #tpu.memory_space<vmem>>, vector<2x16xf32>
    %c0_224 = arith.constant 0 : index
    %c928 = arith.constant 928 : index
    %195 = vector.load %arg16[%c0_224, %c928] : memref<2x1600xf32, #tpu.memory_space<vmem>>, vector<2x16xf32>
    tpu.vector_store %arg16[%c0_224, %c928], %194 {strides = array<i32>} : memref<2x1600xf32, #tpu.memory_space<vmem>>, vector<2x16xf32>,
    %c138 = arith.constant 138 : index
    %c0_225 = arith.constant 0 : index
    %196 = vector.load %arg15[%c138, %c0_225] : memref<288x16xf32, #tpu.memory_space<vmem>>, vector<2x16xf32>
    %c0_226 = arith.constant 0 : index
    %c944 = arith.constant 944 : index
    %197 = vector.load %arg16[%c0_226, %c944] : memref<2x1600xf32, #tpu.memory_space<vmem>>, vector<2x16xf32>
    tpu.vector_store %arg16[%c0_226, %c944], %196 {strides = array<i32>} : memref<2x1600xf32, #tpu.memory_space<vmem>>, vector<2x16xf32>,
    %c144_227 = arith.constant 144 : index
    %c0_228 = arith.constant 0 : index
    %198 = vector.load %arg15[%c144_227, %c0_228] : memref<288x16xf32, #tpu.memory_space<vmem>>, vector<2x16xf32>
    %c0_229 = arith.constant 0 : index
    %c960 = arith.constant 960 : index
    %199 = vector.load %arg16[%c0_229, %c960] : memref<2x1600xf32, #tpu.memory_space<vmem>>, vector<2x16xf32>
    tpu.vector_store %arg16[%c0_229, %c960], %198 {strides = array<i32>} : memref<2x1600xf32, #tpu.memory_space<vmem>>, vector<2x16xf32>,
    %c146 = arith.constant 146 : index
    %c0_230 = arith.constant 0 : index
    %200 = vector.load %arg15[%c146, %c0_230] : memref<288x16xf32, #tpu.memory_space<vmem>>, vector<2x16xf32>
    %c0_231 = arith.constant 0 : index
    %c976 = arith.constant 976 : index
    %201 = vector.load %arg16[%c0_231, %c976] : memref<2x1600xf32, #tpu.memory_space<vmem>>, vector<2x16xf32>
    tpu.vector_store %arg16[%c0_231, %c976], %200 {strides = array<i32>} : memref<2x1600xf32, #tpu.memory_space<vmem>>, vector<2x16xf32>,
    %c148 = arith.constant 148 : index
    %c0_232 = arith.constant 0 : index
    %202 = vector.load %arg15[%c148, %c0_232] : memref<288x16xf32, #tpu.memory_space<vmem>>, vector<2x16xf32>
    %c0_233 = arith.constant 0 : index
    %c992 = arith.constant 992 : index
    %203 = vector.load %arg16[%c0_233, %c992] : memref<2x1600xf32, #tpu.memory_space<vmem>>, vector<2x16xf32>
    tpu.vector_store %arg16[%c0_233, %c992], %202 {strides = array<i32>} : memref<2x1600xf32, #tpu.memory_space<vmem>>, vector<2x16xf32>,
    %c150 = arith.constant 150 : index
    %c0_234 = arith.constant 0 : index
    %204 = vector.load %arg15[%c150, %c0_234] : memref<288x16xf32, #tpu.memory_space<vmem>>, vector<2x16xf32>
    %c0_235 = arith.constant 0 : index
    %c1008 = arith.constant 1008 : index
    %205 = vector.load %arg16[%c0_235, %c1008] : memref<2x1600xf32, #tpu.memory_space<vmem>>, vector<2x16xf32>
    tpu.vector_store %arg16[%c0_235, %c1008], %204 {strides = array<i32>} : memref<2x1600xf32, #tpu.memory_space<vmem>>, vector<2x16xf32>,
    %c152 = arith.constant 152 : index
    %c0_236 = arith.constant 0 : index
    %206 = vector.load %arg15[%c152, %c0_236] : memref<288x16xf32, #tpu.memory_space<vmem>>, vector<2x16xf32>
    %c0_237 = arith.constant 0 : index
    %c1024 = arith.constant 1024 : index
    %207 = vector.load %arg16[%c0_237, %c1024] : memref<2x1600xf32, #tpu.memory_space<vmem>>, vector<2x16xf32>
    tpu.vector_store %arg16[%c0_237, %c1024], %206 {strides = array<i32>} : memref<2x1600xf32, #tpu.memory_space<vmem>>, vector<2x16xf32>,
    %c154 = arith.constant 154 : index
    %c0_238 = arith.constant 0 : index
    %208 = vector.load %arg15[%c154, %c0_238] : memref<288x16xf32, #tpu.memory_space<vmem>>, vector<2x16xf32>
    %c0_239 = arith.constant 0 : index
    %c1040 = arith.constant 1040 : index
    %209 = vector.load %arg16[%c0_239, %c1040] : memref<2x1600xf32, #tpu.memory_space<vmem>>, vector<2x16xf32>
    tpu.vector_store %arg16[%c0_239, %c1040], %208 {strides = array<i32>} : memref<2x1600xf32, #tpu.memory_space<vmem>>, vector<2x16xf32>,
    %c156 = arith.constant 156 : index
    %c0_240 = arith.constant 0 : index
    %210 = vector.load %arg15[%c156, %c0_240] : memref<288x16xf32, #tpu.memory_space<vmem>>, vector<2x16xf32>
    %c0_241 = arith.constant 0 : index
    %c1056 = arith.constant 1056 : index
    %211 = vector.load %arg16[%c0_241, %c1056] : memref<2x1600xf32, #tpu.memory_space<vmem>>, vector<2x16xf32>
    tpu.vector_store %arg16[%c0_241, %c1056], %210 {strides = array<i32>} : memref<2x1600xf32, #tpu.memory_space<vmem>>, vector<2x16xf32>,
    %c158 = arith.constant 158 : index
    %c0_242 = arith.constant 0 : index
    %212 = vector.load %arg15[%c158, %c0_242] : memref<288x16xf32, #tpu.memory_space<vmem>>, vector<2x16xf32>
    %c0_243 = arith.constant 0 : index
    %c1072 = arith.constant 1072 : index
    %213 = vector.load %arg16[%c0_243, %c1072] : memref<2x1600xf32, #tpu.memory_space<vmem>>, vector<2x16xf32>
    tpu.vector_store %arg16[%c0_243, %c1072], %212 {strides = array<i32>} : memref<2x1600xf32, #tpu.memory_space<vmem>>, vector<2x16xf32>,
    %c160_244 = arith.constant 160 : index
    %c0_245 = arith.constant 0 : index
    %214 = vector.load %arg15[%c160_244, %c0_245] : memref<288x16xf32, #tpu.memory_space<vmem>>, vector<2x16xf32>
    %c0_246 = arith.constant 0 : index
    %c1088 = arith.constant 1088 : index
    %215 = vector.load %arg16[%c0_246, %c1088] : memref<2x1600xf32, #tpu.memory_space<vmem>>, vector<2x16xf32>
    tpu.vector_store %arg16[%c0_246, %c1088], %214 {strides = array<i32>} : memref<2x1600xf32, #tpu.memory_space<vmem>>, vector<2x16xf32>,
    %c162 = arith.constant 162 : index
    %c0_247 = arith.constant 0 : index
    %216 = vector.load %arg15[%c162, %c0_247] : memref<288x16xf32, #tpu.memory_space<vmem>>, vector<2x16xf32>
    %c0_248 = arith.constant 0 : index
    %c1104 = arith.constant 1104 : index
    %217 = vector.load %arg16[%c0_248, %c1104] : memref<2x1600xf32, #tpu.memory_space<vmem>>, vector<2x16xf32>
    tpu.vector_store %arg16[%c0_248, %c1104], %216 {strides = array<i32>} : memref<2x1600xf32, #tpu.memory_space<vmem>>, vector<2x16xf32>,
    %c168 = arith.constant 168 : index
    %c0_249 = arith.constant 0 : index
    %218 = vector.load %arg15[%c168, %c0_249] : memref<288x16xf32, #tpu.memory_space<vmem>>, vector<2x16xf32>
    %c0_250 = arith.constant 0 : index
    %c1120 = arith.constant 1120 : index
    %219 = vector.load %arg16[%c0_250, %c1120] : memref<2x1600xf32, #tpu.memory_space<vmem>>, vector<2x16xf32>
    tpu.vector_store %arg16[%c0_250, %c1120], %218 {strides = array<i32>} : memref<2x1600xf32, #tpu.memory_space<vmem>>, vector<2x16xf32>,
    %c170 = arith.constant 170 : index
    %c0_251 = arith.constant 0 : index
    %220 = vector.load %arg15[%c170, %c0_251] : memref<288x16xf32, #tpu.memory_space<vmem>>, vector<2x16xf32>
    %c0_252 = arith.constant 0 : index
    %c1136 = arith.constant 1136 : index
    %221 = vector.load %arg16[%c0_252, %c1136] : memref<2x1600xf32, #tpu.memory_space<vmem>>, vector<2x16xf32>
    tpu.vector_store %arg16[%c0_252, %c1136], %220 {strides = array<i32>} : memref<2x1600xf32, #tpu.memory_space<vmem>>, vector<2x16xf32>,
    %c172 = arith.constant 172 : index
    %c0_253 = arith.constant 0 : index
    %222 = vector.load %arg15[%c172, %c0_253] : memref<288x16xf32, #tpu.memory_space<vmem>>, vector<2x16xf32>
    %c0_254 = arith.constant 0 : index
    %c1152 = arith.constant 1152 : index
    %223 = vector.load %arg16[%c0_254, %c1152] : memref<2x1600xf32, #tpu.memory_space<vmem>>, vector<2x16xf32>
    tpu.vector_store %arg16[%c0_254, %c1152], %222 {strides = array<i32>} : memref<2x1600xf32, #tpu.memory_space<vmem>>, vector<2x16xf32>,
    %c174 = arith.constant 174 : index
    %c0_255 = arith.constant 0 : index
    %224 = vector.load %arg15[%c174, %c0_255] : memref<288x16xf32, #tpu.memory_space<vmem>>, vector<2x16xf32>
    %c0_256 = arith.constant 0 : index
    %c1168 = arith.constant 1168 : index
    %225 = vector.load %arg16[%c0_256, %c1168] : memref<2x1600xf32, #tpu.memory_space<vmem>>, vector<2x16xf32>
    tpu.vector_store %arg16[%c0_256, %c1168], %224 {strides = array<i32>} : memref<2x1600xf32, #tpu.memory_space<vmem>>, vector<2x16xf32>,
    %c176_257 = arith.constant 176 : index
    %c0_258 = arith.constant 0 : index
    %226 = vector.load %arg15[%c176_257, %c0_258] : memref<288x16xf32, #tpu.memory_space<vmem>>, vector<2x16xf32>
    %c0_259 = arith.constant 0 : index
    %c1184 = arith.constant 1184 : index
    %227 = vector.load %arg16[%c0_259, %c1184] : memref<2x1600xf32, #tpu.memory_space<vmem>>, vector<2x16xf32>
    tpu.vector_store %arg16[%c0_259, %c1184], %226 {strides = array<i32>} : memref<2x1600xf32, #tpu.memory_space<vmem>>, vector<2x16xf32>,
    %c178 = arith.constant 178 : index
    %c0_260 = arith.constant 0 : index
    %228 = vector.load %arg15[%c178, %c0_260] : memref<288x16xf32, #tpu.memory_space<vmem>>, vector<2x16xf32>
    %c0_261 = arith.constant 0 : index
    %c1200 = arith.constant 1200 : index
    %229 = vector.load %arg16[%c0_261, %c1200] : memref<2x1600xf32, #tpu.memory_space<vmem>>, vector<2x16xf32>
    tpu.vector_store %arg16[%c0_261, %c1200], %228 {strides = array<i32>} : memref<2x1600xf32, #tpu.memory_space<vmem>>, vector<2x16xf32>,
    %c180 = arith.constant 180 : index
    %c0_262 = arith.constant 0 : index
    %230 = vector.load %arg15[%c180, %c0_262] : memref<288x16xf32, #tpu.memory_space<vmem>>, vector<2x16xf32>
    %c0_263 = arith.constant 0 : index
    %c1216 = arith.constant 1216 : index
    %231 = vector.load %arg16[%c0_263, %c1216] : memref<2x1600xf32, #tpu.memory_space<vmem>>, vector<2x16xf32>
    tpu.vector_store %arg16[%c0_263, %c1216], %230 {strides = array<i32>} : memref<2x1600xf32, #tpu.memory_space<vmem>>, vector<2x16xf32>,
    %c182 = arith.constant 182 : index
    %c0_264 = arith.constant 0 : index
    %232 = vector.load %arg15[%c182, %c0_264] : memref<288x16xf32, #tpu.memory_space<vmem>>, vector<2x16xf32>
    %c0_265 = arith.constant 0 : index
    %c1232 = arith.constant 1232 : index
    %233 = vector.load %arg16[%c0_265, %c1232] : memref<2x1600xf32, #tpu.memory_space<vmem>>, vector<2x16xf32>
    tpu.vector_store %arg16[%c0_265, %c1232], %232 {strides = array<i32>} : memref<2x1600xf32, #tpu.memory_space<vmem>>, vector<2x16xf32>,
    %c184 = arith.constant 184 : index
    %c0_266 = arith.constant 0 : index
    %234 = vector.load %arg15[%c184, %c0_266] : memref<288x16xf32, #tpu.memory_space<vmem>>, vector<2x16xf32>
    %c0_267 = arith.constant 0 : index
    %c1248 = arith.constant 1248 : index
    %235 = vector.load %arg16[%c0_267, %c1248] : memref<2x1600xf32, #tpu.memory_space<vmem>>, vector<2x16xf32>
    tpu.vector_store %arg16[%c0_267, %c1248], %234 {strides = array<i32>} : memref<2x1600xf32, #tpu.memory_space<vmem>>, vector<2x16xf32>,
    %c186 = arith.constant 186 : index
    %c0_268 = arith.constant 0 : index
    %236 = vector.load %arg15[%c186, %c0_268] : memref<288x16xf32, #tpu.memory_space<vmem>>, vector<2x16xf32>
    %c0_269 = arith.constant 0 : index
    %c1264 = arith.constant 1264 : index
    %237 = vector.load %arg16[%c0_269, %c1264] : memref<2x1600xf32, #tpu.memory_space<vmem>>, vector<2x16xf32>
    tpu.vector_store %arg16[%c0_269, %c1264], %236 {strides = array<i32>} : memref<2x1600xf32, #tpu.memory_space<vmem>>, vector<2x16xf32>,
    %c192_270 = arith.constant 192 : index
    %c0_271 = arith.constant 0 : index
    %238 = vector.load %arg15[%c192_270, %c0_271] : memref<288x16xf32, #tpu.memory_space<vmem>>, vector<2x16xf32>
    %c0_272 = arith.constant 0 : index
    %c1280 = arith.constant 1280 : index
    %239 = vector.load %arg16[%c0_272, %c1280] : memref<2x1600xf32, #tpu.memory_space<vmem>>, vector<2x16xf32>
    tpu.vector_store %arg16[%c0_272, %c1280], %238 {strides = array<i32>} : memref<2x1600xf32, #tpu.memory_space<vmem>>, vector<2x16xf32>,
    %c194 = arith.constant 194 : index
    %c0_273 = arith.constant 0 : index
    %240 = vector.load %arg15[%c194, %c0_273] : memref<288x16xf32, #tpu.memory_space<vmem>>, vector<2x16xf32>
    %c0_274 = arith.constant 0 : index
    %c1296 = arith.constant 1296 : index
    %241 = vector.load %arg16[%c0_274, %c1296] : memref<2x1600xf32, #tpu.memory_space<vmem>>, vector<2x16xf32>
    tpu.vector_store %arg16[%c0_274, %c1296], %240 {strides = array<i32>} : memref<2x1600xf32, #tpu.memory_space<vmem>>, vector<2x16xf32>,
    %c196 = arith.constant 196 : index
    %c0_275 = arith.constant 0 : index
    %242 = vector.load %arg15[%c196, %c0_275] : memref<288x16xf32, #tpu.memory_space<vmem>>, vector<2x16xf32>
    %c0_276 = arith.constant 0 : index
    %c1312 = arith.constant 1312 : index
    %243 = vector.load %arg16[%c0_276, %c1312] : memref<2x1600xf32, #tpu.memory_space<vmem>>, vector<2x16xf32>
    tpu.vector_store %arg16[%c0_276, %c1312], %242 {strides = array<i32>} : memref<2x1600xf32, #tpu.memory_space<vmem>>, vector<2x16xf32>,
    %c198 = arith.constant 198 : index
    %c0_277 = arith.constant 0 : index
    %244 = vector.load %arg15[%c198, %c0_277] : memref<288x16xf32, #tpu.memory_space<vmem>>, vector<2x16xf32>
    %c0_278 = arith.constant 0 : index
    %c1328 = arith.constant 1328 : index
    %245 = vector.load %arg16[%c0_278, %c1328] : memref<2x1600xf32, #tpu.memory_space<vmem>>, vector<2x16xf32>
    tpu.vector_store %arg16[%c0_278, %c1328], %244 {strides = array<i32>} : memref<2x1600xf32, #tpu.memory_space<vmem>>, vector<2x16xf32>,
    %c200 = arith.constant 200 : index
    %c0_279 = arith.constant 0 : index
    %246 = vector.load %arg15[%c200, %c0_279] : memref<288x16xf32, #tpu.memory_space<vmem>>, vector<2x16xf32>
    %c0_280 = arith.constant 0 : index
    %c1344 = arith.constant 1344 : index
    %247 = vector.load %arg16[%c0_280, %c1344] : memref<2x1600xf32, #tpu.memory_space<vmem>>, vector<2x16xf32>
    tpu.vector_store %arg16[%c0_280, %c1344], %246 {strides = array<i32>} : memref<2x1600xf32, #tpu.memory_space<vmem>>, vector<2x16xf32>,
    %c202 = arith.constant 202 : index
    %c0_281 = arith.constant 0 : index
    %248 = vector.load %arg15[%c202, %c0_281] : memref<288x16xf32, #tpu.memory_space<vmem>>, vector<2x16xf32>
    %c0_282 = arith.constant 0 : index
    %c1360 = arith.constant 1360 : index
    %249 = vector.load %arg16[%c0_282, %c1360] : memref<2x1600xf32, #tpu.memory_space<vmem>>, vector<2x16xf32>
    tpu.vector_store %arg16[%c0_282, %c1360], %248 {strides = array<i32>} : memref<2x1600xf32, #tpu.memory_space<vmem>>, vector<2x16xf32>,
    %c204 = arith.constant 204 : index
    %c0_283 = arith.constant 0 : index
    %250 = vector.load %arg15[%c204, %c0_283] : memref<288x16xf32, #tpu.memory_space<vmem>>, vector<2x16xf32>
    %c0_284 = arith.constant 0 : index
    %c1376 = arith.constant 1376 : index
    %251 = vector.load %arg16[%c0_284, %c1376] : memref<2x1600xf32, #tpu.memory_space<vmem>>, vector<2x16xf32>
    tpu.vector_store %arg16[%c0_284, %c1376], %250 {strides = array<i32>} : memref<2x1600xf32, #tpu.memory_space<vmem>>, vector<2x16xf32>,
    %c206 = arith.constant 206 : index
    %c0_285 = arith.constant 0 : index
    %252 = vector.load %arg15[%c206, %c0_285] : memref<288x16xf32, #tpu.memory_space<vmem>>, vector<2x16xf32>
    %c0_286 = arith.constant 0 : index
    %c1392 = arith.constant 1392 : index
    %253 = vector.load %arg16[%c0_286, %c1392] : memref<2x1600xf32, #tpu.memory_space<vmem>>, vector<2x16xf32>
    tpu.vector_store %arg16[%c0_286, %c1392], %252 {strides = array<i32>} : memref<2x1600xf32, #tpu.memory_space<vmem>>, vector<2x16xf32>,
    %c208_287 = arith.constant 208 : index
    %c0_288 = arith.constant 0 : index
    %254 = vector.load %arg15[%c208_287, %c0_288] : memref<288x16xf32, #tpu.memory_space<vmem>>, vector<2x16xf32>
    %c0_289 = arith.constant 0 : index
    %c1408 = arith.constant 1408 : index
    %255 = vector.load %arg16[%c0_289, %c1408] : memref<2x1600xf32, #tpu.memory_space<vmem>>, vector<2x16xf32>
    tpu.vector_store %arg16[%c0_289, %c1408], %254 {strides = array<i32>} : memref<2x1600xf32, #tpu.memory_space<vmem>>, vector<2x16xf32>,
    %c210 = arith.constant 210 : index
    %c0_290 = arith.constant 0 : index
    %256 = vector.load %arg15[%c210, %c0_290] : memref<288x16xf32, #tpu.memory_space<vmem>>, vector<2x16xf32>
    %c0_291 = arith.constant 0 : index
    %c1424 = arith.constant 1424 : index
    %257 = vector.load %arg16[%c0_291, %c1424] : memref<2x1600xf32, #tpu.memory_space<vmem>>, vector<2x16xf32>
    tpu.vector_store %arg16[%c0_291, %c1424], %256 {strides = array<i32>} : memref<2x1600xf32, #tpu.memory_space<vmem>>, vector<2x16xf32>,
    %c216 = arith.constant 216 : index
    %c0_292 = arith.constant 0 : index
    %258 = vector.load %arg15[%c216, %c0_292] : memref<288x16xf32, #tpu.memory_space<vmem>>, vector<2x16xf32>
    %c0_293 = arith.constant 0 : index
    %c1440 = arith.constant 1440 : index
    %259 = vector.load %arg16[%c0_293, %c1440] : memref<2x1600xf32, #tpu.memory_space<vmem>>, vector<2x16xf32>
    tpu.vector_store %arg16[%c0_293, %c1440], %258 {strides = array<i32>} : memref<2x1600xf32, #tpu.memory_space<vmem>>, vector<2x16xf32>,
    %c218 = arith.constant 218 : index
    %c0_294 = arith.constant 0 : index
    %260 = vector.load %arg15[%c218, %c0_294] : memref<288x16xf32, #tpu.memory_space<vmem>>, vector<2x16xf32>
    %c0_295 = arith.constant 0 : index
    %c1456 = arith.constant 1456 : index
    %261 = vector.load %arg16[%c0_295, %c1456] : memref<2x1600xf32, #tpu.memory_space<vmem>>, vector<2x16xf32>
    tpu.vector_store %arg16[%c0_295, %c1456], %260 {strides = array<i32>} : memref<2x1600xf32, #tpu.memory_space<vmem>>, vector<2x16xf32>,
    %c220 = arith.constant 220 : index
    %c0_296 = arith.constant 0 : index
    %262 = vector.load %arg15[%c220, %c0_296] : memref<288x16xf32, #tpu.memory_space<vmem>>, vector<2x16xf32>
    %c0_297 = arith.constant 0 : index
    %c1472 = arith.constant 1472 : index
    %263 = vector.load %arg16[%c0_297, %c1472] : memref<2x1600xf32, #tpu.memory_space<vmem>>, vector<2x16xf32>
    tpu.vector_store %arg16[%c0_297, %c1472], %262 {strides = array<i32>} : memref<2x1600xf32, #tpu.memory_space<vmem>>, vector<2x16xf32>,
    %c222 = arith.constant 222 : index
    %c0_298 = arith.constant 0 : index
    %264 = vector.load %arg15[%c222, %c0_298] : memref<288x16xf32, #tpu.memory_space<vmem>>, vector<2x16xf32>
    %c0_299 = arith.constant 0 : index
    %c1488 = arith.constant 1488 : index
    %265 = vector.load %arg16[%c0_299, %c1488] : memref<2x1600xf32, #tpu.memory_space<vmem>>, vector<2x16xf32>
    tpu.vector_store %arg16[%c0_299, %c1488], %264 {strides = array<i32>} : memref<2x1600xf32, #tpu.memory_space<vmem>>, vector<2x16xf32>,
    %c224_300 = arith.constant 224 : index
    %c0_301 = arith.constant 0 : index
    %266 = vector.load %arg15[%c224_300, %c0_301] : memref<288x16xf32, #tpu.memory_space<vmem>>, vector<2x16xf32>
    %c0_302 = arith.constant 0 : index
    %c1504 = arith.constant 1504 : index
    %267 = vector.load %arg16[%c0_302, %c1504] : memref<2x1600xf32, #tpu.memory_space<vmem>>, vector<2x16xf32>
    tpu.vector_store %arg16[%c0_302, %c1504], %266 {strides = array<i32>} : memref<2x1600xf32, #tpu.memory_space<vmem>>, vector<2x16xf32>,
    %c226 = arith.constant 226 : index
    %c0_303 = arith.constant 0 : index
    %268 = vector.load %arg15[%c226, %c0_303] : memref<288x16xf32, #tpu.memory_space<vmem>>, vector<2x16xf32>
    %c0_304 = arith.constant 0 : index
    %c1520 = arith.constant 1520 : index
    %269 = vector.load %arg16[%c0_304, %c1520] : memref<2x1600xf32, #tpu.memory_space<vmem>>, vector<2x16xf32>
    tpu.vector_store %arg16[%c0_304, %c1520], %268 {strides = array<i32>} : memref<2x1600xf32, #tpu.memory_space<vmem>>, vector<2x16xf32>,
    %c228 = arith.constant 228 : index
    %c0_305 = arith.constant 0 : index
    %270 = vector.load %arg15[%c228, %c0_305] : memref<288x16xf32, #tpu.memory_space<vmem>>, vector<2x16xf32>
    %c0_306 = arith.constant 0 : index
    %c1536 = arith.constant 1536 : index
    %271 = vector.load %arg16[%c0_306, %c1536] : memref<2x1600xf32, #tpu.memory_space<vmem>>, vector<2x16xf32>
    tpu.vector_store %arg16[%c0_306, %c1536], %270 {strides = array<i32>} : memref<2x1600xf32, #tpu.memory_space<vmem>>, vector<2x16xf32>,
    %c230 = arith.constant 230 : index
    %c0_307 = arith.constant 0 : index
    %272 = vector.load %arg15[%c230, %c0_307] : memref<288x16xf32, #tpu.memory_space<vmem>>, vector<2x16xf32>
    %c0_308 = arith.constant 0 : index
    %c1552 = arith.constant 1552 : index
    %273 = vector.load %arg16[%c0_308, %c1552] : memref<2x1600xf32, #tpu.memory_space<vmem>>, vector<2x16xf32>
    tpu.vector_store %arg16[%c0_308, %c1552], %272 {strides = array<i32>} : memref<2x1600xf32, #tpu.memory_space<vmem>>, vector<2x16xf32>,
    %c232 = arith.constant 232 : index
    %c0_309 = arith.constant 0 : index
    %274 = vector.load %arg15[%c232, %c0_309] : memref<288x16xf32, #tpu.memory_space<vmem>>, vector<2x16xf32>
    %c0_310 = arith.constant 0 : index
    %c1568 = arith.constant 1568 : index
    %275 = vector.load %arg16[%c0_310, %c1568] : memref<2x1600xf32, #tpu.memory_space<vmem>>, vector<2x16xf32>
    tpu.vector_store %arg16[%c0_310, %c1568], %274 {strides = array<i32>} : memref<2x1600xf32, #tpu.memory_space<vmem>>, vector<2x16xf32>,
    %c234 = arith.constant 234 : index
    %c0_311 = arith.constant 0 : index
    %276 = vector.load %arg15[%c234, %c0_311] : memref<288x16xf32, #tpu.memory_space<vmem>>, vector<2x16xf32>
    %c0_312 = arith.constant 0 : index
    %c1584 = arith.constant 1584 : index
    %277 = vector.load %arg16[%c0_312, %c1584] : memref<2x1600xf32, #tpu.memory_space<vmem>>, vector<2x16xf32>
    tpu.vector_store %arg16[%c0_312, %c1584], %276 {strides = array<i32>} : memref<2x1600xf32, #tpu.memory_space<vmem>>, vector<2x16xf32>,
    %c0_i32_313 = arith.constant 0 : i32
    %278 = tpu.memref_slice %arg21[%c0_i32_313] : memref<4x!tpu.dma_semaphore, #tpu.memory_space<semaphore_mem>> -> memref<1x!tpu.dma_semaphore, #tpu.memory_space<semaphore_mem>>
    %279 = tpu.memref_squeeze %278 : memref<1x!tpu.dma_semaphore, #tpu.memory_space<semaphore_mem>> -> memref<!tpu.dma_semaphore, #tpu.memory_space<semaphore_mem>>
    tpu.wait_dma2 semaphore(%279 : memref<!tpu.dma_semaphore, #tpu.memory_space<semaphore_mem>>) src(%arg9 : memref<1600x256xbf16, #tpu.memory_space<any>>) dst(%arg17 : memref<1600x256xbf16, #tpu.memory_space<vmem>>)
    %c0_314 = arith.constant 0 : index
    %c0_315 = arith.constant 0 : index
    %280 = vector.load %arg16[%c0_314, %c0_315] : memref<2x1600xf32, #tpu.memory_space<vmem>>, vector<2x1600xf32>
    %281 = arith.truncf %280 : vector<2x1600xf32> to vector<2x1600xbf16>
    %c0_316 = arith.constant 0 : index
    %c0_317 = arith.constant 0 : index
    %282 = vector.load %arg17[%c0_316, %c0_317] : memref<1600x256xbf16, #tpu.memory_space<vmem>>, vector<1600x256xbf16>
    %cst_318 = arith.constant dense<0.000000e+00> : vector<2x256xf32>
    %283 = tpu.matmul %281, %282, %cst_318 {dimension_numbers = #tpu.dot_dimension_numbers<[1], [0], [0], [1], [0, 0, 1, 1], [], []>} : vector<2x1600xbf16>, vector<1600x256xbf16>, vector<2x256xf32> -> vector<2x256xf32>
    %c0_319 = arith.constant 0 : index
    %c0_320 = arith.constant 0 : index
    %284 = vector.load %arg5[%c0_319, %c0_320] : memref<1x256xf32, #tpu.memory_space<vmem>>, vector<1x256xf32>
    %285 = vector.broadcast %284 : vector<1x256xf32> to vector<2x256xf32>
    %286 = arith.addf %283, %285 : vector<2x256xf32>
    %cst_321 = arith.constant 0.000000e+00 : f32
    %287 = vector.broadcast %cst_321 : f32 to vector<2x256xf32>
    %288 = arith.maximumf %286, %287 : vector<2x256xf32>
    %c1_i32_322 = arith.constant 1 : i32
    %289 = tpu.memref_slice %arg21[%c1_i32_322] : memref<4x!tpu.dma_semaphore, #tpu.memory_space<semaphore_mem>> -> memref<1x!tpu.dma_semaphore, #tpu.memory_space<semaphore_mem>>
    %290 = tpu.memref_squeeze %289 : memref<1x!tpu.dma_semaphore, #tpu.memory_space<semaphore_mem>> -> memref<!tpu.dma_semaphore, #tpu.memory_space<semaphore_mem>>
    tpu.wait_dma2 semaphore(%290 : memref<!tpu.dma_semaphore, #tpu.memory_space<semaphore_mem>>) src(%arg10 : memref<256x256xbf16, #tpu.memory_space<any>>) dst(%arg18 : memref<256x256xbf16, #tpu.memory_space<vmem>>)
    %291 = arith.truncf %288 : vector<2x256xf32> to vector<2x256xbf16>
    %c0_323 = arith.constant 0 : index
    %c0_324 = arith.constant 0 : index
    %292 = vector.load %arg18[%c0_323, %c0_324] : memref<256x256xbf16, #tpu.memory_space<vmem>>, vector<256x256xbf16>
    %cst_325 = arith.constant dense<0.000000e+00> : vector<2x256xf32>
    %293 = tpu.matmul %291, %292, %cst_325 {dimension_numbers = #tpu.dot_dimension_numbers<[1], [0], [0], [1], [0, 0, 1, 1], [], []>} : vector<2x256xbf16>, vector<256x256xbf16>, vector<2x256xf32> -> vector<2x256xf32>
    %c0_326 = arith.constant 0 : index
    %c0_327 = arith.constant 0 : index
    %294 = vector.load %arg6[%c0_326, %c0_327] : memref<1x256xf32, #tpu.memory_space<vmem>>, vector<1x256xf32>
    %295 = vector.broadcast %294 : vector<1x256xf32> to vector<2x256xf32>
    %296 = arith.addf %293, %295 : vector<2x256xf32>
    %cst_328 = arith.constant 0.000000e+00 : f32
    %297 = vector.broadcast %cst_328 : f32 to vector<2x256xf32>
    %298 = arith.maximumf %296, %297 : vector<2x256xf32>
    %c2_i32_329 = arith.constant 2 : i32
    %299 = tpu.memref_slice %arg21[%c2_i32_329] : memref<4x!tpu.dma_semaphore, #tpu.memory_space<semaphore_mem>> -> memref<1x!tpu.dma_semaphore, #tpu.memory_space<semaphore_mem>>
    %300 = tpu.memref_squeeze %299 : memref<1x!tpu.dma_semaphore, #tpu.memory_space<semaphore_mem>> -> memref<!tpu.dma_semaphore, #tpu.memory_space<semaphore_mem>>
    tpu.wait_dma2 semaphore(%300 : memref<!tpu.dma_semaphore, #tpu.memory_space<semaphore_mem>>) src(%arg11 : memref<256x256xbf16, #tpu.memory_space<any>>) dst(%arg19 : memref<256x256xbf16, #tpu.memory_space<vmem>>)
    %301 = arith.truncf %298 : vector<2x256xf32> to vector<2x256xbf16>
    %c0_330 = arith.constant 0 : index
    %c0_331 = arith.constant 0 : index
    %302 = vector.load %arg19[%c0_330, %c0_331] : memref<256x256xbf16, #tpu.memory_space<vmem>>, vector<256x256xbf16>
    %cst_332 = arith.constant dense<0.000000e+00> : vector<2x256xf32>
    %303 = tpu.matmul %301, %302, %cst_332 {dimension_numbers = #tpu.dot_dimension_numbers<[1], [0], [0], [1], [0, 0, 1, 1], [], []>} : vector<2x256xbf16>, vector<256x256xbf16>, vector<2x256xf32> -> vector<2x256xf32>
    %c0_333 = arith.constant 0 : index
    %c0_334 = arith.constant 0 : index
    %304 = vector.load %arg7[%c0_333, %c0_334] : memref<1x256xf32, #tpu.memory_space<vmem>>, vector<1x256xf32>
    %305 = vector.broadcast %304 : vector<1x256xf32> to vector<2x256xf32>
    %306 = arith.addf %303, %305 : vector<2x256xf32>
    %cst_335 = arith.constant 0.000000e+00 : f32
    %307 = vector.broadcast %cst_335 : f32 to vector<2x256xf32>
    %308 = arith.maximumf %306, %307 : vector<2x256xf32>
    %c3_i32_336 = arith.constant 3 : i32
    %309 = tpu.memref_slice %arg21[%c3_i32_336] : memref<4x!tpu.dma_semaphore, #tpu.memory_space<semaphore_mem>> -> memref<1x!tpu.dma_semaphore, #tpu.memory_space<semaphore_mem>>
    %310 = tpu.memref_squeeze %309 : memref<1x!tpu.dma_semaphore, #tpu.memory_space<semaphore_mem>> -> memref<!tpu.dma_semaphore, #tpu.memory_space<semaphore_mem>>
    tpu.wait_dma2 semaphore(%310 : memref<!tpu.dma_semaphore, #tpu.memory_space<semaphore_mem>>) src(%arg12 : memref<256x128xbf16, #tpu.memory_space<any>>) dst(%arg20 : memref<256x128xbf16, #tpu.memory_space<vmem>>)
    %311 = arith.truncf %308 : vector<2x256xf32> to vector<2x256xbf16>
    %c0_337 = arith.constant 0 : index
    %c0_338 = arith.constant 0 : index
    %312 = vector.load %arg20[%c0_337, %c0_338] : memref<256x128xbf16, #tpu.memory_space<vmem>>, vector<256x128xbf16>
    %cst_339 = arith.constant dense<0.000000e+00> : vector<2x128xf32>
    %313 = tpu.matmul %311, %312, %cst_339 {dimension_numbers = #tpu.dot_dimension_numbers<[1], [0], [0], [1], [0, 0, 1, 1], [], []>} : vector<2x256xbf16>, vector<256x128xbf16>, vector<2x128xf32> -> vector<2x128xf32>
    %c0_340 = arith.constant 0 : index
    %c0_341 = arith.constant 0 : index
    %314 = vector.load %arg8[%c0_340, %c0_341] : memref<1x128xf32, #tpu.memory_space<vmem>>, vector<1x128xf32>
    %315 = vector.broadcast %314 : vector<1x128xf32> to vector<2x128xf32>
    %316 = arith.addf %313, %315 : vector<2x128xf32>
    %c0_342 = arith.constant 0 : index
    %c0_343 = arith.constant 0 : index
    %317 = vector.load %arg13[%c0_342, %c0_343] : memref<2x128xf32, #tpu.memory_space<vmem>>, vector<2x128xf32>
    tpu.vector_store %arg13[%c0_342, %c0_343], %316 {strides = array<i32>} : memref<2x128xf32, #tpu.memory_space<vmem>>, vector<2x128xf32>,
    return
  }
}

</mosaic_0001>

<bundles_post_ra>
// kernel: critic_forward.1
= control target key start
LH: loop header
LB: loop body
LE: loop exit
PB: predicated region body
PF: predicated region fallthrough
CT: control target
= control target key end

     0   :  { %18 = vsyncpa [#allocation11], 0  ;;  %s14307_s0 = inlined_call_operand.vmem [shape: bf16[288,128], index: 0, kind: input, shape index: {}]   ;;  %s14308_s1 = inlined_call_operand.vmem [shape: bf16[128,16], index: 1, kind: input, shape index: {}]   ;;  %s14309_s2 = inlined_call_operand.vmem [shape: f32[1,16], index: 2, kind: input, shape index: {}]   ;;  %s14310_s3 = inlined_call_operand.vmem [shape: f32[144,16], index: 3, kind: input, shape index: {}]   ;;  %s14311_s4 = inlined_call_operand.vmem [shape: f32[1,16], index: 4, kind: input, shape index: {}]   ;;  %s14312_s5 = inlined_call_operand.vmem [shape: f32[1,256], index: 5, kind: input, shape index: {}]   ;;  %s14313_s6 = inlined_call_operand.vmem [shape: f32[1,256], index: 6, kind: input, shape index: {}]   ;;  %s14314_s7 = inlined_call_operand.vmem [shape: f32[1,256], index: 7, kind: input, shape index: {}]   ;;  %s14315_s8 = inlined_call_operand.vmem [shape: f32[1,128], index: 8, kind: input, shape index: {}]   ;;  %s14316_s9 = inlined_call_operand.vmem [shape: bf16[1600,256], index: 9, kind: input, shape index: {}]   ;;  %s14317_s10 = inlined_call_operand.vmem [shape: bf16[256,256], index: 10, kind: input, shape index: {}]   ;;  %s14318_s11 = inlined_call_operand.vmem [shape: bf16[256,256], index: 11, kind: input, shape index: {}]   ;;  %s14319_s12 = inlined_call_operand.vmem [shape: bf16[256,128], index: 12, kind: input, shape index: {}]   ;;  %s14320_s13 = inlined_call_operand.hbm [shape: f32[2,128], index: 13, kind: output, shape index: {}]  }
   0x1   :  { %v55_v0 = vld [vmem:[%s14316_s9] sm:$0xf]  ;;  %v57_v1 = vld [vmem:[%s14316_s9 + $0x8] sm:$0xf]  ;;  %v59_v2 = vld [vmem:[%s14316_s9 + $0x4] sm:$0xf] }
   0x2   :  { %56 = vst [vmem:[#allocation5] sm:$0xf] %v55_v0  ;;  %58 = vst [vmem:[#allocation5 + $0x4] sm:$0xf] %v57_v1  ;;  %v61_v3 = vld [vmem:[%s14316_s9 + $0xc] sm:$0xff]   ;;  %v69_v6 = vld [vmem:[%s14316_s9 + $0x1c] sm:$0xff]  }
   0x3   :  { %v65_v4 = vld [vmem:[%s14316_s9 + $0x18] sm:$0xf]  ;;  %60 = vst [vmem:[#allocation5 + $0x8] sm:$0xf] %v59_v2  ;;  %62 = vst [vmem:[#allocation5 + $0xc] sm:$0xff] %v61_v3   ;;  %v77_v9 = vld [vmem:[%s14316_s9 + $0x2c] sm:$0xff]  }
   0x4   :  { %66 = vst [vmem:[#allocation5 + $0x14] sm:$0xf] %v65_v4  ;;  %v67_v5 = vld [vmem:[%s14316_s9 + $0x14] sm:$0xf]  ;;  %v73_v7 = vld [vmem:[%s14316_s9 + $0x28] sm:$0xf] }
   0x5   :  { %68 = vst [vmem:[#allocation5 + $0x18] sm:$0xf] %v67_v5  ;;  %70 = vst [vmem:[#allocation5 + $0x1c] sm:$0xff] %v69_v6   ;;  %v75_v8 = vld [vmem:[%s14316_s9 + $0x24] sm:$0xf]  ;;  %v85_v12 = vld [vmem:[%s14316_s9 + $0x3c] sm:$0xff]  }
   0x6   :  { %74 = vst [vmem:[#allocation5 + $0x24] sm:$0xf] %v73_v7  ;;  %v81_v10 = vld [vmem:[%s14316_s9 + $0x38] sm:$0xf]  ;;  %76 = vst [vmem:[#allocation5 + $0x28] sm:$0xf] %v75_v8 }
   0x7   :  { %78 = vst [vmem:[#allocation5 + $0x2c] sm:$0xff] %v77_v9   ;;  %82 = vst [vmem:[#allocation5 + $0x34] sm:$0xf] %v81_v10  ;;  %v83_v11 = vld [vmem:[%s14316_s9 + $0x34] sm:$0xf]  ;;  %v93_v15 = vld [vmem:[%s14316_s9 + $0x4c] sm:$0xff]  }
   0x8   :  { %v89_v13 = vld [vmem:[%s14316_s9 + $0x48] sm:$0xf]  ;;  %84 = vst [vmem:[#allocation5 + $0x38] sm:$0xf] %v83_v11  ;;  %86 = vst [vmem:[#allocation5 + $0x3c] sm:$0xff] %v85_v12   ;;  %v101_v18 = vld [vmem:[%s14316_s9 + $0x5c] sm:$0xff]  }
   0x9   :  { %90 = vst [vmem:[#allocation5 + $0x44] sm:$0xf] %v89_v13  ;;  %v91_v14 = vld [vmem:[%s14316_s9 + $0x44] sm:$0xf]  ;;  %v97_v16 = vld [vmem:[%s14316_s9 + $0x58] sm:$0xf] }
   0xa   :  { %92 = vst [vmem:[#allocation5 + $0x48] sm:$0xf] %v91_v14  ;;  %94 = vst [vmem:[#allocation5 + $0x4c] sm:$0xff] %v93_v15   ;;  %v99_v17 = vld [vmem:[%s14316_s9 + $0x54] sm:$0xf]  ;;  %v109_v21 = vld [vmem:[%s14316_s9 + $0x6c] sm:$0xff]  }
   0xb   :  { %98 = vst [vmem:[#allocation5 + $0x54] sm:$0xf] %v97_v16  ;;  %v105_v19 = vld [vmem:[%s14316_s9 + $0x68] sm:$0xf]  ;;  %100 = vst [vmem:[#allocation5 + $0x58] sm:$0xf] %v99_v17 }
   0xc   :  { %102 = vst [vmem:[#allocation5 + $0x5c] sm:$0xff] %v101_v18   ;;  %106 = vst [vmem:[#allocation5 + $0x64] sm:$0xf] %v105_v19  ;;  %v107_v20 = vld [vmem:[%s14316_s9 + $0x64] sm:$0xf]  ;;  %v117_v24 = vld [vmem:[%s14316_s9 + $0x7c] sm:$0xff]  }
   0xd   :  { %v113_v22 = vld [vmem:[%s14316_s9 + $0x78] sm:$0xf]  ;;  %108 = vst [vmem:[#allocation5 + $0x68] sm:$0xf] %v107_v20  ;;  %110 = vst [vmem:[#allocation5 + $0x6c] sm:$0xff] %v109_v21   ;;  %v125_v27 = vld [vmem:[%s14316_s9 + $0x8c] sm:$0xff]  }
   0xe   :  { %114 = vst [vmem:[#allocation5 + $0x74] sm:$0xf] %v113_v22  ;;  %v115_v23 = vld [vmem:[%s14316_s9 + $0x74] sm:$0xf]  ;;  %v121_v25 = vld [vmem:[%s14316_s9 + $0x88] sm:$0xf] }
   0xf   :  { %116 = vst [vmem:[#allocation5 + $0x78] sm:$0xf] %v115_v23  ;;  %118 = vst [vmem:[#allocation5 + $0x7c] sm:$0xff] %v117_v24   ;;  %v123_v26 = vld [vmem:[%s14316_s9 + $0x84] sm:$0xf]  ;;  %v133_v30 = vld [vmem:[%s14316_s9 + $0x9c] sm:$0xff]  }
  0x10   :  { %122 = vst [vmem:[#allocation5 + $0x84] sm:$0xf] %v121_v25  ;;  %v129_v28 = vld [vmem:[%s14316_s9 + $0x98] sm:$0xf]  ;;  %124 = vst [vmem:[#allocation5 + $0x88] sm:$0xf] %v123_v26 }
  0x11   :  { %126 = vst [vmem:[#allocation5 + $0x8c] sm:$0xff] %v125_v27   ;;  %130 = vst [vmem:[#allocation5 + $0x94] sm:$0xf] %v129_v28  ;;  %v131_v29 = vld [vmem:[%s14316_s9 + $0x94] sm:$0xf]  ;;  %v141_v33 = vld [vmem:[%s14316_s9 + $0xac] sm:$0xff]  }
  0x12   :  { %v137_v31 = vld [vmem:[%s14316_s9 + $0xa8] sm:$0xf]  ;;  %132 = vst [vmem:[#allocation5 + $0x98] sm:$0xf] %v131_v29  ;;  %134 = vst [vmem:[#allocation5 + $0x9c] sm:$0xff] %v133_v30   ;;  %v149_v36 = vld [vmem:[%s14316_s9 + $0xbc] sm:$0xff]  }
  0x13   :  { %138 = vst [vmem:[#allocation5 + $0xa4] sm:$0xf] %v137_v31  ;;  %v139_v32 = vld [vmem:[%s14316_s9 + $0xa4] sm:$0xf]  ;;  %v145_v34 = vld [vmem:[%s14316_s9 + $0xb8] sm:$0xf] }
  0x14   :  { %140 = vst [vmem:[#allocation5 + $0xa8] sm:$0xf] %v139_v32  ;;  %142 = vst [vmem:[#allocation5 + $0xac] sm:$0xff] %v141_v33   ;;  %v147_v35 = vld [vmem:[%s14316_s9 + $0xb4] sm:$0xf]  ;;  %v157_v39 = vld [vmem:[%s14316_s9 + $0xcc] sm:$0xff]  }
  0x15   :  { %146 = vst [vmem:[#allocation5 + $0xb4] sm:$0xf] %v145_v34  ;;  %v153_v37 = vld [vmem:[%s14316_s9 + $0xc8] sm:$0xf]  ;;  %148 = vst [vmem:[#allocation5 + $0xb8] sm:$0xf] %v147_v35 }
  0x16   :  { %150 = vst [vmem:[#allocation5 + $0xbc] sm:$0xff] %v149_v36   ;;  %154 = vst [vmem:[#allocation5 + $0xc4] sm:$0xf] %v153_v37  ;;  %v155_v38 = vld [vmem:[%s14316_s9 + $0xc4] sm:$0xf]  ;;  %v165_v42 = vld [vmem:[%s14316_s9 + $0xdc] sm:$0xff]  }
  0x17   :  { %v161_v40 = vld [vmem:[%s14316_s9 + $0xd8] sm:$0xf]  ;;  %156 = vst [vmem:[#allocation5 + $0xc8] sm:$0xf] %v155_v38  ;;  %158 = vst [vmem:[#allocation5 + $0xcc] sm:$0xff] %v157_v39   ;;  %v173_v45 = vld [vmem:[%s14316_s9 + $0xec] sm:$0xff]  }
  0x18   :  { %162 = vst [vmem:[#allocation5 + $0xd4] sm:$0xf] %v161_v40  ;;  %v163_v41 = vld [vmem:[%s14316_s9 + $0xd4] sm:$0xf]  ;;  %v169_v43 = vld [vmem:[%s14316_s9 + $0xe8] sm:$0xf] }
  0x19   :  { %164 = vst [vmem:[#allocation5 + $0xd8] sm:$0xf] %v163_v41  ;;  %166 = vst [vmem:[#allocation5 + $0xdc] sm:$0xff] %v165_v42   ;;  %v171_v44 = vld [vmem:[%s14316_s9 + $0xe4] sm:$0xf]  ;;  %v181_v48 = vld [vmem:[%s14316_s9 + $0xfc] sm:$0xff]  }
  0x1a   :  { %170 = vst [vmem:[#allocation5 + $0xe4] sm:$0xf] %v169_v43  ;;  %v177_v46 = vld [vmem:[%s14316_s9 + $0xf8] sm:$0xf]  ;;  %172 = vst [vmem:[#allocation5 + $0xe8] sm:$0xf] %v171_v44 }
  0x1b   :  { %174 = vst [vmem:[#allocation5 + $0xec] sm:$0xff] %v173_v45   ;;  %178 = vst [vmem:[#allocation5 + $0xf4] sm:$0xf] %v177_v46  ;;  %v179_v47 = vld [vmem:[%s14316_s9 + $0xf4] sm:$0xf]  ;;  %v189_v51 = vld [vmem:[%s14316_s9 + $0x10c] sm:$0xff]  }
  0x1c   :  { %v185_v49 = vld [vmem:[%s14316_s9 + $0x108] sm:$0xf]  ;;  %180 = vst [vmem:[#allocation5 + $0xf8] sm:$0xf] %v179_v47  ;;  %182 = vst [vmem:[#allocation5 + $0xfc] sm:$0xff] %v181_v48   ;;  %v197_v54 = vld [vmem:[%s14316_s9 + $0x11c] sm:$0xff]  }
  0x1d   :  { %186 = vst [vmem:[#allocation5 + $0x104] sm:$0xf] %v185_v49  ;;  %v187_v50 = vld [vmem:[%s14316_s9 + $0x104] sm:$0xf]  ;;  %v193_v52 = vld [vmem:[%s14316_s9 + $0x118] sm:$0xf] }
  0x1e   :  { %188 = vst [vmem:[#allocation5 + $0x108] sm:$0xf] %v187_v50  ;;  %190 = vst [vmem:[#allocation5 + $0x10c] sm:$0xff] %v189_v51   ;;  %v195_v53 = vld [vmem:[%s14316_s9 + $0x114] sm:$0xf]  ;;  %v205_v57 = vld [vmem:[%s14316_s9 + $0x12c] sm:$0xff]  }
  0x1f   :  { %194 = vst [vmem:[#allocation5 + $0x114] sm:$0xf] %v193_v52  ;;  %v201_v55 = vld [vmem:[%s14316_s9 + $0x128] sm:$0xf]  ;;  %196 = vst [vmem:[#allocation5 + $0x118] sm:$0xf] %v195_v53 }
  0x20   :  { %198 = vst [vmem:[#allocation5 + $0x11c] sm:$0xff] %v197_v54   ;;  %202 = vst [vmem:[#allocation5 + $0x124] sm:$0xf] %v201_v55  ;;  %v203_v56 = vld [vmem:[%s14316_s9 + $0x124] sm:$0xf]  ;;  %v213_v60 = vld [vmem:[%s14316_s9 + $0x13c] sm:$0xff]  }
  0x21   :  { %v209_v58 = vld [vmem:[%s14316_s9 + $0x138] sm:$0xf]  ;;  %204 = vst [vmem:[#allocation5 + $0x128] sm:$0xf] %v203_v56  ;;  %206 = vst [vmem:[#allocation5 + $0x12c] sm:$0xff] %v205_v57   ;;  %v221_v63 = vld [vmem:[%s14316_s9 + $0x14c] sm:$0xff]  }
  0x22   :  { %210 = vst [vmem:[#allocation5 + $0x134] sm:$0xf] %v209_v58  ;;  %v211_v59 = vld [vmem:[%s14316_s9 + $0x134] sm:$0xf]  ;;  %v217_v61 = vld [vmem:[%s14316_s9 + $0x148] sm:$0xf] }
  0x23   :  { %212 = vst [vmem:[#allocation5 + $0x138] sm:$0xf] %v211_v59  ;;  %214 = vst [vmem:[#allocation5 + $0x13c] sm:$0xff] %v213_v60   ;;  %v219_v62 = vld [vmem:[%s14316_s9 + $0x144] sm:$0xf]  ;;  %v229_v2 = vld [vmem:[%s14316_s9 + $0x15c] sm:$0xff]  }
  0x24   :  { %218 = vst [vmem:[#allocation5 + $0x144] sm:$0xf] %v217_v61  ;;  %v225_v0 = vld [vmem:[%s14316_s9 + $0x158] sm:$0xf]  ;;  %220 = vst [vmem:[#allocation5 + $0x148] sm:$0xf] %v219_v62 }
  0x25   :  { %222 = vst [vmem:[#allocation5 + $0x14c] sm:$0xff] %v221_v63   ;;  %226 = vst [vmem:[#allocation5 + $0x154] sm:$0xf] %v225_v0  ;;  %v227_v1 = vld [vmem:[%s14316_s9 + $0x154] sm:$0xf]  ;;  %v237_v5 = vld [vmem:[%s14316_s9 + $0x16c] sm:$0xff]  }
  0x26   :  { %v233_v3 = vld [vmem:[%s14316_s9 + $0x168] sm:$0xf]  ;;  %228 = vst [vmem:[#allocation5 + $0x158] sm:$0xf] %v227_v1  ;;  %230 = vst [vmem:[#allocation5 + $0x15c] sm:$0xff] %v229_v2   ;;  %v245_v8 = vld [vmem:[%s14316_s9 + $0x17c] sm:$0xff]  }
  0x27   :  { %234 = vst [vmem:[#allocation5 + $0x164] sm:$0xf] %v233_v3  ;;  %v235_v4 = vld [vmem:[%s14316_s9 + $0x164] sm:$0xf]  ;;  %v241_v6 = vld [vmem:[%s14316_s9 + $0x178] sm:$0xf] }
  0x28   :  { %236 = vst [vmem:[#allocation5 + $0x168] sm:$0xf] %v235_v4  ;;  %238 = vst [vmem:[#allocation5 + $0x16c] sm:$0xff] %v237_v5   ;;  %v243_v7 = vld [vmem:[%s14316_s9 + $0x174] sm:$0xf]  ;;  %v253_v11 = vld [vmem:[%s14316_s9 + $0x18c] sm:$0xff]  }
  0x29   :  { %242 = vst [vmem:[#allocation5 + $0x174] sm:$0xf] %v241_v6  ;;  %v249_v9 = vld [vmem:[%s14316_s9 + $0x188] sm:$0xf]  ;;  %244 = vst [vmem:[#allocation5 + $0x178] sm:$0xf] %v243_v7 }
  0x2a   :  { %246 = vst [vmem:[#allocation5 + $0x17c] sm:$0xff] %v245_v8   ;;  %250 = vst [vmem:[#allocation5 + $0x184] sm:$0xf] %v249_v9  ;;  %v251_v10 = vld [vmem:[%s14316_s9 + $0x184] sm:$0xf]  ;;  %v261_v14 = vld [vmem:[%s14316_s9 + $0x19c] sm:$0xff]  }
  0x2b   :  { %v257_v12 = vld [vmem:[%s14316_s9 + $0x198] sm:$0xf]  ;;  %252 = vst [vmem:[#allocation5 + $0x188] sm:$0xf] %v251_v10  ;;  %254 = vst [vmem:[#allocation5 + $0x18c] sm:$0xff] %v253_v11   ;;  %v269_v17 = vld [vmem:[%s14316_s9 + $0x1ac] sm:$0xff]  }
  0x2c   :  { %258 = vst [vmem:[#allocation5 + $0x194] sm:$0xf] %v257_v12  ;;  %v259_v13 = vld [vmem:[%s14316_s9 + $0x194] sm:$0xf]  ;;  %v265_v15 = vld [vmem:[%s14316_s9 + $0x1a8] sm:$0xf] }
  0x2d   :  { %260 = vst [vmem:[#allocation5 + $0x198] sm:$0xf] %v259_v13  ;;  %262 = vst [vmem:[#allocation5 + $0x19c] sm:$0xff] %v261_v14   ;;  %v267_v16 = vld [vmem:[%s14316_s9 + $0x1a4] sm:$0xf]  ;;  %v277_v20 = vld [vmem:[%s14316_s9 + $0x1bc] sm:$0xff]  }
  0x2e   :  { %266 = vst [vmem:[#allocation5 + $0x1a4] sm:$0xf] %v265_v15  ;;  %v273_v18 = vld [vmem:[%s14316_s9 + $0x1b8] sm:$0xf]  ;;  %268 = vst [vmem:[#allocation5 + $0x1a8] sm:$0xf] %v267_v16 }
  0x2f   :  { %270 = vst [vmem:[#allocation5 + $0x1ac] sm:$0xff] %v269_v17   ;;  %274 = vst [vmem:[#allocation5 + $0x1b4] sm:$0xf] %v273_v18  ;;  %v275_v19 = vld [vmem:[%s14316_s9 + $0x1b4] sm:$0xf]  ;;  %v285_v23 = vld [vmem:[%s14316_s9 + $0x1cc] sm:$0xff]  }
  0x30   :  { %v281_v21 = vld [vmem:[%s14316_s9 + $0x1c8] sm:$0xf]  ;;  %276 = vst [vmem:[#allocation5 + $0x1b8] sm:$0xf] %v275_v19  ;;  %278 = vst [vmem:[#allocation5 + $0x1bc] sm:$0xff] %v277_v20   ;;  %v293_v26 = vld [vmem:[%s14316_s9 + $0x1dc] sm:$0xff]  }
  0x31   :  { %282 = vst [vmem:[#allocation5 + $0x1c4] sm:$0xf] %v281_v21  ;;  %v283_v22 = vld [vmem:[%s14316_s9 + $0x1c4] sm:$0xf]  ;;  %v289_v24 = vld [vmem:[%s14316_s9 + $0x1d8] sm:$0xf] }
  0x32   :  { %284 = vst [vmem:[#allocation5 + $0x1c8] sm:$0xf] %v283_v22  ;;  %286 = vst [vmem:[#allocation5 + $0x1cc] sm:$0xff] %v285_v23   ;;  %v291_v25 = vld [vmem:[%s14316_s9 + $0x1d4] sm:$0xf]  ;;  %v301_v29 = vld [vmem:[%s14316_s9 + $0x1ec] sm:$0xff]  }
  0x33   :  { %290 = vst [vmem:[#allocation5 + $0x1d4] sm:$0xf] %v289_v24  ;;  %v297_v27 = vld [vmem:[%s14316_s9 + $0x1e8] sm:$0xf]  ;;  %292 = vst [vmem:[#allocation5 + $0x1d8] sm:$0xf] %v291_v25 }
  0x34   :  { %294 = vst [vmem:[#allocation5 + $0x1dc] sm:$0xff] %v293_v26   ;;  %298 = vst [vmem:[#allocation5 + $0x1e4] sm:$0xf] %v297_v27  ;;  %v299_v28 = vld [vmem:[%s14316_s9 + $0x1e4] sm:$0xf]  ;;  %v309_v32 = vld [vmem:[%s14316_s9 + $0x1fc] sm:$0xff]  }
  0x35   :  { %v305_v30 = vld [vmem:[%s14316_s9 + $0x1f8] sm:$0xf]  ;;  %300 = vst [vmem:[#allocation5 + $0x1e8] sm:$0xf] %v299_v28  ;;  %302 = vst [vmem:[#allocation5 + $0x1ec] sm:$0xff] %v301_v29   ;;  %v317_v35 = vld [vmem:[%s14316_s9 + $0x20c] sm:$0xff]  }
  0x36   :  { %306 = vst [vmem:[#allocation5 + $0x1f4] sm:$0xf] %v305_v30  ;;  %v307_v31 = vld [vmem:[%s14316_s9 + $0x1f4] sm:$0xf]  ;;  %v313_v33 = vld [vmem:[%s14316_s9 + $0x208] sm:$0xf] }
  0x37   :  { %308 = vst [vmem:[#allocation5 + $0x1f8] sm:$0xf] %v307_v31  ;;  %310 = vst [vmem:[#allocation5 + $0x1fc] sm:$0xff] %v309_v32   ;;  %v315_v34 = vld [vmem:[%s14316_s9 + $0x204] sm:$0xf]  ;;  %v325_v38 = vld [vmem:[%s14316_s9 + $0x21c] sm:$0xff]  }
  0x38   :  { %314 = vst [vmem:[#allocation5 + $0x204] sm:$0xf] %v313_v33  ;;  %v321_v36 = vld [vmem:[%s14316_s9 + $0x218] sm:$0xf]  ;;  %316 = vst [vmem:[#allocation5 + $0x208] sm:$0xf] %v315_v34 }
  0x39   :  { %318 = vst [vmem:[#allocation5 + $0x20c] sm:$0xff] %v317_v35   ;;  %322 = vst [vmem:[#allocation5 + $0x214] sm:$0xf] %v321_v36  ;;  %v323_v37 = vld [vmem:[%s14316_s9 + $0x214] sm:$0xf]  ;;  %v333_v41 = vld [vmem:[%s14316_s9 + $0x22c] sm:$0xff]  }
  0x3a   :  { %v329_v39 = vld [vmem:[%s14316_s9 + $0x228] sm:$0xf]  ;;  %324 = vst [vmem:[#allocation5 + $0x218] sm:$0xf] %v323_v37  ;;  %326 = vst [vmem:[#allocation5 + $0x21c] sm:$0xff] %v325_v38   ;;  %v341_v44 = vld [vmem:[%s14316_s9 + $0x23c] sm:$0xff]  }
  0x3b   :  { %330 = vst [vmem:[#allocation5 + $0x224] sm:$0xf] %v329_v39  ;;  %v331_v40 = vld [vmem:[%s14316_s9 + $0x224] sm:$0xf]  ;;  %v337_v42 = vld [vmem:[%s14316_s9 + $0x238] sm:$0xf] }
  0x3c   :  { %332 = vst [vmem:[#allocation5 + $0x228] sm:$0xf] %v331_v40  ;;  %334 = vst [vmem:[#allocation5 + $0x22c] sm:$0xff] %v333_v41   ;;  %v339_v43 = vld [vmem:[%s14316_s9 + $0x234] sm:$0xf]  ;;  %v349_v47 = vld [vmem:[%s14316_s9 + $0x24c] sm:$0xff]  }
  0x3d   :  { %338 = vst [vmem:[#allocation5 + $0x234] sm:$0xf] %v337_v42  ;;  %v345_v45 = vld [vmem:[%s14316_s9 + $0x248] sm:$0xf]  ;;  %340 = vst [vmem:[#allocation5 + $0x238] sm:$0xf] %v339_v43 }
  0x3e   :  { %342 = vst [vmem:[#allocation5 + $0x23c] sm:$0xff] %v341_v44   ;;  %346 = vst [vmem:[#allocation5 + $0x244] sm:$0xf] %v345_v45  ;;  %v347_v46 = vld [vmem:[%s14316_s9 + $0x244] sm:$0xf]  ;;  %v357_v50 = vld [vmem:[%s14316_s9 + $0x25c] sm:$0xff]  }
  0x3f   :  { %v353_v48 = vld [vmem:[%s14316_s9 + $0x258] sm:$0xf]  ;;  %348 = vst [vmem:[#allocation5 + $0x248] sm:$0xf] %v347_v46  ;;  %350 = vst [vmem:[#allocation5 + $0x24c] sm:$0xff] %v349_v47   ;;  %v365_v53 = vld [vmem:[%s14316_s9 + $0x26c] sm:$0xff]  }
  0x40   :  { %354 = vst [vmem:[#allocation5 + $0x254] sm:$0xf] %v353_v48  ;;  %v355_v49 = vld [vmem:[%s14316_s9 + $0x254] sm:$0xf]  ;;  %v361_v51 = vld [vmem:[%s14316_s9 + $0x268] sm:$0xf] }
  0x41   :  { %356 = vst [vmem:[#allocation5 + $0x258] sm:$0xf] %v355_v49  ;;  %358 = vst [vmem:[#allocation5 + $0x25c] sm:$0xff] %v357_v50   ;;  %v363_v52 = vld [vmem:[%s14316_s9 + $0x264] sm:$0xf]  ;;  %v373_v56 = vld [vmem:[%s14316_s9 + $0x27c] sm:$0xff]  }
  0x42   :  { %362 = vst [vmem:[#allocation5 + $0x264] sm:$0xf] %v361_v51  ;;  %v369_v54 = vld [vmem:[%s14316_s9 + $0x278] sm:$0xf]  ;;  %364 = vst [vmem:[#allocation5 + $0x268] sm:$0xf] %v363_v52 }
  0x43   :  { %366 = vst [vmem:[#allocation5 + $0x26c] sm:$0xff] %v365_v53   ;;  %370 = vst [vmem:[#allocation5 + $0x274] sm:$0xf] %v369_v54  ;;  %v371_v55 = vld [vmem:[%s14316_s9 + $0x274] sm:$0xf]  ;;  %v381_v59 = vld [vmem:[%s14316_s9 + $0x28c] sm:$0xff]  }
  0x44   :  { %v377_v57 = vld [vmem:[%s14316_s9 + $0x288] sm:$0xf]  ;;  %372 = vst [vmem:[#allocation5 + $0x278] sm:$0xf] %v371_v55  ;;  %374 = vst [vmem:[#allocation5 + $0x27c] sm:$0xff] %v373_v56   ;;  %v389_v62 = vld [vmem:[%s14316_s9 + $0x29c] sm:$0xff]  }
  0x45   :  { %378 = vst [vmem:[#allocation5 + $0x284] sm:$0xf] %v377_v57  ;;  %v379_v58 = vld [vmem:[%s14316_s9 + $0x284] sm:$0xf]  ;;  %v385_v60 = vld [vmem:[%s14316_s9 + $0x298] sm:$0xf] }
  0x46   :  { %380 = vst [vmem:[#allocation5 + $0x288] sm:$0xf] %v379_v58  ;;  %382 = vst [vmem:[#allocation5 + $0x28c] sm:$0xff] %v381_v59   ;;  %v387_v61 = vld [vmem:[%s14316_s9 + $0x294] sm:$0xf]  ;;  %v397_v1 = vld [vmem:[%s14316_s9 + $0x2ac] sm:$0xff]  }
  0x47   :  { %386 = vst [vmem:[#allocation5 + $0x294] sm:$0xf] %v385_v60  ;;  %v393_v63 = vld [vmem:[%s14316_s9 + $0x2a8] sm:$0xf]  ;;  %388 = vst [vmem:[#allocation5 + $0x298] sm:$0xf] %v387_v61 }
  0x48   :  { %390 = vst [vmem:[#allocation5 + $0x29c] sm:$0xff] %v389_v62   ;;  %394 = vst [vmem:[#allocation5 + $0x2a4] sm:$0xf] %v393_v63  ;;  %v395_v0 = vld [vmem:[%s14316_s9 + $0x2a4] sm:$0xf]  ;;  %v405_v4 = vld [vmem:[%s14316_s9 + $0x2bc] sm:$0xff]  }
  0x49   :  { %v401_v2 = vld [vmem:[%s14316_s9 + $0x2b8] sm:$0xf]  ;;  %396 = vst [vmem:[#allocation5 + $0x2a8] sm:$0xf] %v395_v0  ;;  %398 = vst [vmem:[#allocation5 + $0x2ac] sm:$0xff] %v397_v1   ;;  %v413_v7 = vld [vmem:[%s14316_s9 + $0x2cc] sm:$0xff]  }
  0x4a   :  { %402 = vst [vmem:[#allocation5 + $0x2b4] sm:$0xf] %v401_v2  ;;  %v403_v3 = vld [vmem:[%s14316_s9 + $0x2b4] sm:$0xf]  ;;  %v409_v5 = vld [vmem:[%s14316_s9 + $0x2c8] sm:$0xf] }
  0x4b   :  { %404 = vst [vmem:[#allocation5 + $0x2b8] sm:$0xf] %v403_v3  ;;  %406 = vst [vmem:[#allocation5 + $0x2bc] sm:$0xff] %v405_v4   ;;  %v411_v6 = vld [vmem:[%s14316_s9 + $0x2c4] sm:$0xf]  ;;  %v421_v10 = vld [vmem:[%s14316_s9 + $0x2dc] sm:$0xff]  }
  0x4c   :  { %410 = vst [vmem:[#allocation5 + $0x2c4] sm:$0xf] %v409_v5  ;;  %v417_v8 = vld [vmem:[%s14316_s9 + $0x2d8] sm:$0xf]  ;;  %412 = vst [vmem:[#allocation5 + $0x2c8] sm:$0xf] %v411_v6 }
  0x4d   :  { %414 = vst [vmem:[#allocation5 + $0x2cc] sm:$0xff] %v413_v7   ;;  %418 = vst [vmem:[#allocation5 + $0x2d4] sm:$0xf] %v417_v8  ;;  %v419_v9 = vld [vmem:[%s14316_s9 + $0x2d4] sm:$0xf]  ;;  %v429_v13 = vld [vmem:[%s14316_s9 + $0x2ec] sm:$0xff]  }
  0x4e   :  { %v425_v11 = vld [vmem:[%s14316_s9 + $0x2e8] sm:$0xf]  ;;  %420 = vst [vmem:[#allocation5 + $0x2d8] sm:$0xf] %v419_v9  ;;  %422 = vst [vmem:[#allocation5 + $0x2dc] sm:$0xff] %v421_v10   ;;  %v437_v16 = vld [vmem:[%s14316_s9 + $0x2fc] sm:$0xff]  }
  0x4f   :  { %426 = vst [vmem:[#allocation5 + $0x2e4] sm:$0xf] %v425_v11  ;;  %v427_v12 = vld [vmem:[%s14316_s9 + $0x2e4] sm:$0xf]  ;;  %v433_v14 = vld [vmem:[%s14316_s9 + $0x2f8] sm:$0xf] }
  0x50   :  { %428 = vst [vmem:[#allocation5 + $0x2e8] sm:$0xf] %v427_v12  ;;  %430 = vst [vmem:[#allocation5 + $0x2ec] sm:$0xff] %v429_v13   ;;  %v435_v15 = vld [vmem:[%s14316_s9 + $0x2f4] sm:$0xf]  ;;  %v445_v19 = vld [vmem:[%s14316_s9 + $0x30c] sm:$0xff]  }
  0x51   :  { %434 = vst [vmem:[#allocation5 + $0x2f4] sm:$0xf] %v433_v14  ;;  %v441_v17 = vld [vmem:[%s14316_s9 + $0x308] sm:$0xf]  ;;  %436 = vst [vmem:[#allocation5 + $0x2f8] sm:$0xf] %v435_v15 }
  0x52   :  { %438 = vst [vmem:[#allocation5 + $0x2fc] sm:$0xff] %v437_v16   ;;  %442 = vst [vmem:[#allocation5 + $0x304] sm:$0xf] %v441_v17  ;;  %v443_v18 = vld [vmem:[%s14316_s9 + $0x304] sm:$0xf]  ;;  %v453_v22 = vld [vmem:[%s14316_s9 + $0x31c] sm:$0xff]  }
  0x53   :  { %v449_v20 = vld [vmem:[%s14316_s9 + $0x318] sm:$0xf]  ;;  %444 = vst [vmem:[#allocation5 + $0x308] sm:$0xf] %v443_v18  ;;  %446 = vst [vmem:[#allocation5 + $0x30c] sm:$0xff] %v445_v19   ;;  %v461_v25 = vld [vmem:[%s14316_s9 + $0x32c] sm:$0xff]  }
  0x54   :  { %450 = vst [vmem:[#allocation5 + $0x314] sm:$0xf] %v449_v20  ;;  %v451_v21 = vld [vmem:[%s14316_s9 + $0x314] sm:$0xf]  ;;  %v457_v23 = vld [vmem:[%s14316_s9 + $0x328] sm:$0xf] }
  0x55   :  { %452 = vst [vmem:[#allocation5 + $0x318] sm:$0xf] %v451_v21  ;;  %454 = vst [vmem:[#allocation5 + $0x31c] sm:$0xff] %v453_v22   ;;  %v459_v24 = vld [vmem:[%s14316_s9 + $0x324] sm:$0xf]  ;;  %v469_v28 = vld [vmem:[%s14316_s9 + $0x33c] sm:$0xff]  }
  0x56   :  { %458 = vst [vmem:[#allocation5 + $0x324] sm:$0xf] %v457_v23  ;;  %v465_v26 = vld [vmem:[%s14316_s9 + $0x338] sm:$0xf]  ;;  %460 = vst [vmem:[#allocation5 + $0x328] sm:$0xf] %v459_v24 }
  0x57   :  { %462 = vst [vmem:[#allocation5 + $0x32c] sm:$0xff] %v461_v25   ;;  %466 = vst [vmem:[#allocation5 + $0x334] sm:$0xf] %v465_v26  ;;  %v467_v27 = vld [vmem:[%s14316_s9 + $0x334] sm:$0xf]  ;;  %v477_v31 = vld [vmem:[%s14316_s9 + $0x34c] sm:$0xff]  }
  0x58   :  { %v473_v29 = vld [vmem:[%s14316_s9 + $0x348] sm:$0xf]  ;;  %468 = vst [vmem:[#allocation5 + $0x338] sm:$0xf] %v467_v27  ;;  %470 = vst [vmem:[#allocation5 + $0x33c] sm:$0xff] %v469_v28   ;;  %v485_v34 = vld [vmem:[%s14316_s9 + $0x35c] sm:$0xff]  }
  0x59   :  { %474 = vst [vmem:[#allocation5 + $0x344] sm:$0xf] %v473_v29  ;;  %v475_v30 = vld [vmem:[%s14316_s9 + $0x344] sm:$0xf]  ;;  %v481_v32 = vld [vmem:[%s14316_s9 + $0x358] sm:$0xf] }
  0x5a   :  { %476 = vst [vmem:[#allocation5 + $0x348] sm:$0xf] %v475_v30  ;;  %478 = vst [vmem:[#allocation5 + $0x34c] sm:$0xff] %v477_v31   ;;  %v483_v33 = vld [vmem:[%s14316_s9 + $0x354] sm:$0xf]  ;;  %v493_v37 = vld [vmem:[%s14316_s9 + $0x36c] sm:$0xff]  }
  0x5b   :  { %482 = vst [vmem:[#allocation5 + $0x354] sm:$0xf] %v481_v32  ;;  %v489_v35 = vld [vmem:[%s14316_s9 + $0x368] sm:$0xf]  ;;  %484 = vst [vmem:[#allocation5 + $0x358] sm:$0xf] %v483_v33 }
  0x5c   :  { %486 = vst [vmem:[#allocation5 + $0x35c] sm:$0xff] %v485_v34   ;;  %490 = vst [vmem:[#allocation5 + $0x364] sm:$0xf] %v489_v35  ;;  %v491_v36 = vld [vmem:[%s14316_s9 + $0x364] sm:$0xf]  ;;  %v501_v40 = vld [vmem:[%s14316_s9 + $0x37c] sm:$0xff]  }
  0x5d   :  { %v497_v38 = vld [vmem:[%s14316_s9 + $0x378] sm:$0xf]  ;;  %492 = vst [vmem:[#allocation5 + $0x368] sm:$0xf] %v491_v36  ;;  %494 = vst [vmem:[#allocation5 + $0x36c] sm:$0xff] %v493_v37   ;;  %v509_v43 = vld [vmem:[%s14316_s9 + $0x38c] sm:$0xff]  }
  0x5e   :  { %498 = vst [vmem:[#allocation5 + $0x374] sm:$0xf] %v497_v38  ;;  %v499_v39 = vld [vmem:[%s14316_s9 + $0x374] sm:$0xf]  ;;  %v505_v41 = vld [vmem:[%s14316_s9 + $0x388] sm:$0xf] }
  0x5f   :  { %500 = vst [vmem:[#allocation5 + $0x378] sm:$0xf] %v499_v39  ;;  %502 = vst [vmem:[#allocation5 + $0x37c] sm:$0xff] %v501_v40   ;;  %v507_v42 = vld [vmem:[%s14316_s9 + $0x384] sm:$0xf]  ;;  %v517_v46 = vld [vmem:[%s14316_s9 + $0x39c] sm:$0xff]  }
  0x60   :  { %506 = vst [vmem:[#allocation5 + $0x384] sm:$0xf] %v505_v41  ;;  %v513_v44 = vld [vmem:[%s14316_s9 + $0x398] sm:$0xf]  ;;  %508 = vst [vmem:[#allocation5 + $0x388] sm:$0xf] %v507_v42 }
  0x61   :  { %510 = vst [vmem:[#allocation5 + $0x38c] sm:$0xff] %v509_v43   ;;  %514 = vst [vmem:[#allocation5 + $0x394] sm:$0xf] %v513_v44  ;;  %v515_v45 = vld [vmem:[%s14316_s9 + $0x394] sm:$0xf]  ;;  %v525_v49 = vld [vmem:[%s14316_s9 + $0x3ac] sm:$0xff]  }
  0x62   :  { %v521_v47 = vld [vmem:[%s14316_s9 + $0x3a8] sm:$0xf]  ;;  %516 = vst [vmem:[#allocation5 + $0x398] sm:$0xf] %v515_v45  ;;  %518 = vst [vmem:[#allocation5 + $0x39c] sm:$0xff] %v517_v46   ;;  %v533_v52 = vld [vmem:[%s14316_s9 + $0x3bc] sm:$0xff]  }
  0x63   :  { %522 = vst [vmem:[#allocation5 + $0x3a4] sm:$0xf] %v521_v47  ;;  %v523_v48 = vld [vmem:[%s14316_s9 + $0x3a4] sm:$0xf]  ;;  %v529_v50 = vld [vmem:[%s14316_s9 + $0x3b8] sm:$0xf] }
  0x64   :  { %524 = vst [vmem:[#allocation5 + $0x3a8] sm:$0xf] %v523_v48  ;;  %526 = vst [vmem:[#allocation5 + $0x3ac] sm:$0xff] %v525_v49   ;;  %v531_v51 = vld [vmem:[%s14316_s9 + $0x3b4] sm:$0xf]  ;;  %v541_v55 = vld [vmem:[%s14316_s9 + $0x3cc] sm:$0xff]  }
  0x65   :  { %530 = vst [vmem:[#allocation5 + $0x3b4] sm:$0xf] %v529_v50  ;;  %v537_v53 = vld [vmem:[%s14316_s9 + $0x3c8] sm:$0xf]  ;;  %532 = vst [vmem:[#allocation5 + $0x3b8] sm:$0xf] %v531_v51 }
  0x66   :  { %534 = vst [vmem:[#allocation5 + $0x3bc] sm:$0xff] %v533_v52   ;;  %538 = vst [vmem:[#allocation5 + $0x3c4] sm:$0xf] %v537_v53  ;;  %v539_v54 = vld [vmem:[%s14316_s9 + $0x3c4] sm:$0xf]  ;;  %v549_v58 = vld [vmem:[%s14316_s9 + $0x3dc] sm:$0xff]  }
  0x67   :  { %v545_v56 = vld [vmem:[%s14316_s9 + $0x3d8] sm:$0xf]  ;;  %540 = vst [vmem:[#allocation5 + $0x3c8] sm:$0xf] %v539_v54  ;;  %542 = vst [vmem:[#allocation5 + $0x3cc] sm:$0xff] %v541_v55   ;;  %v557_v61 = vld [vmem:[%s14316_s9 + $0x3ec] sm:$0xff]  }
  0x68   :  { %546 = vst [vmem:[#allocation5 + $0x3d4] sm:$0xf] %v545_v56  ;;  %v547_v57 = vld [vmem:[%s14316_s9 + $0x3d4] sm:$0xf]  ;;  %v553_v59 = vld [vmem:[%s14316_s9 + $0x3e8] sm:$0xf] }
  0x69   :  { %548 = vst [vmem:[#allocation5 + $0x3d8] sm:$0xf] %v547_v57  ;;  %550 = vst [vmem:[#allocation5 + $0x3dc] sm:$0xff] %v549_v58   ;;  %v555_v60 = vld [vmem:[%s14316_s9 + $0x3e4] sm:$0xf]  ;;  %v565_v0 = vld [vmem:[%s14316_s9 + $0x3fc] sm:$0xff]  }
  0x6a   :  { %554 = vst [vmem:[#allocation5 + $0x3e4] sm:$0xf] %v553_v59  ;;  %v561_v62 = vld [vmem:[%s14316_s9 + $0x3f8] sm:$0xf]  ;;  %556 = vst [vmem:[#allocation5 + $0x3e8] sm:$0xf] %v555_v60 }
  0x6b   :  { %558 = vst [vmem:[#allocation5 + $0x3ec] sm:$0xff] %v557_v61   ;;  %562 = vst [vmem:[#allocation5 + $0x3f4] sm:$0xf] %v561_v62  ;;  %v563_v63 = vld [vmem:[%s14316_s9 + $0x3f4] sm:$0xf]  ;;  %v573_v3 = vld [vmem:[%s14316_s9 + $0x40c] sm:$0xff]  }
  0x6c   :  { %v569_v1 = vld [vmem:[%s14316_s9 + $0x408] sm:$0xf]  ;;  %564 = vst [vmem:[#allocation5 + $0x3f8] sm:$0xf] %v563_v63  ;;  %566 = vst [vmem:[#allocation5 + $0x3fc] sm:$0xff] %v565_v0   ;;  %v581_v6 = vld [vmem:[%s14316_s9 + $0x41c] sm:$0xff]  }
  0x6d   :  { %570 = vst [vmem:[#allocation5 + $0x404] sm:$0xf] %v569_v1  ;;  %v571_v2 = vld [vmem:[%s14316_s9 + $0x404] sm:$0xf]  ;;  %v577_v4 = vld [vmem:[%s14316_s9 + $0x418] sm:$0xf] }
  0x6e   :  { %572 = vst [vmem:[#allocation5 + $0x408] sm:$0xf] %v571_v2  ;;  %574 = vst [vmem:[#allocation5 + $0x40c] sm:$0xff] %v573_v3   ;;  %v579_v5 = vld [vmem:[%s14316_s9 + $0x414] sm:$0xf]  ;;  %v589_v9 = vld [vmem:[%s14316_s9 + $0x42c] sm:$0xff]  }
  0x6f   :  { %578 = vst [vmem:[#allocation5 + $0x414] sm:$0xf] %v577_v4  ;;  %v585_v7 = vld [vmem:[%s14316_s9 + $0x428] sm:$0xf]  ;;  %580 = vst [vmem:[#allocation5 + $0x418] sm:$0xf] %v579_v5 }
  0x70   :  { %582 = vst [vmem:[#allocation5 + $0x41c] sm:$0xff] %v581_v6   ;;  %586 = vst [vmem:[#allocation5 + $0x424] sm:$0xf] %v585_v7  ;;  %v587_v8 = vld [vmem:[%s14316_s9 + $0x424] sm:$0xf]  ;;  %v597_v12 = vld [vmem:[%s14316_s9 + $0x43c] sm:$0xff]  }
  0x71   :  { %v593_v10 = vld [vmem:[%s14316_s9 + $0x438] sm:$0xf]  ;;  %588 = vst [vmem:[#allocation5 + $0x428] sm:$0xf] %v587_v8  ;;  %590 = vst [vmem:[#allocation5 + $0x42c] sm:$0xff] %v589_v9   ;;  %v605_v15 = vld [vmem:[%s14316_s9 + $0x44c] sm:$0xff]  }
  0x72   :  { %594 = vst [vmem:[#allocation5 + $0x434] sm:$0xf] %v593_v10  ;;  %v595_v11 = vld [vmem:[%s14316_s9 + $0x434] sm:$0xf]  ;;  %v601_v13 = vld [vmem:[%s14316_s9 + $0x448] sm:$0xf] }
  0x73   :  { %596 = vst [vmem:[#allocation5 + $0x438] sm:$0xf] %v595_v11  ;;  %598 = vst [vmem:[#allocation5 + $0x43c] sm:$0xff] %v597_v12   ;;  %v603_v14 = vld [vmem:[%s14316_s9 + $0x444] sm:$0xf]  ;;  %v613_v18 = vld [vmem:[%s14316_s9 + $0x45c] sm:$0xff]  }
  0x74   :  { %602 = vst [vmem:[#allocation5 + $0x444] sm:$0xf] %v601_v13  ;;  %v609_v16 = vld [vmem:[%s14316_s9 + $0x458] sm:$0xf]  ;;  %604 = vst [vmem:[#allocation5 + $0x448] sm:$0xf] %v603_v14 }
  0x75   :  { %606 = vst [vmem:[#allocation5 + $0x44c] sm:$0xff] %v605_v15   ;;  %610 = vst [vmem:[#allocation5 + $0x454] sm:$0xf] %v609_v16  ;;  %v611_v17 = vld [vmem:[%s14316_s9 + $0x454] sm:$0xf]  ;;  %v621_v21 = vld [vmem:[%s14316_s9 + $0x46c] sm:$0xff]  }
  0x76   :  { %v617_v19 = vld [vmem:[%s14316_s9 + $0x468] sm:$0xf]  ;;  %612 = vst [vmem:[#allocation5 + $0x458] sm:$0xf] %v611_v17  ;;  %614 = vst [vmem:[#allocation5 + $0x45c] sm:$0xff] %v613_v18   ;;  %v629_v24 = vld [vmem:[%s14316_s9 + $0x47c] sm:$0xff]  }
  0x77   :  { %618 = vst [vmem:[#allocation5 + $0x464] sm:$0xf] %v617_v19  ;;  %v619_v20 = vld [vmem:[%s14316_s9 + $0x464] sm:$0xf]  ;;  %v625_v22 = vld [vmem:[%s14316_s9 + $0x478] sm:$0xf] }
  0x78   :  { %620 = vst [vmem:[#allocation5 + $0x468] sm:$0xf] %v619_v20  ;;  %622 = vst [vmem:[#allocation5 + $0x46c] sm:$0xff] %v621_v21   ;;  %v627_v23 = vld [vmem:[%s14316_s9 + $0x474] sm:$0xf]  ;;  %v637_v27 = vld [vmem:[%s14316_s9 + $0x48c] sm:$0xff]  }
  0x79   :  { %626 = vst [vmem:[#allocation5 + $0x474] sm:$0xf] %v625_v22  ;;  %v633_v25 = vld [vmem:[%s14316_s9 + $0x488] sm:$0xf]  ;;  %628 = vst [vmem:[#allocation5 + $0x478] sm:$0xf] %v627_v23 }
  0x7a   :  { %630 = vst [vmem:[#allocation5 + $0x47c] sm:$0xff] %v629_v24   ;;  %634 = vst [vmem:[#allocation5 + $0x484] sm:$0xf] %v633_v25  ;;  %v635_v26 = vld [vmem:[%s14316_s9 + $0x484] sm:$0xf]  ;;  %v645_v30 = vld [vmem:[%s14316_s9 + $0x49c] sm:$0xff]  }
  0x7b   :  { %v641_v28 = vld [vmem:[%s14316_s9 + $0x498] sm:$0xf]  ;;  %636 = vst [vmem:[#allocation5 + $0x488] sm:$0xf] %v635_v26  ;;  %638 = vst [vmem:[#allocation5 + $0x48c] sm:$0xff] %v637_v27   ;;  %v653_v33 = vld [vmem:[%s14316_s9 + $0x4ac] sm:$0xff]  }
  0x7c   :  { %642 = vst [vmem:[#allocation5 + $0x494] sm:$0xf] %v641_v28  ;;  %v643_v29 = vld [vmem:[%s14316_s9 + $0x494] sm:$0xf]  ;;  %v649_v31 = vld [vmem:[%s14316_s9 + $0x4a8] sm:$0xf] }
  0x7d   :  { %644 = vst [vmem:[#allocation5 + $0x498] sm:$0xf] %v643_v29  ;;  %646 = vst [vmem:[#allocation5 + $0x49c] sm:$0xff] %v645_v30   ;;  %v651_v32 = vld [vmem:[%s14316_s9 + $0x4a4] sm:$0xf]  ;;  %v661_v36 = vld [vmem:[%s14316_s9 + $0x4bc] sm:$0xff]  }
  0x7e   :  { %650 = vst [vmem:[#allocation5 + $0x4a4] sm:$0xf] %v649_v31  ;;  %v657_v34 = vld [vmem:[%s14316_s9 + $0x4b8] sm:$0xf]  ;;  %652 = vst [vmem:[#allocation5 + $0x4a8] sm:$0xf] %v651_v32 }
  0x7f   :  { %654 = vst [vmem:[#allocation5 + $0x4ac] sm:$0xff] %v653_v33   ;;  %658 = vst [vmem:[#allocation5 + $0x4b4] sm:$0xf] %v657_v34  ;;  %v659_v35 = vld [vmem:[%s14316_s9 + $0x4b4] sm:$0xf]  ;;  %v669_v39 = vld [vmem:[%s14316_s9 + $0x4cc] sm:$0xff]  }
  0x80   :  { %v665_v37 = vld [vmem:[%s14316_s9 + $0x4c8] sm:$0xf]  ;;  %660 = vst [vmem:[#allocation5 + $0x4b8] sm:$0xf] %v659_v35  ;;  %662 = vst [vmem:[#allocation5 + $0x4bc] sm:$0xff] %v661_v36   ;;  %v677_v42 = vld [vmem:[%s14316_s9 + $0x4dc] sm:$0xff]  }
  0x81   :  { %666 = vst [vmem:[#allocation5 + $0x4c4] sm:$0xf] %v665_v37  ;;  %v667_v38 = vld [vmem:[%s14316_s9 + $0x4c4] sm:$0xf]  ;;  %v673_v40 = vld [vmem:[%s14316_s9 + $0x4d8] sm:$0xf] }
  0x82   :  { %668 = vst [vmem:[#allocation5 + $0x4c8] sm:$0xf] %v667_v38  ;;  %670 = vst [vmem:[#allocation5 + $0x4cc] sm:$0xff] %v669_v39   ;;  %v675_v41 = vld [vmem:[%s14316_s9 + $0x4d4] sm:$0xf]  ;;  %v685_v45 = vld [vmem:[%s14316_s9 + $0x4ec] sm:$0xff]  }
  0x83   :  { %674 = vst [vmem:[#allocation5 + $0x4d4] sm:$0xf] %v673_v40  ;;  %v681_v43 = vld [vmem:[%s14316_s9 + $0x4e8] sm:$0xf]  ;;  %676 = vst [vmem:[#allocation5 + $0x4d8] sm:$0xf] %v675_v41 }
  0x84   :  { %678 = vst [vmem:[#allocation5 + $0x4dc] sm:$0xff] %v677_v42   ;;  %682 = vst [vmem:[#allocation5 + $0x4e4] sm:$0xf] %v681_v43  ;;  %v683_v44 = vld [vmem:[%s14316_s9 + $0x4e4] sm:$0xf]  ;;  %v693_v48 = vld [vmem:[%s14316_s9 + $0x4fc] sm:$0xff]  }
  0x85   :  { %v689_v46 = vld [vmem:[%s14316_s9 + $0x4f8] sm:$0xf]  ;;  %684 = vst [vmem:[#allocation5 + $0x4e8] sm:$0xf] %v683_v44  ;;  %686 = vst [vmem:[#allocation5 + $0x4ec] sm:$0xff] %v685_v45   ;;  %v701_v51 = vld [vmem:[%s14316_s9 + $0x50c] sm:$0xff]  }
  0x86   :  { %690 = vst [vmem:[#allocation5 + $0x4f4] sm:$0xf] %v689_v46  ;;  %v691_v47 = vld [vmem:[%s14316_s9 + $0x4f4] sm:$0xf]  ;;  %v697_v49 = vld [vmem:[%s14316_s9 + $0x508] sm:$0xf] }
  0x87   :  { %692 = vst [vmem:[#allocation5 + $0x4f8] sm:$0xf] %v691_v47  ;;  %694 = vst [vmem:[#allocation5 + $0x4fc] sm:$0xff] %v693_v48   ;;  %v699_v50 = vld [vmem:[%s14316_s9 + $0x504] sm:$0xf]  ;;  %v709_v54 = vld [vmem:[%s14316_s9 + $0x51c] sm:$0xff]  }
  0x88   :  { %698 = vst [vmem:[#allocation5 + $0x504] sm:$0xf] %v697_v49  ;;  %v705_v52 = vld [vmem:[%s14316_s9 + $0x518] sm:$0xf]  ;;  %700 = vst [vmem:[#allocation5 + $0x508] sm:$0xf] %v699_v50 }
  0x89   :  { %702 = vst [vmem:[#allocation5 + $0x50c] sm:$0xff] %v701_v51   ;;  %706 = vst [vmem:[#allocation5 + $0x514] sm:$0xf] %v705_v52  ;;  %v707_v53 = vld [vmem:[%s14316_s9 + $0x514] sm:$0xf]  ;;  %v717_v57 = vld [vmem:[%s14316_s9 + $0x52c] sm:$0xff]  }
  0x8a   :  { %v713_v55 = vld [vmem:[%s14316_s9 + $0x528] sm:$0xf]  ;;  %708 = vst [vmem:[#allocation5 + $0x518] sm:$0xf] %v707_v53  ;;  %710 = vst [vmem:[#allocation5 + $0x51c] sm:$0xff] %v709_v54   ;;  %v725_v60 = vld [vmem:[%s14316_s9 + $0x53c] sm:$0xff]  }
  0x8b   :  { %714 = vst [vmem:[#allocation5 + $0x524] sm:$0xf] %v713_v55  ;;  %v715_v56 = vld [vmem:[%s14316_s9 + $0x524] sm:$0xf]  ;;  %v721_v58 = vld [vmem:[%s14316_s9 + $0x538] sm:$0xf] }
  0x8c   :  { %716 = vst [vmem:[#allocation5 + $0x528] sm:$0xf] %v715_v56  ;;  %718 = vst [vmem:[#allocation5 + $0x52c] sm:$0xff] %v717_v57   ;;  %v723_v59 = vld [vmem:[%s14316_s9 + $0x534] sm:$0xf]  ;;  %v733_v63 = vld [vmem:[%s14316_s9 + $0x54c] sm:$0xff]  }
  0x8d   :  { %722 = vst [vmem:[#allocation5 + $0x534] sm:$0xf] %v721_v58  ;;  %v729_v61 = vld [vmem:[%s14316_s9 + $0x548] sm:$0xf]  ;;  %724 = vst [vmem:[#allocation5 + $0x538] sm:$0xf] %v723_v59 }
  0x8e   :  { %726 = vst [vmem:[#allocation5 + $0x53c] sm:$0xff] %v725_v60   ;;  %730 = vst [vmem:[#allocation5 + $0x544] sm:$0xf] %v729_v61  ;;  %v731_v62 = vld [vmem:[%s14316_s9 + $0x544] sm:$0xf]  ;;  %v741_v2 = vld [vmem:[%s14316_s9 + $0x55c] sm:$0xff]  }
  0x8f   :  { %v737_v0 = vld [vmem:[%s14316_s9 + $0x558] sm:$0xf]  ;;  %732 = vst [vmem:[#allocation5 + $0x548] sm:$0xf] %v731_v62  ;;  %734 = vst [vmem:[#allocation5 + $0x54c] sm:$0xff] %v733_v63   ;;  %v749_v5 = vld [vmem:[%s14316_s9 + $0x56c] sm:$0xff]  }
  0x90   :  { %738 = vst [vmem:[#allocation5 + $0x554] sm:$0xf] %v737_v0  ;;  %v739_v1 = vld [vmem:[%s14316_s9 + $0x554] sm:$0xf]  ;;  %v745_v3 = vld [vmem:[%s14316_s9 + $0x568] sm:$0xf] }
  0x91   :  { %740 = vst [vmem:[#allocation5 + $0x558] sm:$0xf] %v739_v1  ;;  %742 = vst [vmem:[#allocation5 + $0x55c] sm:$0xff] %v741_v2   ;;  %v747_v4 = vld [vmem:[%s14316_s9 + $0x564] sm:$0xf]  ;;  %v757_v8 = vld [vmem:[%s14316_s9 + $0x57c] sm:$0xff]  }
  0x92   :  { %746 = vst [vmem:[#allocation5 + $0x564] sm:$0xf] %v745_v3  ;;  %v753_v6 = vld [vmem:[%s14316_s9 + $0x578] sm:$0xf]  ;;  %748 = vst [vmem:[#allocation5 + $0x568] sm:$0xf] %v747_v4 }
  0x93   :  { %750 = vst [vmem:[#allocation5 + $0x56c] sm:$0xff] %v749_v5   ;;  %754 = vst [vmem:[#allocation5 + $0x574] sm:$0xf] %v753_v6  ;;  %v755_v7 = vld [vmem:[%s14316_s9 + $0x574] sm:$0xf]  ;;  %v765_v11 = vld [vmem:[%s14316_s9 + $0x58c] sm:$0xff]  }
  0x94   :  { %v761_v9 = vld [vmem:[%s14316_s9 + $0x588] sm:$0xf]  ;;  %756 = vst [vmem:[#allocation5 + $0x578] sm:$0xf] %v755_v7  ;;  %758 = vst [vmem:[#allocation5 + $0x57c] sm:$0xff] %v757_v8   ;;  %v773_v14 = vld [vmem:[%s14316_s9 + $0x59c] sm:$0xff]  }
  0x95   :  { %762 = vst [vmem:[#allocation5 + $0x584] sm:$0xf] %v761_v9  ;;  %v763_v10 = vld [vmem:[%s14316_s9 + $0x584] sm:$0xf]  ;;  %v769_v12 = vld [vmem:[%s14316_s9 + $0x598] sm:$0xf] }
  0x96   :  { %764 = vst [vmem:[#allocation5 + $0x588] sm:$0xf] %v763_v10  ;;  %766 = vst [vmem:[#allocation5 + $0x58c] sm:$0xff] %v765_v11   ;;  %v771_v13 = vld [vmem:[%s14316_s9 + $0x594] sm:$0xf]  ;;  %v781_v17 = vld [vmem:[%s14316_s9 + $0x5ac] sm:$0xff]  }
  0x97   :  { %770 = vst [vmem:[#allocation5 + $0x594] sm:$0xf] %v769_v12  ;;  %v777_v15 = vld [vmem:[%s14316_s9 + $0x5a8] sm:$0xf]  ;;  %772 = vst [vmem:[#allocation5 + $0x598] sm:$0xf] %v771_v13 }
  0x98   :  { %774 = vst [vmem:[#allocation5 + $0x59c] sm:$0xff] %v773_v14   ;;  %778 = vst [vmem:[#allocation5 + $0x5a4] sm:$0xf] %v777_v15  ;;  %v779_v16 = vld [vmem:[%s14316_s9 + $0x5a4] sm:$0xf]  ;;  %v789_v20 = vld [vmem:[%s14316_s9 + $0x5bc] sm:$0xff]  }
  0x99   :  { %v785_v18 = vld [vmem:[%s14316_s9 + $0x5b8] sm:$0xf]  ;;  %780 = vst [vmem:[#allocation5 + $0x5a8] sm:$0xf] %v779_v16  ;;  %782 = vst [vmem:[#allocation5 + $0x5ac] sm:$0xff] %v781_v17   ;;  %v797_v23 = vld [vmem:[%s14316_s9 + $0x5cc] sm:$0xff]  }
  0x9a   :  { %786 = vst [vmem:[#allocation5 + $0x5b4] sm:$0xf] %v785_v18  ;;  %v787_v19 = vld [vmem:[%s14316_s9 + $0x5b4] sm:$0xf]  ;;  %v793_v21 = vld [vmem:[%s14316_s9 + $0x5c8] sm:$0xf] }
  0x9b   :  { %788 = vst [vmem:[#allocation5 + $0x5b8] sm:$0xf] %v787_v19  ;;  %790 = vst [vmem:[#allocation5 + $0x5bc] sm:$0xff] %v789_v20   ;;  %v795_v22 = vld [vmem:[%s14316_s9 + $0x5c4] sm:$0xf]  ;;  %v805_v26 = vld [vmem:[%s14316_s9 + $0x5dc] sm:$0xff]  }
  0x9c   :  { %794 = vst [vmem:[#allocation5 + $0x5c4] sm:$0xf] %v793_v21  ;;  %v801_v24 = vld [vmem:[%s14316_s9 + $0x5d8] sm:$0xf]  ;;  %796 = vst [vmem:[#allocation5 + $0x5c8] sm:$0xf] %v795_v22 }
  0x9d   :  { %798 = vst [vmem:[#allocation5 + $0x5cc] sm:$0xff] %v797_v23   ;;  %802 = vst [vmem:[#allocation5 + $0x5d4] sm:$0xf] %v801_v24  ;;  %v803_v25 = vld [vmem:[%s14316_s9 + $0x5d4] sm:$0xf]  ;;  %v813_v29 = vld [vmem:[%s14316_s9 + $0x5ec] sm:$0xff]  }
  0x9e   :  { %v809_v27 = vld [vmem:[%s14316_s9 + $0x5e8] sm:$0xf]  ;;  %804 = vst [vmem:[#allocation5 + $0x5d8] sm:$0xf] %v803_v25  ;;  %806 = vst [vmem:[#allocation5 + $0x5dc] sm:$0xff] %v805_v26   ;;  %v821_v32 = vld [vmem:[%s14316_s9 + $0x5fc] sm:$0xff]  }
  0x9f   :  { %810 = vst [vmem:[#allocation5 + $0x5e4] sm:$0xf] %v809_v27  ;;  %v811_v28 = vld [vmem:[%s14316_s9 + $0x5e4] sm:$0xf]  ;;  %v817_v30 = vld [vmem:[%s14316_s9 + $0x5f8] sm:$0xf] }
  0xa0   :  { %812 = vst [vmem:[#allocation5 + $0x5e8] sm:$0xf] %v811_v28  ;;  %814 = vst [vmem:[#allocation5 + $0x5ec] sm:$0xff] %v813_v29   ;;  %v819_v31 = vld [vmem:[%s14316_s9 + $0x5f4] sm:$0xf]  ;;  %v829_v35 = vld [vmem:[%s14316_s9 + $0x60c] sm:$0xff]  }
  0xa1   :  { %818 = vst [vmem:[#allocation5 + $0x5f4] sm:$0xf] %v817_v30  ;;  %v825_v33 = vld [vmem:[%s14316_s9 + $0x608] sm:$0xf]  ;;  %820 = vst [vmem:[#allocation5 + $0x5f8] sm:$0xf] %v819_v31 }
  0xa2   :  { %822 = vst [vmem:[#allocation5 + $0x5fc] sm:$0xff] %v821_v32   ;;  %826 = vst [vmem:[#allocation5 + $0x604] sm:$0xf] %v825_v33  ;;  %v827_v34 = vld [vmem:[%s14316_s9 + $0x604] sm:$0xf]  ;;  %v837_v38 = vld [vmem:[%s14316_s9 + $0x61c] sm:$0xff]  }
  0xa3   :  { %v833_v36 = vld [vmem:[%s14316_s9 + $0x618] sm:$0xf]  ;;  %828 = vst [vmem:[#allocation5 + $0x608] sm:$0xf] %v827_v34  ;;  %830 = vst [vmem:[#allocation5 + $0x60c] sm:$0xff] %v829_v35   ;;  %v845_v41 = vld [vmem:[%s14316_s9 + $0x62c] sm:$0xff]  }
  0xa4   :  { %834 = vst [vmem:[#allocation5 + $0x614] sm:$0xf] %v833_v36  ;;  %v835_v37 = vld [vmem:[%s14316_s9 + $0x614] sm:$0xf]  ;;  %v841_v39 = vld [vmem:[%s14316_s9 + $0x628] sm:$0xf] }
  0xa5   :  { %836 = vst [vmem:[#allocation5 + $0x618] sm:$0xf] %v835_v37  ;;  %838 = vst [vmem:[#allocation5 + $0x61c] sm:$0xff] %v837_v38   ;;  %v843_v40 = vld [vmem:[%s14316_s9 + $0x624] sm:$0xf] }
  0xa6   :  { %842 = vst [vmem:[#allocation5 + $0x624] sm:$0xf] %v841_v39  ;;  %v849_v42 = vld [vmem:[%s14316_s9 + $0x638] sm:$0xf]  ;;  %844 = vst [vmem:[#allocation5 + $0x628] sm:$0xf] %v843_v40 }
  0xa7   :  { %846 = vst [vmem:[#allocation5 + $0x62c] sm:$0xff] %v845_v41   ;;  %850 = vst [vmem:[#allocation5 + $0x634] sm:$0xf] %v849_v42  ;;  %v851_v43 = vld [vmem:[%s14316_s9 + $0x634] sm:$0xf] }
  0xa8   :  { %v853_v44 = vld [vmem:[%s14316_s9 + $0x63c] sm:$0xf]  ;;  %852 = vst [vmem:[#allocation5 + $0x638] sm:$0xf] %v851_v43 }
  0xa9   :  { %854 = vst [vmem:[#allocation5 + $0x63c] sm:$0xf] %v853_v44 }
  0xaa   :  { %1685 = vsyncadd [#allocation9], 25600  ;;  %v1704_v45 = vld [vmem:[%s14317_s10] sm:$0xf]  ;;  %v1706_v46 = vld [vmem:[%s14317_s10 + $0x8] sm:$0xf] }
  0xab   :  { %1705 = vst [vmem:[#allocation6] sm:$0xf] %v1704_v45  ;;  %1707 = vst [vmem:[#allocation6 + $0x4] sm:$0xf] %v1706_v46  ;;  %v1708_v47 = vld [vmem:[%s14317_s10 + $0x4] sm:$0xf] }
  0xac   :  { %v1710_v48 = vld [vmem:[%s14317_s10 + $0xc] sm:$0xff]   ;;  %v1714_v49 = vld [vmem:[%s14317_s10 + $0x18] sm:$0xf]  ;;  %1709 = vst [vmem:[#allocation6 + $0x8] sm:$0xf] %v1708_v47  ;;  %v1718_v51 = vld [vmem:[%s14317_s10 + $0x1c] sm:$0xff]  }
  0xad   :  { %1711 = vst [vmem:[#allocation6 + $0xc] sm:$0xff] %v1710_v48   ;;  %1715 = vst [vmem:[#allocation6 + $0x14] sm:$0xf] %v1714_v49  ;;  %v1716_v50 = vld [vmem:[%s14317_s10 + $0x14] sm:$0xf]  ;;  %v1726_v54 = vld [vmem:[%s14317_s10 + $0x2c] sm:$0xff]  }
  0xae   :  { %v1722_v52 = vld [vmem:[%s14317_s10 + $0x28] sm:$0xf]  ;;  %1717 = vst [vmem:[#allocation6 + $0x18] sm:$0xf] %v1716_v50  ;;  %1719 = vst [vmem:[#allocation6 + $0x1c] sm:$0xff] %v1718_v51   ;;  %v1734_v57 = vld [vmem:[%s14317_s10 + $0x3c] sm:$0xff]  }
  0xaf   :  { %1723 = vst [vmem:[#allocation6 + $0x24] sm:$0xf] %v1722_v52  ;;  %v1724_v53 = vld [vmem:[%s14317_s10 + $0x24] sm:$0xf]  ;;  %v1730_v55 = vld [vmem:[%s14317_s10 + $0x38] sm:$0xf] }
  0xb0   :  { %1725 = vst [vmem:[#allocation6 + $0x28] sm:$0xf] %v1724_v53  ;;  %1727 = vst [vmem:[#allocation6 + $0x2c] sm:$0xff] %v1726_v54   ;;  %v1732_v56 = vld [vmem:[%s14317_s10 + $0x34] sm:$0xf]  ;;  %v1742_v60 = vld [vmem:[%s14317_s10 + $0x4c] sm:$0xff]  }
  0xb1   :  { %1731 = vst [vmem:[#allocation6 + $0x34] sm:$0xf] %v1730_v55  ;;  %v1738_v58 = vld [vmem:[%s14317_s10 + $0x48] sm:$0xf]  ;;  %1733 = vst [vmem:[#allocation6 + $0x38] sm:$0xf] %v1732_v56 }
  0xb2   :  { %1735 = vst [vmem:[#allocation6 + $0x3c] sm:$0xff] %v1734_v57   ;;  %1739 = vst [vmem:[#allocation6 + $0x44] sm:$0xf] %v1738_v58  ;;  %v1740_v59 = vld [vmem:[%s14317_s10 + $0x44] sm:$0xf]  ;;  %v1750_v63 = vld [vmem:[%s14317_s10 + $0x5c] sm:$0xff]  }
  0xb3   :  { %v1746_v61 = vld [vmem:[%s14317_s10 + $0x58] sm:$0xf]  ;;  %1741 = vst [vmem:[#allocation6 + $0x48] sm:$0xf] %v1740_v59  ;;  %1743 = vst [vmem:[#allocation6 + $0x4c] sm:$0xff] %v1742_v60   ;;  %v1758_v2 = vld [vmem:[%s14317_s10 + $0x6c] sm:$0xff]  }
  0xb4   :  { %1747 = vst [vmem:[#allocation6 + $0x54] sm:$0xf] %v1746_v61  ;;  %v1748_v62 = vld [vmem:[%s14317_s10 + $0x54] sm:$0xf]  ;;  %v1754_v0 = vld [vmem:[%s14317_s10 + $0x68] sm:$0xf] }
  0xb5   :  { %1749 = vst [vmem:[#allocation6 + $0x58] sm:$0xf] %v1748_v62  ;;  %1751 = vst [vmem:[#allocation6 + $0x5c] sm:$0xff] %v1750_v63   ;;  %v1756_v1 = vld [vmem:[%s14317_s10 + $0x64] sm:$0xf]  ;;  %v1766_v5 = vld [vmem:[%s14317_s10 + $0x7c] sm:$0xff]  }
  0xb6   :  { %1755 = vst [vmem:[#allocation6 + $0x64] sm:$0xf] %v1754_v0  ;;  %v1762_v3 = vld [vmem:[%s14317_s10 + $0x78] sm:$0xf]  ;;  %1757 = vst [vmem:[#allocation6 + $0x68] sm:$0xf] %v1756_v1 }
  0xb7   :  { %1759 = vst [vmem:[#allocation6 + $0x6c] sm:$0xff] %v1758_v2   ;;  %1763 = vst [vmem:[#allocation6 + $0x74] sm:$0xf] %v1762_v3  ;;  %v1764_v4 = vld [vmem:[%s14317_s10 + $0x74] sm:$0xf]  ;;  %v1774_v8 = vld [vmem:[%s14317_s10 + $0x8c] sm:$0xff]  }
  0xb8   :  { %v1770_v6 = vld [vmem:[%s14317_s10 + $0x88] sm:$0xf]  ;;  %1765 = vst [vmem:[#allocation6 + $0x78] sm:$0xf] %v1764_v4  ;;  %1767 = vst [vmem:[#allocation6 + $0x7c] sm:$0xff] %v1766_v5   ;;  %v1782_v11 = vld [vmem:[%s14317_s10 + $0x9c] sm:$0xff]  }
  0xb9   :  { %1771 = vst [vmem:[#allocation6 + $0x84] sm:$0xf] %v1770_v6  ;;  %v1772_v7 = vld [vmem:[%s14317_s10 + $0x84] sm:$0xf]  ;;  %v1778_v9 = vld [vmem:[%s14317_s10 + $0x98] sm:$0xf] }
  0xba   :  { %1773 = vst [vmem:[#allocation6 + $0x88] sm:$0xf] %v1772_v7  ;;  %1775 = vst [vmem:[#allocation6 + $0x8c] sm:$0xff] %v1774_v8   ;;  %v1780_v10 = vld [vmem:[%s14317_s10 + $0x94] sm:$0xf]  ;;  %v1790_v14 = vld [vmem:[%s14317_s10 + $0xac] sm:$0xff]  }
  0xbb   :  { %1779 = vst [vmem:[#allocation6 + $0x94] sm:$0xf] %v1778_v9  ;;  %v1786_v12 = vld [vmem:[%s14317_s10 + $0xa8] sm:$0xf]  ;;  %1781 = vst [vmem:[#allocation6 + $0x98] sm:$0xf] %v1780_v10 }
  0xbc   :  { %1783 = vst [vmem:[#allocation6 + $0x9c] sm:$0xff] %v1782_v11   ;;  %1787 = vst [vmem:[#allocation6 + $0xa4] sm:$0xf] %v1786_v12  ;;  %v1788_v13 = vld [vmem:[%s14317_s10 + $0xa4] sm:$0xf]  ;;  %v1798_v17 = vld [vmem:[%s14317_s10 + $0xbc] sm:$0xff]  }
  0xbd   :  { %v1794_v15 = vld [vmem:[%s14317_s10 + $0xb8] sm:$0xf]  ;;  %1789 = vst [vmem:[#allocation6 + $0xa8] sm:$0xf] %v1788_v13  ;;  %1791 = vst [vmem:[#allocation6 + $0xac] sm:$0xff] %v1790_v14   ;;  %v1806_v20 = vld [vmem:[%s14317_s10 + $0xcc] sm:$0xff]  }
  0xbe   :  { %1795 = vst [vmem:[#allocation6 + $0xb4] sm:$0xf] %v1794_v15  ;;  %v1796_v16 = vld [vmem:[%s14317_s10 + $0xb4] sm:$0xf]  ;;  %v1802_v18 = vld [vmem:[%s14317_s10 + $0xc8] sm:$0xf] }
  0xbf   :  { %1797 = vst [vmem:[#allocation6 + $0xb8] sm:$0xf] %v1796_v16  ;;  %1799 = vst [vmem:[#allocation6 + $0xbc] sm:$0xff] %v1798_v17   ;;  %v1804_v19 = vld [vmem:[%s14317_s10 + $0xc4] sm:$0xf]  ;;  %v1814_v23 = vld [vmem:[%s14317_s10 + $0xdc] sm:$0xff]  }
  0xc0   :  { %1803 = vst [vmem:[#allocation6 + $0xc4] sm:$0xf] %v1802_v18  ;;  %v1810_v21 = vld [vmem:[%s14317_s10 + $0xd8] sm:$0xf]  ;;  %1805 = vst [vmem:[#allocation6 + $0xc8] sm:$0xf] %v1804_v19 }
  0xc1   :  { %1807 = vst [vmem:[#allocation6 + $0xcc] sm:$0xff] %v1806_v20   ;;  %1811 = vst [vmem:[#allocation6 + $0xd4] sm:$0xf] %v1810_v21  ;;  %v1812_v22 = vld [vmem:[%s14317_s10 + $0xd4] sm:$0xf]  ;;  %v1822_v26 = vld [vmem:[%s14317_s10 + $0xec] sm:$0xff]  }
  0xc2   :  { %v1818_v24 = vld [vmem:[%s14317_s10 + $0xe8] sm:$0xf]  ;;  %1813 = vst [vmem:[#allocation6 + $0xd8] sm:$0xf] %v1812_v22  ;;  %1815 = vst [vmem:[#allocation6 + $0xdc] sm:$0xff] %v1814_v23  }
  0xc3   :  { %1819 = vst [vmem:[#allocation6 + $0xe4] sm:$0xf] %v1818_v24  ;;  %v1820_v25 = vld [vmem:[%s14317_s10 + $0xe4] sm:$0xf]  ;;  %v1826_v27 = vld [vmem:[%s14317_s10 + $0xf8] sm:$0xf] }
  0xc4   :  { %1821 = vst [vmem:[#allocation6 + $0xe8] sm:$0xf] %v1820_v25  ;;  %1823 = vst [vmem:[#allocation6 + $0xec] sm:$0xff] %v1822_v26   ;;  %v1828_v28 = vld [vmem:[%s14317_s10 + $0xf4] sm:$0xf] }
  0xc5   :  { %1827 = vst [vmem:[#allocation6 + $0xf4] sm:$0xf] %v1826_v27  ;;  %v1830_v29 = vld [vmem:[%s14317_s10 + $0xfc] sm:$0xf]  ;;  %1829 = vst [vmem:[#allocation6 + $0xf8] sm:$0xf] %v1828_v28 }
  0xc6   :  { %1831 = vst [vmem:[#allocation6 + $0xfc] sm:$0xf] %v1830_v29 }
  0xc7   :  { %1990 = vsyncadd [#allocation9 + $0x1], 4096  ;;  %v2009_v30 = vld [vmem:[%s14318_s11] sm:$0xf]  ;;  %v2011_v31 = vld [vmem:[%s14318_s11 + $0x8] sm:$0xf] }
  0xc8   :  { %2010 = vst [vmem:[#allocation7] sm:$0xf] %v2009_v30  ;;  %2012 = vst [vmem:[#allocation7 + $0x4] sm:$0xf] %v2011_v31  ;;  %v2013_v32 = vld [vmem:[%s14318_s11 + $0x4] sm:$0xf] }
  0xc9   :  { %v2015_v33 = vld [vmem:[%s14318_s11 + $0xc] sm:$0xff]   ;;  %v2019_v34 = vld [vmem:[%s14318_s11 + $0x18] sm:$0xf]  ;;  %2014 = vst [vmem:[#allocation7 + $0x8] sm:$0xf] %v2013_v32  ;;  %v2023_v36 = vld [vmem:[%s14318_s11 + $0x1c] sm:$0xff]  }
  0xca   :  { %2016 = vst [vmem:[#allocation7 + $0xc] sm:$0xff] %v2015_v33   ;;  %2020 = vst [vmem:[#allocation7 + $0x14] sm:$0xf] %v2019_v34  ;;  %v2021_v35 = vld [vmem:[%s14318_s11 + $0x14] sm:$0xf]  ;;  %v2031_v39 = vld [vmem:[%s14318_s11 + $0x2c] sm:$0xff]  }
  0xcb   :  { %v2027_v37 = vld [vmem:[%s14318_s11 + $0x28] sm:$0xf]  ;;  %2022 = vst [vmem:[#allocation7 + $0x18] sm:$0xf] %v2021_v35  ;;  %2024 = vst [vmem:[#allocation7 + $0x1c] sm:$0xff] %v2023_v36   ;;  %v2039_v42 = vld [vmem:[%s14318_s11 + $0x3c] sm:$0xff]  }
  0xcc   :  { %2028 = vst [vmem:[#allocation7 + $0x24] sm:$0xf] %v2027_v37  ;;  %v2029_v38 = vld [vmem:[%s14318_s11 + $0x24] sm:$0xf]  ;;  %v2035_v40 = vld [vmem:[%s14318_s11 + $0x38] sm:$0xf] }
  0xcd   :  { %2030 = vst [vmem:[#allocation7 + $0x28] sm:$0xf] %v2029_v38  ;;  %2032 = vst [vmem:[#allocation7 + $0x2c] sm:$0xff] %v2031_v39   ;;  %v2037_v41 = vld [vmem:[%s14318_s11 + $0x34] sm:$0xf]  ;;  %v2047_v45 = vld [vmem:[%s14318_s11 + $0x4c] sm:$0xff]  }
  0xce   :  { %2036 = vst [vmem:[#allocation7 + $0x34] sm:$0xf] %v2035_v40  ;;  %v2043_v43 = vld [vmem:[%s14318_s11 + $0x48] sm:$0xf]  ;;  %2038 = vst [vmem:[#allocation7 + $0x38] sm:$0xf] %v2037_v41 }
  0xcf   :  { %2040 = vst [vmem:[#allocation7 + $0x3c] sm:$0xff] %v2039_v42   ;;  %2044 = vst [vmem:[#allocation7 + $0x44] sm:$0xf] %v2043_v43  ;;  %v2045_v44 = vld [vmem:[%s14318_s11 + $0x44] sm:$0xf]  ;;  %v2055_v48 = vld [vmem:[%s14318_s11 + $0x5c] sm:$0xff]  }
  0xd0   :  { %v2051_v46 = vld [vmem:[%s14318_s11 + $0x58] sm:$0xf]  ;;  %2046 = vst [vmem:[#allocation7 + $0x48] sm:$0xf] %v2045_v44  ;;  %2048 = vst [vmem:[#allocation7 + $0x4c] sm:$0xff] %v2047_v45   ;;  %v2063_v51 = vld [vmem:[%s14318_s11 + $0x6c] sm:$0xff]  }
  0xd1   :  { %2052 = vst [vmem:[#allocation7 + $0x54] sm:$0xf] %v2051_v46  ;;  %v2053_v47 = vld [vmem:[%s14318_s11 + $0x54] sm:$0xf]  ;;  %v2059_v49 = vld [vmem:[%s14318_s11 + $0x68] sm:$0xf] }
  0xd2   :  { %2054 = vst [vmem:[#allocation7 + $0x58] sm:$0xf] %v2053_v47  ;;  %2056 = vst [vmem:[#allocation7 + $0x5c] sm:$0xff] %v2055_v48   ;;  %v2061_v50 = vld [vmem:[%s14318_s11 + $0x64] sm:$0xf]  ;;  %v2071_v54 = vld [vmem:[%s14318_s11 + $0x7c] sm:$0xff]  }
  0xd3   :  { %2060 = vst [vmem:[#allocation7 + $0x64] sm:$0xf] %v2059_v49  ;;  %v2067_v52 = vld [vmem:[%s14318_s11 + $0x78] sm:$0xf]  ;;  %2062 = vst [vmem:[#allocation7 + $0x68] sm:$0xf] %v2061_v50 }
  0xd4   :  { %2064 = vst [vmem:[#allocation7 + $0x6c] sm:$0xff] %v2063_v51   ;;  %2068 = vst [vmem:[#allocation7 + $0x74] sm:$0xf] %v2067_v52  ;;  %v2069_v53 = vld [vmem:[%s14318_s11 + $0x74] sm:$0xf]  ;;  %v2079_v57 = vld [vmem:[%s14318_s11 + $0x8c] sm:$0xff]  }
  0xd5   :  { %v2075_v55 = vld [vmem:[%s14318_s11 + $0x88] sm:$0xf]  ;;  %2070 = vst [vmem:[#allocation7 + $0x78] sm:$0xf] %v2069_v53  ;;  %2072 = vst [vmem:[#allocation7 + $0x7c] sm:$0xff] %v2071_v54   ;;  %v2087_v60 = vld [vmem:[%s14318_s11 + $0x9c] sm:$0xff]  }
  0xd6   :  { %2076 = vst [vmem:[#allocation7 + $0x84] sm:$0xf] %v2075_v55  ;;  %v2077_v56 = vld [vmem:[%s14318_s11 + $0x84] sm:$0xf]  ;;  %v2083_v58 = vld [vmem:[%s14318_s11 + $0x98] sm:$0xf] }
  0xd7   :  { %2078 = vst [vmem:[#allocation7 + $0x88] sm:$0xf] %v2077_v56  ;;  %2080 = vst [vmem:[#allocation7 + $0x8c] sm:$0xff] %v2079_v57   ;;  %v2085_v59 = vld [vmem:[%s14318_s11 + $0x94] sm:$0xf]  ;;  %v2095_v63 = vld [vmem:[%s14318_s11 + $0xac] sm:$0xff]  }
  0xd8   :  { %2084 = vst [vmem:[#allocation7 + $0x94] sm:$0xf] %v2083_v58  ;;  %v2091_v61 = vld [vmem:[%s14318_s11 + $0xa8] sm:$0xf]  ;;  %2086 = vst [vmem:[#allocation7 + $0x98] sm:$0xf] %v2085_v59 }
  0xd9   :  { %2088 = vst [vmem:[#allocation7 + $0x9c] sm:$0xff] %v2087_v60   ;;  %2092 = vst [vmem:[#allocation7 + $0xa4] sm:$0xf] %v2091_v61  ;;  %v2093_v62 = vld [vmem:[%s14318_s11 + $0xa4] sm:$0xf]  ;;  %v2103_v2 = vld [vmem:[%s14318_s11 + $0xbc] sm:$0xff]  }
  0xda   :  { %v2099_v0 = vld [vmem:[%s14318_s11 + $0xb8] sm:$0xf]  ;;  %2094 = vst [vmem:[#allocation7 + $0xa8] sm:$0xf] %v2093_v62  ;;  %2096 = vst [vmem:[#allocation7 + $0xac] sm:$0xff] %v2095_v63   ;;  %v2111_v5 = vld [vmem:[%s14318_s11 + $0xcc] sm:$0xff]  }
  0xdb   :  { %2100 = vst [vmem:[#allocation7 + $0xb4] sm:$0xf] %v2099_v0  ;;  %v2101_v1 = vld [vmem:[%s14318_s11 + $0xb4] sm:$0xf]  ;;  %v2107_v3 = vld [vmem:[%s14318_s11 + $0xc8] sm:$0xf] }
  0xdc   :  { %2102 = vst [vmem:[#allocation7 + $0xb8] sm:$0xf] %v2101_v1  ;;  %2104 = vst [vmem:[#allocation7 + $0xbc] sm:$0xff] %v2103_v2   ;;  %v2109_v4 = vld [vmem:[%s14318_s11 + $0xc4] sm:$0xf]  ;;  %v2119_v8 = vld [vmem:[%s14318_s11 + $0xdc] sm:$0xff]  }
  0xdd   :  { %2108 = vst [vmem:[#allocation7 + $0xc4] sm:$0xf] %v2107_v3  ;;  %v2115_v6 = vld [vmem:[%s14318_s11 + $0xd8] sm:$0xf]  ;;  %2110 = vst [vmem:[#allocation7 + $0xc8] sm:$0xf] %v2109_v4 }
  0xde   :  { %2112 = vst [vmem:[#allocation7 + $0xcc] sm:$0xff] %v2111_v5   ;;  %2116 = vst [vmem:[#allocation7 + $0xd4] sm:$0xf] %v2115_v6  ;;  %v2117_v7 = vld [vmem:[%s14318_s11 + $0xd4] sm:$0xf]  ;;  %v2127_v11 = vld [vmem:[%s14318_s11 + $0xec] sm:$0xff]  }
  0xdf   :  { %v2123_v9 = vld [vmem:[%s14318_s11 + $0xe8] sm:$0xf]  ;;  %2118 = vst [vmem:[#allocation7 + $0xd8] sm:$0xf] %v2117_v7  ;;  %2120 = vst [vmem:[#allocation7 + $0xdc] sm:$0xff] %v2119_v8  }
  0xe0   :  { %2124 = vst [vmem:[#allocation7 + $0xe4] sm:$0xf] %v2123_v9  ;;  %v2125_v10 = vld [vmem:[%s14318_s11 + $0xe4] sm:$0xf]  ;;  %v2131_v12 = vld [vmem:[%s14318_s11 + $0xf8] sm:$0xf] }
  0xe1   :  { %2126 = vst [vmem:[#allocation7 + $0xe8] sm:$0xf] %v2125_v10  ;;  %2128 = vst [vmem:[#allocation7 + $0xec] sm:$0xff] %v2127_v11   ;;  %v2133_v13 = vld [vmem:[%s14318_s11 + $0xf4] sm:$0xf] }
  0xe2   :  { %2132 = vst [vmem:[#allocation7 + $0xf4] sm:$0xf] %v2131_v12  ;;  %v2135_v14 = vld [vmem:[%s14318_s11 + $0xfc] sm:$0xf]  ;;  %2134 = vst [vmem:[#allocation7 + $0xf8] sm:$0xf] %v2133_v13 }
  0xe3   :  { %2136 = vst [vmem:[#allocation7 + $0xfc] sm:$0xf] %v2135_v14 }
  0xe4   :  { %2295 = vsyncadd [#allocation9 + $0x2], 4096  ;;  %v12348_v15 = vld [vmem:[%s14319_s12] sm:$0xff]  ;;  %v12353_v16 = vld [vmem:[%s14319_s12 + $0x8] sm:$0xff] }
  0xe5   :  { %14321 = vst [vmem:[#allocation21_spill] sm:$0xff] %v12353_v16  ;;  %v12358_v17 = vld [vmem:[%s14319_s12 + $0x10] sm:$0xff]  ;;  %v12363_v18 = vld [vmem:[%s14319_s12 + $0x18] sm:$0xff]  ;;  %v12368_v19 = vld [vmem:[%s14319_s12 + $0x20] sm:$0xff] }
  0xe6   :  { %14322 = vst [vmem:[#allocation22_spill] sm:$0xff] %v12358_v17  ;;  %14323 = vst [vmem:[#allocation23_spill] sm:$0xff] %v12363_v18  ;;  %v12373_v20 = vld [vmem:[%s14319_s12 + $0x28] sm:$0xff]  ;;  %v12378_v21 = vld [vmem:[%s14319_s12 + $0x30] sm:$0xff] }
  0xe7   :  { %14324 = vst [vmem:[#allocation24_spill] sm:$0xff] %v12368_v19  ;;  %14325 = vst [vmem:[#allocation25_spill] sm:$0xff] %v12373_v20  ;;  %v12383_v22 = vld [vmem:[%s14319_s12 + $0x38] sm:$0xff]  ;;  %v12388_v23 = vld [vmem:[%s14319_s12 + $0x40] sm:$0xff] }
  0xe8   :  { %14326 = vst [vmem:[#allocation26_spill] sm:$0xff] %v12378_v21  ;;  %14327 = vst [vmem:[#allocation27_spill] sm:$0xff] %v12383_v22  ;;  %v12393_v24 = vld [vmem:[%s14319_s12 + $0x48] sm:$0xff]  ;;  %v12398_v25 = vld [vmem:[%s14319_s12 + $0x50] sm:$0xff] }
  0xe9   :  { %14328 = vst [vmem:[#allocation28_spill] sm:$0xff] %v12398_v25  ;;  %v12403_v26 = vld [vmem:[%s14319_s12 + $0x58] sm:$0xff]  ;;  %v12408_v27 = vld [vmem:[%s14319_s12 + $0x60] sm:$0xff]  ;;  %v12413_v28 = vld [vmem:[%s14319_s12 + $0x68] sm:$0xff] }
  0xea   :  { %14329 = vst [vmem:[#allocation29_spill] sm:$0xff] %v12403_v26  ;;  %14330 = vst [vmem:[#allocation30_spill] sm:$0xff] %v12408_v27  ;;  %v12418_v29 = vld [vmem:[%s14319_s12 + $0x70] sm:$0xff]  ;;  %v12423_v30 = vld [vmem:[%s14319_s12 + $0x78] sm:$0xff] }
  0xeb   :  { %14331 = vst [vmem:[#allocation31_spill] sm:$0xff] %v12413_v28  ;;  %14332 = vst [vmem:[#allocation32_spill] sm:$0xff] %v12418_v29 }
  0xec   :  { %14333 = vst [vmem:[#allocation33_spill] sm:$0xff] %v12423_v30 }
  0xed   :  { %2368 = vsyncadd [#allocation9 + $0x3], 2048  ;;  %v11006_v31 = vld [vmem:[%s14308_s1] sm:$0xff]   ;;  %v11007_v32 = vld [vmem:[%s14308_s1 + $0x8] sm:$0xff]   ;;  %vm2797_vm0 = vcmask 130048   ;;  %v11067_v63 = vmov 0.0  }
  0xee   :  { %10357 = vmatprep.subr.bf16.mxu0 %v11006_v31  ;;  %v11008_v33 = vld [vmem:[%s14308_s1 + $0x10] sm:$0xff]   ;;  %v11009_v34 = vld [vmem:[%s14308_s1 + $0x18] sm:$0xff]   ;;  %v11014_v35 = vld [vmem:[%s14307_s0] sm:$0xff]   ;;  %2834 = vst.msk [vmem:[#allocation2 + $0x120] sm:$0xff] %vm2797_vm0, %v11067_v63  ;;  %s11069_s18 = smov 64   ;;  %s11070_s19 = smov 112  }
  0xef   :  { %10358 = vmatpush3.bf16.msra.mxu0 %v11006_v31  ;;  %10373 = vmatprep.mubr.bf16.mxu0 %v11014_v35  ;;  %v11010_v36 = vld [vmem:[%s14308_s1 + $0x20] sm:$0xff]   ;;  %v11011_v37 = vld [vmem:[%s14308_s1 + $0x28] sm:$0xff]   ;;  %v11012_v38 = vld [vmem:[%s14308_s1 + $0x30] sm:$0xff]   ;;  %2835 = vst.msk [vmem:[#allocation2 + $0x128] sm:$0xff] %vm2797_vm0, %v11067_v63  ;;  %s11071_s20 = smov 96   ;;  %s11072_s21 = smov 16  }
  0xf0   :  { %10359 = vmatprep.subr.bf16.mxu0 %v11007_v32  ;;  %v11013_v39 = vld [vmem:[%s14308_s1 + $0x38] sm:$0xff]   ;;  %v2877_v40 = vld [vmem:[%s14310_s3] sm:$0xff]  ;;  %v2878_v41 = vld [vmem:[%s14310_s3 + $0x8] sm:$0xff]  ;;  %2836 = vst.msk [vmem:[#allocation2 + $0x130] sm:$0xff] %vm2797_vm0, %v11067_v63  ;;  %s11073_s22 = smov 48   ;;  %s11074_s1 = smov 32  }
  0xf1   :  { %v10931_v42 = vpack.c.bf16 %v2878_v41, %v2877_v40  ;;  %v11015_v43 = vld [vmem:[%s14307_s0 + $0x8] sm:$0xff]   ;;  %v11016_v44 = vld [vmem:[%s14307_s0 + $0x10] sm:$0xff]   ;;  %v11017_v45 = vld [vmem:[%s14307_s0 + $0x18] sm:$0xff]   ;;  %2837 = vst.msk [vmem:[#allocation2 + $0x138] sm:$0xff] %vm2797_vm0, %v11067_v63  ;;  %vm7412_vm1 = vcmask 123904   ;;  %vm7426_vm2 = vcmask 255104  }
  0xf2   :  { %v11018_v46 = vld [vmem:[%s14307_s0 + $0x20] sm:$0xff]   ;;  %v11019_v47 = vld [vmem:[%s14307_s0 + $0x28] sm:$0xff]   ;;  %v11020_v48 = vld [vmem:[%s14307_s0 + $0x30] sm:$0xff]   ;;  %2838 = vst.msk [vmem:[#allocation2 + $0x140] sm:$0xff] %vm2797_vm0, %v11067_v63  ;;  %vm7440_vm3 = vcmask 386304   ;;  %vm7454_vm4 = vcmask 517504  }
  0xf3   :  { %10360 = vmatpush3.bf16.msra.mxu0 %v11007_v32  ;;  %v11021_v49 = vld [vmem:[%s14307_s0 + $0x38] sm:$0xff]   ;;  %v11022_v50 = vld [vmem:[%s14307_s0 + $0x40] sm:$0xff]   ;;  %v11023_v51 = vld [vmem:[%s14307_s0 + $0x48] sm:$0xff]   ;;  %2839 = vst.msk [vmem:[#allocation2 + $0x148] sm:$0xff] %vm2797_vm0, %v11067_v63  ;;  %vm7468_vm5 = vcmask 648704   ;;  %vm7482_vm6 = vcmask 779904  }
  0xf4   :  { %10361 = vmatprep.subr.bf16.mxu0 %v11008_v33  ;;  %v11024_v52 = vld [vmem:[%s14307_s0 + $0x50] sm:$0xff]   ;;  %v11025_v53 = vld [vmem:[%s14307_s0 + $0x58] sm:$0xff]   ;;  %v11026_v54 = vld [vmem:[%s14307_s0 + $0x60] sm:$0xff]   ;;  %2840 = vst.msk [vmem:[#allocation2 + $0x150] sm:$0xff] %vm2797_vm0, %v11067_v63  ;;  %vm7496_vm7 = vcmask 911104   ;;  %vm7510_vm8 = vcmask 1042304  }
  0xf5   :  { %v11027_v55 = vld [vmem:[%s14307_s0 + $0x68] sm:$0xff]   ;;  %v11028_v56 = vld [vmem:[%s14307_s0 + $0x70] sm:$0xff]   ;;  %v11029_v57 = vld [vmem:[%s14307_s0 + $0x78] sm:$0xff]  }
  0xf6   :  { %v11030_v58 = vld [vmem:[%s14307_s0 + $0x80] sm:$0xff]   ;;  %v11031_v59 = vld [vmem:[%s14307_s0 + $0x88] sm:$0xff]   ;;  %v3304_v60 = vld [vmem:[%s14310_s3 + $0x10] sm:$0xff] }
  0xf7   :  { %10362 = vmatpush3.bf16.msra.mxu0 %v11008_v33  ;;  %v3305_v61 = vld [vmem:[%s14310_s3 + $0x18] sm:$0xff]  ;;  %v4302_v0 = vld [vmem:[%s14310_s3 + $0x30] sm:$0xff]  ;;  %v12534_v3 = vld [vmem:[%s14309_s2] ss:$0 sm:$0xff] }
  0xf8   :  { %10363 = vmatprep.subr.bf16.mxu0 %v11009_v34  ;;  %v10935_v62 = vpack.c.bf16 %v3305_v61, %v3304_v60  ;;  %v4303_v1 = vld [vmem:[%s14310_s3 + $0x38] sm:$0xff]  ;;  %v3803_v40 = vld [vmem:[%s14310_s3 + $0x20] sm:$0xff]  ;;  %v3804_v41 = vld [vmem:[%s14310_s3 + $0x28] sm:$0xff] }
  0xf9   :  { %v12528_v2 = vpack.c.bf16 %v4303_v1, %v4302_v0  ;;  %v4801_v19 = vld [vmem:[%s14310_s3 + $0x40] sm:$0xff]  ;;  %v4802_v27 = vld [vmem:[%s14310_s3 + $0x48] sm:$0xff] }
  0xfa   :  { %10967 = vmatprep.subr.bf16.mxu1 %v10935_v62  ;;  %v10947_v17 = vpack.c.bf16 %v4802_v27, %v4801_v19 }
  0xfb   :  { %10364 = vmatpush3.bf16.msra.mxu0 %v11009_v34  ;;  %10968 = vmatpush3.bf16.msra.mxu1 %v10935_v62 }
  0xfc   :  { %10365 = vmatprep.subr.bf16.mxu0 %v11010_v36  ;;  %10944 = vmatprep.subr.bf16.mxu1 %v12528_v2 }
  0xff   :  { %10366 = vmatpush3.bf16.msra.mxu0 %v11010_v36 }
 0x100   :  { %10367 = vmatprep.subr.bf16.mxu0 %v11011_v37 }
 0x103   :  { %10368 = vmatpush3.bf16.msra.mxu0 %v11011_v37 }
 0x104   :  { %10369 = vmatprep.subr.bf16.mxu0 %v11012_v38 }
 0x107   :  { %10370 = vmatpush3.bf16.msra.mxu0 %v11012_v38 }
 0x108   :  { %10371 = vmatprep.subr.bf16.mxu0 %v11013_v39 }
 0x10b   :  { %10372 = vmatpush3.bf16.msra.mxu0 %v11013_v39 }
 0x10c   :  { %10932 = vmatprep.subr.bf16.mxu0 %v10931_v42 }
 0x10e   :  { %10374 = vmatmul.mubr.bf16.vlgmr.msra.gmra.mrb[0].mxu0 %v11015_v43 }
 0x10f   :  { %10377 = vmatprep.mubr.bf16.mxu0 %v11016_v44  ;;  %10934 = vmatpush3.bf16.msra.mxu0 %v10931_v42 }
 0x110   :  { %10936 = vmatprep.subr.bf16.mxu0 %v10935_v62 }
 0x116   :  { %10378 = vmatmul.mubr.bf16.gmra.mrb[4].mxu0 %v11017_v45 }
 0x117   :  { %10381 = vmatprep.mubr.bf16.mxu0 %v11018_v46 }
 0x11e   :  { %10382 = vmatmul.mubr.bf16.gmra.mrb[8].mxu0 %v11019_v47  ;;  %v12557_v47 = vpack.c.bf16 %v3804_v41, %v3803_v40 }
 0x11f   :  { %10385 = vmatprep.mubr.bf16.mxu0 %v11020_v48 }
 0x126   :  { %10386 = vmatmul.mubr.bf16.gmra.mrb[12].mxu0 %v11021_v49 }
 0x127   :  { %10389 = vmatprep.mubr.bf16.mxu0 %v11022_v50 }
 0x12e   :  { %10390 = vmatmul.mubr.bf16.gmra.mrb[16].mxu0 %v11023_v51 }
 0x12f   :  { %10393 = vmatprep.mubr.bf16.mxu0 %v11024_v52 }
 0x136   :  { %10394 = vmatmul.mubr.bf16.gmra.mrb[20].mxu0 %v11025_v53 }
 0x137   :  { %10397 = vmatprep.mubr.bf16.mxu0 %v11026_v54 }
 0x13e   :  { %10398 = vmatmul.mubr.bf16.gmra.mrb[24].mxu0 %v11027_v55 }
 0x13f   :  { %10401 = vmatprep.mubr.bf16.mxu0 %v11028_v56 }
 0x146   :  { %10402 = vmatmul.mubr.bf16.gmra.mrb[28].mxu0 %v11029_v57 }
 0x147   :  { %10405 = vmatprep.mubr.bf16.mxu0 %v11030_v58 }
 0x14e   :  { %10406 = vmatmul.mubr.bf16.gmra.mrb[32].mxu0 %v11031_v59 }
 0x1e1   :  { %v10375_v4 = vpop.f32.mrb[0].mxu0 }
 0x1e2   :  { %v2627_v5 = vadd.f32 %v10375_v4, %v12534_v3  ;;  %v2618_v6 = vpop.f32.mrb[1].mxu0 }
 0x1e3   :  { %v2619_v7 = vadd.f32 %v12534_v3, %v2618_v6  ;;  %v10376_v8 = vpop.f32.mrb[2].mxu0 }
 0x1e4   :  { %v2763_v9 = vmax.f32 %v2627_v5, 0.0  ;;  %v2630_v10 = vadd.f32 %v10376_v8, %v12534_v3  ;;  %v2621_v11 = vpop.f32.mrb[3].mxu0 }
 0x1e5   :  { %v2761_v12 = vmax.f32 %v2619_v7, 0.0  ;;  %v2622_v13 = vadd.f32 %v12534_v3, %v2621_v11 }
 0x1e6   :  { %2800 = vst.msk [vmem:[#allocation2 + $0x10] sm:$0xff] %vm2797_vm0, %v2763_v9  ;;  %v2764_v14 = vmax.f32 %v2630_v10, 0.0 }
 0x1e7   :  { %2798 = vst.msk [vmem:[#allocation2] sm:$0xff] %vm2797_vm0, %v2761_v12  ;;  %v2762_v31 = vmax.f32 %v2622_v13, 0.0 }
 0x1e8   :  { %2801 = vst.msk [vmem:[#allocation2 + $0x18] sm:$0xff] %vm2797_vm0, %v2764_v14 }
 0x1e9   :  { %2799 = vst.msk [vmem:[#allocation2 + $0x8] sm:$0xff] %vm2797_vm0, %v2762_v31  ;;  %v10379_v32 = vpop.f32.mrb[4].mxu0 }
 0x1ea   :  { %v2643_v33 = vadd.f32 %v10379_v32, %v12534_v3  ;;  %v2634_v34 = vpop.f32.mrb[5].mxu0 }
 0x1eb   :  { %v2635_v35 = vadd.f32 %v12534_v3, %v2634_v34  ;;  %v10380_v36 = vpop.f32.mrb[6].mxu0 }
 0x1ec   :  { %v2767_v37 = vmax.f32 %v2643_v33, 0.0  ;;  %v2646_v38 = vadd.f32 %v10380_v36, %v12534_v3  ;;  %v2637_v39 = vpop.f32.mrb[7].mxu0 }
 0x1ed   :  { %v2765_v42 = vmax.f32 %v2635_v35, 0.0  ;;  %v2638_v43 = vadd.f32 %v12534_v3, %v2637_v39  ;;  %v2843_v50 = vld [vmem:[#allocation2 + $0x10] sm:$0xff] }
 0x1ee   :  { %2804 = vst.msk [vmem:[#allocation2 + $0x30] sm:$0xff] %vm2797_vm0, %v2767_v37  ;;  %v2768_v44 = vmax.f32 %v2646_v38, 0.0  ;;  %v2841_v45 = vld [vmem:[#allocation2] sm:$0xff] }
 0x1ef   :  { %2802 = vst.msk [vmem:[#allocation2 + $0x20] sm:$0xff] %vm2797_vm0, %v2765_v42  ;;  %v2766_v46 = vmax.f32 %v2638_v43, 0.0  ;;  %10413 = vmatprep.mubr.msk.f32.mxu0 %vm2797_vm0, %v2841_v45  ;;  %v12567_v58 = vld [vmem:[#allocation2 + $0x18] sm:$0xff] }
 0x1f0   :  { %2805 = vst.msk [vmem:[#allocation2 + $0x38] sm:$0xff] %vm2797_vm0, %v2768_v44  ;;  %v2842_v48 = vld [vmem:[#allocation2 + $0x8] sm:$0xff]  ;;  %v3270_v16 = vld [vmem:[#allocation2 + $0x12] sm:$0xff] }
 0x1f1   :  { %2803 = vst.msk [vmem:[#allocation2 + $0x28] sm:$0xff] %vm2797_vm0, %v2766_v46  ;;  %v10383_v49 = vpop.f32.mrb[8].mxu0  ;;  %10414 = vmatmul.mubr.msk.f32.vlgmr.msra.gmra.mrb[36].mxu0 %vm2797_vm0, %v2842_v48  ;;  %v3268_v18 = vld [vmem:[#allocation2 + $0x2] sm:$0xff]  ;;  %v3269_v25 = vld [vmem:[#allocation2 + $0xa] sm:$0xff] }
 0x1f2   :  { %v2659_v51 = vadd.f32 %v10383_v49, %v12534_v3  ;;  %10938 = vmatpush3.bf16.msra.mxu0 %v10935_v62  ;;  %v2650_v52 = vpop.f32.mrb[9].mxu0  ;;  %10416 = vmatprep.mubr.msk.f32.mxu0 %vm2797_vm0, %v2843_v50 }
 0x1f3   :  { %v2651_v53 = vadd.f32 %v12534_v3, %v2650_v52  ;;  %v10384_v54 = vpop.f32.mrb[10].mxu0  ;;  %10940 = vmatprep.subr.bf16.mxu0 %v12557_v47 }
 0x1f4   :  { %v2771_v55 = vmax.f32 %v2659_v51, 0.0  ;;  %v2662_v56 = vadd.f32 %v10384_v54, %v12534_v3  ;;  %v2653_v57 = vpop.f32.mrb[11].mxu0 }
 0x1f5   :  { %v2769_v59 = vmax.f32 %v2651_v53, 0.0  ;;  %v2654_v60 = vadd.f32 %v12534_v3, %v2653_v57  ;;  %10417 = vmatmul.mubr.msk.f32.gmra.mrb[38].mxu0 %vm2797_vm0, %v12567_v58  ;;  %v12584_v4 = vld [vmem:[#allocation2 + $0x30] sm:$0xff] }
 0x1f6   :  { %2808 = vst.msk [vmem:[#allocation2 + $0x50] sm:$0xff] %vm2797_vm0, %v2771_v55  ;;  %v2772_v61 = vmax.f32 %v2662_v56, 0.0  ;;  %v12573_v62 = vld [vmem:[#allocation2 + $0x20] sm:$0xff] }
 0x1f7   :  { %2806 = vst.msk [vmem:[#allocation2 + $0x40] sm:$0xff] %vm2797_vm0, %v2769_v59  ;;  %v2770_v63 = vmax.f32 %v2654_v60, 0.0  ;;  %10419 = vmatprep.mubr.msk.f32.mxu0 %vm2797_vm0, %v12573_v62  ;;  %v12591_v12 = vld [vmem:[#allocation2 + $0x38] sm:$0xff] }
 0x1f8   :  { %2809 = vst.msk [vmem:[#allocation2 + $0x58] sm:$0xff] %vm2797_vm0, %v2772_v61  ;;  %v12579_v0 = vld [vmem:[#allocation2 + $0x28] sm:$0xff] }
 0x1f9   :  { %2807 = vst.msk [vmem:[#allocation2 + $0x48] sm:$0xff] %vm2797_vm0, %v2770_v63  ;;  %v10387_v1 = vpop.f32.mrb[12].mxu0  ;;  %10420 = vmatmul.mubr.msk.f32.gmra.mrb[40].mxu0 %vm2797_vm0, %v12579_v0  ;;  %v12863_v19 = vld [vmem:[#allocation2 + $0x22] sm:$0xff] }
 0x1fa   :  { %v2675_v5 = vadd.f32 %v10387_v1, %v12534_v3  ;;  %v2666_v6 = vpop.f32.mrb[13].mxu0  ;;  %10422 = vmatprep.mubr.msk.f32.mxu0 %vm2797_vm0, %v12584_v4 }
 0x1fb   :  { %v2667_v7 = vadd.f32 %v12534_v3, %v2666_v6  ;;  %v10388_v8 = vpop.f32.mrb[14].mxu0  ;;  %v5300_v6 = vld [vmem:[%s14310_s3 + $0x50] sm:$0xff] }
 0x1fc   :  { %v2775_v9 = vmax.f32 %v2675_v5, 0.0  ;;  %v2678_v10 = vadd.f32 %v10388_v8, %v12534_v3  ;;  %v2669_v11 = vpop.f32.mrb[15].mxu0 }
 0x1fd   :  { %v2773_v13 = vmax.f32 %v2667_v7, 0.0  ;;  %v2670_v14 = vadd.f32 %v12534_v3, %v2669_v11  ;;  %10423 = vmatmul.mubr.msk.f32.gmra.mrb[42].mxu0 %vm2797_vm0, %v12591_v12  ;;  %v12608_v36 = vld [vmem:[#allocation2 + $0x50] sm:$0xff]  ;;  %v5301_v7 = vld [vmem:[%s14310_s3 + $0x58] sm:$0xff] }
 0x1fe   :  { %2812 = vst.msk [vmem:[#allocation2 + $0x70] sm:$0xff] %vm2797_vm0, %v2775_v9  ;;  %v2776_v31 = vmax.f32 %v2678_v10, 0.0  ;;  %v12597_v32 = vld [vmem:[#allocation2 + $0x40] sm:$0xff] }
 0x1ff   :  { %2810 = vst.msk [vmem:[#allocation2 + $0x60] sm:$0xff] %vm2797_vm0, %v2773_v13  ;;  %v2774_v33 = vmax.f32 %v2670_v14, 0.0  ;;  %10425 = vmatprep.mubr.msk.f32.mxu0 %vm2797_vm0, %v12597_v32  ;;  %v12615_v44 = vld [vmem:[#allocation2 + $0x58] sm:$0xff] }
 0x200   :  { %2813 = vst.msk [vmem:[#allocation2 + $0x78] sm:$0xff] %vm2797_vm0, %v2776_v31  ;;  %v12603_v34 = vld [vmem:[#allocation2 + $0x48] sm:$0xff]  ;;  %v12663_v31 = vpack.c.bf16 %v5301_v7, %v5300_v6  ;;  %v12883_v27 = vld [vmem:[#allocation2 + $0x3a] sm:$0xff] }
 0x201   :  { %2811 = vst.msk [vmem:[#allocation2 + $0x68] sm:$0xff] %vm2797_vm0, %v2774_v33  ;;  %v10391_v35 = vpop.f32.mrb[16].mxu0  ;;  %10426 = vmatmul.mubr.msk.f32.gmra.mrb[44].mxu0 %vm2797_vm0, %v12603_v34 }
 0x202   :  { %v2691_v37 = vadd.f32 %v10391_v35, %v12534_v3  ;;  %v2682_v38 = vpop.f32.mrb[17].mxu0  ;;  %10428 = vmatprep.mubr.msk.f32.mxu0 %vm2797_vm0, %v12608_v36 }
 0x203   :  { %v2683_v39 = vadd.f32 %v12534_v3, %v2682_v38  ;;  %v10392_v40 = vpop.f32.mrb[18].mxu0 }
 0x204   :  { %v2779_v41 = vmax.f32 %v2691_v37, 0.0  ;;  %v2694_v42 = vadd.f32 %v10392_v40, %v12534_v3  ;;  %v2685_v43 = vpop.f32.mrb[19].mxu0 }
 0x205   :  { %v2777_v45 = vmax.f32 %v2683_v39, 0.0  ;;  %v2686_v46 = vadd.f32 %v12534_v3, %v2685_v43  ;;  %10429 = vmatmul.mubr.msk.f32.gmra.mrb[46].mxu0 %vm2797_vm0, %v12615_v44  ;;  %v12632_v53 = vld [vmem:[#allocation2 + $0x70] sm:$0xff] }
 0x206   :  { %2816 = vst.msk [vmem:[#allocation2 + $0x90] sm:$0xff] %vm2797_vm0, %v2779_v41  ;;  %v2780_v48 = vmax.f32 %v2694_v42, 0.0  ;;  %v12621_v49 = vld [vmem:[#allocation2 + $0x60] sm:$0xff] }
 0x207   :  { %2814 = vst.msk [vmem:[#allocation2 + $0x80] sm:$0xff] %vm2797_vm0, %v2777_v45  ;;  %v2778_v50 = vmax.f32 %v2686_v46, 0.0  ;;  %10431 = vmatprep.mubr.msk.f32.mxu0 %vm2797_vm0, %v12621_v49  ;;  %v12639_v63 = vld [vmem:[#allocation2 + $0x78] sm:$0xff] }
 0x208   :  { %2817 = vst.msk [vmem:[#allocation2 + $0x98] sm:$0xff] %vm2797_vm0, %v2780_v48  ;;  %v12627_v51 = vld [vmem:[#allocation2 + $0x68] sm:$0xff] }
 0x209   :  { %2815 = vst.msk [vmem:[#allocation2 + $0x88] sm:$0xff] %vm2797_vm0, %v2778_v50  ;;  %v10395_v52 = vpop.f32.mrb[20].mxu0  ;;  %10432 = vmatmul.mubr.msk.f32.gmra.mrb[48].mxu0 %vm2797_vm0, %v12627_v51 }
 0x20a   :  { %v2707_v54 = vadd.f32 %v10395_v52, %v12534_v3  ;;  %v2698_v55 = vpop.f32.mrb[21].mxu0  ;;  %10434 = vmatprep.mubr.msk.f32.mxu0 %vm2797_vm0, %v12632_v53 }
 0x20b   :  { %v2699_v56 = vadd.f32 %v12534_v3, %v2698_v55  ;;  %v10396_v57 = vpop.f32.mrb[22].mxu0 }
 0x20c   :  { %v2783_v59 = vmax.f32 %v2707_v54, 0.0  ;;  %v2710_v60 = vadd.f32 %v10396_v57, %v12534_v3  ;;  %v2701_v61 = vpop.f32.mrb[23].mxu0 }
 0x20d   :  { %v2781_v1 = vmax.f32 %v2699_v56, 0.0  ;;  %v2702_v5 = vadd.f32 %v12534_v3, %v2701_v61  ;;  %10435 = vmatmul.mubr.msk.f32.gmra.mrb[50].mxu0 %vm2797_vm0, %v12639_v63  ;;  %v12670_v35 = vld [vmem:[#allocation2 + $0x90] sm:$0xff] }
 0x20e   :  { %2820 = vst.msk [vmem:[#allocation2 + $0xb0] sm:$0xff] %vm2797_vm0, %v2783_v59  ;;  %v2784_v8 = vmax.f32 %v2710_v60, 0.0  ;;  %v12651_v9 = vld [vmem:[#allocation2 + $0x80] sm:$0xff] }
 0x20f   :  { %2818 = vst.msk [vmem:[#allocation2 + $0xa0] sm:$0xff] %vm2797_vm0, %v2781_v1  ;;  %v2782_v10 = vmax.f32 %v2702_v5, 0.0  ;;  %10437 = vmatprep.mubr.msk.f32.mxu0 %vm2797_vm0, %v12651_v9  ;;  %v12677_v39 = vld [vmem:[#allocation2 + $0x92] sm:$0xff] }
 0x210   :  { %2821 = vst.msk [vmem:[#allocation2 + $0xb8] sm:$0xff] %vm2797_vm0, %v2784_v8  ;;  %v12657_v11 = vld [vmem:[#allocation2 + $0x88] sm:$0xff]  ;;  %v12684_v46 = vld [vmem:[#allocation2 + $0x98] sm:$0xff] }
 0x211   :  { %v12659_v13 = vld [vmem:[#allocation2 + $0x82] sm:$0xff]  ;;  %v12661_v14 = vld [vmem:[#allocation2 + $0x8a] sm:$0xff]  ;;  %2819 = vst.msk [vmem:[#allocation2 + $0xa8] sm:$0xff] %vm2797_vm0, %v2782_v10  ;;  %v10399_v33 = vpop.f32.mrb[24].mxu0  ;;  %10438 = vmatmul.mubr.msk.f32.gmra.mrb[52].mxu0 %vm2797_vm0, %v12657_v11 }
 0x212   :  { %10495 = vmatprep.mubr.msk.f32.mxu1 %vm2797_vm0, %v12659_v13  ;;  %v2723_v37 = vadd.f32 %v10399_v33, %v12534_v3  ;;  %v2714_v38 = vpop.f32.mrb[25].mxu0  ;;  %10440 = vmatprep.mubr.msk.f32.mxu0 %vm2797_vm0, %v12670_v35 }
 0x213   :  { %10496 = vmatmul.mubr.msk.f32.vlgmr.msra.gmra.mrb[0].mxu1 %vm2797_vm0, %v12661_v14  ;;  %v2715_v40 = vadd.f32 %v12534_v3, %v2714_v38  ;;  %v10400_v41 = vpop.f32.mrb[26].mxu0 }
 0x214   :  { %10498 = vmatprep.mubr.msk.f32.mxu1 %vm2797_vm0, %v12677_v39  ;;  %10946 = vmatpush3.bf16.msra.mxu1 %v12528_v2  ;;  %v2787_v42 = vmax.f32 %v2723_v37, 0.0  ;;  %v2726_v43 = vadd.f32 %v10400_v41, %v12534_v3  ;;  %v2717_v45 = vpop.f32.mrb[27].mxu0 }
 0x215   :  { %10952 = vmatprep.subr.bf16.mxu1 %v12663_v31  ;;  %v2785_v48 = vmax.f32 %v2715_v40, 0.0  ;;  %v2718_v50 = vadd.f32 %v12534_v3, %v2717_v45  ;;  %10441 = vmatmul.mubr.msk.f32.gmra.mrb[54].mxu0 %vm2797_vm0, %v12684_v46  ;;  %v12710_v60 = vld [vmem:[#allocation2 + $0xb0] sm:$0xff] }
 0x216   :  { %2824 = vst.msk [vmem:[#allocation2 + $0xd0] sm:$0xff] %vm2797_vm0, %v2787_v42  ;;  %v2788_v52 = vmax.f32 %v2726_v43, 0.0  ;;  %v12691_v54 = vld [vmem:[#allocation2 + $0xa0] sm:$0xff] }
 0x217   :  { %v12693_v2 = vld [vmem:[#allocation2 + $0x9a] sm:$0xff]  ;;  %2822 = vst.msk [vmem:[#allocation2 + $0xc0] sm:$0xff] %vm2797_vm0, %v2785_v48  ;;  %v2786_v55 = vmax.f32 %v2718_v50, 0.0  ;;  %10443 = vmatprep.mubr.msk.f32.mxu0 %vm2797_vm0, %v12691_v54  ;;  %v12720_v8 = vld [vmem:[#allocation2 + $0xb2] sm:$0xff] }
 0x218   :  { %10499 = vmatmul.mubr.msk.f32.gmra.mrb[2].mxu1 %vm2797_vm0, %v12693_v2  ;;  %2825 = vst.msk [vmem:[#allocation2 + $0xd8] sm:$0xff] %vm2797_vm0, %v2788_v52  ;;  %v12701_v56 = vld [vmem:[#allocation2 + $0xa8] sm:$0xff]  ;;  %v12725_v38 = vld [vmem:[#allocation2 + $0xb8] sm:$0xff] }
 0x219   :  { %v12703_v57 = vld [vmem:[#allocation2 + $0xa2] sm:$0xff]  ;;  %2823 = vst.msk [vmem:[#allocation2 + $0xc8] sm:$0xff] %vm2797_vm0, %v2786_v55  ;;  %v10403_v59 = vpop.f32.mrb[28].mxu0  ;;  %10444 = vmatmul.mubr.msk.f32.gmra.mrb[56].mxu0 %vm2797_vm0, %v12701_v56  ;;  %v12715_v5 = vld [vmem:[#allocation2 + $0xaa] sm:$0xff] }
 0x21a   :  { %10501 = vmatprep.mubr.msk.f32.mxu1 %vm2797_vm0, %v12703_v57  ;;  %v2739_v61 = vadd.f32 %v10403_v59, %v12534_v3  ;;  %v2730_v1 = vpop.f32.mrb[29].mxu0  ;;  %10446 = vmatprep.mubr.msk.f32.mxu0 %vm2797_vm0, %v12710_v60 }
 0x21b   :  { %v2731_v6 = vadd.f32 %v12534_v3, %v2730_v1  ;;  %v10404_v7 = vpop.f32.mrb[30].mxu0 }
 0x21c   :  { %10502 = vmatmul.mubr.msk.f32.gmra.mrb[4].mxu1 %vm2797_vm0, %v12715_v5  ;;  %v2791_v10 = vmax.f32 %v2739_v61, 0.0  ;;  %v2742_v33 = vadd.f32 %v10404_v7, %v12534_v3  ;;  %v2733_v37 = vpop.f32.mrb[31].mxu0 }
 0x21d   :  { %10504 = vmatprep.mubr.msk.f32.mxu1 %vm2797_vm0, %v12720_v8  ;;  %v2789_v40 = vmax.f32 %v2731_v6, 0.0  ;;  %v2734_v41 = vadd.f32 %v12534_v3, %v2733_v37  ;;  %10447 = vmatmul.mubr.msk.f32.gmra.mrb[58].mxu0 %vm2797_vm0, %v12725_v38  ;;  %v12750_v59 = vld [vmem:[#allocation2 + $0xd0] sm:$0xff] }
 0x21e   :  { %2828 = vst.msk [vmem:[#allocation2 + $0xf0] sm:$0xff] %vm2797_vm0, %v2791_v10  ;;  %v2792_v42 = vmax.f32 %v2742_v33, 0.0  ;;  %v12731_v43 = vld [vmem:[#allocation2 + $0xc0] sm:$0xff] }
 0x21f   :  { %v12733_v45 = vld [vmem:[#allocation2 + $0xba] sm:$0xff]  ;;  %2826 = vst.msk [vmem:[#allocation2 + $0xe0] sm:$0xff] %vm2797_vm0, %v2789_v40  ;;  %v2790_v48 = vmax.f32 %v2734_v41, 0.0  ;;  %10449 = vmatprep.mubr.msk.f32.mxu0 %vm2797_vm0, %v12731_v43  ;;  %v12760_v33 = vld [vmem:[#allocation2 + $0xd2] sm:$0xff] }
 0x220   :  { %10505 = vmatmul.mubr.msk.f32.gmra.mrb[6].mxu1 %vm2797_vm0, %v12733_v45  ;;  %2829 = vst.msk [vmem:[#allocation2 + $0xf8] sm:$0xff] %vm2797_vm0, %v2792_v42  ;;  %v12741_v50 = vld [vmem:[#allocation2 + $0xc8] sm:$0xff]  ;;  %v12765_v42 = vld [vmem:[#allocation2 + $0xd8] sm:$0xff] }
 0x221   :  { %v12743_v52 = vld [vmem:[#allocation2 + $0xc2] sm:$0xff]  ;;  %2827 = vst.msk [vmem:[#allocation2 + $0xe8] sm:$0xff] %vm2797_vm0, %v2790_v48  ;;  %v10407_v55 = vpop.f32.mrb[32].mxu0  ;;  %10450 = vmatmul.mubr.msk.f32.gmra.mrb[60].mxu0 %vm2797_vm0, %v12741_v50  ;;  %v12755_v6 = vld [vmem:[#allocation2 + $0xca] sm:$0xff] }
 0x222   :  { %10507 = vmatprep.mubr.msk.f32.mxu1 %vm2797_vm0, %v12743_v52  ;;  %v2755_v61 = vadd.f32 %v10407_v55, %v12534_v3  ;;  %v2746_v1 = vpop.f32.mrb[33].mxu0  ;;  %10452 = vmatprep.mubr.msk.f32.mxu0 %vm2797_vm0, %v12750_v59 }
 0x223   :  { %v2747_v7 = vadd.f32 %v12534_v3, %v2746_v1  ;;  %v10408_v10 = vpop.f32.mrb[34].mxu0 }
 0x224   :  { %10508 = vmatmul.mubr.msk.f32.gmra.mrb[8].mxu1 %vm2797_vm0, %v12755_v6  ;;  %v2795_v37 = vmax.f32 %v2755_v61, 0.0  ;;  %v2758_v40 = vadd.f32 %v10408_v10, %v12534_v3  ;;  %v2749_v41 = vpop.f32.mrb[35].mxu0 }
 0x225   :  { %10510 = vmatprep.mubr.msk.f32.mxu1 %vm2797_vm0, %v12760_v33  ;;  %v2793_v48 = vmax.f32 %v2747_v7, 0.0  ;;  %v2750_v55 = vadd.f32 %v12534_v3, %v2749_v41  ;;  %10453 = vmatmul.mubr.msk.f32.gmra.mrb[62].mxu0 %vm2797_vm0, %v12765_v42 }
 0x226   :  { %2832 = vst.msk [vmem:[#allocation2 + $0x110] sm:$0xff] %vm2797_vm0, %v2795_v37  ;;  %v2796_v1 = vmax.f32 %v2758_v40, 0.0  ;;  %v12771_v22 = vld [vmem:[#allocation2 + $0xe0] sm:$0xff]  ;;  %v12790_v37 = vld [vmem:[#allocation2 + $0xf0] sm:$0xff] }
 0x227   :  { %v12773_v61 = vld [vmem:[#allocation2 + $0xda] sm:$0xff]  ;;  %2830 = vst.msk [vmem:[#allocation2 + $0x100] sm:$0xff] %vm2797_vm0, %v2793_v48  ;;  %v2794_v10 = vmax.f32 %v2750_v55, 0.0  ;;  %10455 = vmatprep.mubr.msk.f32.mxu0 %vm2797_vm0, %v12771_v22  ;;  %v12798_v41 = vld [vmem:[#allocation2 + $0xf2] sm:$0xff] }
 0x228   :  { %10511 = vmatmul.mubr.msk.f32.gmra.mrb[10].mxu1 %vm2797_vm0, %v12773_v61  ;;  %2833 = vst.msk [vmem:[#allocation2 + $0x118] sm:$0xff] %vm2797_vm0, %v2796_v1  ;;  %v12781_v3 = vld [vmem:[#allocation2 + $0xe8] sm:$0xff]  ;;  %v12802_v48 = vld [vmem:[#allocation2 + $0xf8] sm:$0xff] }
 0x229   :  { %v12783_v7 = vld [vmem:[#allocation2 + $0xe2] sm:$0xff]  ;;  %2831 = vst.msk [vmem:[#allocation2 + $0x108] sm:$0xff] %vm2797_vm0, %v2794_v10  ;;  %10456 = vmatmul.mubr.msk.f32.gmra.mrb[64].mxu0 %vm2797_vm0, %v12781_v3  ;;  %v12794_v40 = vld [vmem:[#allocation2 + $0xea] sm:$0xff] }
 0x22a   :  { %10513 = vmatprep.mubr.msk.f32.mxu1 %vm2797_vm0, %v12783_v7  ;;  %10458 = vmatprep.mubr.msk.f32.mxu0 %vm2797_vm0, %v12790_v37 }
 0x22c   :  { %10514 = vmatmul.mubr.msk.f32.gmra.mrb[12].mxu1 %vm2797_vm0, %v12794_v40 }
 0x22d   :  { %10516 = vmatprep.mubr.msk.f32.mxu1 %vm2797_vm0, %v12798_v41  ;;  %10459 = vmatmul.mubr.msk.f32.gmra.mrb[66].mxu0 %vm2797_vm0, %v12802_v48  ;;  %v12822_v21 = vld [vmem:[#allocation2 + $0x110] sm:$0xff] }
 0x22e   :  { %v12806_v55 = vld [vmem:[#allocation2 + $0x100] sm:$0xff] }
 0x22f   :  { %v12808_v1 = vld [vmem:[#allocation2 + $0xfa] sm:$0xff]  ;;  %10461 = vmatprep.mubr.msk.f32.mxu0 %vm2797_vm0, %v12806_v55  ;;  %v12830_v20 = vld [vmem:[#allocation2 + $0x112] sm:$0xff] }
 0x230   :  { %10517 = vmatmul.mubr.msk.f32.gmra.mrb[14].mxu1 %vm2797_vm0, %v12808_v1  ;;  %v12814_v10 = vld [vmem:[#allocation2 + $0x108] sm:$0xff]  ;;  %v12834_v28 = vld [vmem:[#allocation2 + $0x118] sm:$0xff] }
 0x231   :  { %v12816_v30 = vld [vmem:[#allocation2 + $0x102] sm:$0xff]  ;;  %10462 = vmatmul.mubr.msk.f32.gmra.mrb[68].mxu0 %vm2797_vm0, %v12814_v10  ;;  %v12826_v29 = vld [vmem:[#allocation2 + $0x10a] sm:$0xff]  ;;  %v12845_v26 = vld [vmem:[#allocation2 + $0x11a] sm:$0xff] }
 0x232   :  { %10519 = vmatprep.mubr.msk.f32.mxu1 %vm2797_vm0, %v12816_v30  ;;  %10464 = vmatprep.mubr.msk.f32.mxu0 %vm2797_vm0, %v12822_v21 }
 0x234   :  { %10520 = vmatmul.mubr.msk.f32.gmra.mrb[16].mxu1 %vm2797_vm0, %v12826_v29 }
 0x235   :  { %10522 = vmatprep.mubr.msk.f32.mxu1 %vm2797_vm0, %v12830_v20  ;;  %10465 = vmatmul.mubr.msk.f32.gmra.mrb[70].mxu0 %vm2797_vm0, %v12834_v28 }
 0x236   :  { %10471 = vmatprep.mubr.msk.f32.mxu0 %vm2797_vm0, %v3268_v18  ;;  %v12858_v18 = vld [vmem:[#allocation2 + $0x1a] sm:$0xff] }
 0x238   :  { %10523 = vmatmul.mubr.msk.f32.gmra.mrb[18].mxu1 %vm2797_vm0, %v12845_v26 }
 0x239   :  { %10587 = vmatprep.mubr.msk.f32.mxu1 %vm2797_vm0, %v12567_v58  ;;  %10472 = vmatmul.mubr.msk.f32.vlgmr.msra.gmra.mrb[72].mxu0 %vm2797_vm0, %v3269_v25  ;;  %v12875_v25 = vld [vmem:[#allocation2 + $0x32] sm:$0xff] }
 0x23a   :  { %10942 = vmatpush3.bf16.msra.mxu0 %v12557_v47  ;;  %10474 = vmatprep.mubr.msk.f32.mxu0 %vm2797_vm0, %v3270_v16  ;;  %v12871_v16 = vld [vmem:[#allocation2 + $0x2a] sm:$0xff]  ;;  %v12887_v47 = vld [vmem:[#allocation2 + $0x42] sm:$0xff] }
 0x23b   :  { %10948 = vmatprep.subr.bf16.mxu0 %v10947_v17  ;;  %v6298_v58 = vld [vmem:[%s14310_s3 + $0x70] sm:$0xff] }
 0x23c   :  { %10588 = vmatmul.mubr.msk.f32.vlgmr.msra.gmra.mrb[20].mxu1 %vm2797_vm0, %v12573_v62  ;;  %v6299_v62 = vld [vmem:[%s14310_s3 + $0x78] sm:$0xff] }
 0x23d   :  { %10590 = vmatprep.mubr.msk.f32.mxu1 %vm2797_vm0, %v12579_v0  ;;  %10954 = vmatpush3.bf16.msra.mxu1 %v12663_v31  ;;  %v12901_v0 = vld [vmem:[#allocation2 + $0x4a] sm:$0xff]  ;;  %v3769_v31 = vld [vmem:[#allocation2 + $0x14] sm:$0xff] }
 0x23e   :  { %10475 = vmatmul.mubr.msk.f32.gmra.mrb[74].mxu0 %vm2797_vm0, %v12858_v18 }
 0x23f   :  { %10477 = vmatprep.mubr.msk.f32.mxu0 %vm2797_vm0, %v12863_v19 }
 0x240   :  { %10591 = vmatmul.mubr.msk.f32.gmra.mrb[22].mxu1 %vm2797_vm0, %v12584_v4  ;;  %v12903_v4 = vpack.c.bf16 %v6299_v62, %v6298_v58  ;;  %v3771_v58 = vld [vmem:[#allocation2 + $0x24] sm:$0xff] }
 0x241   :  { %10593 = vmatprep.mubr.msk.f32.mxu1 %vm2797_vm0, %v12591_v12  ;;  %v12907_v12 = vld [vmem:[#allocation2 + $0x52] sm:$0xff]  ;;  %v4300_v62 = vld [vmem:[#allocation2 + $0x128] sm:$0xff] }
 0x242   :  { %10478 = vmatmul.mubr.msk.f32.gmra.mrb[76].mxu0 %vm2797_vm0, %v12871_v16  ;;  %10960 = vmatprep.subr.bf16.mxu1 %v12903_v4 }
 0x243   :  { %10480 = vmatprep.mubr.msk.f32.mxu0 %vm2797_vm0, %v12875_v25 }
 0x244   :  { %10594 = vmatmul.mubr.msk.f32.gmra.mrb[24].mxu1 %vm2797_vm0, %v12597_v32  ;;  %v12916_v32 = vld [vmem:[#allocation2 + $0x5a] sm:$0xff] }
 0x245   :  { %10596 = vmatprep.mubr.msk.f32.mxu1 %vm2797_vm0, %v12603_v34  ;;  %v12920_v34 = vld [vmem:[#allocation2 + $0x62] sm:$0xff] }
 0x246   :  { %10481 = vmatmul.mubr.msk.f32.gmra.mrb[78].mxu0 %vm2797_vm0, %v12883_v27 }
 0x247   :  { %10483 = vmatprep.mubr.msk.f32.mxu0 %vm2797_vm0, %v12887_v47 }
 0x248   :  { %10597 = vmatmul.mubr.msk.f32.gmra.mrb[26].mxu1 %vm2797_vm0, %v12608_v36  ;;  %v12928_v36 = vld [vmem:[#allocation2 + $0x6a] sm:$0xff] }
 0x249   :  { %10599 = vmatprep.mubr.msk.f32.mxu1 %vm2797_vm0, %v12615_v44  ;;  %v12932_v44 = vld [vmem:[#allocation2 + $0x72] sm:$0xff] }
 0x24a   :  { %10484 = vmatmul.mubr.msk.f32.gmra.mrb[80].mxu0 %vm2797_vm0, %v12901_v0 }
 0x24b   :  { %10486 = vmatprep.mubr.msk.f32.mxu0 %vm2797_vm0, %v12907_v12 }
 0x24c   :  { %10600 = vmatmul.mubr.msk.f32.gmra.mrb[28].mxu1 %vm2797_vm0, %v12621_v49  ;;  %v12940_v49 = vld [vmem:[#allocation2 + $0x7a] sm:$0xff] }
 0x24d   :  { %10602 = vmatprep.mubr.msk.f32.mxu1 %vm2797_vm0, %v12627_v51  ;;  %v5799_v51 = vld [vmem:[%s14310_s3 + $0x60] sm:$0xff] }
 0x24e   :  { %10487 = vmatmul.mubr.msk.f32.gmra.mrb[82].mxu0 %vm2797_vm0, %v12916_v32 }
 0x24f   :  { %10489 = vmatprep.mubr.msk.f32.mxu0 %vm2797_vm0, %v12920_v34 }
 0x250   :  { %10603 = vmatmul.mubr.msk.f32.gmra.mrb[30].mxu1 %vm2797_vm0, %v12632_v53  ;;  %v5800_v53 = vld [vmem:[%s14310_s3 + $0x68] sm:$0xff] }
 0x251   :  { %10605 = vmatprep.mubr.msk.f32.mxu1 %vm2797_vm0, %v12639_v63  ;;  %v3767_v63 = vld [vmem:[#allocation2 + $0x4] sm:$0xff] }
 0x252   :  { %10490 = vmatmul.mubr.msk.f32.gmra.mrb[84].mxu0 %vm2797_vm0, %v12928_v36 }
 0x253   :  { %10492 = vmatprep.mubr.msk.f32.mxu0 %vm2797_vm0, %v12932_v44 }
 0x254   :  { %10606 = vmatmul.mubr.msk.f32.gmra.mrb[32].mxu1 %vm2797_vm0, %v12651_v9  ;;  %v12953_v9 = vpack.c.bf16 %v5800_v53, %v5799_v51  ;;  %v4301_v51 = vld [vmem:[#allocation2 + $0x130] sm:$0xff] }
 0x255   :  { %10608 = vmatprep.mubr.msk.f32.mxu1 %vm2797_vm0, %v12657_v11  ;;  %v3768_v11 = vld [vmem:[#allocation2 + $0xc] sm:$0xff]  ;;  %v3789_v53 = vld [vmem:[#allocation2 + $0xb4] sm:$0xff] }
 0x256   :  { %10493 = vmatmul.mubr.msk.f32.gmra.mrb[86].mxu0 %vm2797_vm0, %v12940_v49 }
 0x257   :  { %10529 = vmatprep.mubr.msk.f32.mxu0 %vm2797_vm0, %v3767_v63  ;;  %v3790_v63 = vld [vmem:[#allocation2 + $0xbc] sm:$0xff] }
 0x258   :  { %10609 = vmatmul.mubr.msk.f32.gmra.mrb[34].mxu1 %vm2797_vm0, %v12670_v35  ;;  %v3770_v35 = vld [vmem:[#allocation2 + $0x1c] sm:$0xff] }
 0x259   :  { %10611 = vmatprep.mubr.msk.f32.mxu1 %vm2797_vm0, %v12684_v46  ;;  %v3773_v46 = vld [vmem:[#allocation2 + $0x34] sm:$0xff] }
 0x25a   :  { %10530 = vmatmul.mubr.msk.f32.vlgmr.msra.gmra.mrb[88].mxu0 %vm2797_vm0, %v3768_v11  ;;  %v3791_v11 = vld [vmem:[#allocation2 + $0xc4] sm:$0xff] }
 0x25b   :  { %10950 = vmatpush3.bf16.msra.mxu0 %v10947_v17  ;;  %10532 = vmatprep.mubr.msk.f32.mxu0 %vm2797_vm0, %v3769_v31  ;;  %v3772_v17 = vld [vmem:[#allocation2 + $0x2c] sm:$0xff] }
 0x25c   :  { %10612 = vmatmul.mubr.msk.f32.gmra.mrb[36].mxu1 %vm2797_vm0, %v12691_v54  ;;  %10956 = vmatprep.subr.bf16.mxu0 %v12953_v9  ;;  %v3774_v54 = vld [vmem:[#allocation2 + $0x3c] sm:$0xff]  ;;  %v3792_v31 = vld [vmem:[#allocation2 + $0xcc] sm:$0xff] }
 0x25d   :  { %10614 = vmatprep.mubr.msk.f32.mxu1 %vm2797_vm0, %v12701_v56  ;;  %v3775_v56 = vld [vmem:[#allocation2 + $0x44] sm:$0xff] }
 0x25e   :  { %10533 = vmatmul.mubr.msk.f32.gmra.mrb[90].mxu0 %vm2797_vm0, %v3770_v35 }
 0x25f   :  { %10535 = vmatprep.mubr.msk.f32.mxu0 %vm2797_vm0, %v3771_v58 }
 0x260   :  { %10615 = vmatmul.mubr.msk.f32.gmra.mrb[38].mxu1 %vm2797_vm0, %v12710_v60  ;;  %v3776_v60 = vld [vmem:[#allocation2 + $0x4c] sm:$0xff] }
 0x261   :  { %10617 = vmatprep.mubr.msk.f32.mxu1 %vm2797_vm0, %v12725_v38  ;;  %v3777_v38 = vld [vmem:[#allocation2 + $0x54] sm:$0xff] }
 0x262   :  { %10536 = vmatmul.mubr.msk.f32.gmra.mrb[92].mxu0 %vm2797_vm0, %v3772_v17 }
 0x263   :  { %10538 = vmatprep.mubr.msk.f32.mxu0 %vm2797_vm0, %v3773_v46 }
 0x264   :  { %10618 = vmatmul.mubr.msk.f32.gmra.mrb[40].mxu1 %vm2797_vm0, %v12731_v43  ;;  %v3778_v43 = vld [vmem:[#allocation2 + $0x5c] sm:$0xff] }
 0x265   :  { %10620 = vmatprep.mubr.msk.f32.mxu1 %vm2797_vm0, %v12741_v50  ;;  %v3779_v50 = vld [vmem:[#allocation2 + $0x64] sm:$0xff] }
 0x266   :  { %10539 = vmatmul.mubr.msk.f32.gmra.mrb[94].mxu0 %vm2797_vm0, %v3774_v54 }
 0x267   :  { %10541 = vmatprep.mubr.msk.f32.mxu0 %vm2797_vm0, %v3775_v56 }
 0x268   :  { %10621 = vmatmul.mubr.msk.f32.gmra.mrb[42].mxu1 %vm2797_vm0, %v12750_v59  ;;  %v3780_v59 = vld [vmem:[#allocation2 + $0x6c] sm:$0xff] }
 0x269   :  { %10623 = vmatprep.mubr.msk.f32.mxu1 %vm2797_vm0, %v12765_v42  ;;  %v3781_v42 = vld [vmem:[#allocation2 + $0x74] sm:$0xff] }
 0x26a   :  { %10542 = vmatmul.mubr.msk.f32.gmra.mrb[96].mxu0 %vm2797_vm0, %v3776_v60 }
 0x26b   :  { %10544 = vmatprep.mubr.msk.f32.mxu0 %vm2797_vm0, %v3777_v38 }
 0x26c   :  { %10624 = vmatmul.mubr.msk.f32.gmra.mrb[44].mxu1 %vm2797_vm0, %v12771_v22  ;;  %v3782_v22 = vld [vmem:[#allocation2 + $0x7c] sm:$0xff] }
 0x26d   :  { %10626 = vmatprep.mubr.msk.f32.mxu1 %vm2797_vm0, %v12781_v3  ;;  %v3783_v3 = vld [vmem:[#allocation2 + $0x84] sm:$0xff] }
 0x26e   :  { %10545 = vmatmul.mubr.msk.f32.gmra.mrb[98].mxu0 %vm2797_vm0, %v3778_v43 }
 0x26f   :  { %10547 = vmatprep.mubr.msk.f32.mxu0 %vm2797_vm0, %v3779_v50 }
 0x270   :  { %10627 = vmatmul.mubr.msk.f32.gmra.mrb[46].mxu1 %vm2797_vm0, %v12790_v37  ;;  %v3784_v37 = vld [vmem:[#allocation2 + $0x8c] sm:$0xff] }
 0x271   :  { %10629 = vmatprep.mubr.msk.f32.mxu1 %vm2797_vm0, %v12802_v48  ;;  %v4299_v48 = vld [vmem:[#allocation2 + $0x120] sm:$0xff] }
 0x272   :  { %10548 = vmatmul.mubr.msk.f32.gmra.mrb[100].mxu0 %vm2797_vm0, %v3780_v59 }
 0x273   :  { %10550 = vmatprep.mubr.msk.f32.mxu0 %vm2797_vm0, %v3781_v42 }
 0x274   :  { %10630 = vmatmul.mubr.msk.f32.gmra.mrb[48].mxu1 %vm2797_vm0, %v12806_v55  ;;  %v3785_v55 = vld [vmem:[#allocation2 + $0x94] sm:$0xff] }
 0x275   :  { %10632 = vmatprep.mubr.msk.f32.mxu1 %vm2797_vm0, %v12814_v10  ;;  %v3786_v10 = vld [vmem:[#allocation2 + $0x9c] sm:$0xff] }
 0x276   :  { %10551 = vmatmul.mubr.msk.f32.gmra.mrb[102].mxu0 %vm2797_vm0, %v3782_v22 }
 0x277   :  { %10553 = vmatprep.mubr.msk.f32.mxu0 %vm2797_vm0, %v3783_v3 }
 0x278   :  { %10633 = vmatmul.mubr.msk.f32.gmra.mrb[50].mxu1 %vm2797_vm0, %v12822_v21  ;;  %v3787_v21 = vld [vmem:[#allocation2 + $0xa4] sm:$0xff] }
 0x279   :  { %10635 = vmatprep.mubr.msk.f32.mxu1 %vm2797_vm0, %v12834_v28  ;;  %v3788_v28 = vld [vmem:[#allocation2 + $0xac] sm:$0xff] }
 0x27a   :  { %10554 = vmatmul.mubr.msk.f32.gmra.mrb[104].mxu0 %vm2797_vm0, %v3784_v37 }
 0x27b   :  { %10556 = vmatprep.mubr.msk.f32.mxu0 %vm2797_vm0, %v3785_v55 }
 0x27c   :  { %10636 = vmatmul.mubr.msk.f32.gmra.mrb[52].mxu1 %vm2797_vm0, %v4299_v48  ;;  %v6280_v48 = vld [vmem:[#allocation2 + $0xc2] sm:$0xff] }
 0x27d   :  { %10638 = vmatprep.mubr.msk.f32.mxu1 %vm2797_vm0, %v4300_v62  ;;  %v5766_v62 = vld [vmem:[#allocation2 + $0x48] sm:$0xff] }
 0x27e   :  { %10557 = vmatmul.mubr.msk.f32.gmra.mrb[106].mxu0 %vm2797_vm0, %v3786_v10 }
 0x27f   :  { %10559 = vmatprep.mubr.msk.f32.mxu0 %vm2797_vm0, %v3787_v21 }
 0x280   :  { %10639 = vmatmul.mubr.msk.f32.gmra.mrb[54].mxu1 %vm2797_vm0, %v4301_v51 }
 0x281   :  { %10703 = vmatprep.mubr.msk.f32.mxu1 %vm2797_vm0, %v3770_v35  ;;  %v3793_v35 = vld [vmem:[#allocation2 + $0xd4] sm:$0xff] }
 0x282   :  { %10560 = vmatmul.mubr.msk.f32.gmra.mrb[108].mxu0 %vm2797_vm0, %v3788_v28 }
 0x283   :  { %10562 = vmatprep.mubr.msk.f32.mxu0 %vm2797_vm0, %v3789_v53 }
 0x284   :  { %10704 = vmatmul.mubr.msk.f32.vlgmr.msra.gmra.mrb[56].mxu1 %vm2797_vm0, %v3771_v58  ;;  %v3795_v58 = vld [vmem:[#allocation2 + $0xe4] sm:$0xff] }
 0x285   :  { %10706 = vmatprep.mubr.msk.f32.mxu1 %vm2797_vm0, %v3772_v17  ;;  %10962 = vmatpush3.bf16.msra.mxu1 %v12903_v4  ;;  %v3794_v4 = vld [vmem:[#allocation2 + $0xdc] sm:$0xff]  ;;  %v3796_v17 = vld [vmem:[#allocation2 + $0xec] sm:$0xff] }
 0x286   :  { %10563 = vmatmul.mubr.msk.f32.gmra.mrb[110].mxu0 %vm2797_vm0, %v3790_v63 }
 0x287   :  { %10565 = vmatprep.mubr.msk.f32.mxu0 %vm2797_vm0, %v3791_v11 }
 0x288   :  { %10707 = vmatmul.mubr.msk.f32.gmra.mrb[58].mxu1 %vm2797_vm0, %v3773_v46  ;;  %v3797_v46 = vld [vmem:[#allocation2 + $0xf4] sm:$0xff] }
 0x289   :  { %10709 = vmatprep.mubr.msk.f32.mxu1 %vm2797_vm0, %v3774_v54  ;;  %v3798_v54 = vld [vmem:[#allocation2 + $0xfc] sm:$0xff] }
 0x28a   :  { %10566 = vmatmul.mubr.msk.f32.gmra.mrb[112].mxu0 %vm2797_vm0, %v3792_v31 }
 0x28b   :  { %10568 = vmatprep.mubr.msk.f32.mxu0 %vm2797_vm0, %v3793_v35 }
 0x28c   :  { %10710 = vmatmul.mubr.msk.f32.gmra.mrb[60].mxu1 %vm2797_vm0, %v3775_v56  ;;  %v3799_v56 = vld [vmem:[#allocation2 + $0x104] sm:$0xff] }
 0x28d   :  { %10712 = vmatprep.mubr.msk.f32.mxu1 %vm2797_vm0, %v3776_v60  ;;  %v3800_v60 = vld [vmem:[#allocation2 + $0x10c] sm:$0xff] }
 0x28e   :  { %10569 = vmatmul.mubr.msk.f32.gmra.mrb[114].mxu0 %vm2797_vm0, %v3794_v4 }
 0x28f   :  { %10571 = vmatprep.mubr.msk.f32.mxu0 %vm2797_vm0, %v3795_v58 }
 0x290   :  { %10713 = vmatmul.mubr.msk.f32.gmra.mrb[62].mxu1 %vm2797_vm0, %v3777_v38  ;;  %v3801_v38 = vld [vmem:[#allocation2 + $0x114] sm:$0xff] }
 0x291   :  { %10715 = vmatprep.mubr.msk.f32.mxu1 %vm2797_vm0, %v3778_v43  ;;  %v3802_v43 = vld [vmem:[#allocation2 + $0x11c] sm:$0xff] }
 0x292   :  { %10572 = vmatmul.mubr.msk.f32.gmra.mrb[116].mxu0 %vm2797_vm0, %v3796_v17 }
 0x293   :  { %10574 = vmatprep.mubr.msk.f32.mxu0 %vm2797_vm0, %v3797_v46 }
 0x294   :  { %10716 = vmatmul.mubr.msk.f32.gmra.mrb[64].mxu1 %vm2797_vm0, %v3779_v50  ;;  %v6797_v50 = vld [vmem:[%s14310_s3 + $0x80] sm:$0xff] }
 0x295   :  { %10718 = vmatprep.mubr.msk.f32.mxu1 %vm2797_vm0, %v3780_v59  ;;  %v6798_v59 = vld [vmem:[%s14310_s3 + $0x88] sm:$0xff] }
 0x296   :  { %10575 = vmatmul.mubr.msk.f32.gmra.mrb[118].mxu0 %vm2797_vm0, %v3798_v54 }
 0x297   :  { %10577 = vmatprep.mubr.msk.f32.mxu0 %vm2797_vm0, %v3799_v56 }
 0x298   :  { %10719 = vmatmul.mubr.msk.f32.gmra.mrb[66].mxu1 %vm2797_vm0, %v3781_v42  ;;  %v13053_v42 = vpack.c.bf16 %v6798_v59, %v6797_v50  ;;  %v6283_v50 = vld [vmem:[#allocation2 + $0xda] sm:$0xff] }
 0x299   :  { %10721 = vmatprep.mubr.msk.f32.mxu1 %vm2797_vm0, %v3782_v22 }
 0x29a   :  { %10578 = vmatmul.mubr.msk.f32.gmra.mrb[120].mxu0 %vm2797_vm0, %v3800_v60 }
 0x29b   :  { %10580 = vmatprep.mubr.msk.f32.mxu0 %vm2797_vm0, %v3801_v38 }
 0x29c   :  { %10722 = vmatmul.mubr.msk.f32.gmra.mrb[68].mxu1 %vm2797_vm0, %v3783_v3 }
 0x29d   :  { %10724 = vmatprep.mubr.msk.f32.mxu1 %vm2797_vm0, %v3784_v37  ;;  %v6279_v37 = vld [vmem:[#allocation2 + $0xba] sm:$0xff] }
 0x29e   :  { %10581 = vmatmul.mubr.msk.f32.gmra.mrb[122].mxu0 %vm2797_vm0, %v3802_v43 }
 0x29f   :  { %10645 = vmatprep.mubr.msk.f32.mxu0 %vm2797_vm0, %v12858_v18  ;;  %v5297_v18 = vld [vmem:[#allocation2 + $0x124] sm:$0xff] }
 0x2a0   :  { %10725 = vmatmul.mubr.msk.f32.gmra.mrb[70].mxu1 %vm2797_vm0, %v3785_v55 }
 0x2a1   :  { %10727 = vmatprep.mubr.msk.f32.mxu1 %vm2797_vm0, %v3786_v10 }
 0x2a2   :  { %10646 = vmatmul.mubr.msk.f32.vlgmr.msra.gmra.mrb[124].mxu0 %vm2797_vm0, %v12863_v19  ;;  %v5299_v19 = vld [vmem:[#allocation2 + $0x134] sm:$0xff] }
 0x2a3   :  { %10958 = vmatpush3.bf16.msra.mxu0 %v12953_v9  ;;  %10648 = vmatprep.mubr.msk.f32.mxu0 %vm2797_vm0, %v12871_v16 }
 0x2a4   :  { %10728 = vmatmul.mubr.msk.f32.gmra.mrb[72].mxu1 %vm2797_vm0, %v3787_v21  ;;  %10964 = vmatprep.subr.bf16.mxu0 %v13053_v42 }
 0x2a5   :  { %10730 = vmatprep.mubr.msk.f32.mxu1 %vm2797_vm0, %v3788_v28  ;;  %v5767_v28 = vld [vmem:[#allocation2 + $0x50] sm:$0xff] }
 0x2a6   :  { %10649 = vmatmul.mubr.msk.f32.gmra.mrb[126].mxu0 %vm2797_vm0, %v12875_v25 }
 0x2a7   :  { %10651 = vmatprep.mubr.msk.f32.mxu0 %vm2797_vm0, %v12883_v27 }
 0x2a8   :  { %10731 = vmatmul.mubr.msk.f32.gmra.mrb[74].mxu1 %vm2797_vm0, %v3789_v53 }
 0x2a9   :  { %10733 = vmatprep.mubr.msk.f32.mxu1 %vm2797_vm0, %v3790_v63 }
 0x2aa   :  { %10652 = vmatmul.mubr.msk.f32.gmra.mrb[128].mxu0 %vm2797_vm0, %v12887_v47 }
 0x2ab   :  { %10654 = vmatprep.mubr.msk.f32.mxu0 %vm2797_vm0, %v12901_v0 }
 0x2ac   :  { %10734 = vmatmul.mubr.msk.f32.gmra.mrb[76].mxu1 %vm2797_vm0, %v3791_v11  ;;  %v6281_v11 = vld [vmem:[#allocation2 + $0xca] sm:$0xff] }
 0x2ad   :  { %10736 = vmatprep.mubr.msk.f32.mxu1 %vm2797_vm0, %v3792_v31 }
 0x2ae   :  { %10655 = vmatmul.mubr.msk.f32.gmra.mrb[130].mxu0 %vm2797_vm0, %v12907_v12 }
 0x2af   :  { %10657 = vmatprep.mubr.msk.f32.mxu0 %vm2797_vm0, %v12916_v32 }
 0x2b0   :  { %10737 = vmatmul.mubr.msk.f32.gmra.mrb[78].mxu1 %vm2797_vm0, %v3793_v35  ;;  %v6282_v35 = vld [vmem:[#allocation2 + $0xd2] sm:$0xff] }
 0x2b1   :  { %10739 = vmatprep.mubr.msk.f32.mxu1 %vm2797_vm0, %v3794_v4 }
 0x2b2   :  { %10658 = vmatmul.mubr.msk.f32.gmra.mrb[132].mxu0 %vm2797_vm0, %v12920_v34 }
 0x2b3   :  { %10660 = vmatprep.mubr.msk.f32.mxu0 %vm2797_vm0, %v12928_v36 }
 0x2b4   :  { %10740 = vmatmul.mubr.msk.f32.gmra.mrb[80].mxu1 %vm2797_vm0, %v3795_v58 }
 0x2b5   :  { %10742 = vmatprep.mubr.msk.f32.mxu1 %vm2797_vm0, %v3796_v17  ;;  %v5768_v17 = vld [vmem:[#allocation2 + $0x58] sm:$0xff] }
 0x2b6   :  { %10661 = vmatmul.mubr.msk.f32.gmra.mrb[134].mxu0 %vm2797_vm0, %v12932_v44 }
 0x2b7   :  { %10663 = vmatprep.mubr.msk.f32.mxu0 %vm2797_vm0, %v12940_v49 }
 0x2b8   :  { %10743 = vmatmul.mubr.msk.f32.gmra.mrb[82].mxu1 %vm2797_vm0, %v3797_v46 }
 0x2b9   :  { %10745 = vmatprep.mubr.msk.f32.mxu1 %vm2797_vm0, %v3798_v54 }
 0x2ba   :  { %10664 = vmatmul.mubr.msk.f32.gmra.mrb[136].mxu0 %vm2797_vm0, %v12659_v13  ;;  %v5298_v13 = vld [vmem:[#allocation2 + $0x12c] sm:$0xff] }
 0x2bb   :  { %10666 = vmatprep.mubr.msk.f32.mxu0 %vm2797_vm0, %v12661_v14 }
 0x2bc   :  { %10746 = vmatmul.mubr.msk.f32.gmra.mrb[84].mxu1 %vm2797_vm0, %v3799_v56 }
 0x2bd   :  { %10748 = vmatprep.mubr.msk.f32.mxu1 %vm2797_vm0, %v3800_v60  ;;  %v5769_v60 = vld [vmem:[#allocation2 + $0x60] sm:$0xff] }
 0x2be   :  { %10667 = vmatmul.mubr.msk.f32.gmra.mrb[138].mxu0 %vm2797_vm0, %v12677_v39 }
 0x2bf   :  { %10669 = vmatprep.mubr.msk.f32.mxu0 %vm2797_vm0, %v12693_v2 }
 0x2c0   :  { %10749 = vmatmul.mubr.msk.f32.gmra.mrb[86].mxu1 %vm2797_vm0, %v3801_v38 }
 0x2c1   :  { %10751 = vmatprep.mubr.msk.f32.mxu1 %vm2797_vm0, %v3802_v43 }
 0x2c2   :  { %10670 = vmatmul.mubr.msk.f32.gmra.mrb[140].mxu0 %vm2797_vm0, %v12703_v57 }
 0x2c3   :  { %10672 = vmatprep.mubr.msk.f32.mxu0 %vm2797_vm0, %v12715_v5 }
 0x2c4   :  { %10752 = vmatmul.mubr.msk.f32.gmra.mrb[88].mxu1 %vm2797_vm0, %v5297_v18  ;;  %v10415_v14 = vpop.f32.mrb[36].mxu0 }
 0x2c5   :  { %10754 = vmatprep.mubr.msk.f32.mxu1 %vm2797_vm0, %v5298_v13  ;;  %3233 = vst.msk [vmem:[#allocation3 + $0x8] sm:$0xff] %vm2797_vm0, %v10415_v14  ;;  %v3053_v16 = vpop.f32.mrb[37].mxu0  ;;  %v5770_v14 = vld [vmem:[#allocation2 + $0x68] sm:$0xff] }
 0x2c6   :  { %10673 = vmatmul.mubr.msk.f32.gmra.mrb[142].mxu0 %vm2797_vm0, %v12720_v8  ;;  %3232 = vst.msk [vmem:[#allocation3] sm:$0xff] %vm2797_vm0, %v3053_v16 }
 0x2c7   :  { %10675 = vmatprep.mubr.msk.f32.mxu0 %vm2797_vm0, %v12733_v45 }
 0x2c8   :  { %10755 = vmatmul.mubr.msk.f32.gmra.mrb[90].mxu1 %vm2797_vm0, %v5299_v19  ;;  %v10418_v9 = vpop.f32.mrb[38].mxu0 }
 0x2c9   :  { %10819 = vmatprep.mubr.msk.f32.mxu1 %vm2797_vm0, %v12875_v25  ;;  %3235 = vst.msk [vmem:[#allocation3 + $0x18] sm:$0xff] %vm2797_vm0, %v10418_v9  ;;  %v3063_v22 = vpop.f32.mrb[39].mxu0 }
 0x2ca   :  { %10676 = vmatmul.mubr.msk.f32.gmra.mrb[144].mxu0 %vm2797_vm0, %v12743_v52  ;;  %3234 = vst.msk [vmem:[#allocation3 + $0x10] sm:$0xff] %vm2797_vm0, %v3063_v22  ;;  %v5771_v22 = vld [vmem:[#allocation2 + $0x70] sm:$0xff] }
 0x2cb   :  { %10678 = vmatprep.mubr.msk.f32.mxu0 %vm2797_vm0, %v12755_v6 }
 0x2cc   :  { %10820 = vmatmul.mubr.msk.f32.vlgmr.msra.gmra.mrb[92].mxu1 %vm2797_vm0, %v12883_v27  ;;  %v10421_v45 = vpop.f32.mrb[40].mxu0 }
 0x2cd   :  { %10822 = vmatprep.mubr.msk.f32.mxu1 %vm2797_vm0, %v12887_v47  ;;  %3237 = vst.msk [vmem:[#allocation3 + $0x28] sm:$0xff] %vm2797_vm0, %v10421_v45  ;;  %v3073_v25 = vpop.f32.mrb[41].mxu0  ;;  %v13179_v47 = vld [vmem:[#allocation2 + $0x12a] sm:$0xff] }
 0x2ce   :  { %10679 = vmatmul.mubr.msk.f32.gmra.mrb[146].mxu0 %vm2797_vm0, %v12760_v33  ;;  %3236 = vst.msk [vmem:[#allocation3 + $0x20] sm:$0xff] %vm2797_vm0, %v3073_v25 }
 0x2cf   :  { %10681 = vmatprep.mubr.msk.f32.mxu0 %vm2797_vm0, %v12773_v61 }
 0x2d0   :  { %10823 = vmatmul.mubr.msk.f32.gmra.mrb[94].mxu1 %vm2797_vm0, %v12901_v0  ;;  %v10424_v52 = vpop.f32.mrb[42].mxu0 }
 0x2d1   :  { %10825 = vmatprep.mubr.msk.f32.mxu1 %vm2797_vm0, %v12907_v12  ;;  %3239 = vst.msk [vmem:[#allocation3 + $0x38] sm:$0xff] %vm2797_vm0, %v10424_v52  ;;  %v3083_v6 = vpop.f32.mrb[43].mxu0  ;;  %v6285_v52 = vld [vmem:[#allocation2 + $0xea] sm:$0xff] }
 0x2d2   :  { %10682 = vmatmul.mubr.msk.f32.gmra.mrb[148].mxu0 %vm2797_vm0, %v12783_v7  ;;  %3238 = vst.msk [vmem:[#allocation3 + $0x30] sm:$0xff] %vm2797_vm0, %v3083_v6 }
 0x2d3   :  { %10684 = vmatprep.mubr.msk.f32.mxu0 %vm2797_vm0, %v12794_v40 }
 0x2d4   :  { %10826 = vmatmul.mubr.msk.f32.gmra.mrb[96].mxu1 %vm2797_vm0, %v12916_v32  ;;  %v10427_v33 = vpop.f32.mrb[44].mxu0 }
 0x2d5   :  { %10828 = vmatprep.mubr.msk.f32.mxu1 %vm2797_vm0, %v12920_v34  ;;  %3241 = vst.msk [vmem:[#allocation3 + $0x48] sm:$0xff] %vm2797_vm0, %v10427_v33  ;;  %v3093_v61 = vpop.f32.mrb[45].mxu0  ;;  %v5763_v34 = vld [vmem:[#allocation2 + $0x30] sm:$0xff] }
 0x2d6   :  { %10685 = vmatmul.mubr.msk.f32.gmra.mrb[150].mxu0 %vm2797_vm0, %v12798_v41  ;;  %3240 = vst.msk [vmem:[#allocation3 + $0x40] sm:$0xff] %vm2797_vm0, %v3093_v61  ;;  %v6272_v41 = vld [vmem:[#allocation2 + $0x82] sm:$0xff]  ;;  %v6286_v33 = vld [vmem:[#allocation2 + $0xf2] sm:$0xff] }
 0x2d7   :  { %10687 = vmatprep.mubr.msk.f32.mxu0 %vm2797_vm0, %v12808_v1 }
 0x2d8   :  { %10829 = vmatmul.mubr.msk.f32.gmra.mrb[98].mxu1 %vm2797_vm0, %v12928_v36  ;;  %v10430_v7 = vpop.f32.mrb[46].mxu0 }
 0x2d9   :  { %10831 = vmatprep.mubr.msk.f32.mxu1 %vm2797_vm0, %v12932_v44  ;;  %3243 = vst.msk [vmem:[#allocation3 + $0x58] sm:$0xff] %vm2797_vm0, %v10430_v7  ;;  %v3103_v40 = vpop.f32.mrb[47].mxu0 }
 0x2da   :  { %10688 = vmatmul.mubr.msk.f32.gmra.mrb[152].mxu0 %vm2797_vm0, %v12816_v30  ;;  %3242 = vst.msk [vmem:[#allocation3 + $0x50] sm:$0xff] %vm2797_vm0, %v3103_v40  ;;  %v6273_v30 = vld [vmem:[#allocation2 + $0x8a] sm:$0xff]  ;;  %v5772_v40 = vld [vmem:[#allocation2 + $0x78] sm:$0xff] }
 0x2db   :  { %10690 = vmatprep.mubr.msk.f32.mxu0 %vm2797_vm0, %v12826_v29  ;;  %v13176_v29 = vld [vmem:[#allocation2 + $0x122] sm:$0xff] }
 0x2dc   :  { %10832 = vmatmul.mubr.msk.f32.gmra.mrb[100].mxu1 %vm2797_vm0, %v12940_v49  ;;  %v10433_v1 = vpop.f32.mrb[48].mxu0  ;;  %v5765_v49 = vld [vmem:[#allocation2 + $0x40] sm:$0xff] }
 0x2dd   :  { %10834 = vmatprep.mubr.msk.f32.mxu1 %vm2797_vm0, %v6272_v41  ;;  %3245 = vst.msk [vmem:[#allocation3 + $0x68] sm:$0xff] %vm2797_vm0, %v10433_v1  ;;  %v3113_v27 = vpop.f32.mrb[49].mxu0 }
 0x2de   :  { %10691 = vmatmul.mubr.msk.f32.gmra.mrb[154].mxu0 %vm2797_vm0, %v12830_v20  ;;  %3244 = vst.msk [vmem:[#allocation3 + $0x60] sm:$0xff] %vm2797_vm0, %v3113_v27  ;;  %v13189_v20 = vld [vmem:[#allocation2 + $0x132] sm:$0xff] }
 0x2df   :  { %10693 = vmatprep.mubr.msk.f32.mxu0 %vm2797_vm0, %v12845_v26 }
 0x2e0   :  { %10835 = vmatmul.mubr.msk.f32.gmra.mrb[102].mxu1 %vm2797_vm0, %v6273_v30  ;;  %v10436_v0 = vpop.f32.mrb[50].mxu0  ;;  %v5773_v30 = vld [vmem:[#allocation2 + $0x80] sm:$0xff] }
 0x2e1   :  { %10837 = vmatprep.mubr.msk.f32.mxu1 %vm2797_vm0, %v12677_v39  ;;  %3247 = vst.msk [vmem:[#allocation3 + $0x78] sm:$0xff] %vm2797_vm0, %v10436_v0  ;;  %v3123_v12 = vpop.f32.mrb[51].mxu0 }
 0x2e2   :  { %10694 = vmatmul.mubr.msk.f32.gmra.mrb[156].mxu0 %vm2797_vm0, %v13176_v29  ;;  %3246 = vst.msk [vmem:[#allocation3 + $0x70] sm:$0xff] %vm2797_vm0, %v3123_v12 }
 0x2e3   :  { %10696 = vmatprep.mubr.msk.f32.mxu0 %vm2797_vm0, %v13179_v47 }
 0x2e4   :  { %10838 = vmatmul.mubr.msk.f32.gmra.mrb[104].mxu1 %vm2797_vm0, %v12693_v2  ;;  %v10439_v26 = vpop.f32.mrb[52].mxu0 }
 0x2e5   :  { %10840 = vmatprep.mubr.msk.f32.mxu1 %vm2797_vm0, %v12703_v57  ;;  %3249 = vst.msk [vmem:[#allocation3 + $0x88] sm:$0xff] %vm2797_vm0, %v10439_v26  ;;  %v3133_v39 = vpop.f32.mrb[53].mxu0  ;;  %v5764_v57 = vld [vmem:[#allocation2 + $0x38] sm:$0xff] }
 0x2e6   :  { %v10497_v32 = vpop.f32.mrb[0].mxu1  ;;  %10697 = vmatmul.mubr.msk.f32.gmra.mrb[158].mxu0 %vm2797_vm0, %v13189_v20  ;;  %3248 = vst.msk [vmem:[#allocation3 + $0x80] sm:$0xff] %vm2797_vm0, %v3133_v39  ;;  %v6287_v26 = vld [vmem:[#allocation2 + $0xfa] sm:$0xff] }
 0x2e7   :  { %v3560_v36 = vpop.f32.mrb[1].mxu1  ;;  %10761 = vmatprep.mubr.msk.f32.mxu0 %vm2797_vm0, %v5763_v34 }
 0x2e8   :  { %10841 = vmatmul.mubr.msk.f32.gmra.mrb[106].mxu1 %vm2797_vm0, %v12715_v5  ;;  %v10442_v2 = vpop.f32.mrb[54].mxu0 }
 0x2e9   :  { %10843 = vmatprep.mubr.msk.f32.mxu1 %vm2797_vm0, %v12720_v8  ;;  %3251 = vst.msk [vmem:[#allocation3 + $0x98] sm:$0xff] %vm2797_vm0, %v10442_v2  ;;  %v3143_v44 = vpop.f32.mrb[55].mxu0  ;;  %v5774_v2 = vld [vmem:[#allocation2 + $0x88] sm:$0xff] }
 0x2ea   :  { %10762 = vmatmul.mubr.msk.f32.vlgmr.msra.gmra.mrb[160].mxu0 %vm2797_vm0, %v5764_v57  ;;  %3250 = vst.msk [vmem:[#allocation3 + $0x90] sm:$0xff] %vm2797_vm0, %v3143_v44 }
 0x2eb   :  { %10966 = vmatpush3.bf16.msra.mxu0 %v13053_v42  ;;  %v10500_v3 = vpop.f32.mrb[2].mxu1  ;;  %10764 = vmatprep.mubr.msk.f32.mxu0 %vm2797_vm0, %v5765_v49  ;;  %v6284_v42 = vld [vmem:[#allocation2 + $0xe2] sm:$0xff] }
 0x2ec   :  { %v3570_v5 = vpop.f32.mrb[3].mxu1  ;;  %10844 = vmatmul.mubr.msk.f32.gmra.mrb[108].mxu1 %vm2797_vm0, %v6279_v37  ;;  %v3676_v8 = vld [vmem:[#allocation3 + $0x88] sm:$0xff]  ;;  %v10445_v55 = vpop.f32.mrb[56].mxu0 }
 0x2ed   :  { %10846 = vmatprep.mubr.msk.f32.mxu1 %vm2797_vm0, %v6280_v48  ;;  %v3712_v10 = vadd.f32 %v10497_v32, %v3676_v8  ;;  %v3675_v51 = vld [vmem:[#allocation3 + $0x80] sm:$0xff]  ;;  %3253 = vst.msk [vmem:[#allocation3 + $0xa8] sm:$0xff] %vm2797_vm0, %v10445_v55  ;;  %v3153_v21 = vpop.f32.mrb[57].mxu0  ;;  %v6288_v32 = vld [vmem:[#allocation2 + $0x102] sm:$0xff]  ;;  %v6289_v48 = vld [vmem:[#allocation2 + $0x10a] sm:$0xff] }
 0x2ee   :  { %10765 = vmatmul.mubr.msk.f32.gmra.mrb[162].mxu0 %vm2797_vm0, %v5766_v62  ;;  %v3711_v53 = vadd.f32 %v3675_v51, %v3560_v36  ;;  %3252 = vst.msk [vmem:[#allocation3 + $0xa0] sm:$0xff] %vm2797_vm0, %v3153_v21  ;;  %v6290_v55 = vld [vmem:[#allocation2 + $0x112] sm:$0xff] }
 0x2ef   :  { %v10503_v63 = vpop.f32.mrb[4].mxu1  ;;  %10767 = vmatprep.mubr.msk.f32.mxu0 %vm2797_vm0, %v5767_v28  ;;  %3748 = vst.msk [vmem:[#allocation3 + $0x88] sm:$0xff] %vm2797_vm0, %v3712_v10  ;;  %v5776_v51 = vld [vmem:[#allocation2 + $0x98] sm:$0xff] }
 0x2f0   :  { %v3580_v31 = vpop.f32.mrb[5].mxu1  ;;  %10847 = vmatmul.mubr.msk.f32.gmra.mrb[110].mxu1 %vm2797_vm0, %v6281_v11  ;;  %3747 = vst.msk [vmem:[#allocation3 + $0x80] sm:$0xff] %vm2797_vm0, %v3711_v53  ;;  %v3678_v4 = vld [vmem:[#allocation3 + $0x98] sm:$0xff]  ;;  %v10448_v58 = vpop.f32.mrb[58].mxu0 }
 0x2f1   :  { %10849 = vmatprep.mubr.msk.f32.mxu1 %vm2797_vm0, %v6282_v35  ;;  %v3714_v46 = vadd.f32 %v10500_v3, %v3678_v4  ;;  %v3677_v54 = vld [vmem:[#allocation3 + $0x90] sm:$0xff]  ;;  %3255 = vst.msk [vmem:[#allocation3 + $0xb8] sm:$0xff] %vm2797_vm0, %v10448_v58  ;;  %v3163_v56 = vpop.f32.mrb[59].mxu0  ;;  %v5775_v3 = vld [vmem:[#allocation2 + $0x90] sm:$0xff]  ;;  %v6291_v35 = vld [vmem:[#allocation2 + $0x11a] sm:$0xff] }
 0x2f2   :  { %10768 = vmatmul.mubr.msk.f32.gmra.mrb[164].mxu0 %vm2797_vm0, %v5768_v17  ;;  %v3713_v38 = vadd.f32 %v3677_v54, %v3570_v5  ;;  %3254 = vst.msk [vmem:[#allocation3 + $0xb0] sm:$0xff] %vm2797_vm0, %v3163_v56 }
 0x2f3   :  { %v10506_v43 = vpop.f32.mrb[6].mxu1  ;;  %10770 = vmatprep.mubr.msk.f32.mxu0 %vm2797_vm0, %v5769_v60  ;;  %3750 = vst.msk [vmem:[#allocation3 + $0x98] sm:$0xff] %vm2797_vm0, %v3714_v46  ;;  %v5778_v46 = vld [vmem:[#allocation2 + $0xa8] sm:$0xff] }
 0x2f4   :  { %v3590_v59 = vpop.f32.mrb[7].mxu1  ;;  %10850 = vmatmul.mubr.msk.f32.gmra.mrb[112].mxu1 %vm2797_vm0, %v6283_v50  ;;  %3749 = vst.msk [vmem:[#allocation3 + $0x90] sm:$0xff] %vm2797_vm0, %v3713_v38  ;;  %v3680_v18 = vld [vmem:[#allocation3 + $0xa8] sm:$0xff]  ;;  %v10451_v13 = vpop.f32.mrb[60].mxu0  ;;  %v5779_v38 = vld [vmem:[#allocation2 + $0xb0] sm:$0xff] }
 0x2f5   :  { %10852 = vmatprep.mubr.msk.f32.mxu1 %vm2797_vm0, %v6284_v42  ;;  %v3716_v19 = vadd.f32 %v10503_v63, %v3680_v18  ;;  %v3679_v16 = vld [vmem:[#allocation3 + $0xa0] sm:$0xff]  ;;  %3257 = vst.msk [vmem:[#allocation3 + $0xc8] sm:$0xff] %vm2797_vm0, %v10451_v13  ;;  %v3173_v9 = vpop.f32.mrb[61].mxu0  ;;  %v5777_v63 = vld [vmem:[#allocation2 + $0xa0] sm:$0xff] }
 0x2f6   :  { %10771 = vmatmul.mubr.msk.f32.gmra.mrb[166].mxu0 %vm2797_vm0, %v5770_v14  ;;  %v3715_v45 = vadd.f32 %v3679_v16, %v3580_v31  ;;  %3256 = vst.msk [vmem:[#allocation3 + $0xc0] sm:$0xff] %vm2797_vm0, %v3173_v9  ;;  %v5780_v18 = vld [vmem:[#allocation2 + $0xb8] sm:$0xff]  ;;  %v5781_v9 = vld [vmem:[#allocation2 + $0xc0] sm:$0xff] }
 0x2f7   :  { %v10509_v25 = vpop.f32.mrb[8].mxu1  ;;  %10773 = vmatprep.mubr.msk.f32.mxu0 %vm2797_vm0, %v5771_v22  ;;  %3752 = vst.msk [vmem:[#allocation3 + $0xa8] sm:$0xff] %vm2797_vm0, %v3716_v19  ;;  %v6295_v13 = vld [vmem:[#allocation2 + $0x13a] sm:$0xff]  ;;  %v6296_v22 = vld [vmem:[#allocation2 + $0x142] sm:$0xff] }
 0x2f8   :  { %v3600_v6 = vpop.f32.mrb[9].mxu1  ;;  %10853 = vmatmul.mubr.msk.f32.gmra.mrb[114].mxu1 %vm2797_vm0, %v6285_v52  ;;  %3751 = vst.msk [vmem:[#allocation3 + $0xa0] sm:$0xff] %vm2797_vm0, %v3715_v45  ;;  %v3682_v61 = vld [vmem:[#allocation3 + $0xb8] sm:$0xff]  ;;  %v10454_v7 = vpop.f32.mrb[62].mxu0 }
 0x2f9   :  { %10855 = vmatprep.mubr.msk.f32.mxu1 %vm2797_vm0, %v6286_v33  ;;  %v3718_v41 = vadd.f32 %v10506_v43, %v3682_v61  ;;  %v3681_v1 = vld [vmem:[#allocation3 + $0xb0] sm:$0xff]  ;;  %3259 = vst.msk [vmem:[#allocation3 + $0xd8] sm:$0xff] %vm2797_vm0, %v10454_v7  ;;  %v3183_v27 = vpop.f32.mrb[63].mxu0  ;;  %v3660_v33 = vld [vmem:[#allocation3 + $0x8] sm:$0xff] }
 0x2fa   :  { %10774 = vmatmul.mubr.msk.f32.gmra.mrb[168].mxu0 %vm2797_vm0, %v5772_v40  ;;  %v3717_v0 = vadd.f32 %v3681_v1, %v3590_v59  ;;  %3258 = vst.msk [vmem:[#allocation3 + $0xd0] sm:$0xff] %vm2797_vm0, %v3183_v27  ;;  %v6297_v61 = vld [vmem:[#allocation2 + $0x14a] sm:$0xff]  ;;  %v3659_v27 = vld [vmem:[#allocation3] sm:$0xff] }
 0x2fb   :  { %v10512_v12 = vpop.f32.mrb[10].mxu1  ;;  %10776 = vmatprep.mubr.msk.f32.mxu0 %vm2797_vm0, %v5773_v30  ;;  %3754 = vst.msk [vmem:[#allocation3 + $0xb8] sm:$0xff] %vm2797_vm0, %v3718_v41  ;;  %v5783_v30 = vld [vmem:[#allocation2 + $0xd0] sm:$0xff] }
 0x2fc   :  { %v3610_v39 = vpop.f32.mrb[11].mxu1  ;;  %10856 = vmatmul.mubr.msk.f32.gmra.mrb[116].mxu1 %vm2797_vm0, %v6287_v26  ;;  %3753 = vst.msk [vmem:[#allocation3 + $0xb0] sm:$0xff] %vm2797_vm0, %v3717_v0  ;;  %v3684_v34 = vld [vmem:[#allocation3 + $0xc8] sm:$0xff]  ;;  %v10457_v36 = vpop.f32.mrb[64].mxu0 }
 0x2fd   :  { %10858 = vmatprep.mubr.msk.f32.mxu1 %vm2797_vm0, %v6288_v32  ;;  %v3720_v57 = vadd.f32 %v10509_v25, %v3684_v34  ;;  %v3683_v44 = vld [vmem:[#allocation3 + $0xc0] sm:$0xff]  ;;  %3261 = vst.msk [vmem:[#allocation3 + $0xe8] sm:$0xff] %vm2797_vm0, %v10457_v36  ;;  %v3193_v49 = vpop.f32.mrb[65].mxu0  ;;  %v3662_v36 = vld [vmem:[#allocation3 + $0x18] sm:$0xff] }
 0x2fe   :  { %10777 = vmatmul.mubr.msk.f32.gmra.mrb[170].mxu0 %vm2797_vm0, %v5774_v2  ;;  %v3719_v37 = vadd.f32 %v3683_v44, %v3600_v6  ;;  %3260 = vst.msk [vmem:[#allocation3 + $0xe0] sm:$0xff] %vm2797_vm0, %v3193_v49  ;;  %v5784_v2 = vld [vmem:[#allocation2 + $0xd8] sm:$0xff] }
 0x2ff   :  { %v10515_v5 = vpop.f32.mrb[12].mxu1  ;;  %10779 = vmatprep.mubr.msk.f32.mxu0 %vm2797_vm0, %v5775_v3  ;;  %3756 = vst.msk [vmem:[#allocation3 + $0xc8] sm:$0xff] %vm2797_vm0, %v3720_v57 }
 0x300   :  { %v3620_v8 = vpop.f32.mrb[13].mxu1  ;;  %10859 = vmatmul.mubr.msk.f32.gmra.mrb[118].mxu1 %vm2797_vm0, %v6289_v48  ;;  %3755 = vst.msk [vmem:[#allocation3 + $0xc0] sm:$0xff] %vm2797_vm0, %v3719_v37  ;;  %v3686_v62 = vld [vmem:[#allocation3 + $0xd8] sm:$0xff]  ;;  %v10460_v10 = vpop.f32.mrb[66].mxu0  ;;  %v3661_v37 = vld [vmem:[#allocation3 + $0x10] sm:$0xff] }
 0x301   :  { %10861 = vmatprep.mubr.msk.f32.mxu1 %vm2797_vm0, %v6290_v55  ;;  %v3722_v21 = vadd.f32 %v10512_v12, %v3686_v62  ;;  %v3685_v28 = vld [vmem:[#allocation3 + $0xd0] sm:$0xff]  ;;  %3263 = vst.msk [vmem:[#allocation3 + $0xf8] sm:$0xff] %vm2797_vm0, %v10460_v10  ;;  %v3203_v53 = vpop.f32.mrb[67].mxu0 }
 0x302   :  { %10780 = vmatmul.mubr.msk.f32.gmra.mrb[172].mxu0 %vm2797_vm0, %v5776_v51  ;;  %v3721_v11 = vadd.f32 %v3685_v28, %v3610_v39  ;;  %3262 = vst.msk [vmem:[#allocation3 + $0xf0] sm:$0xff] %vm2797_vm0, %v3203_v53  ;;  %v3664_v51 = vld [vmem:[#allocation3 + $0x28] sm:$0xff] }
 0x303   :  { %v10518_v31 = vpop.f32.mrb[14].mxu1  ;;  %10782 = vmatprep.mubr.msk.f32.mxu0 %vm2797_vm0, %v5777_v63  ;;  %3758 = vst.msk [vmem:[#allocation3 + $0xd8] sm:$0xff] %vm2797_vm0, %v3722_v21  ;;  %v5786_v21 = vld [vmem:[#allocation2 + $0xe8] sm:$0xff]  ;;  %v3663_v63 = vld [vmem:[#allocation3 + $0x20] sm:$0xff] }
 0x304   :  { %v3630_v4 = vpop.f32.mrb[15].mxu1  ;;  %10862 = vmatmul.mubr.msk.f32.gmra.mrb[120].mxu1 %vm2797_vm0, %v6291_v35  ;;  %3757 = vst.msk [vmem:[#allocation3 + $0xd0] sm:$0xff] %vm2797_vm0, %v3721_v11  ;;  %v3688_v58 = vld [vmem:[#allocation3 + $0xe8] sm:$0xff]  ;;  %v10463_v17 = vpop.f32.mrb[68].mxu0  ;;  %v5787_v11 = vld [vmem:[#allocation2 + $0xf0] sm:$0xff] }
 0x305   :  { %10864 = vmatprep.mubr.msk.f32.mxu1 %vm2797_vm0, %v13176_v29  ;;  %v3724_v54 = vadd.f32 %v10515_v5, %v3688_v58  ;;  %v3687_v56 = vld [vmem:[#allocation3 + $0xe0] sm:$0xff]  ;;  %3265 = vst.msk [vmem:[#allocation3 + $0x108] sm:$0xff] %vm2797_vm0, %v10463_v17  ;;  %v3213_v60 = vpop.f32.mrb[69].mxu0  ;;  %v5785_v5 = vld [vmem:[#allocation2 + $0xe0] sm:$0xff]  ;;  %v3666_v17 = vld [vmem:[#allocation3 + $0x38] sm:$0xff] }
 0x306   :  { %10783 = vmatmul.mubr.msk.f32.gmra.mrb[174].mxu0 %vm2797_vm0, %v5778_v46  ;;  %v3723_v43 = vadd.f32 %v3687_v56, %v3620_v8  ;;  %3264 = vst.msk [vmem:[#allocation3 + $0x100] sm:$0xff] %vm2797_vm0, %v3213_v60  ;;  %v5788_v46 = vld [vmem:[#allocation2 + $0xf8] sm:$0xff]  ;;  %v3665_v60 = vld [vmem:[#allocation3 + $0x30] sm:$0xff] }
 0x307   :  { %v10521_v50 = vpop.f32.mrb[16].mxu1  ;;  %10785 = vmatprep.mubr.msk.f32.mxu0 %vm2797_vm0, %v5779_v38  ;;  %3760 = vst.msk [vmem:[#allocation3 + $0xe8] sm:$0xff] %vm2797_vm0, %v3724_v54  ;;  %v5789_v38 = vld [vmem:[#allocation2 + $0x100] sm:$0xff] }
 0x308   :  { %v3640_v59 = vpop.f32.mrb[17].mxu1  ;;  %10865 = vmatmul.mubr.msk.f32.gmra.mrb[122].mxu1 %vm2797_vm0, %v13179_v47  ;;  %3759 = vst.msk [vmem:[#allocation3 + $0xe0] sm:$0xff] %vm2797_vm0, %v3723_v43  ;;  %v3690_v29 = vld [vmem:[#allocation3 + $0xf8] sm:$0xff]  ;;  %v10466_v42 = vpop.f32.mrb[70].mxu0 }
 0x309   :  { %10867 = vmatprep.mubr.msk.f32.mxu1 %vm2797_vm0, %v13189_v20  ;;  %v3726_v14 = vadd.f32 %v10518_v31, %v3690_v29  ;;  %v3689_v19 = vld [vmem:[#allocation3 + $0xf0] sm:$0xff]  ;;  %3267 = vst.msk [vmem:[#allocation3 + $0x118] sm:$0xff] %vm2797_vm0, %v10466_v42  ;;  %v3223_v16 = vpop.f32.mrb[71].mxu0  ;;  %v3668_v42 = vld [vmem:[#allocation3 + $0x48] sm:$0xff] }
 0x30a   :  { %10786 = vmatmul.mubr.msk.f32.gmra.mrb[176].mxu0 %vm2797_vm0, %v5780_v18  ;;  %v3725_v45 = vadd.f32 %v3689_v19, %v3630_v4  ;;  %3266 = vst.msk [vmem:[#allocation3 + $0x110] sm:$0xff] %vm2797_vm0, %v3223_v16  ;;  %v5782_v20 = vld [vmem:[#allocation2 + $0xc8] sm:$0xff]  ;;  %v3667_v19 = vld [vmem:[#allocation3 + $0x40] sm:$0xff]  ;;  %v5791_v16 = vld [vmem:[#allocation2 + $0x110] sm:$0xff] }
 0x30b   :  { %v10524_v47 = vpop.f32.mrb[18].mxu1  ;;  %10788 = vmatprep.mubr.msk.f32.mxu0 %vm2797_vm0, %v5781_v9  ;;  %3762 = vst.msk [vmem:[#allocation3 + $0xf8] sm:$0xff] %vm2797_vm0, %v3726_v14  ;;  %v5790_v18 = vld [vmem:[#allocation2 + $0x108] sm:$0xff] }
 0x30c   :  { %v3650_v25 = vpop.f32.mrb[19].mxu1  ;;  %10868 = vmatmul.mubr.msk.f32.gmra.mrb[124].mxu1 %vm2797_vm0, %v6295_v13  ;;  %3761 = vst.msk [vmem:[#allocation3 + $0xf0] sm:$0xff] %vm2797_vm0, %v3725_v45  ;;  %v3692_v52 = vld [vmem:[#allocation3 + $0x108] sm:$0xff]  ;;  %v10473_v6 = vpop.f32.mrb[72].mxu0 }
 0x30d   :  { %10870 = vmatprep.mubr.msk.f32.mxu1 %vm2797_vm0, %v6296_v22  ;;  %v3728_v7 = vadd.f32 %v10521_v50, %v3692_v52  ;;  %v3691_v40 = vld [vmem:[#allocation3 + $0x100] sm:$0xff]  ;;  %v3696_v41 = vadd.f32 %v10473_v6, %v3660_v33  ;;  %v3480_v1 = vpop.f32.mrb[73].mxu0 }
 0x30e   :  { %10789 = vmatmul.mubr.msk.f32.gmra.mrb[178].mxu0 %vm2797_vm0, %v5782_v20  ;;  %v3727_v0 = vadd.f32 %v3691_v40, %v3640_v59  ;;  %v3695_v12 = vadd.f32 %v3659_v27, %v3480_v1  ;;  %v3670_v20 = vld [vmem:[#allocation3 + $0x58] sm:$0xff]  ;;  %v5792_v52 = vld [vmem:[#allocation2 + $0x118] sm:$0xff] }
 0x30f   :  { %v13279_v26 = vpop.f32.mrb[20].mxu1  ;;  %10791 = vmatprep.mubr.msk.f32.mxu0 %vm2797_vm0, %v5783_v30  ;;  %3764 = vst.msk [vmem:[#allocation3 + $0x108] sm:$0xff] %vm2797_vm0, %v3728_v7  ;;  %3732 = vst.msk [vmem:[#allocation3 + $0x8] sm:$0xff] %vm2797_vm0, %v3696_v41  ;;  %v5794_v41 = vld [vmem:[#allocation2 + $0x128] sm:$0xff]  ;;  %v5795_v27 = vld [vmem:[#allocation2 + $0x130] sm:$0xff] }
 0x310   :  { %v13284_v39 = vpop.f32.mrb[21].mxu1  ;;  %10871 = vmatmul.mubr.msk.f32.gmra.mrb[126].mxu1 %vm2797_vm0, %v6297_v61  ;;  %3763 = vst.msk [vmem:[#allocation3 + $0x100] sm:$0xff] %vm2797_vm0, %v3727_v0  ;;  %v3694_v32 = vld [vmem:[#allocation3 + $0x118] sm:$0xff]  ;;  %3731 = vst.msk [vmem:[#allocation3] sm:$0xff] %vm2797_vm0, %v3695_v12  ;;  %v3669_v61 = vld [vmem:[#allocation3 + $0x50] sm:$0xff] }
 0x311   :  { %v10476_v34 = vpop.f32.mrb[74].mxu0  ;;  %v3730_v57 = vadd.f32 %v10524_v47, %v3694_v32  ;;  %v3693_v44 = vld [vmem:[#allocation3 + $0x110] sm:$0xff]  ;;  %v5793_v47 = vld [vmem:[#allocation2 + $0x120] sm:$0xff] }
 0x312   :  { %v3698_v49 = vadd.f32 %v10476_v34, %v3662_v36  ;;  %v3490_v3 = vpop.f32.mrb[75].mxu0  ;;  %10792 = vmatmul.mubr.msk.f32.gmra.mrb[180].mxu0 %vm2797_vm0, %v5784_v2  ;;  %v3729_v48 = vadd.f32 %v3693_v44, %v3650_v25  ;;  %v3672_v0 = vld [vmem:[#allocation3 + $0x68] sm:$0xff]  ;;  %v3671_v34 = vld [vmem:[#allocation3 + $0x60] sm:$0xff] }
 0x313   :  { %v3697_v8 = vadd.f32 %v3661_v37, %v3490_v3  ;;  %v13290_v55 = vpop.f32.mrb[22].mxu1  ;;  %10794 = vmatprep.mubr.msk.f32.mxu0 %vm2797_vm0, %v5785_v5  ;;  %3766 = vst.msk [vmem:[#allocation3 + $0x118] sm:$0xff] %vm2797_vm0, %v3730_v57  ;;  %v5796_v57 = vld [vmem:[#allocation2 + $0x138] sm:$0xff]  ;;  %v3674_v37 = vld [vmem:[#allocation3 + $0x78] sm:$0xff] }
 0x314   :  { %3734 = vst.msk [vmem:[#allocation3 + $0x18] sm:$0xff] %vm2797_vm0, %v3698_v49  ;;  %v13295_v62 = vpop.f32.mrb[23].mxu1  ;;  %3765 = vst.msk [vmem:[#allocation3 + $0x110] sm:$0xff] %vm2797_vm0, %v3729_v48  ;;  %v5797_v49 = vld [vmem:[#allocation2 + $0x140] sm:$0xff] }
 0x315   :  { %3733 = vst.msk [vmem:[#allocation3 + $0x10] sm:$0xff] %vm2797_vm0, %v3697_v8  ;;  %v10479_v10 = vpop.f32.mrb[76].mxu0  ;;  %v3673_v8 = vld [vmem:[#allocation3 + $0x70] sm:$0xff] }
 0x316   :  { %v3700_v28 = vadd.f32 %v10479_v10, %v3664_v51  ;;  %v3500_v53 = vpop.f32.mrb[77].mxu0  ;;  %10795 = vmatmul.mubr.msk.f32.gmra.mrb[182].mxu0 %vm2797_vm0, %v5786_v21  ;;  %v5798_v21 = vld [vmem:[#allocation2 + $0x148] sm:$0xff] }
 0x317   :  { %v3699_v31 = vadd.f32 %v3663_v63, %v3500_v53  ;;  %v13300_v35 = vpop.f32.mrb[24].mxu1  ;;  %10797 = vmatprep.mubr.msk.f32.mxu0 %vm2797_vm0, %v5787_v11  ;;  %v4159_v63 = vld [vmem:[#allocation3 + $0x8] sm:$0xff] }
 0x318   :  { %3736 = vst.msk [vmem:[#allocation3 + $0x28] sm:$0xff] %vm2797_vm0, %v3700_v28  ;;  %v13304_v4 = vpop.f32.mrb[25].mxu1 }
 0x319   :  { %3735 = vst.msk [vmem:[#allocation3 + $0x20] sm:$0xff] %vm2797_vm0, %v3699_v31  ;;  %v10482_v58 = vpop.f32.mrb[78].mxu0 }
 0x31a   :  { %v3702_v54 = vadd.f32 %v10482_v58, %v3666_v17  ;;  %v3510_v56 = vpop.f32.mrb[79].mxu0  ;;  %10798 = vmatmul.mubr.msk.f32.gmra.mrb[184].mxu0 %vm2797_vm0, %v5788_v46  ;;  %v4158_v58 = vld [vmem:[#allocation3] sm:$0xff] }
 0x31b   :  { %v3701_v43 = vadd.f32 %v3665_v60, %v3510_v56  ;;  %v13308_v50 = vpop.f32.mrb[26].mxu1  ;;  %10800 = vmatprep.mubr.msk.f32.mxu0 %vm2797_vm0, %v5789_v38  ;;  %v6761_v17 = vld [vmem:[#allocation2 + $0x34] sm:$0xff] }
 0x31c   :  { %3738 = vst.msk [vmem:[#allocation3 + $0x38] sm:$0xff] %vm2797_vm0, %v3702_v54  ;;  %v13312_v59 = vpop.f32.mrb[27].mxu1  ;;  %v4161_v38 = vld [vmem:[#allocation3 + $0x18] sm:$0xff] }
 0x31d   :  { %3737 = vst.msk [vmem:[#allocation3 + $0x30] sm:$0xff] %vm2797_vm0, %v3701_v43  ;;  %v10485_v29 = vpop.f32.mrb[80].mxu0  ;;  %v6762_v43 = vld [vmem:[#allocation2 + $0x3c] sm:$0xff] }
 0x31e   :  { %v3704_v13 = vadd.f32 %v10485_v29, %v3668_v42  ;;  %v3520_v14 = vpop.f32.mrb[81].mxu0  ;;  %10801 = vmatmul.mubr.msk.f32.gmra.mrb[186].mxu0 %vm2797_vm0, %v5790_v18  ;;  %v4160_v18 = vld [vmem:[#allocation3 + $0x10] sm:$0xff] }
 0x31f   :  { %v3703_v9 = vadd.f32 %v3667_v19, %v3520_v14  ;;  %v13316_v22 = vpop.f32.mrb[28].mxu1  ;;  %10803 = vmatprep.mubr.msk.f32.mxu0 %vm2797_vm0, %v5791_v16 }
 0x320   :  { %3740 = vst.msk [vmem:[#allocation3 + $0x48] sm:$0xff] %vm2797_vm0, %v3704_v13  ;;  %v13320_v45 = vpop.f32.mrb[29].mxu1  ;;  %v6763_v13 = vld [vmem:[#allocation2 + $0x44] sm:$0xff] }
 0x321   :  { %3739 = vst.msk [vmem:[#allocation3 + $0x40] sm:$0xff] %vm2797_vm0, %v3703_v9  ;;  %v10488_v25 = vpop.f32.mrb[82].mxu0 }
 0x322   :  { %v3706_v6 = vadd.f32 %v10488_v25, %v3670_v20  ;;  %v3530_v33 = vpop.f32.mrb[83].mxu0  ;;  %10804 = vmatmul.mubr.msk.f32.gmra.mrb[188].mxu0 %vm2797_vm0, %v5792_v52  ;;  %v6764_v25 = vld [vmem:[#allocation2 + $0x4c] sm:$0xff] }
 0x323   :  { %v3705_v7 = vadd.f32 %v3669_v61, %v3530_v33  ;;  %v13324_v40 = vpop.f32.mrb[30].mxu1  ;;  %10806 = vmatprep.mubr.msk.f32.mxu0 %vm2797_vm0, %v5793_v47  ;;  %v4163_v47 = vld [vmem:[#allocation3 + $0x28] sm:$0xff]  ;;  %v6765_v33 = vld [vmem:[#allocation2 + $0x54] sm:$0xff] }
 0x324   :  { %3742 = vst.msk [vmem:[#allocation3 + $0x58] sm:$0xff] %vm2797_vm0, %v3706_v6  ;;  %v13328_v1 = vpop.f32.mrb[31].mxu1  ;;  %v4162_v6 = vld [vmem:[#allocation3 + $0x20] sm:$0xff] }
 0x325   :  { %3741 = vst.msk [vmem:[#allocation3 + $0x50] sm:$0xff] %vm2797_vm0, %v3705_v7  ;;  %v10491_v30 = vpop.f32.mrb[84].mxu0 }
 0x326   :  { %v3708_v12 = vadd.f32 %v10491_v30, %v3672_v0  ;;  %v3540_v32 = vpop.f32.mrb[85].mxu0  ;;  %10807 = vmatmul.mubr.msk.f32.gmra.mrb[190].mxu0 %vm2797_vm0, %v5794_v41 }
 0x327   :  { %v3707_v36 = vadd.f32 %v3671_v34, %v3540_v32  ;;  %v13332_v2 = vpop.f32.mrb[32].mxu1  ;;  %10809 = vmatprep.mubr.msk.f32.mxu0 %vm2797_vm0, %v5795_v27  ;;  %v4165_v32 = vld [vmem:[#allocation3 + $0x38] sm:$0xff]  ;;  %v6766_v34 = vld [vmem:[#allocation2 + $0x5c] sm:$0xff] }
 0x328   :  { %3744 = vst.msk [vmem:[#allocation3 + $0x68] sm:$0xff] %vm2797_vm0, %v3708_v12  ;;  %v13336_v44 = vpop.f32.mrb[33].mxu1 }
 0x329   :  { %3743 = vst.msk [vmem:[#allocation3 + $0x60] sm:$0xff] %vm2797_vm0, %v3707_v36  ;;  %v10494_v3 = vpop.f32.mrb[86].mxu0 }
 0x32a   :  { %v3710_v5 = vadd.f32 %v10494_v3, %v3674_v37  ;;  %v3550_v48 = vpop.f32.mrb[87].mxu0  ;;  %10810 = vmatmul.mubr.msk.f32.gmra.mrb[192].mxu0 %vm2797_vm0, %v5796_v57  ;;  %v4164_v3 = vld [vmem:[#allocation3 + $0x30] sm:$0xff] }
 0x32b   :  { %v3709_v10 = vadd.f32 %v3673_v8, %v3550_v48  ;;  %v13340_v51 = vpop.f32.mrb[34].mxu1  ;;  %10812 = vmatprep.mubr.msk.f32.mxu0 %vm2797_vm0, %v5797_v49  ;;  %v6767_v37 = vld [vmem:[#allocation2 + $0x64] sm:$0xff] }
 0x32c   :  { %3746 = vst.msk [vmem:[#allocation3 + $0x78] sm:$0xff] %vm2797_vm0, %v3710_v5  ;;  %v13344_v28 = vpop.f32.mrb[35].mxu1 }
 0x32d   :  { %3745 = vst.msk [vmem:[#allocation3 + $0x70] sm:$0xff] %vm2797_vm0, %v3709_v10  ;;  %v10531_v53 = vpop.f32.mrb[88].mxu0 }
 0x32e   :  { %v4195_v11 = vadd.f32 %v10531_v53, %v4159_v63  ;;  %v3979_v31 = vpop.f32.mrb[89].mxu0  ;;  %10813 = vmatmul.mubr.msk.f32.gmra.mrb[194].mxu0 %vm2797_vm0, %v5798_v21  ;;  %v4167_v53 = vld [vmem:[#allocation3 + $0x48] sm:$0xff]  ;;  %v6768_v63 = vld [vmem:[#allocation2 + $0x6c] sm:$0xff] }
 0x32f   :  { %v4194_v46 = vadd.f32 %v4158_v58, %v3979_v31  ;;  %v13348_v54 = vpop.f32.mrb[36].mxu1  ;;  %10877 = vmatprep.mubr.msk.f32.mxu0 %vm2797_vm0, %v6761_v17  ;;  %v4166_v17 = vld [vmem:[#allocation3 + $0x40] sm:$0xff] }
 0x330   :  { %4231 = vst.msk [vmem:[#allocation3 + $0x8] sm:$0xff] %vm2797_vm0, %v4195_v11  ;;  %v13352_v56 = vpop.f32.mrb[37].mxu1 }
 0x331   :  { %4230 = vst.msk [vmem:[#allocation3] sm:$0xff] %vm2797_vm0, %v4194_v46  ;;  %v10534_v60 = vpop.f32.mrb[90].mxu0  ;;  %v6769_v46 = vld [vmem:[#allocation2 + $0x74] sm:$0xff] }
 0x332   :  { %v4197_v29 = vadd.f32 %v10534_v60, %v4161_v38  ;;  %v3989_v42 = vpop.f32.mrb[91].mxu0  ;;  %10878 = vmatmul.mubr.msk.f32.vlgmr.msra.gmra.mrb[196].mxu0 %vm2797_vm0, %v6762_v43 }
 0x333   :  { %v4196_v14 = vadd.f32 %v4160_v18, %v3989_v42  ;;  %v13356_v19 = vpop.f32.mrb[38].mxu1  ;;  %10880 = vmatprep.mubr.msk.f32.mxu0 %vm2797_vm0, %v6763_v13  ;;  %v4169_v18 = vld [vmem:[#allocation3 + $0x58] sm:$0xff]  ;;  %v6770_v13 = vld [vmem:[#allocation2 + $0x7c] sm:$0xff] }
 0x334   :  { %4233 = vst.msk [vmem:[#allocation3 + $0x18] sm:$0xff] %vm2797_vm0, %v4197_v29  ;;  %v13360_v16 = vpop.f32.mrb[39].mxu1 }
 0x335   :  { %4232 = vst.msk [vmem:[#allocation3 + $0x10] sm:$0xff] %vm2797_vm0, %v4196_v14  ;;  %v10537_v9 = vpop.f32.mrb[92].mxu0 }
 0x336   :  { %v4199_v20 = vadd.f32 %v10537_v9, %v4163_v47  ;;  %v3999_v52 = vpop.f32.mrb[93].mxu0  ;;  %10881 = vmatmul.mubr.msk.f32.gmra.mrb[198].mxu0 %vm2797_vm0, %v6764_v25  ;;  %v4168_v25 = vld [vmem:[#allocation3 + $0x50] sm:$0xff] }
 0x337   :  { %v4198_v61 = vadd.f32 %v4162_v6, %v3999_v52  ;;  %v13364_v7 = vpop.f32.mrb[40].mxu1  ;;  %10883 = vmatprep.mubr.msk.f32.mxu0 %vm2797_vm0, %v6765_v33  ;;  %v4658_v41 = vld [vmem:[#allocation3 + $0x8] sm:$0xff] }
 0x338   :  { %4235 = vst.msk [vmem:[#allocation3 + $0x28] sm:$0xff] %vm2797_vm0, %v4199_v20  ;;  %v13368_v27 = vpop.f32.mrb[41].mxu1  ;;  %v4694_v30 = vadd.f32 %v13279_v26, %v4658_v41  ;;  %v4657_v0 = vld [vmem:[#allocation3] sm:$0xff]  ;;  %v6771_v20 = vld [vmem:[#allocation2 + $0x84] sm:$0xff] }
 0x339   :  { %4234 = vst.msk [vmem:[#allocation3 + $0x20] sm:$0xff] %vm2797_vm0, %v4198_v61  ;;  %v10540_v12 = vpop.f32.mrb[94].mxu0  ;;  %v4693_v36 = vadd.f32 %v4657_v0, %v13284_v39  ;;  %v6772_v0 = vld [vmem:[#allocation2 + $0x8c] sm:$0xff] }
 0x33a   :  { %v4201_v57 = vadd.f32 %v10540_v12, %v4165_v32  ;;  %v4009_v49 = vpop.f32.mrb[95].mxu0  ;;  %10884 = vmatmul.mubr.msk.f32.gmra.mrb[200].mxu0 %vm2797_vm0, %v6766_v34  ;;  %4730 = vst.msk [vmem:[#allocation3 + $0x8] sm:$0xff] %vm2797_vm0, %v4694_v30  ;;  %v4171_v30 = vld [vmem:[#allocation3 + $0x68] sm:$0xff] }
 0x33b   :  { %v4200_v5 = vadd.f32 %v4164_v3, %v4009_v49  ;;  %v13375_v48 = vpop.f32.mrb[42].mxu1  ;;  %10886 = vmatprep.mubr.msk.f32.mxu0 %vm2797_vm0, %v6767_v37  ;;  %4729 = vst.msk [vmem:[#allocation3] sm:$0xff] %vm2797_vm0, %v4693_v36  ;;  %v4660_v26 = vld [vmem:[#allocation3 + $0x18] sm:$0xff]  ;;  %v4170_v36 = vld [vmem:[#allocation3 + $0x60] sm:$0xff] }
 0x33c   :  { %4237 = vst.msk [vmem:[#allocation3 + $0x38] sm:$0xff] %vm2797_vm0, %v4201_v57  ;;  %v13380_v8 = vpop.f32.mrb[43].mxu1  ;;  %v4696_v39 = vadd.f32 %v13290_v55, %v4660_v26  ;;  %v4659_v10 = vld [vmem:[#allocation3 + $0x10] sm:$0xff]  ;;  %v6773_v57 = vld [vmem:[#allocation2 + $0x94] sm:$0xff] }
 0x33d   :  { %4236 = vst.msk [vmem:[#allocation3 + $0x30] sm:$0xff] %vm2797_vm0, %v4200_v5  ;;  %v10543_v21 = vpop.f32.mrb[96].mxu0  ;;  %v4695_v11 = vadd.f32 %v4659_v10, %v13295_v62  ;;  %v6774_v10 = vld [vmem:[#allocation2 + $0x9c] sm:$0xff] }
 0x33e   :  { %v4203_v31 = vadd.f32 %v10543_v21, %v4167_v53  ;;  %v4019_v58 = vpop.f32.mrb[97].mxu0  ;;  %10887 = vmatmul.mubr.msk.f32.gmra.mrb[202].mxu0 %vm2797_vm0, %v6768_v63  ;;  %4732 = vst.msk [vmem:[#allocation3 + $0x18] sm:$0xff] %vm2797_vm0, %v4696_v39  ;;  %v4173_v39 = vld [vmem:[#allocation3 + $0x78] sm:$0xff] }
 0x33f   :  { %v4202_v60 = vadd.f32 %v4166_v17, %v4019_v58  ;;  %v13387_v38 = vpop.f32.mrb[44].mxu1  ;;  %10889 = vmatprep.mubr.msk.f32.mxu0 %vm2797_vm0, %v6769_v46  ;;  %4731 = vst.msk [vmem:[#allocation3 + $0x10] sm:$0xff] %vm2797_vm0, %v4695_v11  ;;  %v4662_v55 = vld [vmem:[#allocation3 + $0x28] sm:$0xff]  ;;  %v4172_v11 = vld [vmem:[#allocation3 + $0x70] sm:$0xff] }
 0x340   :  { %4239 = vst.msk [vmem:[#allocation3 + $0x48] sm:$0xff] %vm2797_vm0, %v4203_v31  ;;  %v13392_v43 = vpop.f32.mrb[45].mxu1  ;;  %v4698_v62 = vadd.f32 %v13300_v35, %v4662_v55  ;;  %v4661_v29 = vld [vmem:[#allocation3 + $0x20] sm:$0xff]  ;;  %v6775_v31 = vld [vmem:[#allocation2 + $0xa4] sm:$0xff] }
 0x341   :  { %4238 = vst.msk [vmem:[#allocation3 + $0x40] sm:$0xff] %vm2797_vm0, %v4202_v60  ;;  %v10546_v42 = vpop.f32.mrb[98].mxu0  ;;  %v4697_v14 = vadd.f32 %v4661_v29, %v13304_v4  ;;  %v6776_v29 = vld [vmem:[#allocation2 + $0xac] sm:$0xff] }
 0x342   :  { %v4205_v9 = vadd.f32 %v10546_v42, %v4169_v18  ;;  %v4029_v47 = vpop.f32.mrb[99].mxu0  ;;  %10890 = vmatmul.mubr.msk.f32.gmra.mrb[204].mxu0 %vm2797_vm0, %v6770_v13  ;;  %4734 = vst.msk [vmem:[#allocation3 + $0x28] sm:$0xff] %vm2797_vm0, %v4698_v62  ;;  %v4175_v62 = vld [vmem:[#allocation3 + $0x88] sm:$0xff] }
 0x343   :  { %v4204_v52 = vadd.f32 %v4168_v25, %v4029_v47  ;;  %v13399_v6 = vpop.f32.mrb[46].mxu1  ;;  %10892 = vmatprep.mubr.msk.f32.mxu0 %vm2797_vm0, %v6771_v20  ;;  %4733 = vst.msk [vmem:[#allocation3 + $0x20] sm:$0xff] %vm2797_vm0, %v4697_v14  ;;  %v4664_v35 = vld [vmem:[#allocation3 + $0x38] sm:$0xff]  ;;  %v4174_v14 = vld [vmem:[#allocation3 + $0x80] sm:$0xff] }
 0x344   :  { %4241 = vst.msk [vmem:[#allocation3 + $0x58] sm:$0xff] %vm2797_vm0, %v4205_v9  ;;  %v13404_v33 = vpop.f32.mrb[47].mxu1  ;;  %v4700_v4 = vadd.f32 %v13308_v50, %v4664_v35  ;;  %v4663_v61 = vld [vmem:[#allocation3 + $0x30] sm:$0xff]  ;;  %v6777_v9 = vld [vmem:[#allocation2 + $0xb4] sm:$0xff] }
 0x345   :  { %4240 = vst.msk [vmem:[#allocation3 + $0x50] sm:$0xff] %vm2797_vm0, %v4204_v52  ;;  %v10549_v41 = vpop.f32.mrb[100].mxu0  ;;  %v4699_v12 = vadd.f32 %v4663_v61, %v13312_v59  ;;  %v6778_v61 = vld [vmem:[#allocation2 + $0xbc] sm:$0xff] }
 0x346   :  { %v4207_v32 = vadd.f32 %v10549_v41, %v4171_v30  ;;  %v4039_v34 = vpop.f32.mrb[101].mxu0  ;;  %10893 = vmatmul.mubr.msk.f32.gmra.mrb[206].mxu0 %vm2797_vm0, %v6772_v0  ;;  %4736 = vst.msk [vmem:[#allocation3 + $0x38] sm:$0xff] %vm2797_vm0, %v4700_v4  ;;  %v4177_v4 = vld [vmem:[#allocation3 + $0x98] sm:$0xff] }
 0x347   :  { %v4206_v49 = vadd.f32 %v4170_v36, %v4039_v34  ;;  %v13411_v3 = vpop.f32.mrb[48].mxu1  ;;  %10895 = vmatprep.mubr.msk.f32.mxu0 %vm2797_vm0, %v6773_v57  ;;  %4735 = vst.msk [vmem:[#allocation3 + $0x30] sm:$0xff] %vm2797_vm0, %v4699_v12  ;;  %v4666_v50 = vld [vmem:[#allocation3 + $0x48] sm:$0xff]  ;;  %v4176_v12 = vld [vmem:[#allocation3 + $0x90] sm:$0xff] }
 0x348   :  { %4243 = vst.msk [vmem:[#allocation3 + $0x68] sm:$0xff] %vm2797_vm0, %v4207_v32  ;;  %v13416_v37 = vpop.f32.mrb[49].mxu1  ;;  %v4702_v59 = vadd.f32 %v13316_v22, %v4666_v50  ;;  %v4665_v5 = vld [vmem:[#allocation3 + $0x40] sm:$0xff]  ;;  %v6779_v32 = vld [vmem:[#allocation2 + $0xc4] sm:$0xff] }
 0x349   :  { %4242 = vst.msk [vmem:[#allocation3 + $0x60] sm:$0xff] %vm2797_vm0, %v4206_v49  ;;  %v10552_v26 = vpop.f32.mrb[102].mxu0  ;;  %v4701_v21 = vadd.f32 %v4665_v5, %v13320_v45  ;;  %v6780_v5 = vld [vmem:[#allocation2 + $0xcc] sm:$0xff] }
 0x34a   :  { %v4209_v53 = vadd.f32 %v10552_v26, %v4173_v39  ;;  %v4049_v63 = vpop.f32.mrb[103].mxu0  ;;  %10896 = vmatmul.mubr.msk.f32.gmra.mrb[208].mxu0 %vm2797_vm0, %v6774_v10  ;;  %4738 = vst.msk [vmem:[#allocation3 + $0x48] sm:$0xff] %vm2797_vm0, %v4702_v59  ;;  %v4179_v59 = vld [vmem:[#allocation3 + $0xa8] sm:$0xff] }
 0x34b   :  { %v4208_v58 = vadd.f32 %v4172_v11, %v4049_v63  ;;  %v13423_v17 = vpop.f32.mrb[50].mxu1  ;;  %10898 = vmatprep.mubr.msk.f32.mxu0 %vm2797_vm0, %v6775_v31  ;;  %4737 = vst.msk [vmem:[#allocation3 + $0x40] sm:$0xff] %vm2797_vm0, %v4701_v21  ;;  %v4668_v22 = vld [vmem:[#allocation3 + $0x58] sm:$0xff]  ;;  %v4178_v21 = vld [vmem:[#allocation3 + $0xa0] sm:$0xff] }
 0x34c   :  { %4245 = vst.msk [vmem:[#allocation3 + $0x78] sm:$0xff] %vm2797_vm0, %v4209_v53  ;;  %v13428_v46 = vpop.f32.mrb[51].mxu1  ;;  %v4704_v45 = vadd.f32 %v13324_v40, %v4668_v22  ;;  %v4667_v60 = vld [vmem:[#allocation3 + $0x50] sm:$0xff]  ;;  %v6781_v53 = vld [vmem:[#allocation2 + $0xd4] sm:$0xff] }
 0x34d   :  { %4244 = vst.msk [vmem:[#allocation3 + $0x70] sm:$0xff] %vm2797_vm0, %v4208_v58  ;;  %v10555_v55 = vpop.f32.mrb[104].mxu0  ;;  %v4703_v42 = vadd.f32 %v4667_v60, %v13328_v1  ;;  %v6782_v60 = vld [vmem:[#allocation2 + $0xdc] sm:$0xff] }
 0x34e   :  { %v4211_v18 = vadd.f32 %v10555_v55, %v4175_v62  ;;  %v4059_v13 = vpop.f32.mrb[105].mxu0  ;;  %10899 = vmatmul.mubr.msk.f32.gmra.mrb[210].mxu0 %vm2797_vm0, %v6776_v29  ;;  %4740 = vst.msk [vmem:[#allocation3 + $0x58] sm:$0xff] %vm2797_vm0, %v4704_v45  ;;  %v4181_v45 = vld [vmem:[#allocation3 + $0xb8] sm:$0xff] }
 0x34f   :  { %v4210_v47 = vadd.f32 %v4174_v14, %v4059_v13  ;;  %10901 = vmatprep.mubr.msk.f32.mxu0 %vm2797_vm0, %v6777_v9  ;;  %v13436_v40 = vpop.f32.mrb[52].mxu1  ;;  %4739 = vst.msk [vmem:[#allocation3 + $0x50] sm:$0xff] %vm2797_vm0, %v4703_v42  ;;  %v4670_v25 = vld [vmem:[#allocation3 + $0x68] sm:$0xff]  ;;  %v4180_v42 = vld [vmem:[#allocation3 + $0xb0] sm:$0xff] }
 0x350   :  { %4247 = vst.msk [vmem:[#allocation3 + $0x88] sm:$0xff] %vm2797_vm0, %v4211_v18  ;;  %v13440_v20 = vpop.f32.mrb[53].mxu1  ;;  %v4706_v1 = vadd.f32 %v13332_v2, %v4670_v25  ;;  %v4669_v52 = vld [vmem:[#allocation3 + $0x60] sm:$0xff]  ;;  %v6783_v18 = vld [vmem:[#allocation2 + $0xe4] sm:$0xff] }
 0x351   :  { %4246 = vst.msk [vmem:[#allocation3 + $0x80] sm:$0xff] %vm2797_vm0, %v4210_v47  ;;  %v10558_v35 = vpop.f32.mrb[106].mxu0  ;;  %v4705_v41 = vadd.f32 %v4669_v52, %v13336_v44  ;;  %v6784_v52 = vld [vmem:[#allocation2 + $0xec] sm:$0xff] }
 0x352   :  { %v4213_v30 = vadd.f32 %v10558_v35, %v4177_v4  ;;  %v4069_v0 = vpop.f32.mrb[107].mxu0  ;;  %10902 = vmatmul.mubr.msk.f32.gmra.mrb[212].mxu0 %vm2797_vm0, %v6778_v61  ;;  %4742 = vst.msk [vmem:[#allocation3 + $0x68] sm:$0xff] %vm2797_vm0, %v4706_v1  ;;  %v4183_v1 = vld [vmem:[#allocation3 + $0xc8] sm:$0xff] }
 0x353   :  { %v4212_v34 = vadd.f32 %v4176_v12, %v4069_v0  ;;  %10904 = vmatprep.mubr.msk.f32.mxu0 %vm2797_vm0, %v6779_v32  ;;  %v13448_v2 = vpop.f32.mrb[54].mxu1  ;;  %4741 = vst.msk [vmem:[#allocation3 + $0x60] sm:$0xff] %vm2797_vm0, %v4705_v41  ;;  %v4672_v36 = vld [vmem:[#allocation3 + $0x78] sm:$0xff]  ;;  %v4182_v41 = vld [vmem:[#allocation3 + $0xc0] sm:$0xff] }
 0x354   :  { %4249 = vst.msk [vmem:[#allocation3 + $0x98] sm:$0xff] %vm2797_vm0, %v4213_v30  ;;  %v13452_v57 = vpop.f32.mrb[55].mxu1  ;;  %v4708_v44 = vadd.f32 %v13340_v51, %v4672_v36  ;;  %v4671_v49 = vld [vmem:[#allocation3 + $0x70] sm:$0xff]  ;;  %v6785_v30 = vld [vmem:[#allocation2 + $0xf4] sm:$0xff] }
 0x355   :  { %4248 = vst.msk [vmem:[#allocation3 + $0x90] sm:$0xff] %vm2797_vm0, %v4212_v34  ;;  %v10561_v50 = vpop.f32.mrb[108].mxu0  ;;  %v4707_v26 = vadd.f32 %v4671_v49, %v13344_v28  ;;  %v6786_v49 = vld [vmem:[#allocation2 + $0xfc] sm:$0xff] }
 0x356   :  { %v4215_v39 = vadd.f32 %v10561_v50, %v4179_v59  ;;  %v4079_v10 = vpop.f32.mrb[109].mxu0  ;;  %10905 = vmatmul.mubr.msk.f32.gmra.mrb[214].mxu0 %vm2797_vm0, %v6780_v5  ;;  %4744 = vst.msk [vmem:[#allocation3 + $0x78] sm:$0xff] %vm2797_vm0, %v4708_v44  ;;  %v4185_v44 = vld [vmem:[#allocation3 + $0xd8] sm:$0xff] }
 0x357   :  { %v4214_v63 = vadd.f32 %v4178_v21, %v4079_v10  ;;  %v13459_v11 = vpop.f32.mrb[56].mxu1  ;;  %10907 = vmatprep.mubr.msk.f32.mxu0 %vm2797_vm0, %v6781_v53  ;;  %4743 = vst.msk [vmem:[#allocation3 + $0x70] sm:$0xff] %vm2797_vm0, %v4707_v26  ;;  %v4674_v51 = vld [vmem:[#allocation3 + $0x88] sm:$0xff]  ;;  %v4184_v26 = vld [vmem:[#allocation3 + $0xd0] sm:$0xff] }
 0x358   :  { %4251 = vst.msk [vmem:[#allocation3 + $0xa8] sm:$0xff] %vm2797_vm0, %v4215_v39  ;;  %v13464_v31 = vpop.f32.mrb[57].mxu1  ;;  %v4710_v28 = vadd.f32 %v13348_v54, %v4674_v51  ;;  %v4673_v58 = vld [vmem:[#allocation3 + $0x80] sm:$0xff]  ;;  %v6787_v39 = vld [vmem:[#allocation2 + $0x104] sm:$0xff] }
 0x359   :  { %4250 = vst.msk [vmem:[#allocation3 + $0xa0] sm:$0xff] %vm2797_vm0, %v4214_v63  ;;  %v10564_v22 = vpop.f32.mrb[110].mxu0  ;;  %v4709_v55 = vadd.f32 %v4673_v58, %v13352_v56  ;;  %v6788_v58 = vld [vmem:[#allocation2 + $0x10c] sm:$0xff] }
 0x35a   :  { %v4217_v62 = vadd.f32 %v10564_v22, %v4181_v45  ;;  %v4089_v29 = vpop.f32.mrb[111].mxu0  ;;  %10908 = vmatmul.mubr.msk.f32.gmra.mrb[216].mxu0 %vm2797_vm0, %v6782_v60  ;;  %4746 = vst.msk [vmem:[#allocation3 + $0x88] sm:$0xff] %vm2797_vm0, %v4710_v28  ;;  %v4187_v28 = vld [vmem:[#allocation3 + $0xe8] sm:$0xff] }
 0x35b   :  { %v4216_v13 = vadd.f32 %v4180_v42, %v4089_v29  ;;  %v13471_v14 = vpop.f32.mrb[58].mxu1  ;;  %10910 = vmatprep.mubr.msk.f32.mxu0 %vm2797_vm0, %v6783_v18  ;;  %4745 = vst.msk [vmem:[#allocation3 + $0x80] sm:$0xff] %vm2797_vm0, %v4709_v55  ;;  %v4676_v54 = vld [vmem:[#allocation3 + $0x98] sm:$0xff]  ;;  %v4186_v55 = vld [vmem:[#allocation3 + $0xe0] sm:$0xff] }
 0x35c   :  { %4253 = vst.msk [vmem:[#allocation3 + $0xb8] sm:$0xff] %vm2797_vm0, %v4217_v62  ;;  %v13476_v9 = vpop.f32.mrb[59].mxu1  ;;  %v4712_v56 = vadd.f32 %v13356_v19, %v4676_v54  ;;  %v4675_v47 = vld [vmem:[#allocation3 + $0x90] sm:$0xff]  ;;  %v6789_v62 = vld [vmem:[#allocation2 + $0x114] sm:$0xff] }
 0x35d   :  { %4252 = vst.msk [vmem:[#allocation3 + $0xb0] sm:$0xff] %vm2797_vm0, %v4216_v13  ;;  %v10567_v25 = vpop.f32.mrb[112].mxu0  ;;  %v4711_v35 = vadd.f32 %v4675_v47, %v13360_v16  ;;  %v4189_v47 = vld [vmem:[#allocation3 + $0xf8] sm:$0xff] }
 0x35e   :  { %v4219_v4 = vadd.f32 %v10567_v25, %v4183_v1  ;;  %v4099_v61 = vpop.f32.mrb[113].mxu0  ;;  %10911 = vmatmul.mubr.msk.f32.gmra.mrb[218].mxu0 %vm2797_vm0, %v6784_v52  ;;  %4748 = vst.msk [vmem:[#allocation3 + $0x98] sm:$0xff] %vm2797_vm0, %v4712_v56  ;;  %v6790_v25 = vld [vmem:[#allocation2 + $0x11c] sm:$0xff] }
 0x35f   :  { %v4218_v0 = vadd.f32 %v4182_v41, %v4099_v61  ;;  %v13483_v12 = vpop.f32.mrb[60].mxu1  ;;  %10913 = vmatprep.mubr.msk.f32.mxu0 %vm2797_vm0, %v6785_v30  ;;  %4747 = vst.msk [vmem:[#allocation3 + $0x90] sm:$0xff] %vm2797_vm0, %v4711_v35  ;;  %v4678_v19 = vld [vmem:[#allocation3 + $0xa8] sm:$0xff] }
 0x360   :  { %4255 = vst.msk [vmem:[#allocation3 + $0xc8] sm:$0xff] %vm2797_vm0, %v4219_v4  ;;  %v13488_v32 = vpop.f32.mrb[61].mxu1  ;;  %v4714_v16 = vadd.f32 %v13364_v7, %v4678_v19  ;;  %v4677_v34 = vld [vmem:[#allocation3 + $0xa0] sm:$0xff]  ;;  %v4188_v4 = vld [vmem:[#allocation3 + $0xf0] sm:$0xff] }
 0x361   :  { %4254 = vst.msk [vmem:[#allocation3 + $0xc0] sm:$0xff] %vm2797_vm0, %v4218_v0  ;;  %v10570_v36 = vpop.f32.mrb[114].mxu0  ;;  %v4713_v50 = vadd.f32 %v4677_v34, %v13368_v27 }
 0x362   :  { %v4221_v59 = vadd.f32 %v10570_v36, %v4185_v44  ;;  %v4109_v5 = vpop.f32.mrb[115].mxu0  ;;  %10914 = vmatmul.mubr.msk.f32.gmra.mrb[220].mxu0 %vm2797_vm0, %v6786_v49  ;;  %4750 = vst.msk [vmem:[#allocation3 + $0xa8] sm:$0xff] %vm2797_vm0, %v4714_v16  ;;  %v4191_v36 = vld [vmem:[#allocation3 + $0x108] sm:$0xff] }
 0x363   :  { %v4220_v10 = vadd.f32 %v4184_v26, %v4109_v5  ;;  %v13495_v21 = vpop.f32.mrb[62].mxu1  ;;  %10916 = vmatprep.mubr.msk.f32.mxu0 %vm2797_vm0, %v6787_v39  ;;  %4749 = vst.msk [vmem:[#allocation3 + $0xa0] sm:$0xff] %vm2797_vm0, %v4713_v50  ;;  %v4680_v7 = vld [vmem:[#allocation3 + $0xb8] sm:$0xff] }
 0x364   :  { %4257 = vst.msk [vmem:[#allocation3 + $0xd8] sm:$0xff] %vm2797_vm0, %v4221_v59  ;;  %v13500_v53 = vpop.f32.mrb[63].mxu1  ;;  %v4716_v27 = vadd.f32 %v13375_v48, %v4680_v7  ;;  %v4679_v63 = vld [vmem:[#allocation3 + $0xb0] sm:$0xff]  ;;  %v4190_v59 = vld [vmem:[#allocation3 + $0x100] sm:$0xff] }
 0x365   :  { %4256 = vst.msk [vmem:[#allocation3 + $0xd0] sm:$0xff] %vm2797_vm0, %v4220_v10  ;;  %v10573_v51 = vpop.f32.mrb[116].mxu0  ;;  %v4715_v22 = vadd.f32 %v4679_v63, %v13380_v8  ;;  %v6791_v8 = vld [vmem:[#allocation2 + $0x124] sm:$0xff] }
 0x366   :  { %v4223_v45 = vadd.f32 %v10573_v51, %v4187_v28  ;;  %v4119_v60 = vpop.f32.mrb[117].mxu0  ;;  %10917 = vmatmul.mubr.msk.f32.gmra.mrb[222].mxu0 %vm2797_vm0, %v6788_v58  ;;  %4752 = vst.msk [vmem:[#allocation3 + $0xb8] sm:$0xff] %vm2797_vm0, %v4716_v27  ;;  %v4193_v51 = vld [vmem:[#allocation3 + $0x118] sm:$0xff] }
 0x367   :  { %v4222_v29 = vadd.f32 %v4186_v55, %v4119_v60  ;;  %v13507_v42 = vpop.f32.mrb[64].mxu1  ;;  %10919 = vmatprep.mubr.msk.f32.mxu0 %vm2797_vm0, %v6789_v62  ;;  %4751 = vst.msk [vmem:[#allocation3 + $0xb0] sm:$0xff] %vm2797_vm0, %v4715_v22  ;;  %v4682_v48 = vld [vmem:[#allocation3 + $0xc8] sm:$0xff] }
 0x368   :  { %4259 = vst.msk [vmem:[#allocation3 + $0xe8] sm:$0xff] %vm2797_vm0, %v4223_v45  ;;  %v13512_v18 = vpop.f32.mrb[65].mxu1  ;;  %v4718_v13 = vadd.f32 %v13387_v38, %v4682_v48  ;;  %v4681_v54 = vld [vmem:[#allocation3 + $0xc0] sm:$0xff]  ;;  %v6792_v38 = vld [vmem:[#allocation2 + $0x12c] sm:$0xff] }
 0x369   :  { %4258 = vst.msk [vmem:[#allocation3 + $0xe0] sm:$0xff] %vm2797_vm0, %v4222_v29  ;;  %v10576_v56 = vpop.f32.mrb[118].mxu0  ;;  %v4717_v1 = vadd.f32 %v4681_v54, %v13392_v43  ;;  %v6793_v43 = vld [vmem:[#allocation2 + $0x134] sm:$0xff]  ;;  %v4192_v45 = vld [vmem:[#allocation3 + $0x110] sm:$0xff] }
 0x36a   :  { %v4225_v52 = vadd.f32 %v10576_v56, %v4189_v47  ;;  %v4129_v35 = vpop.f32.mrb[119].mxu0  ;;  %10920 = vmatmul.mubr.msk.f32.gmra.mrb[224].mxu0 %vm2797_vm0, %v6790_v25  ;;  %4754 = vst.msk [vmem:[#allocation3 + $0xc8] sm:$0xff] %vm2797_vm0, %v4718_v13  ;;  %v5157_v13 = vld [vmem:[#allocation3 + $0x8] sm:$0xff]  ;;  %v5156_v25 = vld [vmem:[#allocation3] sm:$0xff] }
 0x36b   :  { %v4224_v61 = vadd.f32 %v4188_v4, %v4129_v35  ;;  %v13519_v41 = vpop.f32.mrb[66].mxu1  ;;  %10922 = vmatprep.mubr.msk.f32.mxu0 %vm2797_vm0, %v6791_v8  ;;  %4753 = vst.msk [vmem:[#allocation3 + $0xc0] sm:$0xff] %vm2797_vm0, %v4717_v1  ;;  %v4684_v30 = vld [vmem:[#allocation3 + $0xd8] sm:$0xff] }
 0x36c   :  { %4261 = vst.msk [vmem:[#allocation3 + $0xf8] sm:$0xff] %vm2797_vm0, %v4225_v52  ;;  %v13524_v0 = vpop.f32.mrb[67].mxu1  ;;  %v4720_v19 = vadd.f32 %v13399_v6, %v4684_v30  ;;  %v4683_v16 = vld [vmem:[#allocation3 + $0xd0] sm:$0xff]  ;;  %v6794_v6 = vld [vmem:[#allocation2 + $0x13c] sm:$0xff] }
 0x36d   :  { %4260 = vst.msk [vmem:[#allocation3 + $0xf0] sm:$0xff] %vm2797_vm0, %v4224_v61  ;;  %v10579_v34 = vpop.f32.mrb[120].mxu0  ;;  %v4719_v44 = vadd.f32 %v4683_v16, %v13404_v33  ;;  %v6795_v33 = vld [vmem:[#allocation2 + $0x144] sm:$0xff] }
 0x36e   :  { %v4227_v49 = vadd.f32 %v10579_v34, %v4191_v36  ;;  %v4139_v50 = vpop.f32.mrb[121].mxu0  ;;  %10923 = vmatmul.mubr.msk.f32.gmra.mrb[226].mxu0 %vm2797_vm0, %v6792_v38  ;;  %4756 = vst.msk [vmem:[#allocation3 + $0xd8] sm:$0xff] %vm2797_vm0, %v4720_v19  ;;  %v5159_v38 = vld [vmem:[#allocation3 + $0x18] sm:$0xff]  ;;  %v5158_v16 = vld [vmem:[#allocation3 + $0x10] sm:$0xff] }
 0x36f   :  { %v4226_v5 = vadd.f32 %v4190_v59, %v4139_v50  ;;  %v13531_v26 = vpop.f32.mrb[68].mxu1  ;;  %10925 = vmatprep.mubr.msk.f32.mxu0 %vm2797_vm0, %v6793_v43  ;;  %4755 = vst.msk [vmem:[#allocation3 + $0xd0] sm:$0xff] %vm2797_vm0, %v4719_v44  ;;  %v4686_v39 = vld [vmem:[#allocation3 + $0xe8] sm:$0xff] }
 0x370   :  { %4263 = vst.msk [vmem:[#allocation3 + $0x108] sm:$0xff] %vm2797_vm0, %v4227_v49  ;;  %v13536_v10 = vpop.f32.mrb[69].mxu1  ;;  %v4722_v7 = vadd.f32 %v13411_v3, %v4686_v39  ;;  %v4685_v27 = vld [vmem:[#allocation3 + $0xe0] sm:$0xff]  ;;  %v6796_v3 = vld [vmem:[#allocation2 + $0x14c] sm:$0xff]  ;;  %v5161_v59 = vld [vmem:[#allocation3 + $0x28] sm:$0xff] }
 0x371   :  { %4262 = vst.msk [vmem:[#allocation3 + $0x100] sm:$0xff] %vm2797_vm0, %v4226_v5  ;;  %v10582_v63 = vpop.f32.mrb[122].mxu0  ;;  %v4721_v28 = vadd.f32 %v4685_v27, %v13416_v37 }
 0x372   :  { %v4229_v58 = vadd.f32 %v10582_v63, %v4193_v51  ;;  %v4149_v22 = vpop.f32.mrb[123].mxu0  ;;  %10926 = vmatmul.mubr.msk.f32.gmra.mrb[228].mxu0 %vm2797_vm0, %v6794_v6  ;;  %4758 = vst.msk [vmem:[#allocation3 + $0xe8] sm:$0xff] %vm2797_vm0, %v4722_v7 }
 0x373   :  { %v4228_v60 = vadd.f32 %v4192_v45, %v4149_v22  ;;  %v13543_v55 = vpop.f32.mrb[70].mxu1  ;;  %10928 = vmatprep.mubr.msk.f32.mxu0 %vm2797_vm0, %v6795_v33  ;;  %4757 = vst.msk [vmem:[#allocation3 + $0xe0] sm:$0xff] %vm2797_vm0, %v4721_v28  ;;  %v4688_v62 = vld [vmem:[#allocation3 + $0xf8] sm:$0xff]  ;;  %v5160_v33 = vld [vmem:[#allocation3 + $0x20] sm:$0xff] }
 0x374   :  { %4265 = vst.msk [vmem:[#allocation3 + $0x118] sm:$0xff] %vm2797_vm0, %v4229_v58  ;;  %v13548_v29 = vpop.f32.mrb[71].mxu1  ;;  %v4724_v37 = vadd.f32 %v13423_v17, %v4688_v62  ;;  %v4687_v48 = vld [vmem:[#allocation3 + $0xf0] sm:$0xff]  ;;  %v5163_v58 = vld [vmem:[#allocation3 + $0x38] sm:$0xff] }
 0x375   :  { %4264 = vst.msk [vmem:[#allocation3 + $0x110] sm:$0xff] %vm2797_vm0, %v4228_v60  ;;  %v10647_v8 = vpop.f32.mrb[124].mxu0  ;;  %v4723_v54 = vadd.f32 %v4687_v48, %v13428_v46 }
 0x376   :  { %v5193_v56 = vadd.f32 %v10647_v8, %v5157_v13  ;;  %v4977_v47 = vpop.f32.mrb[125].mxu0  ;;  %10929 = vmatmul.mubr.msk.f32.gmra.mrb[230].mxu0 %vm2797_vm0, %v6796_v3  ;;  %4760 = vst.msk [vmem:[#allocation3 + $0xf8] sm:$0xff] %vm2797_vm0, %v4724_v37  ;;  %v5162_v3 = vld [vmem:[#allocation3 + $0x30] sm:$0xff] }
 0x377   :  { %v5192_v1 = vadd.f32 %v5156_v25, %v4977_v47  ;;  %v13555_v52 = vpop.f32.mrb[72].mxu1  ;;  %4759 = vst.msk [vmem:[#allocation3 + $0xf0] sm:$0xff] %vm2797_vm0, %v4723_v54  ;;  %v4690_v17 = vld [vmem:[#allocation3 + $0x108] sm:$0xff] }
 0x378   :  { %5229 = vst.msk [vmem:[#allocation3 + $0x8] sm:$0xff] %vm2797_vm0, %v5193_v56  ;;  %v13559_v35 = vpop.f32.mrb[73].mxu1  ;;  %v4726_v4 = vadd.f32 %v13436_v40, %v4690_v17  ;;  %v4689_v46 = vld [vmem:[#allocation3 + $0x100] sm:$0xff]  ;;  %v5165_v54 = vld [vmem:[#allocation3 + $0x48] sm:$0xff] }
 0x379   :  { %5228 = vst.msk [vmem:[#allocation3] sm:$0xff] %vm2797_vm0, %v5192_v1  ;;  %v10650_v61 = vpop.f32.mrb[126].mxu0  ;;  %v4725_v30 = vadd.f32 %v4689_v46, %v13440_v20  ;;  %v5164_v1 = vld [vmem:[#allocation3 + $0x40] sm:$0xff] }
 0x37a   :  { %v5195_v43 = vadd.f32 %v10650_v61, %v5159_v38  ;;  %v4987_v19 = vpop.f32.mrb[127].mxu0  ;;  %4762 = vst.msk [vmem:[#allocation3 + $0x108] sm:$0xff] %vm2797_vm0, %v4726_v4 }
 0x37b   :  { %v5194_v34 = vadd.f32 %v5158_v16, %v4987_v19  ;;  %v13565_v36 = vpop.f32.mrb[74].mxu1  ;;  %4761 = vst.msk [vmem:[#allocation3 + $0x100] sm:$0xff] %vm2797_vm0, %v4725_v30  ;;  %v4692_v44 = vld [vmem:[#allocation3 + $0x118] sm:$0xff] }
 0x37c   :  { %5231 = vst.msk [vmem:[#allocation3 + $0x18] sm:$0xff] %vm2797_vm0, %v5195_v43  ;;  %v13569_v40 = vpop.f32.mrb[75].mxu1  ;;  %v4728_v49 = vadd.f32 %v13448_v2, %v4692_v44  ;;  %v4691_v50 = vld [vmem:[#allocation3 + $0x110] sm:$0xff]  ;;  %v5167_v30 = vld [vmem:[#allocation3 + $0x58] sm:$0xff] }
 0x37d   :  { %5230 = vst.msk [vmem:[#allocation3 + $0x10] sm:$0xff] %vm2797_vm0, %v5194_v34  ;;  %v10653_v20 = vpop.f32.mrb[128].mxu0  ;;  %v4727_v5 = vadd.f32 %v4691_v50, %v13452_v57  ;;  %v5166_v34 = vld [vmem:[#allocation3 + $0x50] sm:$0xff] }
 0x37e   :  { %v5197_v6 = vadd.f32 %v10653_v20, %v5161_v59  ;;  %v4997_v39 = vpop.f32.mrb[129].mxu0  ;;  %4764 = vst.msk [vmem:[#allocation3 + $0x118] sm:$0xff] %vm2797_vm0, %v4728_v49 }
 0x37f   :  { %v5196_v7 = vadd.f32 %v5160_v33, %v4997_v39  ;;  %v13575_v27 = vpop.f32.mrb[76].mxu1  ;;  %4763 = vst.msk [vmem:[#allocation3 + $0x110] sm:$0xff] %vm2797_vm0, %v4727_v5  ;;  %v5656_v63 = vld [vmem:[#allocation3 + $0x8] sm:$0xff] }
 0x380   :  { %5233 = vst.msk [vmem:[#allocation3 + $0x28] sm:$0xff] %vm2797_vm0, %v5197_v6  ;;  %v13579_v2 = vpop.f32.mrb[77].mxu1  ;;  %v5692_v51 = vadd.f32 %v13459_v11, %v5656_v63  ;;  %v5655_v28 = vld [vmem:[#allocation3] sm:$0xff]  ;;  %v5169_v5 = vld [vmem:[#allocation3 + $0x68] sm:$0xff] }
 0x381   :  { %5232 = vst.msk [vmem:[#allocation3 + $0x20] sm:$0xff] %vm2797_vm0, %v5196_v7  ;;  %v10656_v57 = vpop.f32.mrb[130].mxu0  ;;  %v5691_v22 = vadd.f32 %v5655_v28, %v13464_v31  ;;  %v5168_v7 = vld [vmem:[#allocation3 + $0x60] sm:$0xff] }
 0x382   :  { %v5199_v45 = vadd.f32 %v10656_v57, %v5163_v58  ;;  %v5007_v60 = vpop.f32.mrb[131].mxu0  ;;  %5728 = vst.msk [vmem:[#allocation3 + $0x8] sm:$0xff] %vm2797_vm0, %v5692_v51 }
 0x383   :  { %v5198_v62 = vadd.f32 %v5162_v3, %v5007_v60  ;;  %v13585_v37 = vpop.f32.mrb[78].mxu1  ;;  %5727 = vst.msk [vmem:[#allocation3] sm:$0xff] %vm2797_vm0, %v5691_v22  ;;  %v5658_v48 = vld [vmem:[#allocation3 + $0x18] sm:$0xff] }
 0x384   :  { %5235 = vst.msk [vmem:[#allocation3 + $0x38] sm:$0xff] %vm2797_vm0, %v5199_v45  ;;  %v13589_v11 = vpop.f32.mrb[79].mxu1  ;;  %v5694_v8 = vadd.f32 %v13471_v14, %v5658_v48  ;;  %v5657_v13 = vld [vmem:[#allocation3 + $0x10] sm:$0xff]  ;;  %v5171_v22 = vld [vmem:[#allocation3 + $0x78] sm:$0xff] }
 0x385   :  { %5234 = vst.msk [vmem:[#allocation3 + $0x30] sm:$0xff] %vm2797_vm0, %v5198_v62  ;;  %v10659_v31 = vpop.f32.mrb[132].mxu0  ;;  %v5693_v56 = vadd.f32 %v5657_v13, %v13476_v9  ;;  %v5170_v62 = vld [vmem:[#allocation3 + $0x70] sm:$0xff] }
 0x386   :  { %v5201_v47 = vadd.f32 %v10659_v31, %v5165_v54  ;;  %v5017_v25 = vpop.f32.mrb[133].mxu0  ;;  %5730 = vst.msk [vmem:[#allocation3 + $0x18] sm:$0xff] %vm2797_vm0, %v5694_v8 }
 0x387   :  { %v5200_v17 = vadd.f32 %v5164_v1, %v5017_v25  ;;  %v13595_v4 = vpop.f32.mrb[80].mxu1  ;;  %5729 = vst.msk [vmem:[#allocation3 + $0x10] sm:$0xff] %vm2797_vm0, %v5693_v56  ;;  %v5660_v46 = vld [vmem:[#allocation3 + $0x28] sm:$0xff] }
 0x388   :  { %5237 = vst.msk [vmem:[#allocation3 + $0x48] sm:$0xff] %vm2797_vm0, %v5201_v47  ;;  %v13599_v14 = vpop.f32.mrb[81].mxu1  ;;  %v5696_v61 = vadd.f32 %v13483_v12, %v5660_v46  ;;  %v5659_v38 = vld [vmem:[#allocation3 + $0x20] sm:$0xff]  ;;  %v5173_v56 = vld [vmem:[#allocation3 + $0x88] sm:$0xff] }
 0x389   :  { %5236 = vst.msk [vmem:[#allocation3 + $0x40] sm:$0xff] %vm2797_vm0, %v5200_v17  ;;  %v10662_v9 = vpop.f32.mrb[134].mxu0  ;;  %v5695_v43 = vadd.f32 %v5659_v38, %v13488_v32  ;;  %v5172_v17 = vld [vmem:[#allocation3 + $0x80] sm:$0xff] }
 0x38a   :  { %v5203_v19 = vadd.f32 %v10662_v9, %v5167_v30  ;;  %v5027_v16 = vpop.f32.mrb[135].mxu0  ;;  %5732 = vst.msk [vmem:[#allocation3 + $0x28] sm:$0xff] %vm2797_vm0, %v5696_v61 }
 0x38b   :  { %v5202_v44 = vadd.f32 %v5166_v34, %v5027_v16  ;;  %v13605_v49 = vpop.f32.mrb[82].mxu1  ;;  %5731 = vst.msk [vmem:[#allocation3 + $0x20] sm:$0xff] %vm2797_vm0, %v5695_v43  ;;  %v5662_v50 = vld [vmem:[#allocation3 + $0x38] sm:$0xff] }
 0x38c   :  { %5239 = vst.msk [vmem:[#allocation3 + $0x58] sm:$0xff] %vm2797_vm0, %v5203_v19  ;;  %v13609_v12 = vpop.f32.mrb[83].mxu1  ;;  %v5698_v20 = vadd.f32 %v13495_v21, %v5662_v50  ;;  %v5661_v59 = vld [vmem:[#allocation3 + $0x30] sm:$0xff]  ;;  %v5175_v43 = vld [vmem:[#allocation3 + $0x98] sm:$0xff] }
 0x38d   :  { %5238 = vst.msk [vmem:[#allocation3 + $0x50] sm:$0xff] %vm2797_vm0, %v5202_v44  ;;  %v10665_v32 = vpop.f32.mrb[136].mxu0  ;;  %v5697_v6 = vadd.f32 %v5661_v59, %v13500_v53  ;;  %v5174_v44 = vld [vmem:[#allocation3 + $0x90] sm:$0xff] }
 0x38e   :  { %v5205_v39 = vadd.f32 %v10665_v32, %v5169_v5  ;;  %v5037_v33 = vpop.f32.mrb[137].mxu0  ;;  %5734 = vst.msk [vmem:[#allocation3 + $0x38] sm:$0xff] %vm2797_vm0, %v5698_v20 }
 0x38f   :  { %v5204_v63 = vadd.f32 %v5168_v7, %v5037_v33  ;;  %v13615_v51 = vpop.f32.mrb[84].mxu1  ;;  %5733 = vst.msk [vmem:[#allocation3 + $0x30] sm:$0xff] %vm2797_vm0, %v5697_v6  ;;  %v5664_v28 = vld [vmem:[#allocation3 + $0x48] sm:$0xff] }
 0x390   :  { %5241 = vst.msk [vmem:[#allocation3 + $0x68] sm:$0xff] %vm2797_vm0, %v5205_v39  ;;  %v13619_v21 = vpop.f32.mrb[85].mxu1  ;;  %v5700_v57 = vadd.f32 %v13507_v42, %v5664_v28  ;;  %v5663_v58 = vld [vmem:[#allocation3 + $0x40] sm:$0xff]  ;;  %v5177_v6 = vld [vmem:[#allocation3 + $0xa8] sm:$0xff] }
 0x391   :  { %5240 = vst.msk [vmem:[#allocation3 + $0x60] sm:$0xff] %vm2797_vm0, %v5204_v63  ;;  %v10668_v53 = vpop.f32.mrb[138].mxu0  ;;  %v5699_v45 = vadd.f32 %v5663_v58, %v13512_v18  ;;  %v5176_v63 = vld [vmem:[#allocation3 + $0xa0] sm:$0xff] }
 0x392   :  { %v5207_v60 = vadd.f32 %v10668_v53, %v5171_v22  ;;  %v5047_v3 = vpop.f32.mrb[139].mxu0  ;;  %5736 = vst.msk [vmem:[#allocation3 + $0x48] sm:$0xff] %vm2797_vm0, %v5700_v57 }
 0x393   :  { %v5206_v48 = vadd.f32 %v5170_v62, %v5047_v3  ;;  %v13625_v8 = vpop.f32.mrb[86].mxu1  ;;  %5735 = vst.msk [vmem:[#allocation3 + $0x40] sm:$0xff] %vm2797_vm0, %v5699_v45  ;;  %v5666_v13 = vld [vmem:[#allocation3 + $0x58] sm:$0xff] }
 0x394   :  { %5243 = vst.msk [vmem:[#allocation3 + $0x78] sm:$0xff] %vm2797_vm0, %v5207_v60  ;;  %v13629_v42 = vpop.f32.mrb[87].mxu1  ;;  %v5702_v31 = vadd.f32 %v13519_v41, %v5666_v13  ;;  %v5665_v54 = vld [vmem:[#allocation3 + $0x50] sm:$0xff]  ;;  %v5179_v45 = vld [vmem:[#allocation3 + $0xb8] sm:$0xff] }
 0x395   :  { %5242 = vst.msk [vmem:[#allocation3 + $0x70] sm:$0xff] %vm2797_vm0, %v5206_v48  ;;  %v10671_v18 = vpop.f32.mrb[140].mxu0  ;;  %v5701_v47 = vadd.f32 %v5665_v54, %v13524_v0  ;;  %v5178_v48 = vld [vmem:[#allocation3 + $0xb0] sm:$0xff] }
 0x396   :  { %v5209_v25 = vadd.f32 %v10671_v18, %v5173_v56  ;;  %v5057_v1 = vpop.f32.mrb[141].mxu0  ;;  %5738 = vst.msk [vmem:[#allocation3 + $0x58] sm:$0xff] %vm2797_vm0, %v5702_v31 }
 0x397   :  { %v5208_v46 = vadd.f32 %v5172_v17, %v5057_v1  ;;  %v13635_v61 = vpop.f32.mrb[88].mxu1  ;;  %5737 = vst.msk [vmem:[#allocation3 + $0x50] sm:$0xff] %vm2797_vm0, %v5701_v47  ;;  %v5668_v38 = vld [vmem:[#allocation3 + $0x68] sm:$0xff] }
 0x398   :  { %5245 = vst.msk [vmem:[#allocation3 + $0x88] sm:$0xff] %vm2797_vm0, %v5209_v25  ;;  %v13639_v41 = vpop.f32.mrb[89].mxu1  ;;  %v5704_v9 = vadd.f32 %v13531_v26, %v5668_v38  ;;  %v5667_v30 = vld [vmem:[#allocation3 + $0x60] sm:$0xff]  ;;  %v5181_v47 = vld [vmem:[#allocation3 + $0xc8] sm:$0xff] }
 0x399   :  { %5244 = vst.msk [vmem:[#allocation3 + $0x80] sm:$0xff] %vm2797_vm0, %v5208_v46  ;;  %v10674_v0 = vpop.f32.mrb[142].mxu0  ;;  %v5703_v19 = vadd.f32 %v5667_v30, %v13536_v10  ;;  %v5180_v46 = vld [vmem:[#allocation3 + $0xc0] sm:$0xff] }
 0x39a   :  { %v5211_v16 = vadd.f32 %v10674_v0, %v5175_v43  ;;  %v5067_v34 = vpop.f32.mrb[143].mxu0  ;;  %5740 = vst.msk [vmem:[#allocation3 + $0x68] sm:$0xff] %vm2797_vm0, %v5704_v9 }
 0x39b   :  { %v5210_v50 = vadd.f32 %v5174_v44, %v5067_v34  ;;  %v13645_v20 = vpop.f32.mrb[90].mxu1  ;;  %5739 = vst.msk [vmem:[#allocation3 + $0x60] sm:$0xff] %vm2797_vm0, %v5703_v19  ;;  %v5670_v59 = vld [vmem:[#allocation3 + $0x78] sm:$0xff] }
 0x39c   :  { %5247 = vst.msk [vmem:[#allocation3 + $0x98] sm:$0xff] %vm2797_vm0, %v5211_v16  ;;  %v13649_v26 = vpop.f32.mrb[91].mxu1  ;;  %v5706_v32 = vadd.f32 %v13543_v55, %v5670_v59  ;;  %v5669_v5 = vld [vmem:[#allocation3 + $0x70] sm:$0xff]  ;;  %v5183_v19 = vld [vmem:[#allocation3 + $0xd8] sm:$0xff] }
 0x39d   :  { %5246 = vst.msk [vmem:[#allocation3 + $0x90] sm:$0xff] %vm2797_vm0, %v5210_v50  ;;  %v10677_v10 = vpop.f32.mrb[144].mxu0  ;;  %v5705_v39 = vadd.f32 %v5669_v5, %v13548_v29  ;;  %v5182_v50 = vld [vmem:[#allocation3 + $0xd0] sm:$0xff] }
 0x39e   :  { %v5213_v33 = vadd.f32 %v10677_v10, %v5177_v6  ;;  %v5077_v7 = vpop.f32.mrb[145].mxu0  ;;  %5742 = vst.msk [vmem:[#allocation3 + $0x78] sm:$0xff] %vm2797_vm0, %v5706_v32 }
 0x39f   :  { %v5212_v28 = vadd.f32 %v5176_v63, %v5077_v7  ;;  %v13655_v57 = vpop.f32.mrb[92].mxu1  ;;  %5741 = vst.msk [vmem:[#allocation3 + $0x70] sm:$0xff] %vm2797_vm0, %v5705_v39  ;;  %v5672_v58 = vld [vmem:[#allocation3 + $0x88] sm:$0xff] }
 0x3a0   :  { %5249 = vst.msk [vmem:[#allocation3 + $0xa8] sm:$0xff] %vm2797_vm0, %v5213_v33  ;;  %v13659_v55 = vpop.f32.mrb[93].mxu1  ;;  %v5708_v53 = vadd.f32 %v13555_v52, %v5672_v58  ;;  %v5671_v22 = vld [vmem:[#allocation3 + $0x80] sm:$0xff]  ;;  %v5185_v39 = vld [vmem:[#allocation3 + $0xe8] sm:$0xff] }
 0x3a1   :  { %5248 = vst.msk [vmem:[#allocation3 + $0xa0] sm:$0xff] %vm2797_vm0, %v5212_v28  ;;  %v10680_v29 = vpop.f32.mrb[146].mxu0  ;;  %v5707_v60 = vadd.f32 %v5671_v22, %v13559_v35  ;;  %v5184_v28 = vld [vmem:[#allocation3 + $0xe0] sm:$0xff] }
 0x3a2   :  { %v5215_v3 = vadd.f32 %v10680_v29, %v5179_v45  ;;  %v5087_v62 = vpop.f32.mrb[147].mxu0  ;;  %5744 = vst.msk [vmem:[#allocation3 + $0x88] sm:$0xff] %vm2797_vm0, %v5708_v53 }
 0x3a3   :  { %v5214_v13 = vadd.f32 %v5178_v48, %v5087_v62  ;;  %v13665_v31 = vpop.f32.mrb[94].mxu1  ;;  %5743 = vst.msk [vmem:[#allocation3 + $0x80] sm:$0xff] %vm2797_vm0, %v5707_v60  ;;  %v5674_v54 = vld [vmem:[#allocation3 + $0x98] sm:$0xff] }
 0x3a4   :  { %5251 = vst.msk [vmem:[#allocation3 + $0xb8] sm:$0xff] %vm2797_vm0, %v5215_v3  ;;  %v13669_v52 = vpop.f32.mrb[95].mxu1  ;;  %v5710_v18 = vadd.f32 %v13565_v36, %v5674_v54  ;;  %v5673_v56 = vld [vmem:[#allocation3 + $0x90] sm:$0xff]  ;;  %v5187_v60 = vld [vmem:[#allocation3 + $0xf8] sm:$0xff] }
 0x3a5   :  { %5250 = vst.msk [vmem:[#allocation3 + $0xb0] sm:$0xff] %vm2797_vm0, %v5214_v13  ;;  %v10683_v35 = vpop.f32.mrb[148].mxu0  ;;  %v5709_v25 = vadd.f32 %v5673_v56, %v13569_v40  ;;  %v5186_v13 = vld [vmem:[#allocation3 + $0xf0] sm:$0xff] }
 0x3a6   :  { %v5217_v1 = vadd.f32 %v10683_v35, %v5181_v47  ;;  %v5097_v17 = vpop.f32.mrb[149].mxu0  ;;  %5746 = vst.msk [vmem:[#allocation3 + $0x98] sm:$0xff] %vm2797_vm0, %v5710_v18 }
 0x3a7   :  { %v5216_v38 = vadd.f32 %v5180_v46, %v5097_v17  ;;  %v13675_v9 = vpop.f32.mrb[96].mxu1  ;;  %5745 = vst.msk [vmem:[#allocation3 + $0x90] sm:$0xff] %vm2797_vm0, %v5709_v25  ;;  %v5676_v30 = vld [vmem:[#allocation3 + $0xa8] sm:$0xff] }
 0x3a8   :  { %5253 = vst.msk [vmem:[#allocation3 + $0xc8] sm:$0xff] %vm2797_vm0, %v5217_v1  ;;  %v13679_v36 = vpop.f32.mrb[97].mxu1  ;;  %v5712_v0 = vadd.f32 %v13575_v27, %v5676_v30  ;;  %v5675_v43 = vld [vmem:[#allocation3 + $0xa0] sm:$0xff]  ;;  %v5189_v25 = vld [vmem:[#allocation3 + $0x108] sm:$0xff] }
 0x3a9   :  { %5252 = vst.msk [vmem:[#allocation3 + $0xc0] sm:$0xff] %vm2797_vm0, %v5216_v38  ;;  %v10686_v40 = vpop.f32.mrb[150].mxu0  ;;  %v5711_v16 = vadd.f32 %v5675_v43, %v13579_v2  ;;  %v5188_v38 = vld [vmem:[#allocation3 + $0x100] sm:$0xff] }
 0x3aa   :  { %v5219_v34 = vadd.f32 %v10686_v40, %v5183_v19  ;;  %v5107_v44 = vpop.f32.mrb[151].mxu0  ;;  %5748 = vst.msk [vmem:[#allocation3 + $0xa8] sm:$0xff] %vm2797_vm0, %v5712_v0 }
 0x3ab   :  { %v5218_v59 = vadd.f32 %v5182_v50, %v5107_v44  ;;  %v13685_v32 = vpop.f32.mrb[98].mxu1  ;;  %5747 = vst.msk [vmem:[#allocation3 + $0xa0] sm:$0xff] %vm2797_vm0, %v5711_v16  ;;  %v5678_v5 = vld [vmem:[#allocation3 + $0xb8] sm:$0xff] }
 0x3ac   :  { %5255 = vst.msk [vmem:[#allocation3 + $0xd8] sm:$0xff] %vm2797_vm0, %v5219_v34  ;;  %v13689_v27 = vpop.f32.mrb[99].mxu1  ;;  %v5714_v10 = vadd.f32 %v13585_v37, %v5678_v5  ;;  %v5677_v6 = vld [vmem:[#allocation3 + $0xb0] sm:$0xff]  ;;  %v5191_v16 = vld [vmem:[#allocation3 + $0x118] sm:$0xff] }
 0x3ad   :  { %5254 = vst.msk [vmem:[#allocation3 + $0xd0] sm:$0xff] %vm2797_vm0, %v5218_v59  ;;  %v10689_v2 = vpop.f32.mrb[152].mxu0  ;;  %v5713_v33 = vadd.f32 %v5677_v6, %v13589_v11  ;;  %v5190_v59 = vld [vmem:[#allocation3 + $0x110] sm:$0xff] }
 0x3ae   :  { %v5221_v7 = vadd.f32 %v10689_v2, %v5185_v39  ;;  %v5117_v63 = vpop.f32.mrb[153].mxu0  ;;  %5750 = vst.msk [vmem:[#allocation3 + $0xb8] sm:$0xff] %vm2797_vm0, %v5714_v10 }
 0x3af   :  { %v5220_v58 = vadd.f32 %v5184_v28, %v5117_v63  ;;  %v13695_v53 = vpop.f32.mrb[100].mxu1  ;;  %5749 = vst.msk [vmem:[#allocation3 + $0xb0] sm:$0xff] %vm2797_vm0, %v5713_v33  ;;  %v5680_v22 = vld [vmem:[#allocation3 + $0xc8] sm:$0xff] }
 0x3b0   :  { %5257 = vst.msk [vmem:[#allocation3 + $0xe8] sm:$0xff] %vm2797_vm0, %v5221_v7  ;;  %v13699_v37 = vpop.f32.mrb[101].mxu1  ;;  %v5716_v29 = vadd.f32 %v13595_v4, %v5680_v22  ;;  %v5679_v45 = vld [vmem:[#allocation3 + $0xc0] sm:$0xff]  ;;  %v6155_v33 = vld [vmem:[#allocation3 + $0x8] sm:$0xff] }
 0x3b1   :  { %5256 = vst.msk [vmem:[#allocation3 + $0xe0] sm:$0xff] %vm2797_vm0, %v5220_v58  ;;  %v10692_v11 = vpop.f32.mrb[154].mxu0  ;;  %v5715_v3 = vadd.f32 %v5679_v45, %v13599_v14  ;;  %v6154_v58 = vld [vmem:[#allocation3] sm:$0xff] }
 0x3b2   :  { %v5223_v62 = vadd.f32 %v10692_v11, %v5187_v60  ;;  %v5127_v48 = vpop.f32.mrb[155].mxu0  ;;  %5752 = vst.msk [vmem:[#allocation3 + $0xc8] sm:$0xff] %vm2797_vm0, %v5716_v29 }
 0x3b3   :  { %v5222_v54 = vadd.f32 %v5186_v13, %v5127_v48  ;;  %v13705_v18 = vpop.f32.mrb[102].mxu1  ;;  %5751 = vst.msk [vmem:[#allocation3 + $0xc0] sm:$0xff] %vm2797_vm0, %v5715_v3  ;;  %v5682_v56 = vld [vmem:[#allocation3 + $0xd8] sm:$0xff] }
 0x3b4   :  { %5259 = vst.msk [vmem:[#allocation3 + $0xf8] sm:$0xff] %vm2797_vm0, %v5223_v62  ;;  %v13709_v4 = vpop.f32.mrb[103].mxu1  ;;  %v5718_v35 = vadd.f32 %v13605_v49, %v5682_v56  ;;  %v5681_v47 = vld [vmem:[#allocation3 + $0xd0] sm:$0xff]  ;;  %v6157_v3 = vld [vmem:[#allocation3 + $0x18] sm:$0xff] }
 0x3b5   :  { %5258 = vst.msk [vmem:[#allocation3 + $0xf0] sm:$0xff] %vm2797_vm0, %v5222_v54  ;;  %v10695_v14 = vpop.f32.mrb[156].mxu0  ;;  %v5717_v1 = vadd.f32 %v5681_v47, %v13609_v12  ;;  %v6156_v54 = vld [vmem:[#allocation3 + $0x10] sm:$0xff] }
 0x3b6   :  { %v5225_v17 = vadd.f32 %v10695_v14, %v5189_v25  ;;  %v5137_v46 = vpop.f32.mrb[157].mxu0  ;;  %5754 = vst.msk [vmem:[#allocation3 + $0xd8] sm:$0xff] %vm2797_vm0, %v5718_v35 }
 0x3b7   :  { %v5224_v30 = vadd.f32 %v5188_v38, %v5137_v46  ;;  %v13715_v0 = vpop.f32.mrb[104].mxu1  ;;  %5753 = vst.msk [vmem:[#allocation3 + $0xd0] sm:$0xff] %vm2797_vm0, %v5717_v1  ;;  %v5684_v43 = vld [vmem:[#allocation3 + $0xe8] sm:$0xff] }
 0x3b8   :  { %5261 = vst.msk [vmem:[#allocation3 + $0x108] sm:$0xff] %vm2797_vm0, %v5225_v17  ;;  %v13719_v49 = vpop.f32.mrb[105].mxu1  ;;  %v5720_v40 = vadd.f32 %v13615_v51, %v5684_v43  ;;  %v5683_v19 = vld [vmem:[#allocation3 + $0xe0] sm:$0xff]  ;;  %v6159_v1 = vld [vmem:[#allocation3 + $0x28] sm:$0xff] }
 0x3b9   :  { %5260 = vst.msk [vmem:[#allocation3 + $0x100] sm:$0xff] %vm2797_vm0, %v5224_v30  ;;  %v10698_v12 = vpop.f32.mrb[158].mxu0  ;;  %v5719_v34 = vadd.f32 %v5683_v19, %v13619_v21  ;;  %v6158_v30 = vld [vmem:[#allocation3 + $0x20] sm:$0xff] }
 0x3ba   :  { %v5227_v44 = vadd.f32 %v10698_v12, %v5191_v16  ;;  %v5147_v50 = vpop.f32.mrb[159].mxu0  ;;  %5756 = vst.msk [vmem:[#allocation3 + $0xe8] sm:$0xff] %vm2797_vm0, %v5720_v40 }
 0x3bb   :  { %v5226_v5 = vadd.f32 %v5190_v59, %v5147_v50  ;;  %v13725_v10 = vpop.f32.mrb[106].mxu1  ;;  %5755 = vst.msk [vmem:[#allocation3 + $0xe0] sm:$0xff] %vm2797_vm0, %v5719_v34  ;;  %v5686_v6 = vld [vmem:[#allocation3 + $0xf8] sm:$0xff] }
 0x3bc   :  { %5263 = vst.msk [vmem:[#allocation3 + $0x118] sm:$0xff] %vm2797_vm0, %v5227_v44  ;;  %v13729_v51 = vpop.f32.mrb[107].mxu1  ;;  %v5722_v2 = vadd.f32 %v13625_v8, %v5686_v6  ;;  %v5685_v39 = vld [vmem:[#allocation3 + $0xf0] sm:$0xff]  ;;  %v6161_v34 = vld [vmem:[#allocation3 + $0x38] sm:$0xff] }
 0x3bd   :  { %5262 = vst.msk [vmem:[#allocation3 + $0x110] sm:$0xff] %vm2797_vm0, %v5226_v5  ;;  %v10763_v21 = vpop.f32.mrb[160].mxu0  ;;  %v5721_v7 = vadd.f32 %v5685_v39, %v13629_v42  ;;  %v6160_v5 = vld [vmem:[#allocation3 + $0x30] sm:$0xff] }
 0x3be   :  { %v6191_v63 = vadd.f32 %v10763_v21, %v6155_v33  ;;  %v5975_v28 = vpop.f32.mrb[161].mxu0  ;;  %5758 = vst.msk [vmem:[#allocation3 + $0xf8] sm:$0xff] %vm2797_vm0, %v5722_v2 }
 0x3bf   :  { %v6190_v22 = vadd.f32 %v6154_v58, %v5975_v28  ;;  %v13735_v29 = vpop.f32.mrb[108].mxu1  ;;  %5757 = vst.msk [vmem:[#allocation3 + $0xf0] sm:$0xff] %vm2797_vm0, %v5721_v7  ;;  %v5688_v45 = vld [vmem:[#allocation3 + $0x108] sm:$0xff] }
 0x3c0   :  { %6227 = vst.msk [vmem:[#allocation3 + $0x8] sm:$0xff] %vm2797_vm0, %v6191_v63  ;;  %v13739_v8 = vpop.f32.mrb[109].mxu1  ;;  %v5724_v11 = vadd.f32 %v13635_v61, %v5688_v45  ;;  %v5687_v60 = vld [vmem:[#allocation3 + $0x100] sm:$0xff]  ;;  %v6163_v7 = vld [vmem:[#allocation3 + $0x48] sm:$0xff] }
 0x3c1   :  { %6226 = vst.msk [vmem:[#allocation3] sm:$0xff] %vm2797_vm0, %v6190_v22  ;;  %v10766_v42 = vpop.f32.mrb[162].mxu0  ;;  %v5723_v62 = vadd.f32 %v5687_v60, %v13639_v41  ;;  %v6162_v22 = vld [vmem:[#allocation3 + $0x40] sm:$0xff] }
 0x3c2   :  { %v6193_v48 = vadd.f32 %v10766_v42, %v6157_v3  ;;  %v5985_v13 = vpop.f32.mrb[163].mxu0  ;;  %5760 = vst.msk [vmem:[#allocation3 + $0x108] sm:$0xff] %vm2797_vm0, %v5724_v11 }
 0x3c3   :  { %v6192_v56 = vadd.f32 %v6156_v54, %v5985_v13  ;;  %v13745_v35 = vpop.f32.mrb[110].mxu1  ;;  %5759 = vst.msk [vmem:[#allocation3 + $0x100] sm:$0xff] %vm2797_vm0, %v5723_v62  ;;  %v5690_v47 = vld [vmem:[#allocation3 + $0x118] sm:$0xff] }
 0x3c4   :  { %6229 = vst.msk [vmem:[#allocation3 + $0x18] sm:$0xff] %vm2797_vm0, %v6193_v48  ;;  %v13749_v61 = vpop.f32.mrb[111].mxu1  ;;  %v5726_v14 = vadd.f32 %v13645_v20, %v5690_v47  ;;  %v5689_v25 = vld [vmem:[#allocation3 + $0x110] sm:$0xff]  ;;  %v6165_v62 = vld [vmem:[#allocation3 + $0x58] sm:$0xff] }
 0x3c5   :  { %6228 = vst.msk [vmem:[#allocation3 + $0x10] sm:$0xff] %vm2797_vm0, %v6192_v56  ;;  %v10769_v41 = vpop.f32.mrb[164].mxu0  ;;  %v5725_v17 = vadd.f32 %v5689_v25, %v13649_v26  ;;  %v6164_v56 = vld [vmem:[#allocation3 + $0x50] sm:$0xff] }
 0x3c6   :  { %v6195_v46 = vadd.f32 %v10769_v41, %v6159_v1  ;;  %v5995_v38 = vpop.f32.mrb[165].mxu0  ;;  %5762 = vst.msk [vmem:[#allocation3 + $0x118] sm:$0xff] %vm2797_vm0, %v5726_v14 }
 0x3c7   :  { %v6194_v43 = vadd.f32 %v6158_v30, %v5995_v38  ;;  %v13755_v40 = vpop.f32.mrb[112].mxu1  ;;  %5761 = vst.msk [vmem:[#allocation3 + $0x110] sm:$0xff] %vm2797_vm0, %v5725_v17  ;;  %v6654_v19 = vld [vmem:[#allocation3 + $0x8] sm:$0xff] }
 0x3c8   :  { %6231 = vst.msk [vmem:[#allocation3 + $0x28] sm:$0xff] %vm2797_vm0, %v6195_v46  ;;  %v13759_v20 = vpop.f32.mrb[113].mxu1  ;;  %v6690_v12 = vadd.f32 %v13655_v57, %v6654_v19  ;;  %v6653_v16 = vld [vmem:[#allocation3] sm:$0xff]  ;;  %v6167_v17 = vld [vmem:[#allocation3 + $0x68] sm:$0xff] }
 0x3c9   :  { %6230 = vst.msk [vmem:[#allocation3 + $0x20] sm:$0xff] %vm2797_vm0, %v6194_v43  ;;  %v10772_v26 = vpop.f32.mrb[166].mxu0  ;;  %v6689_v44 = vadd.f32 %v6653_v16, %v13659_v55  ;;  %v6166_v43 = vld [vmem:[#allocation3 + $0x60] sm:$0xff] }
 0x3ca   :  { %v6197_v50 = vadd.f32 %v10772_v26, %v6161_v34  ;;  %v6005_v59 = vpop.f32.mrb[167].mxu0  ;;  %6726 = vst.msk [vmem:[#allocation3 + $0x8] sm:$0xff] %vm2797_vm0, %v6690_v12 }
 0x3cb   :  { %v6196_v6 = vadd.f32 %v6160_v5, %v6005_v59  ;;  %v13765_v2 = vpop.f32.mrb[114].mxu1  ;;  %6725 = vst.msk [vmem:[#allocation3] sm:$0xff] %vm2797_vm0, %v6689_v44  ;;  %v6656_v39 = vld [vmem:[#allocation3 + $0x18] sm:$0xff] }
 0x3cc   :  { %6233 = vst.msk [vmem:[#allocation3 + $0x38] sm:$0xff] %vm2797_vm0, %v6197_v50  ;;  %v13769_v57 = vpop.f32.mrb[115].mxu1  ;;  %v6692_v21 = vadd.f32 %v13665_v31, %v6656_v39  ;;  %v6655_v33 = vld [vmem:[#allocation3 + $0x10] sm:$0xff]  ;;  %v6169_v44 = vld [vmem:[#allocation3 + $0x78] sm:$0xff] }
 0x3cd   :  { %6232 = vst.msk [vmem:[#allocation3 + $0x30] sm:$0xff] %vm2797_vm0, %v6196_v6  ;;  %v10775_v55 = vpop.f32.mrb[168].mxu0  ;;  %v6691_v63 = vadd.f32 %v6655_v33, %v13669_v52  ;;  %v6168_v6 = vld [vmem:[#allocation3 + $0x70] sm:$0xff] }
 0x3ce   :  { %v6199_v28 = vadd.f32 %v10775_v55, %v6163_v7  ;;  %v6015_v58 = vpop.f32.mrb[169].mxu0  ;;  %6728 = vst.msk [vmem:[#allocation3 + $0x18] sm:$0xff] %vm2797_vm0, %v6692_v21 }
 0x3cf   :  { %v6198_v45 = vadd.f32 %v6162_v22, %v6015_v58  ;;  %v13775_v11 = vpop.f32.mrb[116].mxu1  ;;  %6727 = vst.msk [vmem:[#allocation3 + $0x10] sm:$0xff] %vm2797_vm0, %v6691_v63  ;;  %v6658_v60 = vld [vmem:[#allocation3 + $0x28] sm:$0xff] }
 0x3d0   :  { %6235 = vst.msk [vmem:[#allocation3 + $0x48] sm:$0xff] %vm2797_vm0, %v6199_v28  ;;  %v13779_v31 = vpop.f32.mrb[117].mxu1  ;;  %v6694_v42 = vadd.f32 %v13675_v9, %v6658_v60  ;;  %v6657_v3 = vld [vmem:[#allocation3 + $0x20] sm:$0xff]  ;;  %v6171_v63 = vld [vmem:[#allocation3 + $0x88] sm:$0xff] }
 0x3d1   :  { %6234 = vst.msk [vmem:[#allocation3 + $0x40] sm:$0xff] %vm2797_vm0, %v6198_v45  ;;  %v10778_v52 = vpop.f32.mrb[170].mxu0  ;;  %v6693_v48 = vadd.f32 %v6657_v3, %v13679_v36  ;;  %v6170_v45 = vld [vmem:[#allocation3 + $0x80] sm:$0xff] }
 0x3d2   :  { %v6201_v13 = vadd.f32 %v10778_v52, %v6165_v62  ;;  %v6025_v54 = vpop.f32.mrb[171].mxu0  ;;  %6730 = vst.msk [vmem:[#allocation3 + $0x28] sm:$0xff] %vm2797_vm0, %v6694_v42 }
 0x3d3   :  { %v6200_v47 = vadd.f32 %v6164_v56, %v6025_v54  ;;  %v13785_v14 = vpop.f32.mrb[118].mxu1  ;;  %6729 = vst.msk [vmem:[#allocation3 + $0x20] sm:$0xff] %vm2797_vm0, %v6693_v48  ;;  %v6660_v25 = vld [vmem:[#allocation3 + $0x38] sm:$0xff] }
 0x3d4   :  { %6237 = vst.msk [vmem:[#allocation3 + $0x58] sm:$0xff] %vm2797_vm0, %v6201_v13  ;;  %v13789_v9 = vpop.f32.mrb[119].mxu1  ;;  %v6696_v41 = vadd.f32 %v13685_v32, %v6660_v25  ;;  %v6659_v1 = vld [vmem:[#allocation3 + $0x30] sm:$0xff]  ;;  %v6173_v48 = vld [vmem:[#allocation3 + $0x98] sm:$0xff] }
 0x3d5   :  { %6236 = vst.msk [vmem:[#allocation3 + $0x50] sm:$0xff] %vm2797_vm0, %v6200_v47  ;;  %v10781_v36 = vpop.f32.mrb[172].mxu0  ;;  %v6695_v46 = vadd.f32 %v6659_v1, %v13689_v27  ;;  %v6172_v47 = vld [vmem:[#allocation3 + $0x90] sm:$0xff] }
 0x3d6   :  { %v6203_v38 = vadd.f32 %v10781_v36, %v6167_v17  ;;  %v6035_v30 = vpop.f32.mrb[173].mxu0  ;;  %6732 = vst.msk [vmem:[#allocation3 + $0x38] sm:$0xff] %vm2797_vm0, %v6696_v41 }
 0x3d7   :  { %v6202_v19 = vadd.f32 %v6166_v43, %v6035_v30  ;;  %v13795_v12 = vpop.f32.mrb[120].mxu1  ;;  %6731 = vst.msk [vmem:[#allocation3 + $0x30] sm:$0xff] %vm2797_vm0, %v6695_v46  ;;  %v6662_v16 = vld [vmem:[#allocation3 + $0x48] sm:$0xff] }
 0x3d8   :  { %6239 = vst.msk [vmem:[#allocation3 + $0x68] sm:$0xff] %vm2797_vm0, %v6203_v38  ;;  %v13799_v32 = vpop.f32.mrb[121].mxu1  ;;  %v6698_v26 = vadd.f32 %v13695_v53, %v6662_v16  ;;  %v6661_v34 = vld [vmem:[#allocation3 + $0x40] sm:$0xff]  ;;  %v6175_v46 = vld [vmem:[#allocation3 + $0xa8] sm:$0xff] }
 0x3d9   :  { %6238 = vst.msk [vmem:[#allocation3 + $0x60] sm:$0xff] %vm2797_vm0, %v6202_v19  ;;  %v10784_v27 = vpop.f32.mrb[174].mxu0  ;;  %v6697_v50 = vadd.f32 %v6661_v34, %v13699_v37  ;;  %v6174_v19 = vld [vmem:[#allocation3 + $0xa0] sm:$0xff] }
 0x3da   :  { %v6205_v59 = vadd.f32 %v10784_v27, %v6169_v44  ;;  %v6045_v5 = vpop.f32.mrb[175].mxu0  ;;  %6734 = vst.msk [vmem:[#allocation3 + $0x48] sm:$0xff] %vm2797_vm0, %v6698_v26  ;;  %v6177_v44 = vld [vmem:[#allocation3 + $0xb8] sm:$0xff] }
 0x3db   :  { %v6204_v39 = vadd.f32 %v6168_v6, %v6045_v5  ;;  %v13805_v21 = vpop.f32.mrb[122].mxu1  ;;  %6733 = vst.msk [vmem:[#allocation3 + $0x40] sm:$0xff] %vm2797_vm0, %v6697_v50  ;;  %v6664_v33 = vld [vmem:[#allocation3 + $0x58] sm:$0xff]  ;;  %v6176_v5 = vld [vmem:[#allocation3 + $0xb0] sm:$0xff] }
 0x3dc   :  { %6241 = vst.msk [vmem:[#allocation3 + $0x78] sm:$0xff] %vm2797_vm0, %v6205_v59  ;;  %v13809_v53 = vpop.f32.mrb[123].mxu1  ;;  %v6700_v55 = vadd.f32 %v13705_v18, %v6664_v33  ;;  %v6663_v7 = vld [vmem:[#allocation3 + $0x50] sm:$0xff] }
 0x3dd   :  { %6240 = vst.msk [vmem:[#allocation3 + $0x70] sm:$0xff] %vm2797_vm0, %v6204_v39  ;;  %v10787_v37 = vpop.f32.mrb[176].mxu0  ;;  %v6699_v28 = vadd.f32 %v6663_v7, %v13709_v4  ;;  %v6179_v7 = vld [vmem:[#allocation3 + $0xc8] sm:$0xff] }
 0x3de   :  { %v6207_v58 = vadd.f32 %v10787_v37, %v6171_v63  ;;  %v6055_v22 = vpop.f32.mrb[177].mxu0  ;;  %6736 = vst.msk [vmem:[#allocation3 + $0x58] sm:$0xff] %vm2797_vm0, %v6700_v55 }
 0x3df   :  { %v6206_v60 = vadd.f32 %v6170_v45, %v6055_v22  ;;  %v13815_v42 = vpop.f32.mrb[124].mxu1  ;;  %6735 = vst.msk [vmem:[#allocation3 + $0x50] sm:$0xff] %vm2797_vm0, %v6699_v28  ;;  %v6666_v3 = vld [vmem:[#allocation3 + $0x68] sm:$0xff]  ;;  %v6178_v28 = vld [vmem:[#allocation3 + $0xc0] sm:$0xff] }
 0x3e0   :  { %6243 = vst.msk [vmem:[#allocation3 + $0x88] sm:$0xff] %vm2797_vm0, %v6207_v58  ;;  %v13819_v18 = vpop.f32.mrb[125].mxu1  ;;  %v6702_v52 = vadd.f32 %v13715_v0, %v6666_v3  ;;  %v6665_v62 = vld [vmem:[#allocation3 + $0x60] sm:$0xff]  ;;  %v6181_v3 = vld [vmem:[#allocation3 + $0xd8] sm:$0xff] }
 0x3e1   :  { %6242 = vst.msk [vmem:[#allocation3 + $0x80] sm:$0xff] %vm2797_vm0, %v6206_v60  ;;  %v10790_v4 = vpop.f32.mrb[178].mxu0  ;;  %v6701_v13 = vadd.f32 %v6665_v62, %v13719_v49 }
 0x3e2   :  { %v6209_v54 = vadd.f32 %v10790_v4, %v6173_v48  ;;  %v6065_v56 = vpop.f32.mrb[179].mxu0  ;;  %6738 = vst.msk [vmem:[#allocation3 + $0x68] sm:$0xff] %vm2797_vm0, %v6702_v52  ;;  %v6180_v4 = vld [vmem:[#allocation3 + $0xd0] sm:$0xff] }
 0x3e3   :  { %v6208_v25 = vadd.f32 %v6172_v47, %v6065_v56  ;;  %v13825_v41 = vpop.f32.mrb[126].mxu1  ;;  %6737 = vst.msk [vmem:[#allocation3 + $0x60] sm:$0xff] %vm2797_vm0, %v6701_v13  ;;  %v6668_v1 = vld [vmem:[#allocation3 + $0x78] sm:$0xff]  ;;  %v6183_v47 = vld [vmem:[#allocation3 + $0xe8] sm:$0xff] }
 0x3e4   :  { %6245 = vst.msk [vmem:[#allocation3 + $0x98] sm:$0xff] %vm2797_vm0, %v6209_v54  ;;  %v13829_v0 = vpop.f32.mrb[127].mxu1  ;;  %v6704_v36 = vadd.f32 %v13725_v10, %v6668_v1  ;;  %v6667_v17 = vld [vmem:[#allocation3 + $0x70] sm:$0xff] }
 0x3e5   :  { %6244 = vst.msk [vmem:[#allocation3 + $0x90] sm:$0xff] %vm2797_vm0, %v6208_v25  ;;  %v10793_v49 = vpop.f32.mrb[180].mxu0  ;;  %v6703_v38 = vadd.f32 %v6667_v17, %v13729_v51 }
 0x3e6   :  { %v6211_v30 = vadd.f32 %v10793_v49, %v6175_v46  ;;  %v6075_v43 = vpop.f32.mrb[181].mxu0  ;;  %6740 = vst.msk [vmem:[#allocation3 + $0x78] sm:$0xff] %vm2797_vm0, %v6704_v36  ;;  %v6182_v36 = vld [vmem:[#allocation3 + $0xe0] sm:$0xff] }
 0x3e7   :  { %v6210_v16 = vadd.f32 %v6174_v19, %v6075_v43  ;;  %6739 = vst.msk [vmem:[#allocation3 + $0x70] sm:$0xff] %vm2797_vm0, %v6703_v38  ;;  %v6670_v26 = vld [vmem:[#allocation3 + $0x88] sm:$0xff] }
 0x3e8   :  { %6247 = vst.msk [vmem:[#allocation3 + $0xa8] sm:$0xff] %vm2797_vm0, %v6211_v30  ;;  %v6706_v10 = vadd.f32 %v13735_v29, %v6670_v26  ;;  %v6669_v34 = vld [vmem:[#allocation3 + $0x80] sm:$0xff]  ;;  %v6185_v30 = vld [vmem:[#allocation3 + $0xf8] sm:$0xff] }
 0x3e9   :  { %6246 = vst.msk [vmem:[#allocation3 + $0xa0] sm:$0xff] %vm2797_vm0, %v6210_v16  ;;  %v10796_v27 = vpop.f32.mrb[182].mxu0  ;;  %v6705_v51 = vadd.f32 %v6669_v34, %v13739_v8  ;;  %v6184_v16 = vld [vmem:[#allocation3 + $0xf0] sm:$0xff] }
 0x3ea   :  { %v6213_v50 = vadd.f32 %v10796_v27, %v6177_v44  ;;  %v6085_v59 = vpop.f32.mrb[183].mxu0  ;;  %6742 = vst.msk [vmem:[#allocation3 + $0x88] sm:$0xff] %vm2797_vm0, %v6706_v10  ;;  %v6187_v44 = vld [vmem:[#allocation3 + $0x108] sm:$0xff] }
 0x3eb   :  { %v6212_v6 = vadd.f32 %v6176_v5, %v6085_v59  ;;  %6741 = vst.msk [vmem:[#allocation3 + $0x80] sm:$0xff] %vm2797_vm0, %v6705_v51  ;;  %v6672_v39 = vld [vmem:[#allocation3 + $0x98] sm:$0xff]  ;;  %v6186_v59 = vld [vmem:[#allocation3 + $0x100] sm:$0xff] }
 0x3ec   :  { %6249 = vst.msk [vmem:[#allocation3 + $0xb8] sm:$0xff] %vm2797_vm0, %v6213_v50  ;;  %v6708_v29 = vadd.f32 %v13745_v35, %v6672_v39  ;;  %v6671_v33 = vld [vmem:[#allocation3 + $0x90] sm:$0xff] }
 0x3ed   :  { %6248 = vst.msk [vmem:[#allocation3 + $0xb0] sm:$0xff] %vm2797_vm0, %v6212_v6  ;;  %v10799_v55 = vpop.f32.mrb[184].mxu0  ;;  %v6707_v8 = vadd.f32 %v6671_v33, %v13749_v61  ;;  %v6189_v33 = vld [vmem:[#allocation3 + $0x118] sm:$0xff] }
 0x3ee   :  { %v6215_v37 = vadd.f32 %v10799_v55, %v6179_v7  ;;  %v6095_v63 = vpop.f32.mrb[185].mxu0  ;;  %6744 = vst.msk [vmem:[#allocation3 + $0x98] sm:$0xff] %vm2797_vm0, %v6708_v29 }
 0x3ef   :  { %v6214_v58 = vadd.f32 %v6178_v28, %v6095_v63  ;;  %6743 = vst.msk [vmem:[#allocation3 + $0x90] sm:$0xff] %vm2797_vm0, %v6707_v8  ;;  %v6674_v22 = vld [vmem:[#allocation3 + $0xa8] sm:$0xff]  ;;  %v6188_v8 = vld [vmem:[#allocation3 + $0x110] sm:$0xff] }
 0x3f0   :  { %6251 = vst.msk [vmem:[#allocation3 + $0xc8] sm:$0xff] %vm2797_vm0, %v6215_v37  ;;  %v6710_v35 = vadd.f32 %v13755_v40, %v6674_v22  ;;  %v6673_v45 = vld [vmem:[#allocation3 + $0xa0] sm:$0xff] }
 0x3f1   :  { %6250 = vst.msk [vmem:[#allocation3 + $0xc0] sm:$0xff] %vm2797_vm0, %v6214_v58  ;;  %v10802_v60 = vpop.f32.mrb[186].mxu0  ;;  %v6709_v61 = vadd.f32 %v6673_v45, %v13759_v20 }
 0x3f2   :  { %v6217_v52 = vadd.f32 %v10802_v60, %v6181_v3  ;;  %v6105_v62 = vpop.f32.mrb[187].mxu0  ;;  %6746 = vst.msk [vmem:[#allocation3 + $0xa8] sm:$0xff] %vm2797_vm0, %v6710_v35  ;;  %v7152_v60 = vld [vmem:[#allocation3] sm:$0xff] }
 0x3f3   :  { %v6216_v48 = vadd.f32 %v6180_v4, %v6105_v62  ;;  %6745 = vst.msk [vmem:[#allocation3 + $0xa0] sm:$0xff] %vm2797_vm0, %v6709_v61  ;;  %v6676_v13 = vld [vmem:[#allocation3 + $0xb8] sm:$0xff] }
 0x3f4   :  { %6253 = vst.msk [vmem:[#allocation3 + $0xd8] sm:$0xff] %vm2797_vm0, %v6217_v52  ;;  %v6712_v40 = vadd.f32 %v13765_v2, %v6676_v13  ;;  %v6675_v54 = vld [vmem:[#allocation3 + $0xb0] sm:$0xff]  ;;  %v7155_v4 = vld [vmem:[#allocation3 + $0x18] sm:$0xff] }
 0x3f5   :  { %6252 = vst.msk [vmem:[#allocation3 + $0xd0] sm:$0xff] %vm2797_vm0, %v6216_v48  ;;  %v10805_v56 = vpop.f32.mrb[188].mxu0  ;;  %v6711_v20 = vadd.f32 %v6675_v54, %v13769_v57 }
 0x3f6   :  { %v6219_v25 = vadd.f32 %v10805_v56, %v6183_v47  ;;  %v6115_v1 = vpop.f32.mrb[189].mxu0  ;;  %6748 = vst.msk [vmem:[#allocation3 + $0xb8] sm:$0xff] %vm2797_vm0, %v6712_v40  ;;  %v7154_v40 = vld [vmem:[#allocation3 + $0x10] sm:$0xff] }
 0x3f7   :  { %v6218_v17 = vadd.f32 %v6182_v36, %v6115_v1  ;;  %6747 = vst.msk [vmem:[#allocation3 + $0xb0] sm:$0xff] %vm2797_vm0, %v6711_v20  ;;  %v6678_v49 = vld [vmem:[#allocation3 + $0xc8] sm:$0xff] }
 0x3f8   :  { %6255 = vst.msk [vmem:[#allocation3 + $0xe8] sm:$0xff] %vm2797_vm0, %v6219_v25  ;;  %v6714_v2 = vadd.f32 %v13775_v11, %v6678_v49  ;;  %v6677_v46 = vld [vmem:[#allocation3 + $0xc0] sm:$0xff]  ;;  %v7157_v1 = vld [vmem:[#allocation3 + $0x28] sm:$0xff] }
 0x3f9   :  { %6254 = vst.msk [vmem:[#allocation3 + $0xe0] sm:$0xff] %vm2797_vm0, %v6218_v17  ;;  %v10808_v38 = vpop.f32.mrb[190].mxu0  ;;  %v6713_v57 = vadd.f32 %v6677_v46, %v13779_v31  ;;  %v7156_v49 = vld [vmem:[#allocation3 + $0x20] sm:$0xff] }
 0x3fa   :  { %v6221_v43 = vadd.f32 %v10808_v38, %v6185_v30  ;;  %v6125_v19 = vpop.f32.mrb[191].mxu0  ;;  %6750 = vst.msk [vmem:[#allocation3 + $0xc8] sm:$0xff] %vm2797_vm0, %v6714_v2 }
 0x3fb   :  { %v6220_v26 = vadd.f32 %v6184_v16, %v6125_v19  ;;  %6749 = vst.msk [vmem:[#allocation3 + $0xc0] sm:$0xff] %vm2797_vm0, %v6713_v57  ;;  %v6680_v10 = vld [vmem:[#allocation3 + $0xd8] sm:$0xff] }
 0x3fc   :  { %6257 = vst.msk [vmem:[#allocation3 + $0xf8] sm:$0xff] %vm2797_vm0, %v6221_v43  ;;  %v6716_v11 = vadd.f32 %v13785_v14, %v6680_v10  ;;  %v6679_v34 = vld [vmem:[#allocation3 + $0xd0] sm:$0xff]  ;;  %v7159_v57 = vld [vmem:[#allocation3 + $0x38] sm:$0xff] }
 0x3fd   :  { %6256 = vst.msk [vmem:[#allocation3 + $0xf0] sm:$0xff] %vm2797_vm0, %v6220_v26  ;;  %v10811_v27 = vpop.f32.mrb[192].mxu0  ;;  %v6715_v31 = vadd.f32 %v6679_v34, %v13789_v9  ;;  %v7158_v26 = vld [vmem:[#allocation3 + $0x30] sm:$0xff] }
 0x3fe   :  { %v6223_v51 = vadd.f32 %v10811_v27, %v6187_v44  ;;  %v6135_v50 = vpop.f32.mrb[193].mxu0  ;;  %6752 = vst.msk [vmem:[#allocation3 + $0xd8] sm:$0xff] %vm2797_vm0, %v6716_v11 }
 0x3ff   :  { %v6222_v5 = vadd.f32 %v6186_v59, %v6135_v50  ;;  %6751 = vst.msk [vmem:[#allocation3 + $0xd0] sm:$0xff] %vm2797_vm0, %v6715_v31  ;;  %v6682_v6 = vld [vmem:[#allocation3 + $0xe8] sm:$0xff] }
 0x400   :  { %6259 = vst.msk [vmem:[#allocation3 + $0x108] sm:$0xff] %vm2797_vm0, %v6223_v51  ;;  %v6718_v14 = vadd.f32 %v13795_v12, %v6682_v6  ;;  %v6681_v39 = vld [vmem:[#allocation3 + $0xe0] sm:$0xff]  ;;  %v7161_v50 = vld [vmem:[#allocation3 + $0x48] sm:$0xff] }
 0x401   :  { %6258 = vst.msk [vmem:[#allocation3 + $0x100] sm:$0xff] %vm2797_vm0, %v6222_v5  ;;  %v10814_v29 = vpop.f32.mrb[194].mxu0  ;;  %v6717_v9 = vadd.f32 %v6681_v39, %v13799_v32  ;;  %v7153_v32 = vld [vmem:[#allocation3 + $0x8] sm:$0xff] }
 0x402   :  { %v6225_v55 = vadd.f32 %v10814_v29, %v6189_v33  ;;  %v6145_v7 = vpop.f32.mrb[195].mxu0  ;;  %6754 = vst.msk [vmem:[#allocation3 + $0xe8] sm:$0xff] %vm2797_vm0, %v6718_v14  ;;  %v7160_v14 = vld [vmem:[#allocation3 + $0x40] sm:$0xff] }
 0x403   :  { %v6224_v37 = vadd.f32 %v6188_v8, %v6145_v7  ;;  %v6684_v63 = vld [vmem:[#allocation3 + $0xf8] sm:$0xff]  ;;  %6753 = vst.msk [vmem:[#allocation3 + $0xe0] sm:$0xff] %vm2797_vm0, %v6717_v9 }
 0x404   :  { %6261 = vst.msk [vmem:[#allocation3 + $0x118] sm:$0xff] %vm2797_vm0, %v6225_v55  ;;  %v6720_v12 = vadd.f32 %v13805_v21, %v6684_v63  ;;  %v6683_v28 = vld [vmem:[#allocation3 + $0xf0] sm:$0xff] }
 0x405   :  { %6260 = vst.msk [vmem:[#allocation3 + $0x110] sm:$0xff] %vm2797_vm0, %v6224_v37  ;;  %v6719_v58 = vadd.f32 %v6683_v28, %v13809_v53  ;;  %v10879_v22 = vpop.f32.mrb[196].mxu0  ;;  %v7163_v37 = vld [vmem:[#allocation3 + $0x58] sm:$0xff] }
 0x406   :  { %6756 = vst.msk [vmem:[#allocation3 + $0xf8] sm:$0xff] %vm2797_vm0, %v6720_v12  ;;  %v7189_v35 = vadd.f32 %v10879_v22, %v7153_v32  ;;  %v6973_v45 = vpop.f32.mrb[197].mxu0 }
 0x407   :  { %6755 = vst.msk [vmem:[#allocation3 + $0xf0] sm:$0xff] %vm2797_vm0, %v6719_v58  ;;  %v7188_v3 = vadd.f32 %v7152_v60, %v6973_v45  ;;  %v6686_v61 = vld [vmem:[#allocation3 + $0x108] sm:$0xff]  ;;  %v7162_v58 = vld [vmem:[#allocation3 + $0x50] sm:$0xff] }
 0x408   :  { %7225 = vst.msk [vmem:[#allocation3 + $0x8] sm:$0xff] %vm2797_vm0, %v7189_v35  ;;  %v6722_v21 = vadd.f32 %v13815_v42, %v6686_v61  ;;  %v6685_v52 = vld [vmem:[#allocation3 + $0x100] sm:$0xff] }
 0x409   :  { %7224 = vst.msk [vmem:[#allocation3] sm:$0xff] %vm2797_vm0, %v7188_v3  ;;  %v6721_v53 = vadd.f32 %v6685_v52, %v13819_v18  ;;  %v10882_v62 = vpop.f32.mrb[198].mxu0  ;;  %v13895_v18 = vld [vmem:[%s14311_s4] ss:$0 sm:$0xff]  ;;  %s11068_s4 = smov 80  }
 0x40a   :  { %6758 = vst.msk [vmem:[#allocation3 + $0x108] sm:$0xff] %vm2797_vm0, %v6722_v21  ;;  %v7191_v48 = vadd.f32 %v10882_v62, %v7155_v4  ;;  %v6983_v13 = vpop.f32.mrb[199].mxu0 }
 0x40b   :  { %6757 = vst.msk [vmem:[#allocation3 + $0x100] sm:$0xff] %vm2797_vm0, %v6721_v53  ;;  %v7190_v54 = vadd.f32 %v7154_v40, %v6983_v13  ;;  %v6688_v56 = vld [vmem:[#allocation3 + $0x118] sm:$0xff]  ;;  %v7165_v53 = vld [vmem:[#allocation3 + $0x68] sm:$0xff]  ;;  %v7164_v13 = vld [vmem:[#allocation3 + $0x60] sm:$0xff] }
 0x40c   :  { %7227 = vst.msk [vmem:[#allocation3 + $0x18] sm:$0xff] %vm2797_vm0, %v7191_v48  ;;  %v6724_v42 = vadd.f32 %v13825_v41, %v6688_v56  ;;  %v6687_v47 = vld [vmem:[#allocation3 + $0x110] sm:$0xff] }
 0x40d   :  { %7226 = vst.msk [vmem:[#allocation3 + $0x10] sm:$0xff] %vm2797_vm0, %v7190_v54  ;;  %v6723_v20 = vadd.f32 %v6687_v47, %v13829_v0  ;;  %v10885_v25 = vpop.f32.mrb[200].mxu0 }
 0x40e   :  { %6760 = vst.msk [vmem:[#allocation3 + $0x118] sm:$0xff] %vm2797_vm0, %v6724_v42  ;;  %v7193_v36 = vadd.f32 %v10885_v25, %v7157_v1  ;;  %v6993_v17 = vpop.f32.mrb[201].mxu0 }
 0x40f   :  { %v7261_v2 = vld [vmem:[#allocation3 + $0x8] sm:$0xff]  ;;  %6759 = vst.msk [vmem:[#allocation3 + $0x110] sm:$0xff] %vm2797_vm0, %v6723_v20  ;;  %v7192_v41 = vadd.f32 %v7156_v49, %v6993_v17  ;;  %v7167_v17 = vld [vmem:[#allocation3 + $0x78] sm:$0xff] }
 0x410   :  { %v7304_v46 = vadd.f32 %v13895_v18, %v7261_v2  ;;  %v7260_v38 = vld [vmem:[#allocation3] sm:$0xff]  ;;  %7229 = vst.msk [vmem:[#allocation3 + $0x28] sm:$0xff] %vm2797_vm0, %v7193_v36 }
 0x411   :  { %v7303_v30 = vadd.f32 %v13895_v18, %v7260_v38  ;;  %7228 = vst.msk [vmem:[#allocation3 + $0x20] sm:$0xff] %vm2797_vm0, %v7192_v41  ;;  %v10888_v0 = vpop.f32.mrb[202].mxu0 }
 0x412   :  { %v7340_v43 = vmax.f32 %v7304_v46, 0.0  ;;  %v7195_v19 = vadd.f32 %v10888_v0, %v7159_v57  ;;  %v7003_v16 = vpop.f32.mrb[203].mxu0  ;;  %v7166_v46 = vld [vmem:[#allocation3 + $0x70] sm:$0xff] }
 0x413   :  { %v7339_v10 = vmax.f32 %v7303_v30, 0.0  ;;  %v7263_v11 = vld [vmem:[#allocation3 + $0x18] sm:$0xff]  ;;  %v7194_v34 = vadd.f32 %v7158_v26, %v7003_v16 }
 0x414   :  { %7376 = vst.msk [vmem:[#allocation3 + $0x8] sm:$0xff] %vm2797_vm0, %v7340_v43  ;;  %v7306_v27 = vadd.f32 %v13895_v18, %v7263_v11  ;;  %v7262_v44 = vld [vmem:[#allocation3 + $0x10] sm:$0xff]  ;;  %7231 = vst.msk [vmem:[#allocation3 + $0x38] sm:$0xff] %vm2797_vm0, %v7195_v19  ;;  %v7169_v11 = vld [vmem:[#allocation3 + $0x88] sm:$0xff] }
 0x415   :  { %7375 = vst.msk [vmem:[#allocation3] sm:$0xff] %vm2797_vm0, %v7339_v10  ;;  %v7305_v31 = vadd.f32 %v13895_v18, %v7262_v44  ;;  %7230 = vst.msk [vmem:[#allocation3 + $0x30] sm:$0xff] %vm2797_vm0, %v7194_v34  ;;  %v10891_v51 = vpop.f32.mrb[204].mxu0 }
 0x416   :  { %v7342_v59 = vmax.f32 %v7306_v27, 0.0  ;;  %v7197_v5 = vadd.f32 %v10891_v51, %v7161_v50  ;;  %v7013_v6 = vpop.f32.mrb[205].mxu0 }
 0x417   :  { %v7341_v39 = vmax.f32 %v7305_v31, 0.0  ;;  %v7265_v29 = vld [vmem:[#allocation3 + $0x28] sm:$0xff]  ;;  %v7196_v33 = vadd.f32 %v7160_v14, %v7013_v6  ;;  %v7168_v31 = vld [vmem:[#allocation3 + $0x80] sm:$0xff] }
 0x418   :  { %7378 = vst.msk [vmem:[#allocation3 + $0x18] sm:$0xff] %vm2797_vm0, %v7342_v59  ;;  %v7308_v9 = vadd.f32 %v13895_v18, %v7265_v29  ;;  %v7264_v55 = vld [vmem:[#allocation3 + $0x20] sm:$0xff]  ;;  %7233 = vst.msk [vmem:[#allocation3 + $0x48] sm:$0xff] %vm2797_vm0, %v7197_v5 }
 0x419   :  { %7377 = vst.msk [vmem:[#allocation3 + $0x10] sm:$0xff] %vm2797_vm0, %v7341_v39  ;;  %v7307_v7 = vadd.f32 %v13895_v18, %v7264_v55  ;;  %7232 = vst.msk [vmem:[#allocation3 + $0x40] sm:$0xff] %vm2797_vm0, %v7196_v33  ;;  %v10894_v8 = vpop.f32.mrb[206].mxu0 }
 0x41a   :  { %v7344_v63 = vmax.f32 %v7308_v9, 0.0  ;;  %v7199_v12 = vadd.f32 %v10894_v8, %v7163_v37  ;;  %v7023_v28 = vpop.f32.mrb[207].mxu0  ;;  %v7171_v9 = vld [vmem:[#allocation3 + $0x98] sm:$0xff]  ;;  %v7170_v37 = vld [vmem:[#allocation3 + $0x90] sm:$0xff] }
 0x41b   :  { %v7343_v22 = vmax.f32 %v7307_v7, 0.0  ;;  %v7267_v32 = vld [vmem:[#allocation3 + $0x38] sm:$0xff]  ;;  %v7198_v35 = vadd.f32 %v7162_v58, %v7023_v28  ;;  %v9877_v45 = vld.sshfl [vmem:[#allocation3 + $0xa] sm:$0x3 pattern:$0x76325410] }
 0x41c   :  { %7380 = vst.msk [vmem:[#allocation3 + $0x28] sm:$0xff] %vm2797_vm0, %v7344_v63  ;;  %v7310_v60 = vadd.f32 %v13895_v18, %v7267_v32  ;;  %v7266_v3 = vld [vmem:[#allocation3 + $0x30] sm:$0xff]  ;;  %7235 = vst.msk [vmem:[#allocation3 + $0x58] sm:$0xff] %vm2797_vm0, %v7199_v12  ;;  %7479 = vrot.lane.b32.xlu0 %v9877_v45, %s11068_s4 }
 0x41d   :  { %v9876_v61 = vld.sshfl [vmem:[#allocation3 + $0x8] sm:$0x3 pattern:$0x76325410]  ;;  %7379 = vst.msk [vmem:[#allocation3 + $0x20] sm:$0xff] %vm2797_vm0, %v7343_v22  ;;  %v7309_v21 = vadd.f32 %v13895_v18, %v7266_v3  ;;  %7234 = vst.msk [vmem:[#allocation3 + $0x50] sm:$0xff] %vm2797_vm0, %v7198_v35 }
 0x41e   :  { %7465 = vrot.lane.b32.xlu1 %v9876_v61, %s11069_s18  ;;  %v10897_v52 = vpop.f32.mrb[208].mxu0  ;;  %v7346_v62 = vmax.f32 %v7310_v60, 0.0  ;;  %v9879_v42 = vld.sshfl [vmem:[#allocation3 + $0xe] sm:$0x3 pattern:$0x76325410] }
 0x41f   :  { %v7201_v4 = vadd.f32 %v10897_v52, %v7165_v53  ;;  %v7033_v48 = vpop.f32.mrb[209].mxu0  ;;  %v7345_v40 = vmax.f32 %v7309_v21, 0.0  ;;  %v7269_v54 = vld [vmem:[#allocation3 + $0x48] sm:$0xff]  ;;  %v7172_v53 = vld [vmem:[#allocation3 + $0xa0] sm:$0xff] }
 0x420   :  { %v7200_v56 = vadd.f32 %v7164_v13, %v7033_v48  ;;  %7382 = vst.msk [vmem:[#allocation3 + $0x38] sm:$0xff] %vm2797_vm0, %v7346_v62  ;;  %v7312_v47 = vadd.f32 %v13895_v18, %v7269_v54  ;;  %v7268_v20 = vld [vmem:[#allocation3 + $0x40] sm:$0xff]  ;;  %7507 = vrot.lane.b32.xlu0 %v9879_v42, %s11070_s19  ;;  %v9878_v25 = vld.sshfl [vmem:[#allocation3 + $0xc] sm:$0x3 pattern:$0x76325410] }
 0x421   :  { %7237 = vst.msk [vmem:[#allocation3 + $0x68] sm:$0xff] %vm2797_vm0, %v7201_v4  ;;  %7381 = vst.msk [vmem:[#allocation3 + $0x30] sm:$0xff] %vm2797_vm0, %v7345_v40  ;;  %v7311_v1 = vadd.f32 %v13895_v18, %v7268_v20  ;;  %v10900_v36 = vpop.f32.mrb[210].mxu0  ;;  %v7173_v3 = vld [vmem:[#allocation3 + $0xa8] sm:$0xff]  ;;  %v7175_v20 = vld [vmem:[#allocation3 + $0xb8] sm:$0xff] }
 0x422   :  { %7236 = vst.msk [vmem:[#allocation3 + $0x60] sm:$0xff] %vm2797_vm0, %v7200_v56  ;;  %7493 = vrot.lane.b32.xlu1 %v9878_v25, %s11071_s20  ;;  %v7348_v49 = vmax.f32 %v7312_v47, 0.0  ;;  %v7203_v2 = vadd.f32 %v10900_v36, %v7167_v17  ;;  %v7043_v41 = vpop.f32.mrb[211].mxu0  ;;  %v7174_v17 = vld [vmem:[#allocation3 + $0xb0] sm:$0xff] }
 0x423   :  { %v7347_v38 = vmax.f32 %v7311_v1, 0.0  ;;  %v7271_v30 = vld [vmem:[#allocation3 + $0x58] sm:$0xff]  ;;  %v7202_v0 = vadd.f32 %v7166_v46, %v7043_v41  ;;  %v9873_v57 = vld.sshfl [vmem:[#allocation3 + $0x2] sm:$0x3 pattern:$0x76325410] }
 0x424   :  { %7384 = vst.msk [vmem:[#allocation3 + $0x48] sm:$0xff] %vm2797_vm0, %v7348_v49  ;;  %v7314_v43 = vadd.f32 %v13895_v18, %v7271_v30  ;;  %v7270_v19 = vld [vmem:[#allocation3 + $0x50] sm:$0xff]  ;;  %7239 = vst.msk [vmem:[#allocation3 + $0x78] sm:$0xff] %vm2797_vm0, %v7203_v2  ;;  %7423 = vrot.lane.b32.xlu0 %v9873_v57, %s11072_s21 }
 0x425   :  { %v9875_v16 = vld.sshfl [vmem:[#allocation3 + $0x6] sm:$0x3 pattern:$0x76325410]  ;;  %7383 = vst.msk [vmem:[#allocation3 + $0x40] sm:$0xff] %vm2797_vm0, %v7347_v38  ;;  %v7313_v26 = vadd.f32 %v13895_v18, %v7270_v19  ;;  %7238 = vst.msk [vmem:[#allocation3 + $0x70] sm:$0xff] %vm2797_vm0, %v7202_v0 }
 0x426   :  { %7451 = vrot.lane.b32.xlu1 %v9875_v16, %s11073_s22  ;;  %v10903_v10 = vpop.f32.mrb[212].mxu0  ;;  %v7350_v34 = vmax.f32 %v7314_v43, 0.0  ;;  %v9874_v5 = vld.sshfl [vmem:[#allocation3 + $0x4] sm:$0x3 pattern:$0x76325410] }
 0x427   :  { %v7205_v27 = vadd.f32 %v10903_v10, %v7169_v11  ;;  %v7053_v44 = vpop.f32.mrb[213].mxu0  ;;  %v7349_v51 = vmax.f32 %v7313_v26, 0.0  ;;  %v9882_v39 = vld.sshfl [vmem:[#allocation3 + $0x1a] sm:$0x3 pattern:$0x76325410] }
 0x428   :  { %v7273_v50 = vld [vmem:[#allocation3 + $0x68] sm:$0xff]  ;;  %v7204_v59 = vadd.f32 %v7168_v31, %v7053_v44  ;;  %7386 = vst.msk [vmem:[#allocation3 + $0x58] sm:$0xff] %vm2797_vm0, %v7350_v34  ;;  %7437 = vrot.lane.b32.xlu0 %v9874_v5, %s11074_s1  ;;  %v9881_v58 = vld.sshfl [vmem:[#allocation3 + $0x18] sm:$0x3 pattern:$0x76325410] }
 0x429   :  { %v7316_v6 = vadd.f32 %v13895_v18, %v7273_v50  ;;  %v7272_v14 = vld [vmem:[#allocation3 + $0x60] sm:$0xff]  ;;  %7241 = vst.msk [vmem:[#allocation3 + $0x88] sm:$0xff] %vm2797_vm0, %v7205_v27  ;;  %7385 = vst.msk [vmem:[#allocation3 + $0x50] sm:$0xff] %vm2797_vm0, %v7349_v51  ;;  %v10906_v33 = vpop.f32.mrb[214].mxu0  ;;  %v7177_v19 = vld [vmem:[#allocation3 + $0xc8] sm:$0xff] }
 0x42a   :  { %v7315_v29 = vadd.f32 %v13895_v18, %v7272_v14  ;;  %7240 = vst.msk [vmem:[#allocation3 + $0x80] sm:$0xff] %vm2797_vm0, %v7204_v59  ;;  %7549 = vrot.lane.b32.xlu1 %v9882_v39, %s11073_s22  ;;  %v7207_v7 = vadd.f32 %v10906_v33, %v7171_v9  ;;  %v7063_v8 = vpop.f32.mrb[215].mxu0  ;;  %v9884_v35 = vld.sshfl [vmem:[#allocation3 + $0x1e] sm:$0x3 pattern:$0x76325410] }
 0x42b   :  { %v7352_v55 = vmax.f32 %v7316_v6, 0.0  ;;  %v7275_v12 = vld [vmem:[#allocation3 + $0x78] sm:$0xff]  ;;  %v7206_v28 = vadd.f32 %v7170_v37, %v7063_v8  ;;  %v9880_v56 = vld.sshfl [vmem:[#allocation3 + $0x12] sm:$0x3 pattern:$0x76325410] }
 0x42c   :  { %v7351_v63 = vmax.f32 %v7315_v29, 0.0  ;;  %v7318_v22 = vadd.f32 %v13895_v18, %v7275_v12  ;;  %v7274_v32 = vld [vmem:[#allocation3 + $0x70] sm:$0xff]  ;;  %7243 = vst.msk [vmem:[#allocation3 + $0x98] sm:$0xff] %vm2797_vm0, %v7207_v7  ;;  %7536 = vrot.lane.b32.xlu0 %v9881_v58, %s11074_s1  ;;  %v7176_v11 = vld [vmem:[#allocation3 + $0xc0] sm:$0xff]  ;;  %v7179_v14 = vld [vmem:[#allocation3 + $0xd8] sm:$0xff] }
 0x42d   :  { %7388 = vst.msk [vmem:[#allocation3 + $0x68] sm:$0xff] %vm2797_vm0, %v7352_v55  ;;  %v7317_v45 = vadd.f32 %v13895_v18, %v7274_v32  ;;  %7242 = vst.msk [vmem:[#allocation3 + $0x90] sm:$0xff] %vm2797_vm0, %v7206_v28  ;;  %v10909_v60 = vpop.f32.mrb[216].mxu0  ;;  %v7178_v9 = vld [vmem:[#allocation3 + $0xd0] sm:$0xff]  ;;  %v7181_v32 = vld [vmem:[#allocation3 + $0xe8] sm:$0xff] }
 0x42e   :  { %7387 = vst.msk [vmem:[#allocation3 + $0x60] sm:$0xff] %vm2797_vm0, %v7351_v63  ;;  %7575 = vrot.lane.b32.xlu1 %v9884_v35, %s11068_s4  ;;  %v7354_v61 = vmax.f32 %v7318_v22, 0.0  ;;  %v7209_v21 = vadd.f32 %v10909_v60, %v7173_v3  ;;  %v7073_v52 = vpop.f32.mrb[217].mxu0  ;;  %v7180_v3 = vld [vmem:[#allocation3 + $0xe0] sm:$0xff] }
 0x42f   :  { %v7353_v62 = vmax.f32 %v7317_v45, 0.0  ;;  %v7208_v48 = vadd.f32 %v7172_v53, %v7073_v52  ;;  %v9883_v13 = vld.sshfl [vmem:[#allocation3 + $0x1c] sm:$0x3 pattern:$0x76325410] }
 0x430   :  { %v7277_v4 = vld [vmem:[#allocation3 + $0x88] sm:$0xff]  ;;  %7390 = vst.msk [vmem:[#allocation3 + $0x78] sm:$0xff] %vm2797_vm0, %v7354_v61  ;;  %7245 = vst.msk [vmem:[#allocation3 + $0xa8] sm:$0xff] %vm2797_vm0, %v7209_v21  ;;  %7562 = vrot.lane.b32.xlu0 %v9883_v13, %s11069_s18 }
 0x431   :  { %v7320_v40 = vadd.f32 %v13895_v18, %v7277_v4  ;;  %v7276_v54 = vld [vmem:[#allocation3 + $0x80] sm:$0xff]  ;;  %7389 = vst.msk [vmem:[#allocation3 + $0x70] sm:$0xff] %vm2797_vm0, %v7353_v62  ;;  %7244 = vst.msk [vmem:[#allocation3 + $0xa0] sm:$0xff] %vm2797_vm0, %v7208_v48  ;;  %v10912_v47 = vpop.f32.mrb[218].mxu0 }
 0x432   :  { %v7319_v42 = vadd.f32 %v13895_v18, %v7276_v54  ;;  %7523 = vrot.lane.b32.xlu1 %v9880_v56, %s11072_s21  ;;  %v7211_v1 = vadd.f32 %v10912_v47, %v7175_v20  ;;  %v7083_v36 = vpop.f32.mrb[219].mxu0  ;;  %v9889_v46 = vld.sshfl [vmem:[#allocation3 + $0x2a] sm:$0x3 pattern:$0x76325410]  ;;  %v7183_v54 = vld [vmem:[#allocation3 + $0xf8] sm:$0xff] }
 0x433   :  { %v7356_v25 = vmax.f32 %v7320_v40, 0.0  ;;  %v7279_v2 = vld [vmem:[#allocation3 + $0x98] sm:$0xff]  ;;  %v7210_v41 = vadd.f32 %v7174_v17, %v7083_v36  ;;  %v9888_v0 = vld.sshfl [vmem:[#allocation3 + $0x28] sm:$0x3 pattern:$0x76325410] }
 0x434   :  { %v7355_v49 = vmax.f32 %v7319_v42, 0.0  ;;  %v7322_v38 = vadd.f32 %v13895_v18, %v7279_v2  ;;  %v7278_v30 = vld [vmem:[#allocation3 + $0x90] sm:$0xff]  ;;  %7247 = vst.msk [vmem:[#allocation3 + $0xb8] sm:$0xff] %vm2797_vm0, %v7211_v1  ;;  %7642 = vrot.lane.b32.xlu0 %v9889_v46, %s11073_s22 }
 0x435   :  { %7392 = vst.msk [vmem:[#allocation3 + $0x88] sm:$0xff] %vm2797_vm0, %v7356_v25  ;;  %v7321_v57 = vadd.f32 %v13895_v18, %v7278_v30  ;;  %7246 = vst.msk [vmem:[#allocation3 + $0xb0] sm:$0xff] %vm2797_vm0, %v7210_v41  ;;  %v10915_v43 = vpop.f32.mrb[220].mxu0  ;;  %v7182_v20 = vld [vmem:[#allocation3 + $0xf0] sm:$0xff]  ;;  %v7185_v30 = vld [vmem:[#allocation3 + $0x108] sm:$0xff] }
 0x436   :  { %7391 = vst.msk [vmem:[#allocation3 + $0x80] sm:$0xff] %vm2797_vm0, %v7355_v49  ;;  %7629 = vrot.lane.b32.xlu1 %v9888_v0, %s11074_s1  ;;  %v7358_v16 = vmax.f32 %v7322_v38, 0.0  ;;  %v7213_v26 = vadd.f32 %v10915_v43, %v7177_v19  ;;  %v7093_v10 = vpop.f32.mrb[221].mxu0  ;;  %v7184_v19 = vld [vmem:[#allocation3 + $0x100] sm:$0xff] }
 0x437   :  { %v7357_v34 = vmax.f32 %v7321_v57, 0.0  ;;  %v7281_v27 = vld [vmem:[#allocation3 + $0xa8] sm:$0xff]  ;;  %v7212_v44 = vadd.f32 %v7176_v11, %v7093_v10  ;;  %v9885_v31 = vld.sshfl [vmem:[#allocation3 + $0x20] sm:$0x3 pattern:$0x76325410] }
 0x438   :  { %7394 = vst.msk [vmem:[#allocation3 + $0x98] sm:$0xff] %vm2797_vm0, %v7358_v16  ;;  %v7324_v51 = vadd.f32 %v13895_v18, %v7281_v27  ;;  %v7280_v50 = vld [vmem:[#allocation3 + $0xa0] sm:$0xff]  ;;  %7249 = vst.msk [vmem:[#allocation3 + $0xc8] sm:$0xff] %vm2797_vm0, %v7213_v26  ;;  %7588 = vrot.lane.b32.xlu0 %v9885_v31, %s11071_s20 }
 0x439   :  { %v9886_v59 = vld.sshfl [vmem:[#allocation3 + $0x22] sm:$0x3 pattern:$0x76325410]  ;;  %7393 = vst.msk [vmem:[#allocation3 + $0x90] sm:$0xff] %vm2797_vm0, %v7357_v34  ;;  %v7323_v5 = vadd.f32 %v13895_v18, %v7280_v50  ;;  %7248 = vst.msk [vmem:[#allocation3 + $0xc0] sm:$0xff] %vm2797_vm0, %v7212_v44 }
 0x43a   :  { %7601 = vrot.lane.b32.xlu1 %v9886_v59, %s11070_s19  ;;  %v10918_v6 = vpop.f32.mrb[222].mxu0  ;;  %v7360_v39 = vmax.f32 %v7324_v51, 0.0  ;;  %v9887_v37 = vld.sshfl [vmem:[#allocation3 + $0x26] sm:$0x3 pattern:$0x76325410] }
 0x43b   :  { %v7215_v29 = vadd.f32 %v10918_v6, %v7179_v14  ;;  %v7103_v33 = vpop.f32.mrb[223].mxu0  ;;  %v7359_v55 = vmax.f32 %v7323_v5, 0.0  ;;  %v7283_v7 = vld [vmem:[#allocation3 + $0xb8] sm:$0xff]  ;;  %v7186_v14 = vld [vmem:[#allocation3 + $0x110] sm:$0xff] }
 0x43c   :  { %v7214_v8 = vadd.f32 %v7178_v9, %v7103_v33  ;;  %7396 = vst.msk [vmem:[#allocation3 + $0xa8] sm:$0xff] %vm2797_vm0, %v7360_v39  ;;  %v7326_v63 = vadd.f32 %v13895_v18, %v7283_v7  ;;  %v7282_v12 = vld [vmem:[#allocation3 + $0xb0] sm:$0xff]  ;;  %7616 = vrot.lane.b32.xlu0 %v9887_v37, %s11072_s21  ;;  %v9894_v28 = vld.sshfl [vmem:[#allocation3 + $0x3a] sm:$0x3 pattern:$0x76325410] }
 0x43d   :  { %7251 = vst.msk [vmem:[#allocation3 + $0xd8] sm:$0xff] %vm2797_vm0, %v7215_v29  ;;  %7395 = vst.msk [vmem:[#allocation3 + $0xa0] sm:$0xff] %vm2797_vm0, %v7359_v55  ;;  %v7325_v58 = vadd.f32 %v13895_v18, %v7282_v12  ;;  %v10921_v22 = vpop.f32.mrb[224].mxu0  ;;  %v7187_v50 = vld [vmem:[#allocation3 + $0x118] sm:$0xff] }
 0x43e   :  { %7250 = vst.msk [vmem:[#allocation3 + $0xd0] sm:$0xff] %vm2797_vm0, %v7214_v8  ;;  %7709 = vrot.lane.b32.xlu1 %v9894_v28, %s11072_s21  ;;  %v7362_v35 = vmax.f32 %v7326_v63, 0.0  ;;  %v7217_v45 = vadd.f32 %v10921_v22, %v7181_v32  ;;  %v7113_v60 = vpop.f32.mrb[225].mxu0  ;;  %v7411_v63 = vld [vmem:[#allocation3] sm:$0x3] }
 0x43f   :  { %v7361_v61 = vmax.f32 %v7325_v58, 0.0  ;;  %v7285_v21 = vld [vmem:[#allocation3 + $0xc8] sm:$0xff]  ;;  %v7216_v52 = vadd.f32 %v7180_v3, %v7113_v60  ;;  %v9895_v53 = vld.sshfl [vmem:[#allocation3 + $0x3c] sm:$0x3 pattern:$0x76325410] }
 0x440   :  { %7398 = vst.msk [vmem:[#allocation3 + $0xb8] sm:$0xff] %vm2797_vm0, %v7362_v35  ;;  %v7328_v62 = vadd.f32 %v13895_v18, %v7285_v21  ;;  %v7284_v4 = vld [vmem:[#allocation3 + $0xc0] sm:$0xff]  ;;  %7253 = vst.msk [vmem:[#allocation3 + $0xe8] sm:$0xff] %vm2797_vm0, %v7217_v45  ;;  %7722 = vrot.lane.b32.xlu0 %v9895_v53, %s11074_s1  ;;  %v7512_v3 = vld [vmem:[#allocation3 + $0x10] sm:$0x3] }
 0x441   :  { %v9896_v48 = vld.sshfl [vmem:[#allocation3 + $0x3e] sm:$0x3 pattern:$0x76325410]  ;;  %7397 = vst.msk [vmem:[#allocation3 + $0xb0] sm:$0xff] %vm2797_vm0, %v7361_v61  ;;  %v7327_v13 = vadd.f32 %v13895_v18, %v7284_v4  ;;  %7252 = vst.msk [vmem:[#allocation3 + $0xe0] sm:$0xff] %vm2797_vm0, %v7216_v52 }
 0x442   :  { %7735 = vrot.lane.b32.xlu1 %v9896_v48, %s11073_s22  ;;  %v10924_v40 = vpop.f32.mrb[226].mxu0  ;;  %v7364_v56 = vmax.f32 %v7328_v62, 0.0  ;;  %v9891_v17 = vld.sshfl [vmem:[#allocation3 + $0x32] sm:$0x3 pattern:$0x76325410] }
 0x443   :  { %v7219_v42 = vadd.f32 %v10924_v40, %v7183_v54  ;;  %v7123_v47 = vpop.f32.mrb[227].mxu0  ;;  %v7363_v25 = vmax.f32 %v7327_v13, 0.0  ;;  %v9890_v41 = vld.sshfl [vmem:[#allocation3 + $0x30] sm:$0x3 pattern:$0x76325410] }
 0x444   :  { %v7287_v1 = vld [vmem:[#allocation3 + $0xd8] sm:$0xff]  ;;  %v7218_v36 = vadd.f32 %v7182_v20, %v7123_v47  ;;  %7400 = vst.msk [vmem:[#allocation3 + $0xc8] sm:$0xff] %vm2797_vm0, %v7364_v56  ;;  %7668 = vrot.lane.b32.xlu0 %v9891_v17, %s11068_s4  ;;  %v9893_v11 = vld.sshfl [vmem:[#allocation3 + $0x36] sm:$0x3 pattern:$0x76325410] }
 0x445   :  { %v7330_v49 = vadd.f32 %v13895_v18, %v7287_v1  ;;  %v7286_v2 = vld [vmem:[#allocation3 + $0xd0] sm:$0xff]  ;;  %7255 = vst.msk [vmem:[#allocation3 + $0xf8] sm:$0xff] %vm2797_vm0, %v7219_v42  ;;  %7399 = vst.msk [vmem:[#allocation3 + $0xc0] sm:$0xff] %vm2797_vm0, %v7363_v25  ;;  %v10927_v38 = vpop.f32.mrb[228].mxu0  ;;  %v7605_v40 = vld [vmem:[#allocation3 + $0x24] sm:$0x3] }
 0x446   :  { %v7329_v46 = vadd.f32 %v13895_v18, %v7286_v2  ;;  %7254 = vst.msk [vmem:[#allocation3 + $0xf0] sm:$0xff] %vm2797_vm0, %v7218_v36  ;;  %7655 = vrot.lane.b32.xlu1 %v9890_v41, %s11069_s18  ;;  %v7221_v57 = vadd.f32 %v10927_v38, %v7185_v30  ;;  %v7133_v43 = vpop.f32.mrb[229].mxu0  ;;  %v9892_v44 = vld.sshfl [vmem:[#allocation3 + $0x34] sm:$0x3 pattern:$0x76325410] }
 0x447   :  { %v7366_v0 = vmax.f32 %v7330_v49, 0.0  ;;  %v7289_v26 = vld [vmem:[#allocation3 + $0xe8] sm:$0xff]  ;;  %v7220_v10 = vadd.f32 %v7184_v19, %v7133_v43  ;;  %7413 = vst.msk [vmem:[#allocation4] sm:$0x3] %vm7412_vm1, %v7411_v63  ;;  %7513 = vst.msk [vmem:[#allocation4 + $0x2] sm:$0x3] %vm7412_vm1, %v7512_v3 }
 0x448   :  { %v7365_v16 = vmax.f32 %v7329_v46, 0.0  ;;  %v7332_v34 = vadd.f32 %v13895_v18, %v7289_v26  ;;  %v7288_v27 = vld [vmem:[#allocation3 + $0xe0] sm:$0xff]  ;;  %7257 = vst.msk [vmem:[#allocation3 + $0x108] sm:$0xff] %vm2797_vm0, %v7221_v57  ;;  %7694 = vrot.lane.b32.xlu0 %v9893_v11, %s11070_s19  ;;  %v7698_v20 = vld [vmem:[#allocation3 + $0x38] sm:$0x3] }
 0x449   :  { %7402 = vst.msk [vmem:[#allocation3 + $0xd8] sm:$0xff] %vm2797_vm0, %v7366_v0  ;;  %v7331_v31 = vadd.f32 %v13895_v18, %v7288_v27  ;;  %7256 = vst.msk [vmem:[#allocation3 + $0x100] sm:$0xff] %vm2797_vm0, %v7220_v10  ;;  %v10930_v51 = vpop.f32.mrb[230].mxu0  ;;  %v7884_v25 = vld [vmem:[#allocation3 + $0x60] sm:$0x3] }
 0x44a   :  { %7401 = vst.msk [vmem:[#allocation3 + $0xd0] sm:$0xff] %vm2797_vm0, %v7365_v16  ;;  %7681 = vrot.lane.b32.xlu1 %v9892_v44, %s11071_s20  ;;  %v7368_v59 = vmax.f32 %v7332_v34, 0.0  ;;  %v7223_v5 = vadd.f32 %v10930_v51, %v7187_v50  ;;  %v7143_v6 = vpop.f32.mrb[231].mxu0  ;;  %v7977_v36 = vld [vmem:[#allocation3 + $0x70] sm:$0x3] }
 0x44b   :  { %v7367_v39 = vmax.f32 %v7331_v31, 0.0  ;;  %v7222_v33 = vadd.f32 %v7186_v14, %v7143_v6  ;;  %v9899_v9 = vld.sshfl [vmem:[#allocation3 + $0x48] sm:$0x3 pattern:$0x76325410] }
 0x44c   :  { %v7291_v29 = vld [vmem:[#allocation3 + $0xf8] sm:$0xff]  ;;  %7404 = vst.msk [vmem:[#allocation3 + $0xe8] sm:$0xff] %vm2797_vm0, %v7368_v59  ;;  %7259 = vst.msk [vmem:[#allocation3 + $0x118] sm:$0xff] %vm2797_vm0, %v7223_v5  ;;  %7774 = vrot.lane.b32.xlu0 %v9899_v9, %s11071_s20  ;;  %v8070_v49 = vld [vmem:[#allocation3 + $0x84] sm:$0x3] }
 0x44d   :  { %v7334_v55 = vadd.f32 %v13895_v18, %v7291_v29  ;;  %v7290_v7 = vld [vmem:[#allocation3 + $0xf0] sm:$0xff]  ;;  %v9900_v8 = vld.sshfl [vmem:[#allocation3 + $0x4a] sm:$0x3 pattern:$0x76325410]  ;;  %7403 = vst.msk [vmem:[#allocation3 + $0xe0] sm:$0xff] %vm2797_vm0, %v7367_v39 }
 0x44e   :  { %v7333_v37 = vadd.f32 %v13895_v18, %v7290_v7  ;;  %7258 = vst.msk [vmem:[#allocation3 + $0x110] sm:$0xff] %vm2797_vm0, %v7222_v33  ;;  %7787 = vrot.lane.b32.xlu1 %v9900_v8, %s11070_s19  ;;  %v9901_v22 = vld.sshfl [vmem:[#allocation3 + $0x4e] sm:$0x3 pattern:$0x76325410] }
 0x44f   :  { %v7370_v12 = vmax.f32 %v7334_v55, 0.0  ;;  %v7293_v58 = vld [vmem:[#allocation3 + $0x108] sm:$0xff]  ;;  %v9898_v45 = vld.sshfl [vmem:[#allocation3 + $0x42] sm:$0x3 pattern:$0x76325410] }
 0x450   :  { %v7369_v28 = vmax.f32 %v7333_v37, 0.0  ;;  %v7336_v32 = vadd.f32 %v13895_v18, %v7293_v58  ;;  %v7292_v35 = vld [vmem:[#allocation3 + $0x100] sm:$0xff]  ;;  %7802 = vrot.lane.b32.xlu0 %v9901_v22, %s11072_s21  ;;  %v9906_v48 = vld.sshfl [vmem:[#allocation3 + $0x58] sm:$0x3 pattern:$0x76325410] }
 0x451   :  { %7406 = vst.msk [vmem:[#allocation3 + $0xf8] sm:$0xff] %vm2797_vm0, %v7370_v12  ;;  %v7335_v60 = vadd.f32 %v13895_v18, %v7292_v35  ;;  %v9897_v53 = vld.sshfl [vmem:[#allocation3 + $0x40] sm:$0x3 pattern:$0x76325410] }
 0x452   :  { %7405 = vst.msk [vmem:[#allocation3 + $0xf0] sm:$0xff] %vm2797_vm0, %v7369_v28  ;;  %7761 = vrot.lane.b32.xlu1 %v9898_v45, %s11068_s4  ;;  %v7372_v61 = vmax.f32 %v7336_v32, 0.0  ;;  %v9907_v42 = vld.sshfl [vmem:[#allocation3 + $0x5a] sm:$0x3 pattern:$0x76325410] }
 0x453   :  { %v7371_v21 = vmax.f32 %v7335_v60, 0.0  ;;  %v7295_v52 = vld [vmem:[#allocation3 + $0x118] sm:$0xff]  ;;  %7606 = vst.msk [vmem:[#allocation4 + $0x4] sm:$0x3] %vm7412_vm1, %v7605_v40  ;;  %7699 = vst.msk [vmem:[#allocation4 + $0x6] sm:$0x3] %vm7412_vm1, %v7698_v20 }
 0x454   :  { %7408 = vst.msk [vmem:[#allocation3 + $0x108] sm:$0xff] %vm2797_vm0, %v7372_v61  ;;  %v7338_v62 = vadd.f32 %v13895_v18, %v7295_v52  ;;  %7748 = vrot.lane.b32.xlu0 %v9897_v53, %s11069_s18  ;;  %v9902_v47 = vld.sshfl [vmem:[#allocation3 + $0x50] sm:$0x3 pattern:$0x76325410] }
 0x455   :  { %v7294_v4 = vld [vmem:[#allocation3 + $0x110] sm:$0xff]  ;;  %7407 = vst.msk [vmem:[#allocation3 + $0x100] sm:$0xff] %vm2797_vm0, %v7371_v21  ;;  %v8163_v2 = vld [vmem:[#allocation3 + $0x98] sm:$0x3]  ;;  %v8256_v41 = vld [vmem:[#allocation3 + $0xac] sm:$0x3] }
 0x456   :  { %v7337_v13 = vadd.f32 %v13895_v18, %v7294_v4  ;;  %7867 = vrot.lane.b32.xlu1 %v9906_v48, %s11071_s20  ;;  %v7374_v54 = vmax.f32 %v7338_v62, 0.0  ;;  %v7791_v18 = vld [vmem:[#allocation3 + $0x4c] sm:$0x3]  ;;  %7885 = vst.msk [vmem:[#allocation4 + $0xa] sm:$0x3] %vm7412_vm1, %v7884_v25 }
 0x457   :  { %7792 = vst.msk [vmem:[#allocation4 + $0x8] sm:$0x3] %vm7412_vm1, %v7791_v18  ;;  %v9903_v1 = vld.sshfl [vmem:[#allocation3 + $0x52] sm:$0x3 pattern:$0x76325410] }
 0x458   :  { %v7373_v56 = vmax.f32 %v7337_v13, 0.0  ;;  %7410 = vst.msk [vmem:[#allocation3 + $0x118] sm:$0xff] %vm2797_vm0, %v7374_v54  ;;  %7880 = vrot.lane.b32.xlu0 %v9907_v42, %s11070_s19  ;;  %v9904_v17 = vld.sshfl [vmem:[#allocation3 + $0x54] sm:$0x3 pattern:$0x76325410] }
 0x459   :  { %7978 = vst.msk [vmem:[#allocation4 + $0xc] sm:$0x3] %vm7412_vm1, %v7977_v36  ;;  %8071 = vst.msk [vmem:[#allocation4 + $0xe] sm:$0x3] %vm7412_vm1, %v8070_v49  ;;  %v8349_v38 = vld [vmem:[#allocation3 + $0xc0] sm:$0x3] }
 0x45a   :  { %7409 = vst.msk [vmem:[#allocation3 + $0x110] sm:$0xff] %vm2797_vm0, %v7373_v56  ;;  %7815 = vrot.lane.b32.xlu1 %v9902_v47, %s11074_s1  ;;  %v9905_v46 = vld.sshfl [vmem:[#allocation3 + $0x56] sm:$0x3 pattern:$0x76325410] }
 0x45b   :  { %8164 = vst.msk [vmem:[#allocation4 + $0x10] sm:$0x3] %vm7412_vm1, %v8163_v2  ;;  %8257 = vst.msk [vmem:[#allocation4 + $0x12] sm:$0x3] %vm7412_vm1, %v8256_v41  ;;  %v8535_v0 = vld [vmem:[#allocation3 + $0xe4] sm:$0x3] }
 0x45c   :  { %7828 = vrot.lane.b32.xlu0 %v9903_v1, %s11073_s22  ;;  %v9912_v30 = vld.sshfl [vmem:[#allocation3 + $0x6a] sm:$0x3 pattern:$0x76325410]  ;;  %8350 = vst.msk [vmem:[#allocation4 + $0x14] sm:$0x3] %vm7412_vm1, %v8349_v38 }
 0x45d   :  { %8536 = vst.msk [vmem:[#allocation4 + $0x18] sm:$0x3] %vm7412_vm1, %v8535_v0  ;;  %v8442_v57 = vld [vmem:[#allocation3 + $0xd0] sm:$0x3] }
 0x45e   :  { %7841 = vrot.lane.b32.xlu1 %v9904_v17, %s11069_s18  ;;  %8443 = vst.msk [vmem:[#allocation4 + $0x16] sm:$0x3] %vm7412_vm1, %v8442_v57  ;;  %v9911_v43 = vld.sshfl [vmem:[#allocation3 + $0x68] sm:$0x3 pattern:$0x76325410] }
 0x45f   :  { %v9914_v19 = vld.sshfl [vmem:[#allocation3 + $0x6e] sm:$0x3 pattern:$0x76325410] }
 0x460   :  { %7854 = vrot.lane.b32.xlu0 %v9905_v46, %s11068_s4  ;;  %v9913_v16 = vld.sshfl [vmem:[#allocation3 + $0x6c] sm:$0x3 pattern:$0x76325410] }
 0x461   :  { %v9908_v26 = vld.sshfl [vmem:[#allocation3 + $0x62] sm:$0x3 pattern:$0x76325410] }
 0x462   :  { %7947 = vrot.lane.b32.xlu1 %v9912_v30, %s11068_s4  ;;  %v9909_v10 = vld.sshfl [vmem:[#allocation3 + $0x64] sm:$0x3 pattern:$0x76325410] }
 0x463   :  { %v9910_v11 = vld.sshfl [vmem:[#allocation3 + $0x66] sm:$0x3 pattern:$0x76325410] }
 0x464   :  { %7934 = vrot.lane.b32.xlu0 %v9911_v43, %s11069_s18  ;;  %v9917_v34 = vld.sshfl [vmem:[#allocation3 + $0x7a] sm:$0x3 pattern:$0x76325410] }
 0x465   :  { %v9916_v27 = vld.sshfl [vmem:[#allocation3 + $0x78] sm:$0x3 pattern:$0x76325410] }
 0x466   :  { %7973 = vrot.lane.b32.xlu1 %v9914_v19, %s11070_s19  ;;  %v9919_v44 = vld.sshfl [vmem:[#allocation3 + $0x7e] sm:$0x3 pattern:$0x76325410] }
 0x467   :  { %v9918_v31 = vld.sshfl [vmem:[#allocation3 + $0x7c] sm:$0x3 pattern:$0x76325410] }
 0x468   :  { %7960 = vrot.lane.b32.xlu0 %v9913_v16, %s11071_s20  ;;  %v9915_v51 = vld.sshfl [vmem:[#allocation3 + $0x72] sm:$0x3 pattern:$0x76325410] }
 0x469   :  { %v9924_v50 = vld.sshfl [vmem:[#allocation3 + $0x8a] sm:$0x3 pattern:$0x76325410] }
 0x46a   :  { %7895 = vrot.lane.b32.xlu1 %v9908_v26, %s11072_s21  ;;  %v9923_v59 = vld.sshfl [vmem:[#allocation3 + $0x88] sm:$0x3 pattern:$0x76325410] }
 0x46b   :  { %v9920_v5 = vld.sshfl [vmem:[#allocation3 + $0x80] sm:$0x3 pattern:$0x76325410] }
 0x46c   :  { %7908 = vrot.lane.b32.xlu0 %v9909_v10, %s11074_s1  ;;  %v9921_v6 = vld.sshfl [vmem:[#allocation3 + $0x82] sm:$0x3 pattern:$0x76325410] }
 0x46d   :  { %v9922_v14 = vld.sshfl [vmem:[#allocation3 + $0x86] sm:$0x3 pattern:$0x76325410] }
 0x46e   :  { %7921 = vrot.lane.b32.xlu1 %v9910_v11, %s11073_s22  ;;  %v9925_v39 = vld.sshfl [vmem:[#allocation3 + $0x90] sm:$0x3 pattern:$0x76325410] }
 0x46f   :  { %v9929_v29 = vld.sshfl [vmem:[#allocation3 + $0x9a] sm:$0x3 pattern:$0x76325410] }
 0x470   :  { %8014 = vrot.lane.b32.xlu0 %v9917_v34, %s11073_s22  ;;  %v9927_v33 = vld.sshfl [vmem:[#allocation3 + $0x94] sm:$0x3 pattern:$0x76325410] }
 0x471   :  { %v9930_v9 = vld.sshfl [vmem:[#allocation3 + $0x9c] sm:$0x3 pattern:$0x76325410] }
 0x472   :  { %8001 = vrot.lane.b32.xlu1 %v9916_v27, %s11074_s1  ;;  %v9936_v55 = vld.sshfl [vmem:[#allocation3 + $0xae] sm:$0x3 pattern:$0x76325410] }
 0x473   :  { %v9931_v7 = vld.sshfl [vmem:[#allocation3 + $0x9e] sm:$0x3 pattern:$0x76325410] }
 0x474   :  { %8040 = vrot.lane.b32.xlu0 %v9919_v44, %s11068_s4  ;;  %v9934_v63 = vld.sshfl [vmem:[#allocation3 + $0xa8] sm:$0x3 pattern:$0x76325410] }
 0x475   :  { %v9926_v12 = vld.sshfl [vmem:[#allocation3 + $0x92] sm:$0x3 pattern:$0x76325410] }
 0x476   :  { %8027 = vrot.lane.b32.xlu1 %v9918_v31, %s11069_s18  ;;  %v9935_v22 = vld.sshfl [vmem:[#allocation3 + $0xaa] sm:$0x3 pattern:$0x76325410] }
 0x477   :  { %v9928_v32 = vld.sshfl [vmem:[#allocation3 + $0x96] sm:$0x3 pattern:$0x76325410] }
 0x478   :  { %7988 = vrot.lane.b32.xlu0 %v9915_v51, %s11072_s21  ;;  %v9937_v60 = vld.sshfl [vmem:[#allocation3 + $0xb0] sm:$0x3 pattern:$0x76325410] }
 0x479   :  { %v9932_v3 = vld.sshfl [vmem:[#allocation3 + $0xa0] sm:$0x3 pattern:$0x76325410] }
 0x47a   :  { %8107 = vrot.lane.b32.xlu1 %v9924_v50, %s11073_s22  ;;  %v9938_v52 = vld.sshfl [vmem:[#allocation3 + $0xb2] sm:$0x3 pattern:$0x76325410] }
 0x47b   :  { %v9933_v53 = vld.sshfl [vmem:[#allocation3 + $0xa2] sm:$0x3 pattern:$0x76325410] }
 0x47c   :  { %8094 = vrot.lane.b32.xlu0 %v9923_v59, %s11074_s1  ;;  %v9939_v48 = vld.sshfl [vmem:[#allocation3 + $0xb4] sm:$0x3 pattern:$0x76325410] }
 0x47d   :  { %v9941_v13 = vld.sshfl [vmem:[#allocation3 + $0xb8] sm:$0x3 pattern:$0x76325410] }
 0x47e   :  { %8053 = vrot.lane.b32.xlu1 %v9920_v5, %s11071_s20  ;;  %v9940_v56 = vld.sshfl [vmem:[#allocation3 + $0xb6] sm:$0x3 pattern:$0x76325410] }
 0x47f   :  { %v9942_v42 = vld.sshfl [vmem:[#allocation3 + $0xba] sm:$0x3 pattern:$0x76325410] }
 0x480   :  { %8066 = vrot.lane.b32.xlu0 %v9921_v6, %s11070_s19  ;;  %v9948_v18 = vld.sshfl [vmem:[#allocation3 + $0xcc] sm:$0x3 pattern:$0x76325410] }
 0x481   :  { %v9946_v25 = vld.sshfl [vmem:[#allocation3 + $0xc8] sm:$0x3 pattern:$0x76325410] }
 0x482   :  { %8081 = vrot.lane.b32.xlu1 %v9922_v14, %s11072_s21  ;;  %v9949_v17 = vld.sshfl [vmem:[#allocation3 + $0xce] sm:$0x3 pattern:$0x76325410] }
 0x483   :  { %v9947_v49 = vld.sshfl [vmem:[#allocation3 + $0xca] sm:$0x3 pattern:$0x76325410] }
 0x484   :  { %8120 = vrot.lane.b32.xlu0 %v9925_v39, %s11069_s18  ;;  %v9951_v46 = vld.sshfl [vmem:[#allocation3 + $0xd8] sm:$0x3 pattern:$0x76325410] }
 0x485   :  { %v9943_v38 = vld.sshfl [vmem:[#allocation3 + $0xc2] sm:$0x3 pattern:$0x76325410] }
 0x486   :  { %8174 = vrot.lane.b32.xlu1 %v9929_v29, %s11072_s21  ;;  %v9952_v57 = vld.sshfl [vmem:[#allocation3 + $0xda] sm:$0x3 pattern:$0x76325410] }
 0x487   :  { %v9944_v43 = vld.sshfl [vmem:[#allocation3 + $0xc4] sm:$0x3 pattern:$0x76325410] }
 0x488   :  { %8146 = vrot.lane.b32.xlu0 %v9927_v33, %s11071_s20  ;;  %v9953_v26 = vld.sshfl [vmem:[#allocation3 + $0xdc] sm:$0x3 pattern:$0x76325410] }
 0x489   :  { %v9945_v10 = vld.sshfl [vmem:[#allocation3 + $0xc6] sm:$0x3 pattern:$0x76325410] }
 0x48a   :  { %8187 = vrot.lane.b32.xlu1 %v9930_v9, %s11074_s1  ;;  %v9954_v27 = vld.sshfl [vmem:[#allocation3 + $0xde] sm:$0x3 pattern:$0x76325410] }
 0x48b   :  { %v9957_v44 = vld.sshfl [vmem:[#allocation3 + $0xe6] sm:$0x3 pattern:$0x76325410] }
 0x48c   :  { %8267 = vrot.lane.b32.xlu0 %v9936_v55, %s11072_s21  ;;  %v9950_v50 = vld.sshfl [vmem:[#allocation3 + $0xd2] sm:$0x3 pattern:$0x76325410] }
 0x48d   :  { %v9955_v59 = vld.sshfl [vmem:[#allocation3 + $0xe0] sm:$0x3 pattern:$0x76325410] }
 0x48e   :  { %8200 = vrot.lane.b32.xlu1 %v9931_v7, %s11073_s22  ;;  %v7480_v8 = vpop.permute.xlu0 %7479  ;;  %v9958_v14 = vld.sshfl [vmem:[#allocation3 + $0xe8] sm:$0x3 pattern:$0x76325410] }
 0x48f   :  { %v9956_v39 = vld.sshfl [vmem:[#allocation3 + $0xe2] sm:$0x3 pattern:$0x76325410] }
 0x490   :  { %v7466_v37 = vpop.permute.xlu1 %7465  ;;  %8239 = vrot.lane.b32.xlu0 %v9934_v63, %s11071_s20  ;;  %v9959_v9 = vld.sshfl [vmem:[#allocation3 + $0xea] sm:$0x3 pattern:$0x76325410] }
 0x492   :  { %8133 = vrot.lane.b32.xlu1 %v9926_v12, %s11068_s4  ;;  %v7508_v28 = vpop.permute.xlu0 %7507 }
 0x494   :  { %v7494_v58 = vpop.permute.xlu1 %7493  ;;  %8252 = vrot.lane.b32.xlu0 %v9935_v22, %s11070_s19 }
 0x496   :  { %8159 = vrot.lane.b32.xlu1 %v9928_v32, %s11070_s19  ;;  %v7424_v35 = vpop.permute.xlu0 %7423 }
 0x497   :  { %7427 = vst.msk [vmem:[#allocation4] sm:$0x3] %vm7426_vm2, %v7424_v35 }
 0x498   :  { %v7452_v45 = vpop.permute.xlu1 %7451  ;;  %8280 = vrot.lane.b32.xlu0 %v9937_v60, %s11074_s1 }
 0x49a   :  { %8213 = vrot.lane.b32.xlu1 %v9932_v3, %s11069_s18  ;;  %v7438_v61 = vpop.permute.xlu0 %7437 }
 0x49b   :  { %7441 = vst.msk [vmem:[#allocation4] sm:$0x3] %vm7440_vm3, %v7438_v61 }
 0x49c   :  { %v7550_v21 = vpop.permute.xlu1 %7549  ;;  %7455 = vst.msk [vmem:[#allocation4] sm:$0x3] %vm7454_vm4, %v7452_v45  ;;  %8293 = vrot.lane.b32.xlu0 %v9938_v52, %s11073_s22 }
 0x49d   :  { %7469 = vst.msk [vmem:[#allocation4] sm:$0x3] %vm7468_vm5, %v7466_v37 }
 0x49e   :  { %8226 = vrot.lane.b32.xlu1 %v9933_v53, %s11068_s4  ;;  %7483 = vst.msk [vmem:[#allocation4] sm:$0x3] %vm7482_vm6, %v7480_v8  ;;  %v7537_v62 = vpop.permute.xlu0 %7536 }
 0x49f   :  { %7497 = vst.msk [vmem:[#allocation4] sm:$0x3] %vm7496_vm7, %v7494_v58 }
 0x4a0   :  { %v7576_v4 = vpop.permute.xlu1 %7575  ;;  %7511 = vst.msk [vmem:[#allocation4] sm:$0x3] %vm7510_vm8, %v7508_v28  ;;  %8306 = vrot.lane.b32.xlu0 %v9939_v48, %s11069_s18 }
 0x4a2   :  { %8332 = vrot.lane.b32.xlu1 %v9941_v13, %s11071_s20  ;;  %v7563_v40 = vpop.permute.xlu0 %7562 }
 0x4a4   :  { %v7524_v54 = vpop.permute.xlu1 %7523  ;;  %8319 = vrot.lane.b32.xlu0 %v9940_v56, %s11068_s4 }
 0x4a5   :  { %7526 = vst.msk [vmem:[#allocation4 + $0x2] sm:$0x3] %vm7426_vm2, %v7524_v54 }
 0x4a6   :  { %7539 = vst.msk [vmem:[#allocation4 + $0x2] sm:$0x3] %vm7440_vm3, %v7537_v62  ;;  %8345 = vrot.lane.b32.xlu1 %v9942_v42, %s11070_s19  ;;  %v7643_v47 = vpop.permute.xlu0 %7642 }
 0x4a7   :  { %7552 = vst.msk [vmem:[#allocation4 + $0x2] sm:$0x3] %vm7454_vm4, %v7550_v21 }
 0x4a8   :  { %7565 = vst.msk [vmem:[#allocation4 + $0x2] sm:$0x3] %vm7468_vm5, %v7563_v40  ;;  %v7630_v20 = vpop.permute.xlu1 %7629  ;;  %8425 = vrot.lane.b32.xlu0 %v9948_v18, %s11071_s20 }
 0x4a9   :  { %7578 = vst.msk [vmem:[#allocation4 + $0x2] sm:$0x3] %vm7482_vm6, %v7576_v4 }
 0x4aa   :  { %8399 = vrot.lane.b32.xlu1 %v9946_v25, %s11069_s18  ;;  %v7589_v1 = vpop.permute.xlu0 %7588 }
 0x4ab   :  { %7591 = vst.msk [vmem:[#allocation4 + $0x2] sm:$0x3] %vm7496_vm7, %v7589_v1 }
 0x4ac   :  { %v7602_v36 = vpop.permute.xlu1 %7601  ;;  %8438 = vrot.lane.b32.xlu0 %v9949_v17, %s11070_s19 }
 0x4ad   :  { %7604 = vst.msk [vmem:[#allocation4 + $0x2] sm:$0x3] %vm7510_vm8, %v7602_v36 }
 0x4ae   :  { %8412 = vrot.lane.b32.xlu1 %v9947_v49, %s11068_s4  ;;  %v7617_v2 = vpop.permute.xlu0 %7616 }
 0x4af   :  { %7619 = vst.msk [vmem:[#allocation4 + $0x4] sm:$0x3] %vm7426_vm2, %v7617_v2 }
 0x4b0   :  { %v7710_v41 = vpop.permute.xlu1 %7709  ;;  %7632 = vst.msk [vmem:[#allocation4 + $0x4] sm:$0x3] %vm7440_vm3, %v7630_v20  ;;  %8466 = vrot.lane.b32.xlu0 %v9951_v46, %s11074_s1 }
 0x4b1   :  { %7712 = vst.msk [vmem:[#allocation4 + $0x6] sm:$0x3] %vm7426_vm2, %v7710_v41 }
 0x4b2   :  { %7645 = vst.msk [vmem:[#allocation4 + $0x4] sm:$0x3] %vm7454_vm4, %v7643_v47  ;;  %8360 = vrot.lane.b32.xlu1 %v9943_v38, %s11072_s21  ;;  %v7723_v30 = vpop.permute.xlu0 %7722 }
 0x4b3   :  { %7725 = vst.msk [vmem:[#allocation4 + $0x6] sm:$0x3] %vm7440_vm3, %v7723_v30 }
 0x4b4   :  { %v7736_v0 = vpop.permute.xlu1 %7735  ;;  %8479 = vrot.lane.b32.xlu0 %v9952_v57, %s11073_s22 }
 0x4b5   :  { %7738 = vst.msk [vmem:[#allocation4 + $0x6] sm:$0x3] %vm7454_vm4, %v7736_v0 }
 0x4b6   :  { %8373 = vrot.lane.b32.xlu1 %v9944_v43, %s11074_s1  ;;  %v7669_v19 = vpop.permute.xlu0 %7668 }
 0x4b8   :  { %v7656_v16 = vpop.permute.xlu1 %7655  ;;  %8492 = vrot.lane.b32.xlu0 %v9953_v26, %s11069_s18 }
 0x4b9   :  { %7658 = vst.msk [vmem:[#allocation4 + $0x4] sm:$0x3] %vm7468_vm5, %v7656_v16 }
 0x4ba   :  { %7671 = vst.msk [vmem:[#allocation4 + $0x4] sm:$0x3] %vm7482_vm6, %v7669_v19  ;;  %8386 = vrot.lane.b32.xlu1 %v9945_v10, %s11073_s22  ;;  %v7695_v11 = vpop.permute.xlu0 %7694 }
 0x4bc   :  { %v7682_v34 = vpop.permute.xlu1 %7681  ;;  %8505 = vrot.lane.b32.xlu0 %v9954_v27, %s11068_s4 }
 0x4bd   :  { %7684 = vst.msk [vmem:[#allocation4 + $0x4] sm:$0x3] %vm7496_vm7, %v7682_v34 }
 0x4be   :  { %7697 = vst.msk [vmem:[#allocation4 + $0x4] sm:$0x3] %vm7510_vm8, %v7695_v11  ;;  %8546 = vrot.lane.b32.xlu1 %v9957_v44, %s11072_s21  ;;  %v7775_v31 = vpop.permute.xlu0 %7774 }
 0x4c0   :  { %v7788_v51 = vpop.permute.xlu1 %7787  ;;  %8453 = vrot.lane.b32.xlu0 %v9950_v50, %s11072_s21 }
 0x4c2   :  { %8518 = vrot.lane.b32.xlu1 %v9955_v59, %s11071_s20  ;;  %v7803_v5 = vpop.permute.xlu0 %7802 }
 0x4c3   :  { %7805 = vst.msk [vmem:[#allocation4 + $0x8] sm:$0x3] %vm7426_vm2, %v7803_v5 }
 0x4c4   :  { %v7762_v6 = vpop.permute.xlu1 %7761  ;;  %8559 = vrot.lane.b32.xlu0 %v9958_v14, %s11074_s1 }
 0x4c6   :  { %8531 = vrot.lane.b32.xlu1 %v9956_v39, %s11070_s19  ;;  %v7749_v29 = vpop.permute.xlu0 %7748 }
 0x4c7   :  { %7751 = vst.msk [vmem:[#allocation4 + $0x6] sm:$0x3] %vm7468_vm5, %v7749_v29 }
 0x4c8   :  { %v7868_v33 = vpop.permute.xlu1 %7867  ;;  %7764 = vst.msk [vmem:[#allocation4 + $0x6] sm:$0x3] %vm7482_vm6, %v7762_v6  ;;  %8572 = vrot.lane.b32.xlu0 %v9959_v9, %s11073_s22 }
 0x4c9   :  { %7777 = vst.msk [vmem:[#allocation4 + $0x6] sm:$0x3] %vm7496_vm7, %v7775_v31 }
 0x4ca   :  { %7790 = vst.msk [vmem:[#allocation4 + $0x6] sm:$0x3] %vm7510_vm8, %v7788_v51  ;;  %v7881_v55 = vpop.permute.xlu0 %7880 }
 0x4cc   :  { %v7816_v7 = vpop.permute.xlu1 %7815 }
 0x4cd   :  { %7818 = vst.msk [vmem:[#allocation4 + $0x8] sm:$0x3] %vm7440_vm3, %v7816_v7 }
 0x4ce   :  { %v7829_v8 = vpop.permute.xlu0 %7828 }
 0x4cf   :  { %7831 = vst.msk [vmem:[#allocation4 + $0x8] sm:$0x3] %vm7454_vm4, %v7829_v8 }
 0x4d0   :  { %v7842_v37 = vpop.permute.xlu1 %7841 }
 0x4d1   :  { %7844 = vst.msk [vmem:[#allocation4 + $0x8] sm:$0x3] %vm7468_vm5, %v7842_v37 }
 0x4d2   :  { %v7855_v63 = vpop.permute.xlu0 %7854 }
 0x4d3   :  { %7857 = vst.msk [vmem:[#allocation4 + $0x8] sm:$0x3] %vm7482_vm6, %v7855_v63 }
 0x4d4   :  { %v7948_v12 = vpop.permute.xlu1 %7947  ;;  %7870 = vst.msk [vmem:[#allocation4 + $0x8] sm:$0x3] %vm7496_vm7, %v7868_v33 }
 0x4d5   :  { %7883 = vst.msk [vmem:[#allocation4 + $0x8] sm:$0x3] %vm7510_vm8, %v7881_v55 }
 0x4d6   :  { %v7935_v28 = vpop.permute.xlu0 %7934 }
 0x4d8   :  { %v7974_v58 = vpop.permute.xlu1 %7973 }
 0x4da   :  { %v7961_v22 = vpop.permute.xlu0 %7960 }
 0x4dc   :  { %v7896_v32 = vpop.permute.xlu1 %7895 }
 0x4dd   :  { %7898 = vst.msk [vmem:[#allocation4 + $0xa] sm:$0x3] %vm7426_vm2, %v7896_v32 }
 0x4de   :  { %v7909_v35 = vpop.permute.xlu0 %7908 }
 0x4df   :  { %7911 = vst.msk [vmem:[#allocation4 + $0xa] sm:$0x3] %vm7440_vm3, %v7909_v35 }
 0x4e0   :  { %v7922_v45 = vpop.permute.xlu1 %7921 }
 0x4e1   :  { %7924 = vst.msk [vmem:[#allocation4 + $0xa] sm:$0x3] %vm7454_vm4, %v7922_v45 }
 0x4e2   :  { %7937 = vst.msk [vmem:[#allocation4 + $0xa] sm:$0x3] %vm7468_vm5, %v7935_v28  ;;  %v8015_v60 = vpop.permute.xlu0 %8014 }
 0x4e3   :  { %7950 = vst.msk [vmem:[#allocation4 + $0xa] sm:$0x3] %vm7482_vm6, %v7948_v12 }
 0x4e4   :  { %7963 = vst.msk [vmem:[#allocation4 + $0xa] sm:$0x3] %vm7496_vm7, %v7961_v22  ;;  %v8002_v3 = vpop.permute.xlu1 %8001 }
 0x4e5   :  { %7976 = vst.msk [vmem:[#allocation4 + $0xa] sm:$0x3] %vm7510_vm8, %v7974_v58 }
 0x4e6   :  { %v8041_v61 = vpop.permute.xlu0 %8040 }
 0x4e8   :  { %v8028_v21 = vpop.permute.xlu1 %8027 }
 0x4ea   :  { %v7989_v52 = vpop.permute.xlu0 %7988 }
 0x4eb   :  { %7991 = vst.msk [vmem:[#allocation4 + $0xc] sm:$0x3] %vm7426_vm2, %v7989_v52 }
 0x4ec   :  { %v8108_v53 = vpop.permute.xlu1 %8107  ;;  %8004 = vst.msk [vmem:[#allocation4 + $0xc] sm:$0x3] %vm7440_vm3, %v8002_v3 }
 0x4ed   :  { %8017 = vst.msk [vmem:[#allocation4 + $0xc] sm:$0x3] %vm7454_vm4, %v8015_v60 }
 0x4ee   :  { %8030 = vst.msk [vmem:[#allocation4 + $0xc] sm:$0x3] %vm7468_vm5, %v8028_v21  ;;  %v8095_v62 = vpop.permute.xlu0 %8094 }
 0x4ef   :  { %8043 = vst.msk [vmem:[#allocation4 + $0xc] sm:$0x3] %vm7482_vm6, %v8041_v61 }
 0x4f0   :  { %v8054_v4 = vpop.permute.xlu1 %8053 }
 0x4f1   :  { %8056 = vst.msk [vmem:[#allocation4 + $0xc] sm:$0x3] %vm7496_vm7, %v8054_v4 }
 0x4f2   :  { %v8067_v48 = vpop.permute.xlu0 %8066 }
 0x4f3   :  { %8069 = vst.msk [vmem:[#allocation4 + $0xc] sm:$0x3] %vm7510_vm8, %v8067_v48 }
 0x4f4   :  { %v8082_v13 = vpop.permute.xlu1 %8081 }
 0x4f5   :  { %8084 = vst.msk [vmem:[#allocation4 + $0xe] sm:$0x3] %vm7426_vm2, %v8082_v13 }
 0x4f6   :  { %8097 = vst.msk [vmem:[#allocation4 + $0xe] sm:$0x3] %vm7440_vm3, %v8095_v62  ;;  %v8121_v40 = vpop.permute.xlu0 %8120 }
 0x4f7   :  { %8110 = vst.msk [vmem:[#allocation4 + $0xe] sm:$0x3] %vm7454_vm4, %v8108_v53 }
 0x4f8   :  { %v8175_v54 = vpop.permute.xlu1 %8174  ;;  %8123 = vst.msk [vmem:[#allocation4 + $0xe] sm:$0x3] %vm7468_vm5, %v8121_v40 }
 0x4f9   :  { %8177 = vst.msk [vmem:[#allocation4 + $0x10] sm:$0x3] %vm7426_vm2, %v8175_v54 }
 0x4fa   :  { %v8147_v56 = vpop.permute.xlu0 %8146 }
 0x4fc   :  { %v8188_v42 = vpop.permute.xlu1 %8187 }
 0x4fd   :  { %8190 = vst.msk [vmem:[#allocation4 + $0x10] sm:$0x3] %vm7440_vm3, %v8188_v42 }
 0x4fe   :  { %v8268_v47 = vpop.permute.xlu0 %8267 }
 0x4ff   :  { %8270 = vst.msk [vmem:[#allocation4 + $0x12] sm:$0x3] %vm7426_vm2, %v8268_v47 }
 0x500   :  { %v8201_v20 = vpop.permute.xlu1 %8200 }
 0x501   :  { %8203 = vst.msk [vmem:[#allocation4 + $0x10] sm:$0x3] %vm7454_vm4, %v8201_v20 }
 0x502   :  { %v8240_v18 = vpop.permute.xlu0 %8239 }
 0x504   :  { %v8134_v25 = vpop.permute.xlu1 %8133 }
 0x505   :  { %8136 = vst.msk [vmem:[#allocation4 + $0xe] sm:$0x3] %vm7482_vm6, %v8134_v25 }
 0x506   :  { %8149 = vst.msk [vmem:[#allocation4 + $0xe] sm:$0x3] %vm7496_vm7, %v8147_v56  ;;  %v8253_v1 = vpop.permute.xlu0 %8252 }
 0x508   :  { %v8160_v36 = vpop.permute.xlu1 %8159 }
 0x509   :  { %8162 = vst.msk [vmem:[#allocation4 + $0xe] sm:$0x3] %vm7510_vm8, %v8160_v36 }
 0x50a   :  { %v8281_v17 = vpop.permute.xlu0 %8280 }
 0x50b   :  { %8283 = vst.msk [vmem:[#allocation4 + $0x12] sm:$0x3] %vm7440_vm3, %v8281_v17 }
 0x50c   :  { %v8214_v49 = vpop.permute.xlu1 %8213 }
 0x50d   :  { %8216 = vst.msk [vmem:[#allocation4 + $0x10] sm:$0x3] %vm7468_vm5, %v8214_v49 }
 0x50e   :  { %v8294_v2 = vpop.permute.xlu0 %8293 }
 0x50f   :  { %8296 = vst.msk [vmem:[#allocation4 + $0x12] sm:$0x3] %vm7454_vm4, %v8294_v2 }
 0x510   :  { %v8227_v41 = vpop.permute.xlu1 %8226 }
 0x511   :  { %8229 = vst.msk [vmem:[#allocation4 + $0x10] sm:$0x3] %vm7482_vm6, %v8227_v41 }
 0x512   :  { %8242 = vst.msk [vmem:[#allocation4 + $0x10] sm:$0x3] %vm7496_vm7, %v8240_v18  ;;  %v8307_v46 = vpop.permute.xlu0 %8306 }
 0x513   :  { %8255 = vst.msk [vmem:[#allocation4 + $0x10] sm:$0x3] %vm7510_vm8, %v8253_v1 }
 0x514   :  { %v8333_v38 = vpop.permute.xlu1 %8332  ;;  %8309 = vst.msk [vmem:[#allocation4 + $0x12] sm:$0x3] %vm7468_vm5, %v8307_v46 }
 0x516   :  { %v8320_v30 = vpop.permute.xlu0 %8319 }
 0x517   :  { %8322 = vst.msk [vmem:[#allocation4 + $0x12] sm:$0x3] %vm7482_vm6, %v8320_v30 }
 0x518   :  { %v8346_v0 = vpop.permute.xlu1 %8345  ;;  %8335 = vst.msk [vmem:[#allocation4 + $0x12] sm:$0x3] %vm7496_vm7, %v8333_v38 }
 0x519   :  { %8348 = vst.msk [vmem:[#allocation4 + $0x12] sm:$0x3] %vm7510_vm8, %v8346_v0 }
 0x51a   :  { %v8426_v57 = vpop.permute.xlu0 %8425 }
 0x51c   :  { %v8400_v43 = vpop.permute.xlu1 %8399 }
 0x51e   :  { %v8439_v19 = vpop.permute.xlu0 %8438 }
 0x520   :  { %v8413_v16 = vpop.permute.xlu1 %8412 }
 0x522   :  { %v8467_v26 = vpop.permute.xlu0 %8466 }
 0x524   :  { %v8361_v10 = vpop.permute.xlu1 %8360 }
 0x525   :  { %8363 = vst.msk [vmem:[#allocation4 + $0x14] sm:$0x3] %vm7426_vm2, %v8361_v10 }
 0x526   :  { %v8480_v11 = vpop.permute.xlu0 %8479 }
 0x528   :  { %v8374_v34 = vpop.permute.xlu1 %8373 }
 0x529   :  { %8376 = vst.msk [vmem:[#allocation4 + $0x14] sm:$0x3] %vm7440_vm3, %v8374_v34 }
 0x52a   :  { %v8493_v27 = vpop.permute.xlu0 %8492 }
 0x52c   :  { %v8387_v44 = vpop.permute.xlu1 %8386 }
 0x52d   :  { %8389 = vst.msk [vmem:[#allocation4 + $0x14] sm:$0x3] %vm7454_vm4, %v8387_v44 }
 0x52e   :  { %8402 = vst.msk [vmem:[#allocation4 + $0x14] sm:$0x3] %vm7468_vm5, %v8400_v43  ;;  %v8506_v31 = vpop.permute.xlu0 %8505 }
 0x52f   :  { %8415 = vst.msk [vmem:[#allocation4 + $0x14] sm:$0x3] %vm7482_vm6, %v8413_v16 }
 0x530   :  { %8428 = vst.msk [vmem:[#allocation4 + $0x14] sm:$0x3] %vm7496_vm7, %v8426_v57  ;;  %v8547_v51 = vpop.permute.xlu1 %8546 }
 0x531   :  { %8441 = vst.msk [vmem:[#allocation4 + $0x14] sm:$0x3] %vm7510_vm8, %v8439_v19 }
 0x532   :  { %8549 = vst.msk [vmem:[#allocation4 + $0x18] sm:$0x3] %vm7426_vm2, %v8547_v51  ;;  %v8454_v50 = vpop.permute.xlu0 %8453 }
 0x533   :  { %8456 = vst.msk [vmem:[#allocation4 + $0x16] sm:$0x3] %vm7426_vm2, %v8454_v50 }
 0x534   :  { %v8519_v59 = vpop.permute.xlu1 %8518  ;;  %8469 = vst.msk [vmem:[#allocation4 + $0x16] sm:$0x3] %vm7440_vm3, %v8467_v26 }
 0x535   :  { %8482 = vst.msk [vmem:[#allocation4 + $0x16] sm:$0x3] %vm7454_vm4, %v8480_v11 }
 0x536   :  { %8495 = vst.msk [vmem:[#allocation4 + $0x16] sm:$0x3] %vm7468_vm5, %v8493_v27  ;;  %v8560_v5 = vpop.permute.xlu0 %8559 }
 0x537   :  { %8508 = vst.msk [vmem:[#allocation4 + $0x16] sm:$0x3] %vm7482_vm6, %v8506_v31 }
 0x538   :  { %8562 = vst.msk [vmem:[#allocation4 + $0x18] sm:$0x3] %vm7440_vm3, %v8560_v5  ;;  %v8532_v6 = vpop.permute.xlu1 %8531 }
 0x539   :  { %8521 = vst.msk [vmem:[#allocation4 + $0x16] sm:$0x3] %vm7496_vm7, %v8519_v59 }
 0x53a   :  { %8534 = vst.msk [vmem:[#allocation4 + $0x16] sm:$0x3] %vm7510_vm8, %v8532_v6  ;;  %v8573_v14 = vpop.permute.xlu0 %8572 }
 0x53b   :  { %8575 = vst.msk [vmem:[#allocation4 + $0x18] sm:$0x3] %vm7454_vm4, %v8573_v14 }
 0x53c   :  { %11057 = dma.done.wait [#allocation9], 25600 }
 0x53d   :  { %11058 = vsyncadd [#allocation9], 4294941696  ;;  %v11075_v39 = vmov 1983009808   ;;  %v8592_v33 = vlaneseq  ;;  %v8673_v9 = vld [vmem:[#allocation5 + $0x8] sm:$0xff]  ;;  %v8672_v55 = vld [vmem:[#allocation5] sm:$0xff] }
 0x53e   :  { %v8590_v29 = vunpack.c.l.s4 %v11075_v39  ;;  %v8675_v7 = vld [vmem:[#allocation5 + $0x18] sm:$0xff]  ;;  %8888 = vmatprep.subr.bf16.mxu1 %v8673_v9  ;;  %v8674_v8 = vld [vmem:[#allocation5 + $0x10] sm:$0xff]  ;;  %v8677_v12 = vld [vmem:[#allocation5 + $0x28] sm:$0xff]  ;;  %vm8884_vm9 = vcmask 523264  }
 0x53f   :  { %8889 = vmatpush1.bf16.msra.mxu1 %v8672_v55  ;;  %v14192_v63 = vshrl.u32 %v8592_v33, 7  ;;  %v8676_v28 = vld [vmem:[#allocation5 + $0x20] sm:$0xff]  ;;  %v8679_v22 = vld [vmem:[#allocation5 + $0x38] sm:$0xff]  ;;  %v8678_v35 = vld [vmem:[#allocation5 + $0x30] sm:$0xff] }
 0x540   :  { %8890 = vmatprep.subr.bf16.mxu1 %v8675_v7  ;;  %v8591_v37 = vunpack.c.0.s8 %v8590_v29  ;;  %v8580_v32 = vld [vmem:[#allocation4] sm:$0xff]  ;;  %v8683_v52 = vld [vmem:[#allocation5 + $0x58] sm:$0xff]  ;;  %v8682_v53 = vld [vmem:[#allocation5 + $0x50] sm:$0xff] }
 0x541   :  { %v8681_v60 = vld [vmem:[#allocation5 + $0x48] sm:$0xff]  ;;  %v8680_v61 = vld [vmem:[#allocation5 + $0x40] sm:$0xff]  ;;  %v8687_v48 = vld [vmem:[#allocation5 + $0x78] sm:$0xff]  ;;  %v8588_v49 = vcombine.high %v8580_v32, %v8580_v32 }
 0x542   :  { %v14195_v58 = vsub.s32 %v8591_v37, %v14192_v63  ;;  %v8685_v62 = vld [vmem:[#allocation5 + $0x68] sm:$0xff]  ;;  %v8684_v4 = vld [vmem:[#allocation5 + $0x60] sm:$0xff]  ;;  %v8686_v13 = vld [vmem:[#allocation5 + $0x70] sm:$0xff] }
 0x543   :  { %8891 = vmatpush1.bf16.msra.mxu1 %v8674_v8  ;;  %v8689_v40 = vld [vmem:[#allocation5 + $0x88] sm:$0xff]  ;;  %v8688_v54 = vld [vmem:[#allocation5 + $0x80] sm:$0xff]  ;;  %v8691_v56 = vld [vmem:[#allocation5 + $0x98] sm:$0xff] }
 0x544   :  { %8892 = vmatprep.subr.bf16.mxu1 %v8677_v12  ;;  %v8595_v45 = vrot.slane %v8580_v32, %v14195_v58  ;;  %v8690_v42 = vld [vmem:[#allocation5 + $0x90] sm:$0xff]  ;;  %v8693_v47 = vld [vmem:[#allocation5 + $0xa8] sm:$0xff]  ;;  %v8692_v20 = vld [vmem:[#allocation5 + $0xa0] sm:$0xff]  ;;  %v14199_v46 = vrot.slane %v8588_v49, %v14195_v58 }
 0x545   :  { %v8695_v18 = vld [vmem:[#allocation5 + $0xb8] sm:$0xff]  ;;  %v8694_v25 = vld [vmem:[#allocation5 + $0xb0] sm:$0xff]  ;;  %v8697_v1 = vld [vmem:[#allocation5 + $0xc8] sm:$0xff] }
 0x546   :  { %v8603_v3 = vcombine.high %v8595_v45, %v8595_v45  ;;  %v8696_v36 = vld [vmem:[#allocation5 + $0xc0] sm:$0xff]  ;;  %v8699_v17 = vld [vmem:[#allocation5 + $0xd8] sm:$0xff]  ;;  %v8698_v2 = vld [vmem:[#allocation5 + $0xd0] sm:$0xff]  ;;  %v8604_v0 = vcombine.high %v14199_v46, %v14199_v46  ;;  %v8659_v19 = vpack.c.bf16 %v8595_v45, %v8595_v45 }
 0x547   :  { %8893 = vmatpush1.bf16.msra.mxu1 %v8676_v28  ;;  %v8701_v41 = vld [vmem:[#allocation5 + $0xe8] sm:$0xff]  ;;  %v8700_v38 = vld [vmem:[#allocation5 + $0xe0] sm:$0xff]  ;;  %v8703_v30 = vld [vmem:[#allocation5 + $0xf8] sm:$0xff] }
 0x548   :  { %8894 = vmatprep.subr.bf16.mxu1 %v8679_v22  ;;  %v8660_v21 = vpack.c.bf16 %v8603_v3, %v8603_v3  ;;  %v8702_v57 = vld [vmem:[#allocation5 + $0xf0] sm:$0xff]  ;;  %v8705_v43 = vld [vmem:[#allocation5 + $0x108] sm:$0xff]  ;;  %v8662_v16 = vpack.c.bf16 %v8604_v0, %v8604_v0  ;;  %v8704_v26 = vld [vmem:[#allocation5 + $0x100] sm:$0xff] }
 0x549   :  { %v8707_v10 = vld [vmem:[#allocation5 + $0x118] sm:$0xff]  ;;  %v8706_v11 = vld [vmem:[#allocation5 + $0x110] sm:$0xff]  ;;  %v8709_v34 = vld [vmem:[#allocation5 + $0x128] sm:$0xff] }
 0x54a   :  { %8920 = vmatprep.mubr.bf16.mxu1 %v8660_v21  ;;  %v8708_v27 = vld [vmem:[#allocation5 + $0x120] sm:$0xff]  ;;  %v8711_v44 = vld [vmem:[#allocation5 + $0x138] sm:$0xff]  ;;  %v8710_v31 = vld [vmem:[#allocation5 + $0x130] sm:$0xff] }
 0x54b   :  { %8895 = vmatpush1.bf16.msra.mxu1 %v8678_v35  ;;  %v8713_v51 = vld [vmem:[#allocation5 + $0x148] sm:$0xff]  ;;  %v8712_v50 = vld [vmem:[#allocation5 + $0x140] sm:$0xff]  ;;  %v8715_v59 = vld [vmem:[#allocation5 + $0x158] sm:$0xff] }
 0x54c   :  { %8896 = vmatprep.subr.bf16.mxu1 %v8681_v60  ;;  %v8714_v5 = vld [vmem:[#allocation5 + $0x150] sm:$0xff]  ;;  %v8717_v6 = vld [vmem:[#allocation5 + $0x168] sm:$0xff]  ;;  %v8716_v14 = vld [vmem:[#allocation5 + $0x160] sm:$0xff] }
 0x54d   :  { %v8719_v39 = vld [vmem:[#allocation5 + $0x178] sm:$0xff]  ;;  %v8718_v29 = vld [vmem:[#allocation5 + $0x170] sm:$0xff]  ;;  %v8721_v33 = vld [vmem:[#allocation5 + $0x188] sm:$0xff] }
 0x54e   :  { %v8720_v9 = vld [vmem:[#allocation5 + $0x180] sm:$0xff]  ;;  %v8723_v55 = vld [vmem:[#allocation5 + $0x198] sm:$0xff]  ;;  %v8722_v7 = vld [vmem:[#allocation5 + $0x190] sm:$0xff] }
 0x54f   :  { %8897 = vmatpush1.bf16.msra.mxu1 %v8680_v61  ;;  %v8725_v8 = vld [vmem:[#allocation5 + $0x1a8] sm:$0xff]  ;;  %v8724_v37 = vld [vmem:[#allocation5 + $0x1a0] sm:$0xff]  ;;  %v8727_v12 = vld [vmem:[#allocation5 + $0x1b8] sm:$0xff] }
 0x550   :  { %8898 = vmatprep.subr.bf16.mxu1 %v8683_v52  ;;  %v8726_v28 = vld [vmem:[#allocation5 + $0x1b0] sm:$0xff]  ;;  %v8729_v22 = vld [vmem:[#allocation5 + $0x1c8] sm:$0xff]  ;;  %v8728_v32 = vld [vmem:[#allocation5 + $0x1c0] sm:$0xff] }
 0x551   :  { %v8731_v35 = vld [vmem:[#allocation5 + $0x1d8] sm:$0xff]  ;;  %v8730_v45 = vld [vmem:[#allocation5 + $0x1d0] sm:$0xff]  ;;  %v8733_v3 = vld [vmem:[#allocation5 + $0x1e8] sm:$0xff] }
 0x552   :  { %v14203_v60 = vld [vmem:[#allocation4 + $0x8] sm:$0xff]  ;;  %v8732_v21 = vld [vmem:[#allocation5 + $0x1e0] sm:$0xff]  ;;  %v8735_v52 = vld [vmem:[#allocation5 + $0x1f8] sm:$0xff] }
 0x553   :  { %8899 = vmatpush1.bf16.msra.mxu1 %v8682_v53  ;;  %v14207_v61 = vrot.slane %v14203_v60, %v14195_v58  ;;  %v8749_v49 = vld [vmem:[#allocation5 + $0x268] sm:$0xff]  ;;  %v8755_v0 = vld [vmem:[#allocation5 + $0x298] sm:$0xff] }
 0x554   :  { %8900 = vmatprep.subr.bf16.mxu1 %v8685_v62  ;;  %v8734_v62 = vld [vmem:[#allocation5 + $0x1f0] sm:$0xff] }
 0x555   :  { %v8620_v53 = vcombine.high %v14207_v61, %v14207_v61 }
 0x557   :  { %8901 = vmatpush1.bf16.msra.mxu1 %v8684_v4  ;;  %v8737_v4 = vld [vmem:[#allocation5 + $0x208] sm:$0xff] }
 0x558   :  { %8902 = vmatprep.subr.bf16.mxu1 %v8687_v48  ;;  %v8661_v48 = vpack.c.bf16 %v14199_v46, %v14199_v46  ;;  %v8750_v46 = vld [vmem:[#allocation5 + $0x270] sm:$0xff] }
 0x55b   :  { %8903 = vmatpush1.bf16.msra.mxu1 %v8686_v13  ;;  %v8664_v13 = vpack.c.bf16 %v8620_v53, %v8620_v53  ;;  %v8787_v53 = vld [vmem:[#allocation5 + $0x398] sm:$0xff] }
 0x55c   :  { %8904 = vmatprep.subr.bf16.mxu1 %v8689_v40  ;;  %v8736_v40 = vld [vmem:[#allocation5 + $0x200] sm:$0xff] }
 0x55f   :  { %8905 = vmatpush1.bf16.msra.mxu1 %v8688_v54  ;;  %v8739_v54 = vld [vmem:[#allocation5 + $0x218] sm:$0xff] }
 0x560   :  { %8906 = vmatprep.subr.bf16.mxu1 %v8691_v56  ;;  %v8738_v56 = vld [vmem:[#allocation5 + $0x210] sm:$0xff] }
 0x563   :  { %8907 = vmatpush1.bf16.msra.mxu1 %v8690_v42  ;;  %v8741_v42 = vld [vmem:[#allocation5 + $0x228] sm:$0xff] }
 0x564   :  { %8908 = vmatprep.subr.bf16.mxu1 %v8693_v47  ;;  %v8740_v47 = vld [vmem:[#allocation5 + $0x220] sm:$0xff] }
 0x567   :  { %8909 = vmatpush1.bf16.msra.mxu1 %v8692_v20  ;;  %v8743_v20 = vld [vmem:[#allocation5 + $0x238] sm:$0xff] }
 0x568   :  { %8910 = vmatprep.subr.bf16.mxu1 %v8695_v18  ;;  %v8742_v18 = vld [vmem:[#allocation5 + $0x230] sm:$0xff] }
 0x56b   :  { %8911 = vmatpush1.bf16.msra.mxu1 %v8694_v25  ;;  %v8745_v25 = vld [vmem:[#allocation5 + $0x248] sm:$0xff] }
 0x56c   :  { %8912 = vmatprep.subr.bf16.mxu1 %v8697_v1  ;;  %v8744_v1 = vld [vmem:[#allocation5 + $0x240] sm:$0xff] }
 0x56f   :  { %8913 = vmatpush1.bf16.msra.mxu1 %v8696_v36  ;;  %v8747_v36 = vld [vmem:[#allocation5 + $0x258] sm:$0xff] }
 0x570   :  { %8914 = vmatprep.subr.bf16.mxu1 %v8699_v17  ;;  %v8746_v17 = vld [vmem:[#allocation5 + $0x250] sm:$0xff] }
 0x573   :  { %8915 = vmatpush1.bf16.msra.mxu1 %v8698_v2  ;;  %v8748_v2 = vld [vmem:[#allocation5 + $0x260] sm:$0xff] }
 0x574   :  { %8916 = vmatprep.subr.bf16.mxu1 %v8701_v41  ;;  %v8751_v41 = vld [vmem:[#allocation5 + $0x278] sm:$0xff] }
 0x577   :  { %8917 = vmatpush1.bf16.msra.mxu1 %v8700_v38  ;;  %v8753_v38 = vld [vmem:[#allocation5 + $0x288] sm:$0xff] }
 0x578   :  { %8918 = vmatprep.subr.bf16.mxu1 %v8703_v30  ;;  %v8752_v30 = vld [vmem:[#allocation5 + $0x280] sm:$0xff] }
 0x57b   :  { %8919 = vmatpush1.bf16.msra.mxu1 %v8702_v57  ;;  %v8754_v57 = vld [vmem:[#allocation5 + $0x290] sm:$0xff] }
 0x57c   :  { %8929 = vmatprep.subr.bf16.mxu1 %v8705_v43  ;;  %v8757_v43 = vld [vmem:[#allocation5 + $0x2a8] sm:$0xff] }
 0x57e   :  { %8921 = vmatmul.mubr.bf16.vlgmr.msra.gmra.mrb[128].mxu1 %v8659_v19  ;;  %v8756_v19 = vld [vmem:[#allocation5 + $0x2a0] sm:$0xff] }
 0x57f   :  { %8930 = vmatpush1.bf16.msra.mxu1 %v8704_v26  ;;  %8961 = vmatprep.mubr.bf16.mxu1 %v8662_v16  ;;  %v8759_v16 = vld [vmem:[#allocation5 + $0x2b8] sm:$0xff]  ;;  %v8758_v26 = vld [vmem:[#allocation5 + $0x2b0] sm:$0xff] }
 0x580   :  { %8931 = vmatprep.subr.bf16.mxu1 %v8707_v10  ;;  %v8761_v10 = vld [vmem:[#allocation5 + $0x2c8] sm:$0xff] }
 0x583   :  { %8932 = vmatpush1.bf16.msra.mxu1 %v8706_v11  ;;  %v8760_v11 = vld [vmem:[#allocation5 + $0x2c0] sm:$0xff] }
 0x584   :  { %8933 = vmatprep.subr.bf16.mxu1 %v8709_v34  ;;  %v8763_v34 = vld [vmem:[#allocation5 + $0x2d8] sm:$0xff] }
 0x587   :  { %8934 = vmatpush1.bf16.msra.mxu1 %v8708_v27  ;;  %v8605_v27 = vcombine.high %v14203_v60, %v14203_v60  ;;  %v8780_v60 = vld [vmem:[#allocation5 + $0x360] sm:$0xff] }
 0x588   :  { %8935 = vmatprep.subr.bf16.mxu1 %v8711_v44  ;;  %v8762_v44 = vld [vmem:[#allocation5 + $0x2d0] sm:$0xff] }
 0x58b   :  { %8936 = vmatpush1.bf16.msra.mxu1 %v8710_v31  ;;  %v8765_v31 = vld [vmem:[#allocation5 + $0x2e8] sm:$0xff] }
 0x58c   :  { %8937 = vmatprep.subr.bf16.mxu1 %v8713_v51  ;;  %v14216_v51 = vrot.slane %v8605_v27, %v14195_v58  ;;  %v8813_v27 = vld [vmem:[#allocation5 + $0x468] sm:$0xff] }
 0x58f   :  { %8938 = vmatpush1.bf16.msra.mxu1 %v8712_v50  ;;  %v8764_v50 = vld [vmem:[#allocation5 + $0x2e0] sm:$0xff] }
 0x590   :  { %8939 = vmatprep.subr.bf16.mxu1 %v8715_v59  ;;  %v8767_v59 = vld [vmem:[#allocation5 + $0x2f8] sm:$0xff] }
 0x593   :  { %8940 = vmatpush1.bf16.msra.mxu1 %v8714_v5  ;;  %v8621_v5 = vcombine.high %v14216_v51, %v14216_v51 }
 0x594   :  { %8941 = vmatprep.subr.bf16.mxu1 %v8717_v6  ;;  %v8766_v6 = vld [vmem:[#allocation5 + $0x2f0] sm:$0xff] }
 0x597   :  { %8942 = vmatpush1.bf16.msra.mxu1 %v8716_v14  ;;  %v8769_v14 = vld [vmem:[#allocation5 + $0x308] sm:$0xff] }
 0x598   :  { %8943 = vmatprep.subr.bf16.mxu1 %v8719_v39  ;;  %v8663_v39 = vpack.c.bf16 %v14207_v61, %v14207_v61  ;;  %v8782_v61 = vld [vmem:[#allocation5 + $0x370] sm:$0xff] }
 0x59b   :  { %8944 = vmatpush1.bf16.msra.mxu1 %v8718_v29  ;;  %v8666_v29 = vpack.c.bf16 %v8621_v5, %v8621_v5  ;;  %v8819_v5 = vld [vmem:[#allocation5 + $0x498] sm:$0xff] }
 0x59c   :  { %8945 = vmatprep.subr.bf16.mxu1 %v8721_v33  ;;  %v8768_v33 = vld [vmem:[#allocation5 + $0x300] sm:$0xff] }
 0x59f   :  { %8946 = vmatpush1.bf16.msra.mxu1 %v8720_v9  ;;  %v8771_v9 = vld [vmem:[#allocation5 + $0x318] sm:$0xff] }
 0x5a0   :  { %8947 = vmatprep.subr.bf16.mxu1 %v8723_v55  ;;  %v8770_v55 = vld [vmem:[#allocation5 + $0x310] sm:$0xff] }
 0x5a3   :  { %8948 = vmatpush1.bf16.msra.mxu1 %v8722_v7  ;;  %v8773_v7 = vld [vmem:[#allocation5 + $0x328] sm:$0xff] }
 0x5a4   :  { %8949 = vmatprep.subr.bf16.mxu1 %v8725_v8  ;;  %v8772_v8 = vld [vmem:[#allocation5 + $0x320] sm:$0xff] }
 0x5a7   :  { %8950 = vmatpush1.bf16.msra.mxu1 %v8724_v37  ;;  %v8775_v37 = vld [vmem:[#allocation5 + $0x338] sm:$0xff] }
 0x5a8   :  { %8951 = vmatprep.subr.bf16.mxu1 %v8727_v12  ;;  %v8774_v12 = vld [vmem:[#allocation5 + $0x330] sm:$0xff] }
 0x5ab   :  { %8952 = vmatpush1.bf16.msra.mxu1 %v8726_v28  ;;  %v8777_v28 = vld [vmem:[#allocation5 + $0x348] sm:$0xff] }
 0x5ac   :  { %8953 = vmatprep.subr.bf16.mxu1 %v8729_v22  ;;  %v8776_v22 = vld [vmem:[#allocation5 + $0x340] sm:$0xff] }
 0x5af   :  { %8954 = vmatpush1.bf16.msra.mxu1 %v8728_v32  ;;  %v8779_v32 = vld [vmem:[#allocation5 + $0x358] sm:$0xff] }
 0x5b0   :  { %8955 = vmatprep.subr.bf16.mxu1 %v8731_v35  ;;  %v8778_v35 = vld [vmem:[#allocation5 + $0x350] sm:$0xff] }
 0x5b3   :  { %8956 = vmatpush1.bf16.msra.mxu1 %v8730_v45  ;;  %v8781_v45 = vld [vmem:[#allocation5 + $0x368] sm:$0xff] }
 0x5b4   :  { %8957 = vmatprep.subr.bf16.mxu1 %v8733_v3  ;;  %v8783_v3 = vld [vmem:[#allocation5 + $0x378] sm:$0xff] }
 0x5b7   :  { %8958 = vmatpush1.bf16.msra.mxu1 %v8732_v21  ;;  %v8785_v21 = vld [vmem:[#allocation5 + $0x388] sm:$0xff] }
 0x5b8   :  { %8959 = vmatprep.subr.bf16.mxu1 %v8735_v52  ;;  %v8784_v52 = vld [vmem:[#allocation5 + $0x380] sm:$0xff] }
 0x5bb   :  { %8960 = vmatpush1.bf16.msra.mxu1 %v8734_v62  ;;  %v8786_v62 = vld [vmem:[#allocation5 + $0x390] sm:$0xff] }
 0x5bc   :  { %8970 = vmatprep.subr.bf16.mxu1 %v8737_v4  ;;  %v8789_v4 = vld [vmem:[#allocation5 + $0x3a8] sm:$0xff] }
 0x5be   :  { %8962 = vmatmul.mubr.bf16.vlgmr.msra.gmra.mrb[128].mxu1 %v8661_v48  ;;  %v8788_v48 = vld [vmem:[#allocation5 + $0x3a0] sm:$0xff] }
 0x5bf   :  { %8971 = vmatpush1.bf16.msra.mxu1 %v8736_v40  ;;  %9002 = vmatprep.mubr.bf16.mxu1 %v8664_v13  ;;  %v8791_v13 = vld [vmem:[#allocation5 + $0x3b8] sm:$0xff]  ;;  %v8790_v40 = vld [vmem:[#allocation5 + $0x3b0] sm:$0xff] }
 0x5c0   :  { %8972 = vmatprep.subr.bf16.mxu1 %v8739_v54  ;;  %v8793_v54 = vld [vmem:[#allocation5 + $0x3c8] sm:$0xff] }
 0x5c3   :  { %8973 = vmatpush1.bf16.msra.mxu1 %v8738_v56  ;;  %v8792_v56 = vld [vmem:[#allocation5 + $0x3c0] sm:$0xff] }
 0x5c4   :  { %8974 = vmatprep.subr.bf16.mxu1 %v8741_v42  ;;  %v8795_v42 = vld [vmem:[#allocation5 + $0x3d8] sm:$0xff] }
 0x5c7   :  { %8975 = vmatpush1.bf16.msra.mxu1 %v8740_v47  ;;  %v8794_v47 = vld [vmem:[#allocation5 + $0x3d0] sm:$0xff] }
 0x5c8   :  { %8976 = vmatprep.subr.bf16.mxu1 %v8743_v20  ;;  %v14222_v20 = vld [vmem:[#allocation4 + $0x10] sm:$0xff] }
 0x5cb   :  { %8977 = vmatpush1.bf16.msra.mxu1 %v8742_v18  ;;  %v8797_v18 = vld [vmem:[#allocation5 + $0x3e8] sm:$0xff] }
 0x5cc   :  { %8978 = vmatprep.subr.bf16.mxu1 %v8745_v25  ;;  %v14226_v25 = vrot.slane %v14222_v20, %v14195_v58 }
 0x5cf   :  { %8979 = vmatpush1.bf16.msra.mxu1 %v8744_v1  ;;  %v8796_v1 = vld [vmem:[#allocation5 + $0x3e0] sm:$0xff] }
 0x5d0   :  { %8980 = vmatprep.subr.bf16.mxu1 %v8747_v36  ;;  %v8799_v36 = vld [vmem:[#allocation5 + $0x3f8] sm:$0xff] }
 0x5d3   :  { %8981 = vmatpush1.bf16.msra.mxu1 %v8746_v17  ;;  %v8637_v17 = vcombine.high %v14226_v25, %v14226_v25 }
 0x5d4   :  { %8982 = vmatprep.subr.bf16.mxu1 %v8749_v49  ;;  %v8798_v49 = vld [vmem:[#allocation5 + $0x3f0] sm:$0xff] }
 0x5d7   :  { %8983 = vmatpush1.bf16.msra.mxu1 %v8748_v2  ;;  %v8801_v2 = vld [vmem:[#allocation5 + $0x408] sm:$0xff] }
 0x5d8   :  { %8984 = vmatprep.subr.bf16.mxu1 %v8751_v41  ;;  %v8665_v41 = vpack.c.bf16 %v14216_v51, %v14216_v51  ;;  %v8814_v51 = vld [vmem:[#allocation5 + $0x470] sm:$0xff] }
 0x5db   :  { %8985 = vmatpush1.bf16.msra.mxu1 %v8750_v46  ;;  %v8668_v46 = vpack.c.bf16 %v8637_v17, %v8637_v17  ;;  %v8850_v17 = vld [vmem:[#allocation5 + $0x590] sm:$0xff] }
 0x5dc   :  { %8986 = vmatprep.subr.bf16.mxu1 %v8753_v38  ;;  %v8800_v38 = vld [vmem:[#allocation5 + $0x400] sm:$0xff] }
 0x5df   :  { %8987 = vmatpush1.bf16.msra.mxu1 %v8752_v30  ;;  %v8803_v30 = vld [vmem:[#allocation5 + $0x418] sm:$0xff] }
 0x5e0   :  { %8988 = vmatprep.subr.bf16.mxu1 %v8755_v0  ;;  %v8802_v0 = vld [vmem:[#allocation5 + $0x410] sm:$0xff] }
 0x5e3   :  { %8989 = vmatpush1.bf16.msra.mxu1 %v8754_v57  ;;  %v8805_v57 = vld [vmem:[#allocation5 + $0x428] sm:$0xff] }
 0x5e4   :  { %8990 = vmatprep.subr.bf16.mxu1 %v8757_v43  ;;  %v8804_v43 = vld [vmem:[#allocation5 + $0x420] sm:$0xff] }
 0x5e7   :  { %8991 = vmatpush1.bf16.msra.mxu1 %v8756_v19  ;;  %v8807_v19 = vld [vmem:[#allocation5 + $0x438] sm:$0xff] }
 0x5e8   :  { %8992 = vmatprep.subr.bf16.mxu1 %v8759_v16  ;;  %v8806_v16 = vld [vmem:[#allocation5 + $0x430] sm:$0xff] }
 0x5eb   :  { %8993 = vmatpush1.bf16.msra.mxu1 %v8758_v26  ;;  %v8809_v26 = vld [vmem:[#allocation5 + $0x448] sm:$0xff] }
 0x5ec   :  { %8994 = vmatprep.subr.bf16.mxu1 %v8761_v10  ;;  %v8808_v10 = vld [vmem:[#allocation5 + $0x440] sm:$0xff] }
 0x5ef   :  { %8995 = vmatpush1.bf16.msra.mxu1 %v8760_v11  ;;  %v8811_v11 = vld [vmem:[#allocation5 + $0x458] sm:$0xff] }
 0x5f0   :  { %8996 = vmatprep.subr.bf16.mxu1 %v8763_v34  ;;  %v8810_v34 = vld [vmem:[#allocation5 + $0x450] sm:$0xff] }
 0x5f3   :  { %8997 = vmatpush1.bf16.msra.mxu1 %v8762_v44  ;;  %v8812_v44 = vld [vmem:[#allocation5 + $0x460] sm:$0xff] }
 0x5f4   :  { %8998 = vmatprep.subr.bf16.mxu1 %v8765_v31  ;;  %v8815_v31 = vld [vmem:[#allocation5 + $0x478] sm:$0xff] }
 0x5f7   :  { %8999 = vmatpush1.bf16.msra.mxu1 %v8764_v50  ;;  %v8817_v50 = vld [vmem:[#allocation5 + $0x488] sm:$0xff] }
 0x5f8   :  { %9000 = vmatprep.subr.bf16.mxu1 %v8767_v59  ;;  %v8816_v59 = vld [vmem:[#allocation5 + $0x480] sm:$0xff] }
 0x5fb   :  { %9001 = vmatpush1.bf16.msra.mxu1 %v8766_v6  ;;  %v8818_v6 = vld [vmem:[#allocation5 + $0x490] sm:$0xff] }
 0x5fc   :  { %9011 = vmatprep.subr.bf16.mxu1 %v8769_v14  ;;  %v8821_v14 = vld [vmem:[#allocation5 + $0x4a8] sm:$0xff] }
 0x5fe   :  { %9003 = vmatmul.mubr.bf16.vlgmr.msra.gmra.mrb[128].mxu1 %v8663_v39  ;;  %v8820_v39 = vld [vmem:[#allocation5 + $0x4a0] sm:$0xff] }
 0x5ff   :  { %9012 = vmatpush1.bf16.msra.mxu1 %v8768_v33  ;;  %9043 = vmatprep.mubr.bf16.mxu1 %v8666_v29  ;;  %v8823_v29 = vld [vmem:[#allocation5 + $0x4b8] sm:$0xff]  ;;  %v8822_v33 = vld [vmem:[#allocation5 + $0x4b0] sm:$0xff] }
 0x600   :  { %9013 = vmatprep.subr.bf16.mxu1 %v8771_v9  ;;  %v8825_v9 = vld [vmem:[#allocation5 + $0x4c8] sm:$0xff] }
 0x603   :  { %9014 = vmatpush1.bf16.msra.mxu1 %v8770_v55  ;;  %v8824_v55 = vld [vmem:[#allocation5 + $0x4c0] sm:$0xff] }
 0x604   :  { %9015 = vmatprep.subr.bf16.mxu1 %v8773_v7  ;;  %v8827_v7 = vld [vmem:[#allocation5 + $0x4d8] sm:$0xff] }
 0x607   :  { %9016 = vmatpush1.bf16.msra.mxu1 %v8772_v8  ;;  %v8622_v8 = vcombine.high %v14222_v20, %v14222_v20  ;;  %v8847_v20 = vld [vmem:[#allocation5 + $0x578] sm:$0xff] }
 0x608   :  { %9017 = vmatprep.subr.bf16.mxu1 %v8775_v37  ;;  %v8826_v37 = vld [vmem:[#allocation5 + $0x4d0] sm:$0xff] }
 0x60b   :  { %9018 = vmatpush1.bf16.msra.mxu1 %v8774_v12  ;;  %v8829_v12 = vld [vmem:[#allocation5 + $0x4e8] sm:$0xff] }
 0x60c   :  { %9019 = vmatprep.subr.bf16.mxu1 %v8777_v28  ;;  %v14235_v28 = vrot.slane %v8622_v8, %v14195_v58  ;;  %v8834_v58 = vld [vmem:[#allocation5 + $0x510] sm:$0xff] }
 0x60f   :  { %9020 = vmatpush1.bf16.msra.mxu1 %v8776_v22  ;;  %v8828_v22 = vld [vmem:[#allocation5 + $0x4e0] sm:$0xff] }
 0x610   :  { %9021 = vmatprep.subr.bf16.mxu1 %v8779_v32  ;;  %v8831_v32 = vld [vmem:[#allocation5 + $0x4f8] sm:$0xff] }
 0x613   :  { %9022 = vmatpush1.bf16.msra.mxu1 %v8778_v35  ;;  %v8638_v35 = vcombine.high %v14235_v28, %v14235_v28 }
 0x614   :  { %9023 = vmatprep.subr.bf16.mxu1 %v8781_v45  ;;  %v8830_v45 = vld [vmem:[#allocation5 + $0x4f0] sm:$0xff] }
 0x617   :  { %9024 = vmatpush1.bf16.msra.mxu1 %v8780_v60  ;;  %v8833_v60 = vld [vmem:[#allocation5 + $0x508] sm:$0xff] }
 0x618   :  { %9025 = vmatprep.subr.bf16.mxu1 %v8783_v3  ;;  %v8667_v3 = vpack.c.bf16 %v14226_v25, %v14226_v25  ;;  %v8849_v25 = vld [vmem:[#allocation5 + $0x588] sm:$0xff] }
 0x61b   :  { %9026 = vmatpush1.bf16.msra.mxu1 %v8782_v61  ;;  %v8670_v61 = vpack.c.bf16 %v8638_v35, %v8638_v35 }
 0x61c   :  { %9027 = vmatprep.subr.bf16.mxu1 %v8785_v21  ;;  %v8832_v21 = vld [vmem:[#allocation5 + $0x500] sm:$0xff] }
 0x61f   :  { %9028 = vmatpush1.bf16.msra.mxu1 %v8784_v52  ;;  %v8835_v52 = vld [vmem:[#allocation5 + $0x518] sm:$0xff] }
 0x620   :  { %9029 = vmatprep.subr.bf16.mxu1 %v8787_v53  ;;  %v8837_v53 = vld [vmem:[#allocation5 + $0x528] sm:$0xff] }
 0x623   :  { %9030 = vmatpush1.bf16.msra.mxu1 %v8786_v62  ;;  %v8836_v62 = vld [vmem:[#allocation5 + $0x520] sm:$0xff] }
 0x624   :  { %9031 = vmatprep.subr.bf16.mxu1 %v8789_v4  ;;  %v8839_v4 = vld [vmem:[#allocation5 + $0x538] sm:$0xff] }
 0x627   :  { %9032 = vmatpush1.bf16.msra.mxu1 %v8788_v48  ;;  %v8838_v48 = vld [vmem:[#allocation5 + $0x530] sm:$0xff] }
 0x628   :  { %9033 = vmatprep.subr.bf16.mxu1 %v8791_v13  ;;  %v8841_v13 = vld [vmem:[#allocation5 + $0x548] sm:$0xff] }
 0x62b   :  { %9034 = vmatpush1.bf16.msra.mxu1 %v8790_v40  ;;  %v8840_v40 = vld [vmem:[#allocation5 + $0x540] sm:$0xff] }
 0x62c   :  { %9035 = vmatprep.subr.bf16.mxu1 %v8793_v54  ;;  %v8843_v54 = vld [vmem:[#allocation5 + $0x558] sm:$0xff] }
 0x62f   :  { %9036 = vmatpush1.bf16.msra.mxu1 %v8792_v56  ;;  %v8842_v56 = vld [vmem:[#allocation5 + $0x550] sm:$0xff] }
 0x630   :  { %9037 = vmatprep.subr.bf16.mxu1 %v8795_v42  ;;  %v8845_v42 = vld [vmem:[#allocation5 + $0x568] sm:$0xff] }
 0x633   :  { %9038 = vmatpush1.bf16.msra.mxu1 %v8794_v47  ;;  %v8844_v47 = vld [vmem:[#allocation5 + $0x560] sm:$0xff] }
 0x634   :  { %9039 = vmatprep.subr.bf16.mxu1 %v8797_v18  ;;  %v8846_v18 = vld [vmem:[#allocation5 + $0x570] sm:$0xff] }
 0x637   :  { %9040 = vmatpush1.bf16.msra.mxu1 %v8796_v1  ;;  %v8848_v1 = vld [vmem:[#allocation5 + $0x580] sm:$0xff] }
 0x638   :  { %9041 = vmatprep.subr.bf16.mxu1 %v8799_v36  ;;  %v8851_v36 = vld [vmem:[#allocation5 + $0x598] sm:$0xff] }
 0x63b   :  { %9042 = vmatpush1.bf16.msra.mxu1 %v8798_v49  ;;  %v8853_v49 = vld [vmem:[#allocation5 + $0x5a8] sm:$0xff] }
 0x63c   :  { %9052 = vmatprep.subr.bf16.mxu1 %v8801_v2  ;;  %v8852_v2 = vld [vmem:[#allocation5 + $0x5a0] sm:$0xff] }
 0x63e   :  { %9044 = vmatmul.mubr.bf16.vlgmr.msra.gmra.mrb[128].mxu1 %v8665_v41  ;;  %v8855_v41 = vld [vmem:[#allocation5 + $0x5b8] sm:$0xff] }
 0x63f   :  { %9053 = vmatpush1.bf16.msra.mxu1 %v8800_v38  ;;  %9084 = vmatprep.mubr.bf16.mxu1 %v8668_v46  ;;  %v8854_v46 = vld [vmem:[#allocation5 + $0x5b0] sm:$0xff]  ;;  %v8857_v38 = vld [vmem:[#allocation5 + $0x5c8] sm:$0xff] }
 0x640   :  { %9054 = vmatprep.subr.bf16.mxu1 %v8803_v30  ;;  %v8856_v30 = vld [vmem:[#allocation5 + $0x5c0] sm:$0xff] }
 0x643   :  { %9055 = vmatpush1.bf16.msra.mxu1 %v8802_v0  ;;  %v8859_v0 = vld [vmem:[#allocation5 + $0x5d8] sm:$0xff] }
 0x644   :  { %9056 = vmatprep.subr.bf16.mxu1 %v8805_v57  ;;  %v8858_v57 = vld [vmem:[#allocation5 + $0x5d0] sm:$0xff] }
 0x647   :  { %9057 = vmatpush1.bf16.msra.mxu1 %v8804_v43  ;;  %v8861_v43 = vld [vmem:[#allocation5 + $0x5e8] sm:$0xff] }
 0x648   :  { %9058 = vmatprep.subr.bf16.mxu1 %v8807_v19  ;;  %v8860_v19 = vld [vmem:[#allocation5 + $0x5e0] sm:$0xff] }
 0x64b   :  { %9059 = vmatpush1.bf16.msra.mxu1 %v8806_v16  ;;  %v8863_v16 = vld [vmem:[#allocation5 + $0x5f8] sm:$0xff] }
 0x64c   :  { %9060 = vmatprep.subr.bf16.mxu1 %v8809_v26  ;;  %v8862_v26 = vld [vmem:[#allocation5 + $0x5f0] sm:$0xff] }
 0x64f   :  { %9061 = vmatpush1.bf16.msra.mxu1 %v8808_v10  ;;  %v8865_v10 = vld [vmem:[#allocation5 + $0x608] sm:$0xff] }
 0x650   :  { %9062 = vmatprep.subr.bf16.mxu1 %v8811_v11  ;;  %v8669_v11 = vpack.c.bf16 %v14235_v28, %v14235_v28 }
 0x653   :  { %9063 = vmatpush1.bf16.msra.mxu1 %v8810_v34  ;;  %v8864_v34 = vld [vmem:[#allocation5 + $0x600] sm:$0xff] }
 0x654   :  { %9064 = vmatprep.subr.bf16.mxu1 %v8813_v27  ;;  %v8867_v27 = vld [vmem:[#allocation5 + $0x618] sm:$0xff] }
 0x657   :  { %9065 = vmatpush1.bf16.msra.mxu1 %v8812_v44  ;;  %v11076_v44 = vmov 0  }
 0x658   :  { %9066 = vmatprep.subr.bf16.mxu1 %v8815_v31  ;;  %v8866_v31 = vld [vmem:[#allocation5 + $0x610] sm:$0xff] }
 0x65b   :  { %9067 = vmatpush1.bf16.msra.mxu1 %v8814_v51  ;;  %v8869_v51 = vld [vmem:[#allocation5 + $0x628] sm:$0xff] }
 0x65c   :  { %9068 = vmatprep.subr.bf16.mxu1 %v8817_v50  ;;  %v8868_v50 = vld [vmem:[#allocation5 + $0x620] sm:$0xff] }
 0x65f   :  { %9069 = vmatpush1.bf16.msra.mxu1 %v8816_v59  ;;  %v8871_v59 = vld [vmem:[#allocation5 + $0x638] sm:$0xff] }
 0x660   :  { %9070 = vmatprep.subr.bf16.mxu1 %v8819_v5  ;;  %v9960_v5 = vld.sshfl [vmem:[#allocation4 + $0x18] sm:$0x3 pattern:$0x76325410] }
 0x663   :  { %9071 = vmatpush1.bf16.msra.mxu1 %v8818_v6  ;;  %v8870_v6 = vld [vmem:[#allocation5 + $0x630] sm:$0xff] }
 0x664   :  { %9072 = vmatprep.subr.bf16.mxu1 %v8821_v14  ;;  %v8671_v14 = vpack.c.bf16 %v9960_v5, %v9960_v5 }
 0x667   :  { %9073 = vmatpush1.bf16.msra.mxu1 %v8820_v39  ;;  %v14244_v39 = vsub.s32 0, %v14192_v63 }
 0x668   :  { %9074 = vmatprep.subr.bf16.mxu1 %v8823_v29  ;;  %v8872_v29 = vld [vmem:[%s14312_s5] sm:$0x3] }
 0x66b   :  { %9075 = vmatpush1.bf16.msra.mxu1 %v8822_v33  ;;  %v14250_v33 = vsub.s32 1, %v14192_v63 }
 0x66c   :  { %9076 = vmatprep.subr.bf16.mxu1 %v8825_v9  ;;  %v8877_v9 = vrot.slane %v8872_v29, %v14244_v39 }
 0x66f   :  { %9077 = vmatpush1.bf16.msra.mxu1 %v8824_v55  ;;  %v8881_v55 = vrot.slane %v8872_v29, %v14250_v33 }
 0x670   :  { %9078 = vmatprep.subr.bf16.mxu1 %v8827_v7 }
 0x673   :  { %9079 = vmatpush1.bf16.msra.mxu1 %v8826_v37 }
 0x674   :  { %9080 = vmatprep.subr.bf16.mxu1 %v8829_v12 }
 0x677   :  { %9081 = vmatpush1.bf16.msra.mxu1 %v8828_v22 }
 0x678   :  { %9082 = vmatprep.subr.bf16.mxu1 %v8831_v32 }
 0x67b   :  { %9083 = vmatpush1.bf16.msra.mxu1 %v8830_v45 }
 0x67c   :  { %9093 = vmatprep.subr.bf16.mxu1 %v8833_v60 }
 0x67e   :  { %9085 = vmatmul.mubr.bf16.vlgmr.msra.gmra.mrb[128].mxu1 %v8667_v3 }
 0x67f   :  { %9094 = vmatpush1.bf16.msra.mxu1 %v8832_v21  ;;  %9125 = vmatprep.mubr.bf16.mxu1 %v8670_v61 }
 0x680   :  { %9095 = vmatprep.subr.bf16.mxu1 %v8835_v52 }
 0x683   :  { %9096 = vmatpush1.bf16.msra.mxu1 %v8834_v58 }
 0x684   :  { %9097 = vmatprep.subr.bf16.mxu1 %v8837_v53 }
 0x687   :  { %9098 = vmatpush1.bf16.msra.mxu1 %v8836_v62 }
 0x688   :  { %9099 = vmatprep.subr.bf16.mxu1 %v8839_v4 }
 0x68b   :  { %9100 = vmatpush1.bf16.msra.mxu1 %v8838_v48 }
 0x68c   :  { %9101 = vmatprep.subr.bf16.mxu1 %v8841_v13 }
 0x68f   :  { %9102 = vmatpush1.bf16.msra.mxu1 %v8840_v40 }
 0x690   :  { %9103 = vmatprep.subr.bf16.mxu1 %v8843_v54 }
 0x693   :  { %9104 = vmatpush1.bf16.msra.mxu1 %v8842_v56 }
 0x694   :  { %9105 = vmatprep.subr.bf16.mxu1 %v8845_v42 }
 0x697   :  { %9106 = vmatpush1.bf16.msra.mxu1 %v8844_v47 }
 0x698   :  { %9107 = vmatprep.subr.bf16.mxu1 %v8847_v20 }
 0x69b   :  { %9108 = vmatpush1.bf16.msra.mxu1 %v8846_v18 }
 0x69c   :  { %9109 = vmatprep.subr.bf16.mxu1 %v8849_v25 }
 0x69f   :  { %9110 = vmatpush1.bf16.msra.mxu1 %v8848_v1 }
 0x6a0   :  { %9111 = vmatprep.subr.bf16.mxu1 %v8851_v36 }
 0x6a3   :  { %9112 = vmatpush1.bf16.msra.mxu1 %v8850_v17 }
 0x6a4   :  { %9113 = vmatprep.subr.bf16.mxu1 %v8853_v49 }
 0x6a7   :  { %9114 = vmatpush1.bf16.msra.mxu1 %v8852_v2 }
 0x6a8   :  { %9115 = vmatprep.subr.bf16.mxu1 %v8855_v41 }
 0x6ab   :  { %9116 = vmatpush1.bf16.msra.mxu1 %v8854_v46 }
 0x6ac   :  { %9117 = vmatprep.subr.bf16.mxu1 %v8857_v38 }
 0x6af   :  { %9118 = vmatpush1.bf16.msra.mxu1 %v8856_v30 }
 0x6b0   :  { %9119 = vmatprep.subr.bf16.mxu1 %v8859_v0 }
 0x6b3   :  { %9120 = vmatpush1.bf16.msra.mxu1 %v8858_v57 }
 0x6b4   :  { %9121 = vmatprep.subr.bf16.mxu1 %v8861_v43 }
 0x6b7   :  { %9122 = vmatpush1.bf16.msra.mxu1 %v8860_v19 }
 0x6b8   :  { %9123 = vmatprep.subr.bf16.mxu1 %v8863_v16 }
 0x6bb   :  { %9124 = vmatpush1.bf16.msra.mxu1 %v8862_v26 }
 0x6bc   :  { %9134 = vmatprep.subr.bf16.mxu1 %v8865_v10 }
 0x6be   :  { %9126 = vmatmul.mubr.bf16.vlgmr.msra.gmra.mrb[128].mxu1 %v8669_v11 }
 0x6bf   :  { %9135 = vmatpush1.bf16.msra.mxu1 %v8864_v34  ;;  %9166 = vmatprep.mubr.bf16.mxu1 %v11076_v44 }
 0x6c0   :  { %9136 = vmatprep.subr.bf16.mxu1 %v8867_v27 }
 0x6c3   :  { %9137 = vmatpush1.bf16.msra.mxu1 %v8866_v31 }
 0x6c4   :  { %9138 = vmatprep.subr.bf16.mxu1 %v8869_v51 }
 0x6c7   :  { %9139 = vmatpush1.bf16.msra.mxu1 %v8868_v50 }
 0x6c8   :  { %9140 = vmatprep.subr.bf16.mxu1 %v8871_v59 }
 0x6cb   :  { %9141 = vmatpush1.bf16.msra.mxu1 %v8870_v6 }
 0x6ce   :  { %9961 = vmatmul.mubr.msk.bf16.vlgmr.msra.gmra.mrb[128].mxu1 %vm8884_vm9, %v8671_v14 }
 0x7a1   :  { %v9168_v7 = vpop.f32.mrb[128].mxu1 }
 0x7a2   :  { %v14254_v8 = vadd.f32 %v9168_v7, %v8877_v9  ;;  %v9170_v37 = vpop.f32.mrb[129].mxu1 }
 0x7a3   :  { %v10970_v12 = vadd.f32 %v9170_v37, %v8881_v55  ;;  %v9172_v28 = vpop.f32.mrb[130].mxu1 }
 0x7a4   :  { %v9175_v22 = vmax.f32 %v14254_v8, 0.0  ;;  %v9173_v32 = vpop.f32.mrb[131].mxu1 }
 0x7a5   :  { %v9176_v35 = vmax.f32 %v10970_v12, 0.0 }
 0x7a6   :  { %11059 = dma.done.wait [#allocation9 + $0x1], 4096 }
 0x7a7   :  { %11060 = vsyncadd [#allocation9 + $0x1], 4294963200  ;;  %v9182_v45 = vpack.c.bf16 %v9176_v35, %v9176_v35  ;;  %v9184_v63 = vld [vmem:[#allocation6 + $0x8] sm:$0xff]  ;;  %v9183_v60 = vld [vmem:[#allocation6] sm:$0xff]  ;;  %v9181_v19 = vpack.c.bf16 %v9175_v22, %v9175_v22 }
 0x7a8   :  { %v9186_v3 = vld [vmem:[#allocation6 + $0x18] sm:$0xff]  ;;  %9227 = vmatprep.subr.bf16.mxu0 %v9184_v63  ;;  %v9185_v61 = vld [vmem:[#allocation6 + $0x10] sm:$0xff]  ;;  %v9188_v21 = vld [vmem:[#allocation6 + $0x28] sm:$0xff] }
 0x7a9   :  { %9259 = vmatprep.mubr.bf16.mxu0 %v9182_v45  ;;  %9228 = vmatpush1.bf16.msra.mxu0 %v9183_v60  ;;  %v9187_v52 = vld [vmem:[#allocation6 + $0x20] sm:$0xff]  ;;  %v9190_v58 = vld [vmem:[#allocation6 + $0x38] sm:$0xff]  ;;  %v9189_v53 = vld [vmem:[#allocation6 + $0x30] sm:$0xff] }
 0x7aa   :  { %9229 = vmatprep.subr.bf16.mxu0 %v9186_v3  ;;  %v9192_v62 = vld [vmem:[#allocation6 + $0x48] sm:$0xff]  ;;  %v9191_v4 = vld [vmem:[#allocation6 + $0x40] sm:$0xff]  ;;  %v9194_v48 = vld [vmem:[#allocation6 + $0x58] sm:$0xff] }
 0x7ab   :  { %v9193_v13 = vld [vmem:[#allocation6 + $0x50] sm:$0xff]  ;;  %v9196_v40 = vld [vmem:[#allocation6 + $0x68] sm:$0xff]  ;;  %v9195_v54 = vld [vmem:[#allocation6 + $0x60] sm:$0xff] }
 0x7ac   :  { %v9198_v56 = vld [vmem:[#allocation6 + $0x78] sm:$0xff]  ;;  %v9197_v42 = vld [vmem:[#allocation6 + $0x70] sm:$0xff]  ;;  %v9200_v47 = vld [vmem:[#allocation6 + $0x88] sm:$0xff] }
 0x7ad   :  { %9230 = vmatpush1.bf16.msra.mxu0 %v9185_v61  ;;  %v9199_v20 = vld [vmem:[#allocation6 + $0x80] sm:$0xff]  ;;  %v9202_v18 = vld [vmem:[#allocation6 + $0x98] sm:$0xff]  ;;  %v9201_v25 = vld [vmem:[#allocation6 + $0x90] sm:$0xff] }
 0x7ae   :  { %9231 = vmatprep.subr.bf16.mxu0 %v9188_v21  ;;  %v9204_v1 = vld [vmem:[#allocation6 + $0xa8] sm:$0xff]  ;;  %v9203_v36 = vld [vmem:[#allocation6 + $0xa0] sm:$0xff]  ;;  %v9206_v17 = vld [vmem:[#allocation6 + $0xb8] sm:$0xff] }
 0x7af   :  { %v9205_v49 = vld [vmem:[#allocation6 + $0xb0] sm:$0xff]  ;;  %v9208_v2 = vld [vmem:[#allocation6 + $0xc8] sm:$0xff]  ;;  %v9207_v41 = vld [vmem:[#allocation6 + $0xc0] sm:$0xff] }
 0x7b0   :  { %v9210_v46 = vld [vmem:[#allocation6 + $0xd8] sm:$0xff]  ;;  %v9209_v38 = vld [vmem:[#allocation6 + $0xd0] sm:$0xff]  ;;  %v9212_v30 = vld [vmem:[#allocation6 + $0xe8] sm:$0xff] }
 0x7b1   :  { %9232 = vmatpush1.bf16.msra.mxu0 %v9187_v52  ;;  %v9211_v0 = vld [vmem:[#allocation6 + $0xe0] sm:$0xff]  ;;  %v9214_v57 = vld [vmem:[#allocation6 + $0xf8] sm:$0xff]  ;;  %v9213_v43 = vld [vmem:[#allocation6 + $0xf0] sm:$0xff] }
 0x7b2   :  { %9233 = vmatprep.subr.bf16.mxu0 %v9190_v58  ;;  %v9215_v16 = vld [vmem:[%s14313_s6] sm:$0x3] }
 0x7b3   :  { %v9220_v26 = vrot.slane %v9215_v16, %v14244_v39  ;;  %v9224_v10 = vrot.slane %v9215_v16, %v14250_v33 }
 0x7b5   :  { %9234 = vmatpush1.bf16.msra.mxu0 %v9189_v53 }
 0x7b6   :  { %9235 = vmatprep.subr.bf16.mxu0 %v9192_v62 }
 0x7b9   :  { %9236 = vmatpush1.bf16.msra.mxu0 %v9191_v4 }
 0x7ba   :  { %9237 = vmatprep.subr.bf16.mxu0 %v9194_v48 }
 0x7bd   :  { %9238 = vmatpush1.bf16.msra.mxu0 %v9193_v13 }
 0x7be   :  { %9239 = vmatprep.subr.bf16.mxu0 %v9196_v40 }
 0x7c1   :  { %9240 = vmatpush1.bf16.msra.mxu0 %v9195_v54 }
 0x7c2   :  { %9241 = vmatprep.subr.bf16.mxu0 %v9198_v56 }
 0x7c5   :  { %9242 = vmatpush1.bf16.msra.mxu0 %v9197_v42 }
 0x7c6   :  { %9243 = vmatprep.subr.bf16.mxu0 %v9200_v47 }
 0x7c9   :  { %9244 = vmatpush1.bf16.msra.mxu0 %v9199_v20 }
 0x7ca   :  { %9245 = vmatprep.subr.bf16.mxu0 %v9202_v18 }
 0x7cd   :  { %9246 = vmatpush1.bf16.msra.mxu0 %v9201_v25 }
 0x7ce   :  { %9247 = vmatprep.subr.bf16.mxu0 %v9204_v1 }
 0x7d1   :  { %9248 = vmatpush1.bf16.msra.mxu0 %v9203_v36 }
 0x7d2   :  { %9249 = vmatprep.subr.bf16.mxu0 %v9206_v17 }
 0x7d5   :  { %9250 = vmatpush1.bf16.msra.mxu0 %v9205_v49 }
 0x7d6   :  { %9251 = vmatprep.subr.bf16.mxu0 %v9208_v2 }
 0x7d9   :  { %9252 = vmatpush1.bf16.msra.mxu0 %v9207_v41 }
 0x7da   :  { %9253 = vmatprep.subr.bf16.mxu0 %v9210_v46 }
 0x7dd   :  { %9254 = vmatpush1.bf16.msra.mxu0 %v9209_v38 }
 0x7de   :  { %9255 = vmatprep.subr.bf16.mxu0 %v9212_v30 }
 0x7e1   :  { %9256 = vmatpush1.bf16.msra.mxu0 %v9211_v0 }
 0x7e2   :  { %9257 = vmatprep.subr.bf16.mxu0 %v9214_v57 }
 0x7e5   :  { %9258 = vmatpush1.bf16.msra.mxu0 %v9213_v43 }
 0x7e8   :  { %9260 = vmatmul.mubr.bf16.vlgmr.msra.gmra.mrb[232].mxu0 %v9181_v19 }
 0x8bb   :  { %v9261_v11 = vpop.f32.mrb[232].mxu0 }
 0x8bc   :  { %v14265_v34 = vadd.f32 %v9261_v11, %v9220_v26  ;;  %v9263_v27 = vpop.f32.mrb[233].mxu0 }
 0x8bd   :  { %v9264_v44 = vadd.f32 %v9263_v27, %v9224_v10  ;;  %v9265_v31 = vpop.f32.mrb[234].mxu0 }
 0x8be   :  { %v9268_v51 = vmax.f32 %v14265_v34, 0.0  ;;  %v9266_v50 = vpop.f32.mrb[235].mxu0 }
 0x8bf   :  { %v9269_v59 = vmax.f32 %v9264_v44, 0.0 }
 0x8c0   :  { %11061 = dma.done.wait [#allocation9 + $0x2], 4096 }
 0x8c1   :  { %11062 = vsyncadd [#allocation9 + $0x2], 4294963200  ;;  %v9273_v5 = vpack.c.bf16 %v9269_v59, %v9269_v59  ;;  %v9275_v6 = vld [vmem:[#allocation7 + $0x8] sm:$0xff]  ;;  %v9274_v14 = vld [vmem:[#allocation7] sm:$0xff]  ;;  %v9272_v18 = vpack.c.bf16 %v9268_v51, %v9268_v51 }
 0x8c2   :  { %v9277_v29 = vld [vmem:[#allocation7 + $0x18] sm:$0xff]  ;;  %9318 = vmatprep.subr.bf16.mxu0 %v9275_v6  ;;  %v9276_v9 = vld [vmem:[#allocation7 + $0x10] sm:$0xff]  ;;  %v9279_v55 = vld [vmem:[#allocation7 + $0x28] sm:$0xff] }
 0x8c3   :  { %9350 = vmatprep.mubr.bf16.mxu0 %v9273_v5  ;;  %9319 = vmatpush1.bf16.msra.mxu0 %v9274_v14  ;;  %v9278_v7 = vld [vmem:[#allocation7 + $0x20] sm:$0xff]  ;;  %v9281_v8 = vld [vmem:[#allocation7 + $0x38] sm:$0xff]  ;;  %v9280_v37 = vld [vmem:[#allocation7 + $0x30] sm:$0xff] }
 0x8c4   :  { %9320 = vmatprep.subr.bf16.mxu0 %v9277_v29  ;;  %v9283_v12 = vld [vmem:[#allocation7 + $0x48] sm:$0xff]  ;;  %v9282_v28 = vld [vmem:[#allocation7 + $0x40] sm:$0xff]  ;;  %v9285_v22 = vld [vmem:[#allocation7 + $0x58] sm:$0xff] }
 0x8c5   :  { %v9284_v32 = vld [vmem:[#allocation7 + $0x50] sm:$0xff]  ;;  %v9287_v35 = vld [vmem:[#allocation7 + $0x68] sm:$0xff]  ;;  %v9286_v45 = vld [vmem:[#allocation7 + $0x60] sm:$0xff] }
 0x8c6   :  { %v9289_v63 = vld [vmem:[#allocation7 + $0x78] sm:$0xff]  ;;  %v9288_v60 = vld [vmem:[#allocation7 + $0x70] sm:$0xff]  ;;  %v9291_v3 = vld [vmem:[#allocation7 + $0x88] sm:$0xff] }
 0x8c7   :  { %9321 = vmatpush1.bf16.msra.mxu0 %v9276_v9  ;;  %v9290_v61 = vld [vmem:[#allocation7 + $0x80] sm:$0xff]  ;;  %v9293_v21 = vld [vmem:[#allocation7 + $0x98] sm:$0xff]  ;;  %v9292_v52 = vld [vmem:[#allocation7 + $0x90] sm:$0xff] }
 0x8c8   :  { %9322 = vmatprep.subr.bf16.mxu0 %v9279_v55  ;;  %v9295_v58 = vld [vmem:[#allocation7 + $0xa8] sm:$0xff]  ;;  %v9294_v53 = vld [vmem:[#allocation7 + $0xa0] sm:$0xff]  ;;  %v9297_v62 = vld [vmem:[#allocation7 + $0xb8] sm:$0xff] }
 0x8c9   :  { %v9296_v4 = vld [vmem:[#allocation7 + $0xb0] sm:$0xff]  ;;  %v9299_v48 = vld [vmem:[#allocation7 + $0xc8] sm:$0xff]  ;;  %v9298_v13 = vld [vmem:[#allocation7 + $0xc0] sm:$0xff] }
 0x8ca   :  { %v9301_v40 = vld [vmem:[#allocation7 + $0xd8] sm:$0xff]  ;;  %v9300_v54 = vld [vmem:[#allocation7 + $0xd0] sm:$0xff]  ;;  %v9303_v56 = vld [vmem:[#allocation7 + $0xe8] sm:$0xff] }
 0x8cb   :  { %9323 = vmatpush1.bf16.msra.mxu0 %v9278_v7  ;;  %v9302_v42 = vld [vmem:[#allocation7 + $0xe0] sm:$0xff]  ;;  %v9305_v47 = vld [vmem:[#allocation7 + $0xf8] sm:$0xff]  ;;  %v9304_v20 = vld [vmem:[#allocation7 + $0xf0] sm:$0xff] }
 0x8cc   :  { %9324 = vmatprep.subr.bf16.mxu0 %v9281_v8  ;;  %v9306_v25 = vld [vmem:[%s14314_s7] sm:$0x3] }
 0x8cd   :  { %v9311_v1 = vrot.slane %v9306_v25, %v14244_v39  ;;  %v9315_v36 = vrot.slane %v9306_v25, %v14250_v33 }
 0x8cf   :  { %9325 = vmatpush1.bf16.msra.mxu0 %v9280_v37 }
 0x8d0   :  { %9326 = vmatprep.subr.bf16.mxu0 %v9283_v12 }
 0x8d3   :  { %9327 = vmatpush1.bf16.msra.mxu0 %v9282_v28 }
 0x8d4   :  { %9328 = vmatprep.subr.bf16.mxu0 %v9285_v22 }
 0x8d7   :  { %9329 = vmatpush1.bf16.msra.mxu0 %v9284_v32 }
 0x8d8   :  { %9330 = vmatprep.subr.bf16.mxu0 %v9287_v35 }
 0x8db   :  { %9331 = vmatpush1.bf16.msra.mxu0 %v9286_v45 }
 0x8dc   :  { %9332 = vmatprep.subr.bf16.mxu0 %v9289_v63 }
 0x8df   :  { %9333 = vmatpush1.bf16.msra.mxu0 %v9288_v60 }
 0x8e0   :  { %9334 = vmatprep.subr.bf16.mxu0 %v9291_v3 }
 0x8e3   :  { %9335 = vmatpush1.bf16.msra.mxu0 %v9290_v61 }
 0x8e4   :  { %9336 = vmatprep.subr.bf16.mxu0 %v9293_v21 }
 0x8e7   :  { %9337 = vmatpush1.bf16.msra.mxu0 %v9292_v52 }
 0x8e8   :  { %9338 = vmatprep.subr.bf16.mxu0 %v9295_v58 }
 0x8eb   :  { %9339 = vmatpush1.bf16.msra.mxu0 %v9294_v53 }
 0x8ec   :  { %9340 = vmatprep.subr.bf16.mxu0 %v9297_v62 }
 0x8ef   :  { %9341 = vmatpush1.bf16.msra.mxu0 %v9296_v4 }
 0x8f0   :  { %9342 = vmatprep.subr.bf16.mxu0 %v9299_v48 }
 0x8f3   :  { %9343 = vmatpush1.bf16.msra.mxu0 %v9298_v13 }
 0x8f4   :  { %9344 = vmatprep.subr.bf16.mxu0 %v9301_v40 }
 0x8f7   :  { %9345 = vmatpush1.bf16.msra.mxu0 %v9300_v54 }
 0x8f8   :  { %9346 = vmatprep.subr.bf16.mxu0 %v9303_v56 }
 0x8fb   :  { %9347 = vmatpush1.bf16.msra.mxu0 %v9302_v42 }
 0x8fc   :  { %9348 = vmatprep.subr.bf16.mxu0 %v9305_v47 }
 0x8ff   :  { %9349 = vmatpush1.bf16.msra.mxu0 %v9304_v20 }
 0x900   :  { %10335 = vmatprep.subr.bf16.mxu0 %v12388_v23 }
 0x902   :  { %9351 = vmatmul.mubr.bf16.vlgmr.msra.gmra.mrb[236].mxu0 %v9272_v18 }
 0x9d5   :  { %v9352_v17 = vpop.f32.mrb[236].mxu0 }
 0x9d6   :  { %v9353_v49 = vadd.f32 %v9352_v17, %v9311_v1  ;;  %v9354_v2 = vpop.f32.mrb[237].mxu0 }
 0x9d7   :  { %v9355_v41 = vadd.f32 %v9354_v2, %v9315_v36  ;;  %v9356_v46 = vpop.f32.mrb[238].mxu0 }
 0x9d8   :  { %v9359_v38 = vmax.f32 %v9353_v49, 0.0  ;;  %v9357_v30 = vpop.f32.mrb[239].mxu0 }
 0x9d9   :  { %v9360_v0 = vmax.f32 %v9355_v41, 0.0 }
 0x9db   :  { %v9365_v57 = vpack.c.bf16 %v9360_v0, %v9360_v0 }
 0x9dc   :  { %11063 = dma.done.wait [#allocation9 + $0x3], 2048 }
 0x9dd   :  { %11064 = vsyncadd [#allocation9 + $0x3], 4294965248  ;;  %10336 = vmatpush3.bf16.msra.mxu0 %v12348_v15  ;;  %9421 = vmatprep.mubr.bf16.mxu0 %v9365_v57  ;;  %v14334_v39 = vld [vmem:[#allocation21_spill] sm:$0xff]  ;;  %v14335_v33 = vld [vmem:[#allocation28_spill] sm:$0xff]  ;;  %v9364_v27 = vpack.c.bf16 %v9359_v38, %v9359_v38  ;;  %s11077_s26 = smov [#allocation10]  }
 0x9de   :  { %10337 = vmatprep.subr.bf16.mxu0 %v12393_v24  ;;  %v14336_v43 = vld [vmem:[#allocation22_spill] sm:$0xff]  ;;  %v14337_v19 = vld [vmem:[#allocation29_spill] sm:$0xff]  ;;  %v14338_v16 = vld [vmem:[#allocation23_spill] sm:$0xff]  ;;  %s9436_s27 = sshll.u32 %s11077_s26, 4  ;;  %s9437_s27 = int_to_ptr.vmem [resolvable:$true] %s9436_s27 }
 0x9df   :  { %v14339_v26 = vld [vmem:[#allocation30_spill] sm:$0xff]  ;;  %v14340_v23 = vld [vmem:[#allocation24_spill] sm:$0xff]  ;;  %v14341_v10 = vld [vmem:[#allocation31_spill] sm:$0xff]  ;;  %s11035_s28 = scalar_lea.vmem %s9437_s27, 32  ;;  %p11040_p1 = scmp.lt.s32.totalorder %s9437_s27, %s9437_s27 }
 0x9e0   :  { %v14342_v15 = vld [vmem:[#allocation25_spill] sm:$0xff]  ;;  %v14343_v24 = vld [vmem:[#allocation32_spill] sm:$0xff]  ;;  %v14344_v11 = vld [vmem:[#allocation26_spill] sm:$0xff]  ;;  %p11036_p0 = scmp.ne.s32.totalorder %s9437_s27, %s11035_s28  ;;  %p11041_p2 = scmp.lt.s32.totalorder %s11035_s28, %s11035_s28 }
 0x9e1   :  { %10338 = vmatpush3.bf16.msra.mxu0 %v14334_v39  ;;  %v14345_v34 = vld [vmem:[#allocation33_spill] sm:$0xff]  ;;  %v14346_v44 = vld [vmem:[#allocation27_spill] sm:$0xff]  ;;  %v9962_v51 = vld [vmem:[%s14315_s8] ss:$0 sm:$0xff] }
 0x9e2   :  { %10339 = vmatprep.subr.bf16.mxu0 %v14335_v33  ;;  %p11042_p3 = por %p11041_p2, %p11040_p1 }
 0x9e4   :  { %p11043_p4 = pnand %p11042_p3, %p11036_p0 }
 0x9e5   :  { %10340 = vmatpush3.bf16.msra.mxu0 %v14336_v43 }
 0x9e6   :  { %10341 = vmatprep.subr.bf16.mxu0 %v14337_v19 }
 0x9e9   :  { %10342 = vmatpush3.bf16.msra.mxu0 %v14338_v16 }
 0x9ea   :  { %10343 = vmatprep.subr.bf16.mxu0 %v14339_v26 }
 0x9ed   :  { %10344 = vmatpush3.bf16.msra.mxu0 %v14340_v23 }
 0x9ee   :  { %10345 = vmatprep.subr.bf16.mxu0 %v14341_v10 }
 0x9f1   :  { %10346 = vmatpush3.bf16.msra.mxu0 %v14342_v15 }
 0x9f2   :  { %10347 = vmatprep.subr.bf16.mxu0 %v14343_v24 }
 0x9f5   :  { %10348 = vmatpush3.bf16.msra.mxu0 %v14344_v11 }
 0x9f6   :  { %10349 = vmatprep.subr.bf16.mxu0 %v14345_v34 }
 0x9f9   :  { %10350 = vmatpush3.bf16.msra.mxu0 %v14346_v44 }
 0x9fc   :  { %9422 = vmatmul.mubr.bf16.vlgmr.msra.gmra.mrb[240].mxu0 %v9364_v27 }
 0xacf   :  { %v10351_v31 = vpop.f32.mrb[240].mxu0 }
 0xad0   :  { %v10352_v50 = vpop.f32.mrb[241].mxu0 }
 0xad1   :  { %v10353_v59 = vadd.f32 %v10352_v50, %v10351_v31  ;;  %v10354_v5 = vpop.f32.mrb[242].mxu0 }
 0xad2   :  { %v10355_v6 = vpop.f32.mrb[243].mxu0 }
 0xad3   :  { %v9424_v14 = vadd.f32 %v10353_v59, %v9962_v51 }
 0xad5   :  { %9429 = vst [vmem:[#allocation10] sm:$0x3] %v9424_v14 }
 0xad6   :  { %11046 = shalt.err (!%p11043_p4)
}
 0xad7   :  { %s11047_s8 = scalar_lea.hbm %s14320_s13, 32 }
 0xad8   :  { %p11048_p5 = scmp.ne.s32.totalorder %s14320_s13, %s11047_s8  ;;  %p11051_p6 = scmp.lt.u32.totalorder %s11047_s8, %s14320_s13 }
 0xada   :  { %p11053_p7 = pnand %p11051_p6, %p11048_p5 }
 0xadc   :  { %11056 = shalt.err (!%p11053_p7)
}
 0xadd   :  { %9439 = dma.vmem_to_hbm [thread:$0]  %s9437_s27, 32, %s14320_s13, [#allocation11]  }
 0xade   :  { %11065 = dma.done.wait [#allocation11], 32  }
 0xadf   :  { %11066 = vsyncadd [#allocation11], 4294967264 }
 0xae0   :  { %9443 = vsyncpa [#allocation11], 1 }
 0xae1   :  { %9444 = vsyncmov [#allocation9] }
 0xae4   :  { %s9445_s17 = vpop.sfrf %9444 }
 0xae5   :  { %p9963_p8 = scmp.ne.s32.totalorder %s9445_s17, 0 }
 0xae7   :  { %9449 = shalt.err (%p9963_p8)  }
 0xae8   :  { %9451 = vsyncmov [#allocation9 + $0x1] }
 0xaeb   :  { %s9452_s3 = vpop.sfrf %9451 }
 0xaec   :  { %p9964_p9 = scmp.ne.s32.totalorder %s9452_s3, 0 }
 0xaee   :  { %9456 = shalt.err (%p9964_p9)  }
 0xaef   :  { %9458 = vsyncmov [#allocation9 + $0x2] }
 0xaf2   :  { %s9459_s2 = vpop.sfrf %9458 }
 0xaf3   :  { %p9965_p10 = scmp.ne.s32.totalorder %s9459_s2, 0 }
 0xaf5   :  { %9463 = shalt.err (%p9965_p10)  }
 0xaf6   :  { %9465 = vsyncmov [#allocation9 + $0x3] }
 0xaf9   :  { %s9466_s4 = vpop.sfrf %9465 }
 0xafa   :  { %p9966_p11 = scmp.ne.s32.totalorder %s9466_s4, 0 }
 0xafc   :  { %9470 = shalt.err (%p9966_p11)  }

</bundles_post_ra>
